<compile_context>
chip_gen: v6e
topology: v6e:2x2x1
jax: 0.10.0
libtpu: 0.0.40
codegen_flags: <defaults>
</compile_context>

<pallas_src>
import functools

import jax
import jax.numpy as jnp
from jax.experimental import pallas as pl
from jax.experimental.pallas import tpu as pltpu

EPS = 1e-5          # nn.BatchNorm2d default eps
CPAD = 128          # channel / lane padding target

_VMEM = pl.BlockSpec(memory_space=pltpu.MemorySpace.VMEM)


def _round_up(v, m):
    return ((v + m - 1) // m) * m


# ----------------------------------------------------------------------------
# Pallas kernels
# ----------------------------------------------------------------------------

def _conv_bn_kernel(a_ref, w_ref, g_ref, b_ref, *rest, relu, has_shortcut, inv_m):
    """Fused conv(matmul) + batch-stat BN + (residual add) + (ReLU)."""
    o_ref = rest[-1]
    # MXU: bf16 x bf16 -> f32 accumulator.
    acc = jnp.dot(a_ref[...], w_ref[...], preferred_element_type=jnp.float32)
    # One-pass batch statistics (biased variance, PyTorch BN training-mode norm).
    mean = jnp.sum(acc, axis=0, keepdims=True) * inv_m
    var = jnp.sum(acc * acc, axis=0, keepdims=True) * inv_m - mean * mean
    var = jnp.maximum(var, 0.0)                        # guard cancellation
    scale = g_ref[...] * jax.lax.rsqrt(var + EPS)      # rsqrt -> EUP slot
    shift = b_ref[...] - mean * scale
    y = acc * scale + shift                            # single FMA per element (f32)
    if has_shortcut:
        y = y + rest[0][...].astype(jnp.float32)       # residual add in f32
    if relu:
        y = jnp.maximum(y, 0.0)
    o_ref[...] = y.astype(o_ref.dtype)                 # lane-dense (M, 128) store


def _pool_fc_kernel(x_ref, w_ref, b_ref, o_ref, *, inv_hw):
    """AdaptiveAvgPool2d(1) + Linear fused: sublane-sum pool + small matmul."""
    x = x_ref[...].astype(jnp.float32)                 # (N, H*W, 128)
    pooled = jnp.sum(x, axis=1) * inv_hw               # (N, 128)  XLU reduce
    o_ref[...] = jnp.dot(pooled, w_ref[...],
                         preferred_element_type=jnp.float32) + b_ref[...]


# ----------------------------------------------------------------------------
# Wrappers (JAX glue: im2col / padding; all heavy math happens in the kernels)
# ----------------------------------------------------------------------------

def _fused_conv_bn_call(a, w, gamma, beta, *, relu, shortcut=None):
    m = a.shape[0]
    args = [a, w, gamma, beta]
    if shortcut is not None:
        args.append(shortcut)
    kern = functools.partial(_conv_bn_kernel, relu=relu,
                             has_shortcut=shortcut is not None, inv_m=1.0 / m)
    return pl.pallas_call(
        kern,
        out_shape=jax.ShapeDtypeStruct((m, CPAD), jnp.bfloat16),
        in_specs=[_VMEM] * len(args),
        out_specs=_VMEM,
    )(*args)


def conv_bn(x, cin, w_packed, gamma, beta, *, k, stride, relu, shortcut=None):
    """x: (N, H, W, >=cin) bf16 NHWC.  Returns (N, Ho, Wo, 128) bf16."""
    n, h, w_dim, _ = x.shape
    pad = 1 if k == 3 else 0
    ho = (h + 2 * pad - k) // stride + 1
    wo = (w_dim + 2 * pad - k) // stride + 1
    xr = x[..., :cin]                                  # drop lane padding before im2col
    xp = jnp.pad(xr, ((0, 0), (pad, pad), (pad, pad), (0, 0))) if pad else xr
    cols = []
    for di in range(k):
        for dj in range(k):
            cols.append(xp[:, di:di + stride * ho:stride,
                           dj:dj + stride * wo:stride, :])
    a = jnp.concatenate(cols, axis=-1).reshape(n * ho * wo, k * k * cin)
    k_pad = w_packed.shape[0]
    if k_pad > k * k * cin:                            # pad contraction dim to x128
        a = jnp.pad(a, ((0, 0), (0, k_pad - k * k * cin)))
    y = _fused_conv_bn_call(a, w_packed, gamma, beta, relu=relu, shortcut=shortcut)
    return y.reshape(n, ho, wo, CPAD)


def basic_block(x, blk, inplane, planes, stride):
    out1 = conv_bn(x, inplane, blk['conv1_w'], blk['bn1_g'], blk['bn1_b'],
                   k=3, stride=stride, relu=True)
    if 'down_w' in blk:
        short = conv_bn(x, inplane, blk['down_w'], blk['down_g'], blk['down_b'],
                        k=1, stride=stride, relu=False)
    else:
        short = x
    n, ho, wo, c = out1.shape
    # conv2 + bn2 + residual add + ReLU, all in one kernel.
    out = conv_bn(out1, planes, blk['conv2_w'], blk['bn2_g'], blk['bn2_b'],
                  k=3, stride=1, relu=True,
                  shortcut=short.reshape(n * ho * wo, c))
    return out


def resnet_forward(params, x_nchw, *, num_classes=10):
    x = jnp.transpose(x_nchw, (0, 2, 3, 1)).astype(jnp.bfloat16)   # NCHW -> NHWC
    x = conv_bn(x, 3, params['conv1_w'], params['bn1_g'], params['bn1_b'],
                k=3, stride=1, relu=True)
    inplane = 16
    for (planes, stride0), layer in zip(((16, 1), (32, 2), (64, 2)),
                                        params['layers']):
        for bi, blk in enumerate(layer):
            x = basic_block(x, blk, inplane, planes, stride0 if bi == 0 else 1)
            inplane = planes
    n, h, w_dim, c = x.shape
    hw = h * w_dim
    # AdaptiveAvgPool2d(1) + fc as one kernel: in-kernel mean over HW + matmul.
    out = pl.pallas_call(
        functools.partial(_pool_fc_kernel, inv_hw=1.0 / hw),
        out_shape=jax.ShapeDtypeStruct((n, CPAD), jnp.float32),
        in_specs=[_VMEM] * 3,
        out_specs=_VMEM,
    )(x.reshape(n, hw, c), params['fc_w'], params['fc_b'])
    return out[:, :num_classes]


# ----------------------------------------------------------------------------
# Parameter init (mirrors the PyTorch module) + packing to padded bf16 layout
# ----------------------------------------------------------------------------

def _kaiming(key, shape):          # kaiming_normal_, fan_in, (Cout, Cin, kh, kw)
    fan_in = shape[1] * shape[2] * shape[3]
    std = (2.0 / fan_in) ** 0.5
    return std * jax.random.normal(key, shape, jnp.float32)


def init_params(key, n_size=1, num_classes=10):
    keys = iter(jax.random.split(key, 64))
    raw = {
        'conv1_w': _kaiming(next(keys), (16, 3, 3, 3)),
        'bn1_g': jnp.ones((16,), jnp.float32),
        'bn1_b': jnp.zeros((16,), jnp.float32),
    }
    inplane = 16
    layers = []
    for planes, stride0 in ((16, 1), (32, 2), (64, 2)):
        layer = []
        for s in [stride0] + [1] * (n_size - 1):
            blk = {
                'conv1_w': _kaiming(next(keys), (planes, inplane, 3, 3)),
                'bn1_g': jnp.ones((planes,), jnp.float32),
                'bn1_b': jnp.zeros((planes,), jnp.float32),
                'conv2_w': _kaiming(next(keys), (planes, planes, 3, 3)),
                'bn2_g': jnp.ones((planes,), jnp.float32),
                'bn2_b': jnp.zeros((planes,), jnp.float32),
            }
            if s != 1 or inplane != planes:
                blk['down_w'] = _kaiming(next(keys), (planes, inplane, 1, 1))
                blk['down_g'] = jnp.ones((planes,), jnp.float32)
                blk['down_b'] = jnp.zeros((planes,), jnp.float32)
            layer.append(blk)
            inplane = planes
        layers.append(layer)
    raw['layers'] = layers
    bound = 1.0 / (64.0 ** 0.5)    # nn.Linear(64, num_classes) default init
    raw['fc_w'] = jax.random.uniform(next(keys), (64, num_classes),
                                     jnp.float32, -bound, bound)
    raw['fc_b'] = jax.random.uniform(next(keys), (num_classes,),
                                     jnp.float32, -bound, bound)
    return raw


def _pack_conv(w):                 # (Cout,Cin,kh,kw) -> (round128(k*k*Cin), 128) bf16
    cout, cin, kh, kw = w.shape
    k_real = kh * kw * cin
    w2 = jnp.transpose(w, (2, 3, 1, 0)).reshape(k_real, cout)
    w2 = jnp.pad(w2, ((0, _round_up(k_real, CPAD) - k_real), (0, CPAD - cout)))
    return w2.astype(jnp.bfloat16)


def _pack_vec(v):                  # (C,) -> (1, 128) f32 (zero padded)
    return jnp.pad(v, (0, CPAD - v.shape[0])).reshape(1, CPAD).astype(jnp.float32)


def pack_params(raw):
    packed = {
        'conv1_w': _pack_conv(raw['conv1_w']),
        'bn1_g': _pack_vec(raw['bn1_g']),
        'bn1_b': _pack_vec(raw['bn1_b']),
        'fc_w': jnp.pad(raw['fc_w'],
                        ((0, CPAD - raw['fc_w'].shape[0]),
                         (0, CPAD - raw['fc_w'].shape[1]))).astype(jnp.float32),
        'fc_b': _pack_vec(raw['fc_b']),
        'layers': [],
    }
    for layer in raw['layers']:
        packed_layer = []
        for blk in layer:
            pb = {
                'conv1_w': _pack_conv(blk['conv1_w']),
                'bn1_g': _pack_vec(blk['bn1_g']),
                'bn1_b': _pack_vec(blk['bn1_b']),
                'conv2_w': _pack_conv(blk['conv2_w']),
                'bn2_g': _pack_vec(blk['bn2_g']),
                'bn2_b': _pack_vec(blk['bn2_b']),
            }
            if 'down_w' in blk:
                pb['down_w'] = _pack_conv(blk['down_w'])
                pb['down_g'] = _pack_vec(blk['down_g'])
                pb['down_b'] = _pack_vec(blk['down_b'])
            packed_layer.append(pb)
        packed['layers'].append(packed_layer)
    return packed


if __name__ == "__main__":
    key = jax.random.PRNGKey(0)
    kx, kp = jax.random.split(key)
    # small CIFAR-like input: batch=2, 3 channels, 16x16 spatial (NCHW like PyTorch)
    x = jax.random.normal(kx, (2, 3, 16, 16), jnp.float32)
    raw = init_params(kp, n_size=1, num_classes=10)
    params = pack_params(raw)

    fwd = jax.jit(functools.partial(resnet_forward, num_classes=10))
    out = fwd(params, x)
    jax.block_until_ready(out)
    assert out.shape == (2, 10) and out.dtype == jnp.float32
    print("KERNEL_OK")
</pallas_src>

<mosaic_0001>
module attributes {stable_mosaic.version = 11 : i64} {
  func.func @_conv_bn_kernel(%arg0: memref<512x128xbf16, #tpu.memory_space<vmem>>, %arg1: memref<128x128xbf16, #tpu.memory_space<vmem>>, %arg2: memref<1x128xf32, #tpu.memory_space<vmem>>, %arg3: memref<1x128xf32, #tpu.memory_space<vmem>>, %arg4: memref<512x128xbf16, #tpu.memory_space<vmem>>) attributes {dimension_semantics = [], scalar_prefetch = 0 : i64, scratch_operands = 0 : i64, tpu.core_type = #tpu.core_type<tc>} {
    %c0 = arith.constant 0 : index
    %c0_0 = arith.constant 0 : index
    %0 = vector.load %arg0[%c0, %c0_0] : memref<512x128xbf16, #tpu.memory_space<vmem>>, vector<512x128xbf16>
    %c0_1 = arith.constant 0 : index
    %c0_2 = arith.constant 0 : index
    %1 = vector.load %arg1[%c0_1, %c0_2] : memref<128x128xbf16, #tpu.memory_space<vmem>>, vector<128x128xbf16>
    %cst = arith.constant dense<0.000000e+00> : vector<512x128xf32>
    %2 = tpu.matmul %0, %1, %cst {dimension_numbers = #tpu.dot_dimension_numbers<[1], [0], [0], [1], [0, 0, 1, 1], [], []>} : vector<512x128xbf16>, vector<128x128xbf16>, vector<512x128xf32> -> vector<512x128xf32>
    %cst_3 = arith.constant dense<0.000000e+00> : vector<128xf32>
    %3 = vector.multi_reduction <add>, %2, %cst_3 [0] : vector<512x128xf32> to vector<128xf32>
    %4 = vector.shape_cast %3 : vector<128xf32> to vector<1x128xf32>
    %cst_4 = arith.constant 0.001953125 : f32
    %5 = vector.broadcast %cst_4 : f32 to vector<1x128xf32>
    %6 = arith.mulf %4, %5 : vector<1x128xf32>
    %7 = arith.mulf %2, %2 : vector<512x128xf32>
    %cst_5 = arith.constant dense<0.000000e+00> : vector<128xf32>
    %8 = vector.multi_reduction <add>, %7, %cst_5 [0] : vector<512x128xf32> to vector<128xf32>
    %9 = vector.shape_cast %8 : vector<128xf32> to vector<1x128xf32>
    %cst_6 = arith.constant 0.001953125 : f32
    %10 = vector.broadcast %cst_6 : f32 to vector<1x128xf32>
    %11 = arith.mulf %9, %10 : vector<1x128xf32>
    %12 = arith.mulf %6, %6 : vector<1x128xf32>
    %13 = arith.subf %11, %12 : vector<1x128xf32>
    %cst_7 = arith.constant 0.000000e+00 : f32
    %14 = vector.broadcast %cst_7 : f32 to vector<1x128xf32>
    %15 = arith.maximumf %13, %14 : vector<1x128xf32>
    %c0_8 = arith.constant 0 : index
    %c0_9 = arith.constant 0 : index
    %16 = vector.load %arg2[%c0_8, %c0_9] : memref<1x128xf32, #tpu.memory_space<vmem>>, vector<1x128xf32>
    %cst_10 = arith.constant 9.99999974E-6 : f32
    %17 = vector.broadcast %cst_10 : f32 to vector<1x128xf32>
    %18 = arith.addf %15, %17 : vector<1x128xf32>
    %19 = math.rsqrt %18 : vector<1x128xf32>
    %20 = arith.mulf %16, %19 : vector<1x128xf32>
    %c0_11 = arith.constant 0 : index
    %c0_12 = arith.constant 0 : index
    %21 = vector.load %arg3[%c0_11, %c0_12] : memref<1x128xf32, #tpu.memory_space<vmem>>, vector<1x128xf32>
    %22 = arith.mulf %6, %20 : vector<1x128xf32>
    %23 = arith.subf %21, %22 : vector<1x128xf32>
    %24 = vector.broadcast %20 : vector<1x128xf32> to vector<512x128xf32>
    %25 = arith.mulf %2, %24 : vector<512x128xf32>
    %26 = vector.broadcast %23 : vector<1x128xf32> to vector<512x128xf32>
    %27 = arith.addf %25, %26 : vector<512x128xf32>
    %cst_13 = arith.constant 0.000000e+00 : f32
    %28 = vector.broadcast %cst_13 : f32 to vector<512x128xf32>
    %29 = arith.maximumf %27, %28 : vector<512x128xf32>
    %30 = arith.truncf %29 : vector<512x128xf32> to vector<512x128xbf16>
    %c0_14 = arith.constant 0 : index
    %c0_15 = arith.constant 0 : index
    %31 = vector.load %arg4[%c0_14, %c0_15] : memref<512x128xbf16, #tpu.memory_space<vmem>>, vector<512x128xbf16>
    tpu.vector_store %arg4[%c0_14, %c0_15], %30 {strides = array<i32>} : memref<512x128xbf16, #tpu.memory_space<vmem>>, vector<512x128xbf16>,
    return
  }
}

module attributes {stable_mosaic.version = 11 : i64} {
  func.func @_conv_bn_kernel(%arg0: memref<512x256xbf16, #tpu.memory_space<vmem>>, %arg1: memref<256x128xbf16, #tpu.memory_space<vmem>>, %arg2: memref<1x128xf32, #tpu.memory_space<vmem>>, %arg3: memref<1x128xf32, #tpu.memory_space<vmem>>, %arg4: memref<512x128xbf16, #tpu.memory_space<vmem>>) attributes {dimension_semantics = [], scalar_prefetch = 0 : i64, scratch_operands = 0 : i64, tpu.core_type = #tpu.core_type<tc>} {
    %c0 = arith.constant 0 : index
    %c0_0 = arith.constant 0 : index
    %0 = vector.load %arg0[%c0, %c0_0] : memref<512x256xbf16, #tpu.memory_space<vmem>>, vector<512x256xbf16>
    %c0_1 = arith.constant 0 : index
    %c0_2 = arith.constant 0 : index
    %1 = vector.load %arg1[%c0_1, %c0_2] : memref<256x128xbf16, #tpu.memory_space<vmem>>, vector<256x128xbf16>
    %cst = arith.constant dense<0.000000e+00> : vector<512x128xf32>
    %2 = tpu.matmul %0, %1, %cst {dimension_numbers = #tpu.dot_dimension_numbers<[1], [0], [0], [1], [0, 0, 1, 1], [], []>} : vector<512x256xbf16>, vector<256x128xbf16>, vector<512x128xf32> -> vector<512x128xf32>
    %cst_3 = arith.constant dense<0.000000e+00> : vector<128xf32>
    %3 = vector.multi_reduction <add>, %2, %cst_3 [0] : vector<512x128xf32> to vector<128xf32>
    %4 = vector.shape_cast %3 : vector<128xf32> to vector<1x128xf32>
    %cst_4 = arith.constant 0.001953125 : f32
    %5 = vector.broadcast %cst_4 : f32 to vector<1x128xf32>
    %6 = arith.mulf %4, %5 : vector<1x128xf32>
    %7 = arith.mulf %2, %2 : vector<512x128xf32>
    %cst_5 = arith.constant dense<0.000000e+00> : vector<128xf32>
    %8 = vector.multi_reduction <add>, %7, %cst_5 [0] : vector<512x128xf32> to vector<128xf32>
    %9 = vector.shape_cast %8 : vector<128xf32> to vector<1x128xf32>
    %cst_6 = arith.constant 0.001953125 : f32
    %10 = vector.broadcast %cst_6 : f32 to vector<1x128xf32>
    %11 = arith.mulf %9, %10 : vector<1x128xf32>
    %12 = arith.mulf %6, %6 : vector<1x128xf32>
    %13 = arith.subf %11, %12 : vector<1x128xf32>
    %cst_7 = arith.constant 0.000000e+00 : f32
    %14 = vector.broadcast %cst_7 : f32 to vector<1x128xf32>
    %15 = arith.maximumf %13, %14 : vector<1x128xf32>
    %c0_8 = arith.constant 0 : index
    %c0_9 = arith.constant 0 : index
    %16 = vector.load %arg2[%c0_8, %c0_9] : memref<1x128xf32, #tpu.memory_space<vmem>>, vector<1x128xf32>
    %cst_10 = arith.constant 9.99999974E-6 : f32
    %17 = vector.broadcast %cst_10 : f32 to vector<1x128xf32>
    %18 = arith.addf %15, %17 : vector<1x128xf32>
    %19 = math.rsqrt %18 : vector<1x128xf32>
    %20 = arith.mulf %16, %19 : vector<1x128xf32>
    %c0_11 = arith.constant 0 : index
    %c0_12 = arith.constant 0 : index
    %21 = vector.load %arg3[%c0_11, %c0_12] : memref<1x128xf32, #tpu.memory_space<vmem>>, vector<1x128xf32>
    %22 = arith.mulf %6, %20 : vector<1x128xf32>
    %23 = arith.subf %21, %22 : vector<1x128xf32>
    %24 = vector.broadcast %20 : vector<1x128xf32> to vector<512x128xf32>
    %25 = arith.mulf %2, %24 : vector<512x128xf32>
    %26 = vector.broadcast %23 : vector<1x128xf32> to vector<512x128xf32>
    %27 = arith.addf %25, %26 : vector<512x128xf32>
    %cst_13 = arith.constant 0.000000e+00 : f32
    %28 = vector.broadcast %cst_13 : f32 to vector<512x128xf32>
    %29 = arith.maximumf %27, %28 : vector<512x128xf32>
    %30 = arith.truncf %29 : vector<512x128xf32> to vector<512x128xbf16>
    %c0_14 = arith.constant 0 : index
    %c0_15 = arith.constant 0 : index
    %31 = vector.load %arg4[%c0_14, %c0_15] : memref<512x128xbf16, #tpu.memory_space<vmem>>, vector<512x128xbf16>
    tpu.vector_store %arg4[%c0_14, %c0_15], %30 {strides = array<i32>} : memref<512x128xbf16, #tpu.memory_space<vmem>>, vector<512x128xbf16>,
    return
  }
}

module attributes {stable_mosaic.version = 11 : i64} {
  func.func @_conv_bn_kernel(%arg0: memref<512x256xbf16, #tpu.memory_space<vmem>>, %arg1: memref<256x128xbf16, #tpu.memory_space<vmem>>, %arg2: memref<1x128xf32, #tpu.memory_space<vmem>>, %arg3: memref<1x128xf32, #tpu.memory_space<vmem>>, %arg4: memref<512x128xbf16, #tpu.memory_space<vmem>>, %arg5: memref<512x128xbf16, #tpu.memory_space<vmem>>) attributes {dimension_semantics = [], scalar_prefetch = 0 : i64, scratch_operands = 0 : i64, tpu.core_type = #tpu.core_type<tc>} {
    %c0 = arith.constant 0 : index
    %c0_0 = arith.constant 0 : index
    %0 = vector.load %arg0[%c0, %c0_0] : memref<512x256xbf16, #tpu.memory_space<vmem>>, vector<512x256xbf16>
    %c0_1 = arith.constant 0 : index
    %c0_2 = arith.constant 0 : index
    %1 = vector.load %arg1[%c0_1, %c0_2] : memref<256x128xbf16, #tpu.memory_space<vmem>>, vector<256x128xbf16>
    %cst = arith.constant dense<0.000000e+00> : vector<512x128xf32>
    %2 = tpu.matmul %0, %1, %cst {dimension_numbers = #tpu.dot_dimension_numbers<[1], [0], [0], [1], [0, 0, 1, 1], [], []>} : vector<512x256xbf16>, vector<256x128xbf16>, vector<512x128xf32> -> vector<512x128xf32>
    %cst_3 = arith.constant dense<0.000000e+00> : vector<128xf32>
    %3 = vector.multi_reduction <add>, %2, %cst_3 [0] : vector<512x128xf32> to vector<128xf32>
    %4 = vector.shape_cast %3 : vector<128xf32> to vector<1x128xf32>
    %cst_4 = arith.constant 0.001953125 : f32
    %5 = vector.broadcast %cst_4 : f32 to vector<1x128xf32>
    %6 = arith.mulf %4, %5 : vector<1x128xf32>
    %7 = arith.mulf %2, %2 : vector<512x128xf32>
    %cst_5 = arith.constant dense<0.000000e+00> : vector<128xf32>
    %8 = vector.multi_reduction <add>, %7, %cst_5 [0] : vector<512x128xf32> to vector<128xf32>
    %9 = vector.shape_cast %8 : vector<128xf32> to vector<1x128xf32>
    %cst_6 = arith.constant 0.001953125 : f32
    %10 = vector.broadcast %cst_6 : f32 to vector<1x128xf32>
    %11 = arith.mulf %9, %10 : vector<1x128xf32>
    %12 = arith.mulf %6, %6 : vector<1x128xf32>
    %13 = arith.subf %11, %12 : vector<1x128xf32>
    %cst_7 = arith.constant 0.000000e+00 : f32
    %14 = vector.broadcast %cst_7 : f32 to vector<1x128xf32>
    %15 = arith.maximumf %13, %14 : vector<1x128xf32>
    %c0_8 = arith.constant 0 : index
    %c0_9 = arith.constant 0 : index
    %16 = vector.load %arg2[%c0_8, %c0_9] : memref<1x128xf32, #tpu.memory_space<vmem>>, vector<1x128xf32>
    %cst_10 = arith.constant 9.99999974E-6 : f32
    %17 = vector.broadcast %cst_10 : f32 to vector<1x128xf32>
    %18 = arith.addf %15, %17 : vector<1x128xf32>
    %19 = math.rsqrt %18 : vector<1x128xf32>
    %20 = arith.mulf %16, %19 : vector<1x128xf32>
    %c0_11 = arith.constant 0 : index
    %c0_12 = arith.constant 0 : index
    %21 = vector.load %arg3[%c0_11, %c0_12] : memref<1x128xf32, #tpu.memory_space<vmem>>, vector<1x128xf32>
    %22 = arith.mulf %6, %20 : vector<1x128xf32>
    %23 = arith.subf %21, %22 : vector<1x128xf32>
    %24 = vector.broadcast %20 : vector<1x128xf32> to vector<512x128xf32>
    %25 = arith.mulf %2, %24 : vector<512x128xf32>
    %26 = vector.broadcast %23 : vector<1x128xf32> to vector<512x128xf32>
    %27 = arith.addf %25, %26 : vector<512x128xf32>
    %c0_13 = arith.constant 0 : index
    %c0_14 = arith.constant 0 : index
    %28 = vector.load %arg4[%c0_13, %c0_14] : memref<512x128xbf16, #tpu.memory_space<vmem>>, vector<512x128xbf16>
    %29 = arith.extf %28 : vector<512x128xbf16> to vector<512x128xf32>
    %30 = arith.addf %27, %29 : vector<512x128xf32>
    %cst_15 = arith.constant 0.000000e+00 : f32
    %31 = vector.broadcast %cst_15 : f32 to vector<512x128xf32>
    %32 = arith.maximumf %30, %31 : vector<512x128xf32>
    %33 = arith.truncf %32 : vector<512x128xf32> to vector<512x128xbf16>
    %c0_16 = arith.constant 0 : index
    %c0_17 = arith.constant 0 : index
    %34 = vector.load %arg5[%c0_16, %c0_17] : memref<512x128xbf16, #tpu.memory_space<vmem>>, vector<512x128xbf16>
    tpu.vector_store %arg5[%c0_16, %c0_17], %33 {strides = array<i32>} : memref<512x128xbf16, #tpu.memory_space<vmem>>, vector<512x128xbf16>,
    return
  }
}

module attributes {stable_mosaic.version = 11 : i64} {
  func.func @_conv_bn_kernel(%arg0: memref<128x128xbf16, #tpu.memory_space<vmem>>, %arg1: memref<128x128xbf16, #tpu.memory_space<vmem>>, %arg2: memref<1x128xf32, #tpu.memory_space<vmem>>, %arg3: memref<1x128xf32, #tpu.memory_space<vmem>>, %arg4: memref<128x128xbf16, #tpu.memory_space<vmem>>) attributes {dimension_semantics = [], scalar_prefetch = 0 : i64, scratch_operands = 0 : i64, tpu.core_type = #tpu.core_type<tc>} {
    %c0 = arith.constant 0 : index
    %c0_0 = arith.constant 0 : index
    %0 = vector.load %arg0[%c0, %c0_0] : memref<128x128xbf16, #tpu.memory_space<vmem>>, vector<128x128xbf16>
    %c0_1 = arith.constant 0 : index
    %c0_2 = arith.constant 0 : index
    %1 = vector.load %arg1[%c0_1, %c0_2] : memref<128x128xbf16, #tpu.memory_space<vmem>>, vector<128x128xbf16>
    %cst = arith.constant dense<0.000000e+00> : vector<128x128xf32>
    %2 = tpu.matmul %0, %1, %cst {dimension_numbers = #tpu.dot_dimension_numbers<[1], [0], [0], [1], [0, 0, 1, 1], [], []>} : vector<128x128xbf16>, vector<128x128xbf16>, vector<128x128xf32> -> vector<128x128xf32>
    %cst_3 = arith.constant dense<0.000000e+00> : vector<128xf32>
    %3 = vector.multi_reduction <add>, %2, %cst_3 [0] : vector<128x128xf32> to vector<128xf32>
    %4 = vector.shape_cast %3 : vector<128xf32> to vector<1x128xf32>
    %cst_4 = arith.constant 7.812500e-03 : f32
    %5 = vector.broadcast %cst_4 : f32 to vector<1x128xf32>
    %6 = arith.mulf %4, %5 : vector<1x128xf32>
    %7 = arith.mulf %2, %2 : vector<128x128xf32>
    %cst_5 = arith.constant dense<0.000000e+00> : vector<128xf32>
    %8 = vector.multi_reduction <add>, %7, %cst_5 [0] : vector<128x128xf32> to vector<128xf32>
    %9 = vector.shape_cast %8 : vector<128xf32> to vector<1x128xf32>
    %cst_6 = arith.constant 7.812500e-03 : f32
    %10 = vector.broadcast %cst_6 : f32 to vector<1x128xf32>
    %11 = arith.mulf %9, %10 : vector<1x128xf32>
    %12 = arith.mulf %6, %6 : vector<1x128xf32>
    %13 = arith.subf %11, %12 : vector<1x128xf32>
    %cst_7 = arith.constant 0.000000e+00 : f32
    %14 = vector.broadcast %cst_7 : f32 to vector<1x128xf32>
    %15 = arith.maximumf %13, %14 : vector<1x128xf32>
    %c0_8 = arith.constant 0 : index
    %c0_9 = arith.constant 0 : index
    %16 = vector.load %arg2[%c0_8, %c0_9] : memref<1x128xf32, #tpu.memory_space<vmem>>, vector<1x128xf32>
    %cst_10 = arith.constant 9.99999974E-6 : f32
    %17 = vector.broadcast %cst_10 : f32 to vector<1x128xf32>
    %18 = arith.addf %15, %17 : vector<1x128xf32>
    %19 = math.rsqrt %18 : vector<1x128xf32>
    %20 = arith.mulf %16, %19 : vector<1x128xf32>
    %c0_11 = arith.constant 0 : index
    %c0_12 = arith.constant 0 : index
    %21 = vector.load %arg3[%c0_11, %c0_12] : memref<1x128xf32, #tpu.memory_space<vmem>>, vector<1x128xf32>
    %22 = arith.mulf %6, %20 : vector<1x128xf32>
    %23 = arith.subf %21, %22 : vector<1x128xf32>
    %24 = vector.broadcast %20 : vector<1x128xf32> to vector<128x128xf32>
    %25 = arith.mulf %2, %24 : vector<128x128xf32>
    %26 = vector.broadcast %23 : vector<1x128xf32> to vector<128x128xf32>
    %27 = arith.addf %25, %26 : vector<128x128xf32>
    %28 = arith.truncf %27 : vector<128x128xf32> to vector<128x128xbf16>
    %c0_13 = arith.constant 0 : index
    %c0_14 = arith.constant 0 : index
    %29 = vector.load %arg4[%c0_13, %c0_14] : memref<128x128xbf16, #tpu.memory_space<vmem>>, vector<128x128xbf16>
    tpu.vector_store %arg4[%c0_13, %c0_14], %28 {strides = array<i32>} : memref<128x128xbf16, #tpu.memory_space<vmem>>, vector<128x128xbf16>,
    return
  }
}

module attributes {stable_mosaic.version = 11 : i64} {
  func.func @_conv_bn_kernel(%arg0: memref<128x256xbf16, #tpu.memory_space<vmem>>, %arg1: memref<256x128xbf16, #tpu.memory_space<vmem>>, %arg2: memref<1x128xf32, #tpu.memory_space<vmem>>, %arg3: memref<1x128xf32, #tpu.memory_space<vmem>>, %arg4: memref<128x128xbf16, #tpu.memory_space<vmem>>) attributes {dimension_semantics = [], scalar_prefetch = 0 : i64, scratch_operands = 0 : i64, tpu.core_type = #tpu.core_type<tc>} {
    %c0 = arith.constant 0 : index
    %c0_0 = arith.constant 0 : index
    %0 = vector.load %arg0[%c0, %c0_0] : memref<128x256xbf16, #tpu.memory_space<vmem>>, vector<128x256xbf16>
    %c0_1 = arith.constant 0 : index
    %c0_2 = arith.constant 0 : index
    %1 = vector.load %arg1[%c0_1, %c0_2] : memref<256x128xbf16, #tpu.memory_space<vmem>>, vector<256x128xbf16>
    %cst = arith.constant dense<0.000000e+00> : vector<128x128xf32>
    %2 = tpu.matmul %0, %1, %cst {dimension_numbers = #tpu.dot_dimension_numbers<[1], [0], [0], [1], [0, 0, 1, 1], [], []>} : vector<128x256xbf16>, vector<256x128xbf16>, vector<128x128xf32> -> vector<128x128xf32>
    %cst_3 = arith.constant dense<0.000000e+00> : vector<128xf32>
    %3 = vector.multi_reduction <add>, %2, %cst_3 [0] : vector<128x128xf32> to vector<128xf32>
    %4 = vector.shape_cast %3 : vector<128xf32> to vector<1x128xf32>
    %cst_4 = arith.constant 7.812500e-03 : f32
    %5 = vector.broadcast %cst_4 : f32 to vector<1x128xf32>
    %6 = arith.mulf %4, %5 : vector<1x128xf32>
    %7 = arith.mulf %2, %2 : vector<128x128xf32>
    %cst_5 = arith.constant dense<0.000000e+00> : vector<128xf32>
    %8 = vector.multi_reduction <add>, %7, %cst_5 [0] : vector<128x128xf32> to vector<128xf32>
    %9 = vector.shape_cast %8 : vector<128xf32> to vector<1x128xf32>
    %cst_6 = arith.constant 7.812500e-03 : f32
    %10 = vector.broadcast %cst_6 : f32 to vector<1x128xf32>
    %11 = arith.mulf %9, %10 : vector<1x128xf32>
    %12 = arith.mulf %6, %6 : vector<1x128xf32>
    %13 = arith.subf %11, %12 : vector<1x128xf32>
    %cst_7 = arith.constant 0.000000e+00 : f32
    %14 = vector.broadcast %cst_7 : f32 to vector<1x128xf32>
    %15 = arith.maximumf %13, %14 : vector<1x128xf32>
    %c0_8 = arith.constant 0 : index
    %c0_9 = arith.constant 0 : index
    %16 = vector.load %arg2[%c0_8, %c0_9] : memref<1x128xf32, #tpu.memory_space<vmem>>, vector<1x128xf32>
    %cst_10 = arith.constant 9.99999974E-6 : f32
    %17 = vector.broadcast %cst_10 : f32 to vector<1x128xf32>
    %18 = arith.addf %15, %17 : vector<1x128xf32>
    %19 = math.rsqrt %18 : vector<1x128xf32>
    %20 = arith.mulf %16, %19 : vector<1x128xf32>
    %c0_11 = arith.constant 0 : index
    %c0_12 = arith.constant 0 : index
    %21 = vector.load %arg3[%c0_11, %c0_12] : memref<1x128xf32, #tpu.memory_space<vmem>>, vector<1x128xf32>
    %22 = arith.mulf %6, %20 : vector<1x128xf32>
    %23 = arith.subf %21, %22 : vector<1x128xf32>
    %24 = vector.broadcast %20 : vector<1x128xf32> to vector<128x128xf32>
    %25 = arith.mulf %2, %24 : vector<128x128xf32>
    %26 = vector.broadcast %23 : vector<1x128xf32> to vector<128x128xf32>
    %27 = arith.addf %25, %26 : vector<128x128xf32>
    %cst_13 = arith.constant 0.000000e+00 : f32
    %28 = vector.broadcast %cst_13 : f32 to vector<128x128xf32>
    %29 = arith.maximumf %27, %28 : vector<128x128xf32>
    %30 = arith.truncf %29 : vector<128x128xf32> to vector<128x128xbf16>
    %c0_14 = arith.constant 0 : index
    %c0_15 = arith.constant 0 : index
    %31 = vector.load %arg4[%c0_14, %c0_15] : memref<128x128xbf16, #tpu.memory_space<vmem>>, vector<128x128xbf16>
    tpu.vector_store %arg4[%c0_14, %c0_15], %30 {strides = array<i32>} : memref<128x128xbf16, #tpu.memory_space<vmem>>, vector<128x128xbf16>,
    return
  }
}

module attributes {stable_mosaic.version = 11 : i64} {
  func.func @_conv_bn_kernel(%arg0: memref<128x384xbf16, #tpu.memory_space<vmem>>, %arg1: memref<384x128xbf16, #tpu.memory_space<vmem>>, %arg2: memref<1x128xf32, #tpu.memory_space<vmem>>, %arg3: memref<1x128xf32, #tpu.memory_space<vmem>>, %arg4: memref<128x128xbf16, #tpu.memory_space<vmem>>, %arg5: memref<128x128xbf16, #tpu.memory_space<vmem>>) attributes {dimension_semantics = [], scalar_prefetch = 0 : i64, scratch_operands = 0 : i64, tpu.core_type = #tpu.core_type<tc>} {
    %c0 = arith.constant 0 : index
    %c0_0 = arith.constant 0 : index
    %0 = vector.load %arg0[%c0, %c0_0] : memref<128x384xbf16, #tpu.memory_space<vmem>>, vector<128x384xbf16>
    %c0_1 = arith.constant 0 : index
    %c0_2 = arith.constant 0 : index
    %1 = vector.load %arg1[%c0_1, %c0_2] : memref<384x128xbf16, #tpu.memory_space<vmem>>, vector<384x128xbf16>
    %cst = arith.constant dense<0.000000e+00> : vector<128x128xf32>
    %2 = tpu.matmul %0, %1, %cst {dimension_numbers = #tpu.dot_dimension_numbers<[1], [0], [0], [1], [0, 0, 1, 1], [], []>} : vector<128x384xbf16>, vector<384x128xbf16>, vector<128x128xf32> -> vector<128x128xf32>
    %cst_3 = arith.constant dense<0.000000e+00> : vector<128xf32>
    %3 = vector.multi_reduction <add>, %2, %cst_3 [0] : vector<128x128xf32> to vector<128xf32>
    %4 = vector.shape_cast %3 : vector<128xf32> to vector<1x128xf32>
    %cst_4 = arith.constant 7.812500e-03 : f32
    %5 = vector.broadcast %cst_4 : f32 to vector<1x128xf32>
    %6 = arith.mulf %4, %5 : vector<1x128xf32>
    %7 = arith.mulf %2, %2 : vector<128x128xf32>
    %cst_5 = arith.constant dense<0.000000e+00> : vector<128xf32>
    %8 = vector.multi_reduction <add>, %7, %cst_5 [0] : vector<128x128xf32> to vector<128xf32>
    %9 = vector.shape_cast %8 : vector<128xf32> to vector<1x128xf32>
    %cst_6 = arith.constant 7.812500e-03 : f32
    %10 = vector.broadcast %cst_6 : f32 to vector<1x128xf32>
    %11 = arith.mulf %9, %10 : vector<1x128xf32>
    %12 = arith.mulf %6, %6 : vector<1x128xf32>
    %13 = arith.subf %11, %12 : vector<1x128xf32>
    %cst_7 = arith.constant 0.000000e+00 : f32
    %14 = vector.broadcast %cst_7 : f32 to vector<1x128xf32>
    %15 = arith.maximumf %13, %14 : vector<1x128xf32>
    %c0_8 = arith.constant 0 : index
    %c0_9 = arith.constant 0 : index
    %16 = vector.load %arg2[%c0_8, %c0_9] : memref<1x128xf32, #tpu.memory_space<vmem>>, vector<1x128xf32>
    %cst_10 = arith.constant 9.99999974E-6 : f32
    %17 = vector.broadcast %cst_10 : f32 to vector<1x128xf32>
    %18 = arith.addf %15, %17 : vector<1x128xf32>
    %19 = math.rsqrt %18 : vector<1x128xf32>
    %20 = arith.mulf %16, %19 : vector<1x128xf32>
    %c0_11 = arith.constant 0 : index
    %c0_12 = arith.constant 0 : index
    %21 = vector.load %arg3[%c0_11, %c0_12] : memref<1x128xf32, #tpu.memory_space<vmem>>, vector<1x128xf32>
    %22 = arith.mulf %6, %20 : vector<1x128xf32>
    %23 = arith.subf %21, %22 : vector<1x128xf32>
    %24 = vector.broadcast %20 : vector<1x128xf32> to vector<128x128xf32>
    %25 = arith.mulf %2, %24 : vector<128x128xf32>
    %26 = vector.broadcast %23 : vector<1x128xf32> to vector<128x128xf32>
    %27 = arith.addf %25, %26 : vector<128x128xf32>
    %c0_13 = arith.constant 0 : index
    %c0_14 = arith.constant 0 : index
    %28 = vector.load %arg4[%c0_13, %c0_14] : memref<128x128xbf16, #tpu.memory_space<vmem>>, vector<128x128xbf16>
    %29 = arith.extf %28 : vector<128x128xbf16> to vector<128x128xf32>
    %30 = arith.addf %27, %29 : vector<128x128xf32>
    %cst_15 = arith.constant 0.000000e+00 : f32
    %31 = vector.broadcast %cst_15 : f32 to vector<128x128xf32>
    %32 = arith.maximumf %30, %31 : vector<128x128xf32>
    %33 = arith.truncf %32 : vector<128x128xf32> to vector<128x128xbf16>
    %c0_16 = arith.constant 0 : index
    %c0_17 = arith.constant 0 : index
    %34 = vector.load %arg5[%c0_16, %c0_17] : memref<128x128xbf16, #tpu.memory_space<vmem>>, vector<128x128xbf16>
    tpu.vector_store %arg5[%c0_16, %c0_17], %33 {strides = array<i32>} : memref<128x128xbf16, #tpu.memory_space<vmem>>, vector<128x128xbf16>,
    return
  }
}

module attributes {stable_mosaic.version = 11 : i64} {
  func.func @_conv_bn_kernel(%arg0: memref<32x128xbf16, #tpu.memory_space<vmem>>, %arg1: memref<128x128xbf16, #tpu.memory_space<vmem>>, %arg2: memref<1x128xf32, #tpu.memory_space<vmem>>, %arg3: memref<1x128xf32, #tpu.memory_space<vmem>>, %arg4: memref<32x128xbf16, #tpu.memory_space<vmem>>) attributes {dimension_semantics = [], scalar_prefetch = 0 : i64, scratch_operands = 0 : i64, tpu.core_type = #tpu.core_type<tc>} {
    %c0 = arith.constant 0 : index
    %c0_0 = arith.constant 0 : index
    %0 = vector.load %arg0[%c0, %c0_0] : memref<32x128xbf16, #tpu.memory_space<vmem>>, vector<32x128xbf16>
    %c0_1 = arith.constant 0 : index
    %c0_2 = arith.constant 0 : index
    %1 = vector.load %arg1[%c0_1, %c0_2] : memref<128x128xbf16, #tpu.memory_space<vmem>>, vector<128x128xbf16>
    %cst = arith.constant dense<0.000000e+00> : vector<32x128xf32>
    %2 = tpu.matmul %0, %1, %cst {dimension_numbers = #tpu.dot_dimension_numbers<[1], [0], [0], [1], [0, 0, 1, 1], [], []>} : vector<32x128xbf16>, vector<128x128xbf16>, vector<32x128xf32> -> vector<32x128xf32>
    %cst_3 = arith.constant dense<0.000000e+00> : vector<128xf32>
    %3 = vector.multi_reduction <add>, %2, %cst_3 [0] : vector<32x128xf32> to vector<128xf32>
    %4 = vector.shape_cast %3 : vector<128xf32> to vector<1x128xf32>
    %cst_4 = arith.constant 3.125000e-02 : f32
    %5 = vector.broadcast %cst_4 : f32 to vector<1x128xf32>
    %6 = arith.mulf %4, %5 : vector<1x128xf32>
    %7 = arith.mulf %2, %2 : vector<32x128xf32>
    %cst_5 = arith.constant dense<0.000000e+00> : vector<128xf32>
    %8 = vector.multi_reduction <add>, %7, %cst_5 [0] : vector<32x128xf32> to vector<128xf32>
    %9 = vector.shape_cast %8 : vector<128xf32> to vector<1x128xf32>
    %cst_6 = arith.constant 3.125000e-02 : f32
    %10 = vector.broadcast %cst_6 : f32 to vector<1x128xf32>
    %11 = arith.mulf %9, %10 : vector<1x128xf32>
    %12 = arith.mulf %6, %6 : vector<1x128xf32>
    %13 = arith.subf %11, %12 : vector<1x128xf32>
    %cst_7 = arith.constant 0.000000e+00 : f32
    %14 = vector.broadcast %cst_7 : f32 to vector<1x128xf32>
    %15 = arith.maximumf %13, %14 : vector<1x128xf32>
    %c0_8 = arith.constant 0 : index
    %c0_9 = arith.constant 0 : index
    %16 = vector.load %arg2[%c0_8, %c0_9] : memref<1x128xf32, #tpu.memory_space<vmem>>, vector<1x128xf32>
    %cst_10 = arith.constant 9.99999974E-6 : f32
    %17 = vector.broadcast %cst_10 : f32 to vector<1x128xf32>
    %18 = arith.addf %15, %17 : vector<1x128xf32>
    %19 = math.rsqrt %18 : vector<1x128xf32>
    %20 = arith.mulf %16, %19 : vector<1x128xf32>
    %c0_11 = arith.constant 0 : index
    %c0_12 = arith.constant 0 : index
    %21 = vector.load %arg3[%c0_11, %c0_12] : memref<1x128xf32, #tpu.memory_space<vmem>>, vector<1x128xf32>
    %22 = arith.mulf %6, %20 : vector<1x128xf32>
    %23 = arith.subf %21, %22 : vector<1x128xf32>
    %24 = vector.broadcast %20 : vector<1x128xf32> to vector<32x128xf32>
    %25 = arith.mulf %2, %24 : vector<32x128xf32>
    %26 = vector.broadcast %23 : vector<1x128xf32> to vector<32x128xf32>
    %27 = arith.addf %25, %26 : vector<32x128xf32>
    %28 = arith.truncf %27 : vector<32x128xf32> to vector<32x128xbf16>
    %c0_13 = arith.constant 0 : index
    %c0_14 = arith.constant 0 : index
    %29 = vector.load %arg4[%c0_13, %c0_14] : memref<32x128xbf16, #tpu.memory_space<vmem>>, vector<32x128xbf16>
    tpu.vector_store %arg4[%c0_13, %c0_14], %28 {strides = array<i32>} : memref<32x128xbf16, #tpu.memory_space<vmem>>, vector<32x128xbf16>,
    return
  }
}

module attributes {stable_mosaic.version = 11 : i64} {
  func.func @_conv_bn_kernel(%arg0: memref<32x384xbf16, #tpu.memory_space<vmem>>, %arg1: memref<384x128xbf16, #tpu.memory_space<vmem>>, %arg2: memref<1x128xf32, #tpu.memory_space<vmem>>, %arg3: memref<1x128xf32, #tpu.memory_space<vmem>>, %arg4: memref<32x128xbf16, #tpu.memory_space<vmem>>) attributes {dimension_semantics = [], scalar_prefetch = 0 : i64, scratch_operands = 0 : i64, tpu.core_type = #tpu.core_type<tc>} {
    %c0 = arith.constant 0 : index
    %c0_0 = arith.constant 0 : index
    %0 = vector.load %arg0[%c0, %c0_0] : memref<32x384xbf16, #tpu.memory_space<vmem>>, vector<32x384xbf16>
    %c0_1 = arith.constant 0 : index
    %c0_2 = arith.constant 0 : index
    %1 = vector.load %arg1[%c0_1, %c0_2] : memref<384x128xbf16, #tpu.memory_space<vmem>>, vector<384x128xbf16>
    %cst = arith.constant dense<0.000000e+00> : vector<32x128xf32>
    %2 = tpu.matmul %0, %1, %cst {dimension_numbers = #tpu.dot_dimension_numbers<[1], [0], [0], [1], [0, 0, 1, 1], [], []>} : vector<32x384xbf16>, vector<384x128xbf16>, vector<32x128xf32> -> vector<32x128xf32>
    %cst_3 = arith.constant dense<0.000000e+00> : vector<128xf32>
    %3 = vector.multi_reduction <add>, %2, %cst_3 [0] : vector<32x128xf32> to vector<128xf32>
    %4 = vector.shape_cast %3 : vector<128xf32> to vector<1x128xf32>
    %cst_4 = arith.constant 3.125000e-02 : f32
    %5 = vector.broadcast %cst_4 : f32 to vector<1x128xf32>
    %6 = arith.mulf %4, %5 : vector<1x128xf32>
    %7 = arith.mulf %2, %2 : vector<32x128xf32>
    %cst_5 = arith.constant dense<0.000000e+00> : vector<128xf32>
    %8 = vector.multi_reduction <add>, %7, %cst_5 [0] : vector<32x128xf32> to vector<128xf32>
    %9 = vector.shape_cast %8 : vector<128xf32> to vector<1x128xf32>
    %cst_6 = arith.constant 3.125000e-02 : f32
    %10 = vector.broadcast %cst_6 : f32 to vector<1x128xf32>
    %11 = arith.mulf %9, %10 : vector<1x128xf32>
    %12 = arith.mulf %6, %6 : vector<1x128xf32>
    %13 = arith.subf %11, %12 : vector<1x128xf32>
    %cst_7 = arith.constant 0.000000e+00 : f32
    %14 = vector.broadcast %cst_7 : f32 to vector<1x128xf32>
    %15 = arith.maximumf %13, %14 : vector<1x128xf32>
    %c0_8 = arith.constant 0 : index
    %c0_9 = arith.constant 0 : index
    %16 = vector.load %arg2[%c0_8, %c0_9] : memref<1x128xf32, #tpu.memory_space<vmem>>, vector<1x128xf32>
    %cst_10 = arith.constant 9.99999974E-6 : f32
    %17 = vector.broadcast %cst_10 : f32 to vector<1x128xf32>
    %18 = arith.addf %15, %17 : vector<1x128xf32>
    %19 = math.rsqrt %18 : vector<1x128xf32>
    %20 = arith.mulf %16, %19 : vector<1x128xf32>
    %c0_11 = arith.constant 0 : index
    %c0_12 = arith.constant 0 : index
    %21 = vector.load %arg3[%c0_11, %c0_12] : memref<1x128xf32, #tpu.memory_space<vmem>>, vector<1x128xf32>
    %22 = arith.mulf %6, %20 : vector<1x128xf32>
    %23 = arith.subf %21, %22 : vector<1x128xf32>
    %24 = vector.broadcast %20 : vector<1x128xf32> to vector<32x128xf32>
    %25 = arith.mulf %2, %24 : vector<32x128xf32>
    %26 = vector.broadcast %23 : vector<1x128xf32> to vector<32x128xf32>
    %27 = arith.addf %25, %26 : vector<32x128xf32>
    %cst_13 = arith.constant 0.000000e+00 : f32
    %28 = vector.broadcast %cst_13 : f32 to vector<32x128xf32>
    %29 = arith.maximumf %27, %28 : vector<32x128xf32>
    %30 = arith.truncf %29 : vector<32x128xf32> to vector<32x128xbf16>
    %c0_14 = arith.constant 0 : index
    %c0_15 = arith.constant 0 : index
    %31 = vector.load %arg4[%c0_14, %c0_15] : memref<32x128xbf16, #tpu.memory_space<vmem>>, vector<32x128xbf16>
    tpu.vector_store %arg4[%c0_14, %c0_15], %30 {strides = array<i32>} : memref<32x128xbf16, #tpu.memory_space<vmem>>, vector<32x128xbf16>,
    return
  }
}

module attributes {stable_mosaic.version = 11 : i64} {
  func.func @_conv_bn_kernel(%arg0: memref<32x640xbf16, #tpu.memory_space<vmem>>, %arg1: memref<640x128xbf16, #tpu.memory_space<vmem>>, %arg2: memref<1x128xf32, #tpu.memory_space<vmem>>, %arg3: memref<1x128xf32, #tpu.memory_space<vmem>>, %arg4: memref<32x128xbf16, #tpu.memory_space<vmem>>, %arg5: memref<32x128xbf16, #tpu.memory_space<vmem>>) attributes {dimension_semantics = [], scalar_prefetch = 0 : i64, scratch_operands = 0 : i64, tpu.core_type = #tpu.core_type<tc>} {
    %c0 = arith.constant 0 : index
    %c0_0 = arith.constant 0 : index
    %0 = vector.load %arg0[%c0, %c0_0] : memref<32x640xbf16, #tpu.memory_space<vmem>>, vector<32x640xbf16>
    %c0_1 = arith.constant 0 : index
    %c0_2 = arith.constant 0 : index
    %1 = vector.load %arg1[%c0_1, %c0_2] : memref<640x128xbf16, #tpu.memory_space<vmem>>, vector<640x128xbf16>
    %cst = arith.constant dense<0.000000e+00> : vector<32x128xf32>
    %2 = tpu.matmul %0, %1, %cst {dimension_numbers = #tpu.dot_dimension_numbers<[1], [0], [0], [1], [0, 0, 1, 1], [], []>} : vector<32x640xbf16>, vector<640x128xbf16>, vector<32x128xf32> -> vector<32x128xf32>
    %cst_3 = arith.constant dense<0.000000e+00> : vector<128xf32>
    %3 = vector.multi_reduction <add>, %2, %cst_3 [0] : vector<32x128xf32> to vector<128xf32>
    %4 = vector.shape_cast %3 : vector<128xf32> to vector<1x128xf32>
    %cst_4 = arith.constant 3.125000e-02 : f32
    %5 = vector.broadcast %cst_4 : f32 to vector<1x128xf32>
    %6 = arith.mulf %4, %5 : vector<1x128xf32>
    %7 = arith.mulf %2, %2 : vector<32x128xf32>
    %cst_5 = arith.constant dense<0.000000e+00> : vector<128xf32>
    %8 = vector.multi_reduction <add>, %7, %cst_5 [0] : vector<32x128xf32> to vector<128xf32>
    %9 = vector.shape_cast %8 : vector<128xf32> to vector<1x128xf32>
    %cst_6 = arith.constant 3.125000e-02 : f32
    %10 = vector.broadcast %cst_6 : f32 to vector<1x128xf32>
    %11 = arith.mulf %9, %10 : vector<1x128xf32>
    %12 = arith.mulf %6, %6 : vector<1x128xf32>
    %13 = arith.subf %11, %12 : vector<1x128xf32>
    %cst_7 = arith.constant 0.000000e+00 : f32
    %14 = vector.broadcast %cst_7 : f32 to vector<1x128xf32>
    %15 = arith.maximumf %13, %14 : vector<1x128xf32>
    %c0_8 = arith.constant 0 : index
    %c0_9 = arith.constant 0 : index
    %16 = vector.load %arg2[%c0_8, %c0_9] : memref<1x128xf32, #tpu.memory_space<vmem>>, vector<1x128xf32>
    %cst_10 = arith.constant 9.99999974E-6 : f32
    %17 = vector.broadcast %cst_10 : f32 to vector<1x128xf32>
    %18 = arith.addf %15, %17 : vector<1x128xf32>
    %19 = math.rsqrt %18 : vector<1x128xf32>
    %20 = arith.mulf %16, %19 : vector<1x128xf32>
    %c0_11 = arith.constant 0 : index
    %c0_12 = arith.constant 0 : index
    %21 = vector.load %arg3[%c0_11, %c0_12] : memref<1x128xf32, #tpu.memory_space<vmem>>, vector<1x128xf32>
    %22 = arith.mulf %6, %20 : vector<1x128xf32>
    %23 = arith.subf %21, %22 : vector<1x128xf32>
    %24 = vector.broadcast %20 : vector<1x128xf32> to vector<32x128xf32>
    %25 = arith.mulf %2, %24 : vector<32x128xf32>
    %26 = vector.broadcast %23 : vector<1x128xf32> to vector<32x128xf32>
    %27 = arith.addf %25, %26 : vector<32x128xf32>
    %c0_13 = arith.constant 0 : index
    %c0_14 = arith.constant 0 : index
    %28 = vector.load %arg4[%c0_13, %c0_14] : memref<32x128xbf16, #tpu.memory_space<vmem>>, vector<32x128xbf16>
    %29 = arith.extf %28 : vector<32x128xbf16> to vector<32x128xf32>
    %30 = arith.addf %27, %29 : vector<32x128xf32>
    %cst_15 = arith.constant 0.000000e+00 : f32
    %31 = vector.broadcast %cst_15 : f32 to vector<32x128xf32>
    %32 = arith.maximumf %30, %31 : vector<32x128xf32>
    %33 = arith.truncf %32 : vector<32x128xf32> to vector<32x128xbf16>
    %c0_16 = arith.constant 0 : index
    %c0_17 = arith.constant 0 : index
    %34 = vector.load %arg5[%c0_16, %c0_17] : memref<32x128xbf16, #tpu.memory_space<vmem>>, vector<32x128xbf16>
    tpu.vector_store %arg5[%c0_16, %c0_17], %33 {strides = array<i32>} : memref<32x128xbf16, #tpu.memory_space<vmem>>, vector<32x128xbf16>,
    return
  }
}

module attributes {stable_mosaic.version = 11 : i64} {
  func.func @_pool_fc_kernel(%arg0: memref<2x16x128xbf16, #tpu.memory_space<vmem>>, %arg1: memref<128x128xf32, #tpu.memory_space<vmem>>, %arg2: memref<1x128xf32, #tpu.memory_space<vmem>>, %arg3: memref<2x128xf32, #tpu.memory_space<vmem>>) attributes {dimension_semantics = [], scalar_prefetch = 0 : i64, scratch_operands = 0 : i64, tpu.core_type = #tpu.core_type<tc>} {
    %c0 = arith.constant 0 : index
    %c0_0 = arith.constant 0 : index
    %c0_1 = arith.constant 0 : index
    %0 = vector.load %arg0[%c0, %c0_0, %c0_1] : memref<2x16x128xbf16, #tpu.memory_space<vmem>>, vector<2x16x128xbf16>
    %1 = arith.extf %0 : vector<2x16x128xbf16> to vector<2x16x128xf32>
    %cst = arith.constant dense<0.000000e+00> : vector<2x128xf32>
    %2 = vector.multi_reduction <add>, %1, %cst [1] : vector<2x16x128xf32> to vector<2x128xf32>
    %cst_2 = arith.constant 6.250000e-02 : f32
    %3 = vector.broadcast %cst_2 : f32 to vector<2x128xf32>
    %4 = arith.mulf %2, %3 : vector<2x128xf32>
    %c0_3 = arith.constant 0 : index
    %c0_4 = arith.constant 0 : index
    %5 = vector.load %arg1[%c0_3, %c0_4] : memref<128x128xf32, #tpu.memory_space<vmem>>, vector<128x128xf32>
    %cst_5 = arith.constant dense<0.000000e+00> : vector<2x128xf32>
    %6 = tpu.matmul %4, %5, %cst_5 {dimension_numbers = #tpu.dot_dimension_numbers<[1], [0], [0], [1], [0, 0, 1, 1], [], []>} : vector<2x128xf32>, vector<128x128xf32>, vector<2x128xf32> -> vector<2x128xf32>
    %c0_6 = arith.constant 0 : index
    %c0_7 = arith.constant 0 : index
    %7 = vector.load %arg2[%c0_6, %c0_7] : memref<1x128xf32, #tpu.memory_space<vmem>>, vector<1x128xf32>
    %8 = vector.broadcast %7 : vector<1x128xf32> to vector<2x128xf32>
    %9 = arith.addf %6, %8 : vector<2x128xf32>
    %c0_8 = arith.constant 0 : index
    %c0_9 = arith.constant 0 : index
    %10 = vector.load %arg3[%c0_8, %c0_9] : memref<2x128xf32, #tpu.memory_space<vmem>>, vector<2x128xf32>
    tpu.vector_store %arg3[%c0_8, %c0_9], %9 {strides = array<i32>} : memref<2x128xf32, #tpu.memory_space<vmem>>, vector<2x128xf32>,
    return
  }
}

</mosaic_0001>

<bundles_post_ra>
// kernel: resnet_forward.10
= control target key start
LH: loop header
LB: loop body
LE: loop exit
PB: predicated region body
PF: predicated region fallthrough
CT: control target
= control target key end

     0   :  { %s3076_s1 = inlined_call_operand.vmem [shape: bf16[128,128], index: 1, kind: input, shape index: {}]   ;;  %s3077_s0 = inlined_call_operand.vmem [shape: bf16[512,128], index: 0, kind: input, shape index: {}]   ;;  %s3078_s2 = inlined_call_operand.vmem [shape: f32[1,128], index: 2, kind: input, shape index: {}]   ;;  %s3079_s3 = inlined_call_operand.vmem [shape: f32[1,128], index: 3, kind: input, shape index: {}]   ;;  %s3080_s4 = inlined_call_operand.vmem [shape: bf16[512,128], index: 4, kind: output, shape index: {}]  }
   0x1   :  { %v1864_v0 = vld [vmem:[%s3076_s1 + $0x38] sm:$0xff]   ;;  %v1865_v1 = vld [vmem:[%s3076_s1 + $0x30] sm:$0xff]   ;;  %v1866_v2 = vld [vmem:[%s3076_s1 + $0x28] sm:$0xff]  }
   0x2   :  { %1768 = vmatprep.subr.bf16.mxu0 %v1864_v0  ;;  %1848 = vmatprep.subr.bf16.mxu1 %v1864_v0  ;;  %v1867_v3 = vld [vmem:[%s3076_s1 + $0x20] sm:$0xff]   ;;  %v1868_v5 = vld [vmem:[%s3076_s1 + $0x18] sm:$0xff]   ;;  %v1869_v6 = vld [vmem:[%s3076_s1 + $0x10] sm:$0xff]  }
   0x3   :  { %1769 = vmatpush3.bf16.msra.mxu0 %v1864_v0  ;;  %1856 = vmatpush3.bf16.msra.mxu1 %v1864_v0  ;;  %v1872_v4 = vld [vmem:[%s3077_s0] sm:$0xff]   ;;  %v1870_v7 = vld [vmem:[%s3076_s1 + $0x8] sm:$0xff]   ;;  %v1874_v11 = vld [vmem:[%s3077_s0 + $0x10] sm:$0xff]  }
   0x4   :  { %1770 = vmatprep.subr.bf16.mxu0 %v1865_v1  ;;  %1849 = vmatprep.subr.bf16.mxu1 %v1865_v1  ;;  %v1871_v8 = vld [vmem:[%s3076_s1] sm:$0xff]   ;;  %v1873_v10 = vld [vmem:[%s3077_s0 + $0x8] sm:$0xff]   ;;  %v1890_v13 = vld [vmem:[%s3077_s0 + $0x90] sm:$0xff]  }
   0x5   :  { %1784 = vmatprep.mubr.bf16.mxu0 %v1872_v4  ;;  %v1888_v9 = vld [vmem:[%s3077_s0 + $0x80] sm:$0xff]   ;;  %v1889_v12 = vld [vmem:[%s3077_s0 + $0x88] sm:$0xff]   ;;  %v1875_v14 = vld [vmem:[%s3077_s0 + $0x18] sm:$0xff]  }
   0x6   :  { %1816 = vmatprep.mubr.bf16.mxu1 %v1888_v9  ;;  %v1876_v15 = vld [vmem:[%s3077_s0 + $0x20] sm:$0xff]   ;;  %v1891_v16 = vld [vmem:[%s3077_s0 + $0x98] sm:$0xff]   ;;  %v1877_v18 = vld [vmem:[%s3077_s0 + $0x28] sm:$0xff]  }
   0x7   :  { %1771 = vmatpush3.bf16.msra.mxu0 %v1865_v1  ;;  %1857 = vmatpush3.bf16.msra.mxu1 %v1865_v1  ;;  %v1892_v17 = vld [vmem:[%s3077_s0 + $0xa0] sm:$0xff]   ;;  %v1893_v19 = vld [vmem:[%s3077_s0 + $0xa8] sm:$0xff]   ;;  %v1878_v20 = vld [vmem:[%s3077_s0 + $0x30] sm:$0xff]  }
   0x8   :  { %1772 = vmatprep.subr.bf16.mxu0 %v1866_v2  ;;  %1850 = vmatprep.subr.bf16.mxu1 %v1866_v2  ;;  %v1894_v21 = vld [vmem:[%s3077_s0 + $0xb0] sm:$0xff]   ;;  %v1879_v22 = vld [vmem:[%s3077_s0 + $0x38] sm:$0xff]   ;;  %v1880_v24 = vld [vmem:[%s3077_s0 + $0x40] sm:$0xff]  }
   0x9   :  { %v1895_v23 = vld [vmem:[%s3077_s0 + $0xb8] sm:$0xff]   ;;  %v1896_v25 = vld [vmem:[%s3077_s0 + $0xc0] sm:$0xff]   ;;  %v1881_v26 = vld [vmem:[%s3077_s0 + $0x48] sm:$0xff]  }
   0xa   :  { %v1897_v27 = vld [vmem:[%s3077_s0 + $0xc8] sm:$0xff]   ;;  %v1882_v28 = vld [vmem:[%s3077_s0 + $0x50] sm:$0xff]   ;;  %v1883_v30 = vld [vmem:[%s3077_s0 + $0x58] sm:$0xff]  }
   0xb   :  { %1773 = vmatpush3.bf16.msra.mxu0 %v1866_v2  ;;  %1858 = vmatpush3.bf16.msra.mxu1 %v1866_v2  ;;  %v1898_v29 = vld [vmem:[%s3077_s0 + $0xd0] sm:$0xff]   ;;  %v1899_v31 = vld [vmem:[%s3077_s0 + $0xd8] sm:$0xff]   ;;  %v1884_v32 = vld [vmem:[%s3077_s0 + $0x60] sm:$0xff]  }
   0xc   :  { %1774 = vmatprep.subr.bf16.mxu0 %v1867_v3  ;;  %1851 = vmatprep.subr.bf16.mxu1 %v1867_v3  ;;  %v1900_v33 = vld [vmem:[%s3077_s0 + $0xe0] sm:$0xff]   ;;  %v1885_v34 = vld [vmem:[%s3077_s0 + $0x68] sm:$0xff]   ;;  %v1886_v36 = vld [vmem:[%s3077_s0 + $0x70] sm:$0xff]  }
   0xd   :  { %v1901_v35 = vld [vmem:[%s3077_s0 + $0xe8] sm:$0xff]   ;;  %v1902_v37 = vld [vmem:[%s3077_s0 + $0xf0] sm:$0xff]   ;;  %v1887_v38 = vld [vmem:[%s3077_s0 + $0x78] sm:$0xff]  }
   0xe   :  { %v1903_v39 = vld [vmem:[%s3077_s0 + $0xf8] sm:$0xff]  }
   0xf   :  { %1775 = vmatpush3.bf16.msra.mxu0 %v1867_v3  ;;  %1859 = vmatpush3.bf16.msra.mxu1 %v1867_v3 }
  0x10   :  { %1776 = vmatprep.subr.bf16.mxu0 %v1868_v5  ;;  %1852 = vmatprep.subr.bf16.mxu1 %v1868_v5 }
  0x13   :  { %1777 = vmatpush3.bf16.msra.mxu0 %v1868_v5  ;;  %1860 = vmatpush3.bf16.msra.mxu1 %v1868_v5 }
  0x14   :  { %1778 = vmatprep.subr.bf16.mxu0 %v1869_v6  ;;  %1853 = vmatprep.subr.bf16.mxu1 %v1869_v6 }
  0x17   :  { %1779 = vmatpush3.bf16.msra.mxu0 %v1869_v6  ;;  %1861 = vmatpush3.bf16.msra.mxu1 %v1869_v6 }
  0x18   :  { %1780 = vmatprep.subr.bf16.mxu0 %v1870_v7  ;;  %1854 = vmatprep.subr.bf16.mxu1 %v1870_v7 }
  0x1b   :  { %1781 = vmatpush3.bf16.msra.mxu0 %v1870_v7  ;;  %1862 = vmatpush3.bf16.msra.mxu1 %v1870_v7 }
  0x1c   :  { %1782 = vmatprep.subr.bf16.mxu0 %v1871_v8  ;;  %1855 = vmatprep.subr.bf16.mxu1 %v1871_v8 }
  0x1f   :  { %1783 = vmatpush3.bf16.msra.mxu0 %v1871_v8  ;;  %1863 = vmatpush3.bf16.msra.mxu1 %v1871_v8 }
  0x22   :  { %1785 = vmatmul.mubr.bf16.vlgmr.msra.gmra.mxu0 %v1873_v10  ;;  %1817 = vmatmul.mubr.bf16.vlgmr.msra.gmra.mxu1 %v1889_v12 }
  0x23   :  { %1788 = vmatprep.mubr.bf16.mxu0 %v1874_v11  ;;  %1820 = vmatprep.mubr.bf16.mxu1 %v1890_v13 }
  0x2a   :  { %1789 = vmatmul.mubr.bf16.gmra.mxu0 %v1875_v14  ;;  %1821 = vmatmul.mubr.bf16.gmra.mxu1 %v1891_v16 }
  0x2b   :  { %1792 = vmatprep.mubr.bf16.mxu0 %v1876_v15  ;;  %1824 = vmatprep.mubr.bf16.mxu1 %v1892_v17 }
  0x32   :  { %1793 = vmatmul.mubr.bf16.gmra.mxu0 %v1877_v18  ;;  %1825 = vmatmul.mubr.bf16.gmra.mxu1 %v1893_v19 }
  0x33   :  { %1796 = vmatprep.mubr.bf16.mxu0 %v1878_v20  ;;  %1828 = vmatprep.mubr.bf16.mxu1 %v1894_v21 }
  0x3a   :  { %1797 = vmatmul.mubr.bf16.gmra.mxu0 %v1879_v22  ;;  %1829 = vmatmul.mubr.bf16.gmra.mxu1 %v1895_v23 }
  0x3b   :  { %1800 = vmatprep.mubr.bf16.mxu0 %v1880_v24  ;;  %1832 = vmatprep.mubr.bf16.mxu1 %v1896_v25 }
  0x42   :  { %1801 = vmatmul.mubr.bf16.gmra.mxu0 %v1881_v26  ;;  %1833 = vmatmul.mubr.bf16.gmra.mxu1 %v1897_v27 }
  0x43   :  { %1804 = vmatprep.mubr.bf16.mxu0 %v1882_v28  ;;  %1836 = vmatprep.mubr.bf16.mxu1 %v1898_v29 }
  0x4a   :  { %1805 = vmatmul.mubr.bf16.gmra.mxu0 %v1883_v30  ;;  %1837 = vmatmul.mubr.bf16.gmra.mxu1 %v1899_v31 }
  0x4b   :  { %1808 = vmatprep.mubr.bf16.mxu0 %v1884_v32  ;;  %1840 = vmatprep.mubr.bf16.mxu1 %v1900_v33 }
  0x52   :  { %1809 = vmatmul.mubr.bf16.gmra.mxu0 %v1885_v34  ;;  %1841 = vmatmul.mubr.bf16.gmra.mxu1 %v1901_v35 }
  0x53   :  { %1812 = vmatprep.mubr.bf16.mxu0 %v1886_v36  ;;  %1844 = vmatprep.mubr.bf16.mxu1 %v1902_v37 }
  0x5a   :  { %1813 = vmatmul.mubr.bf16.gmra.mxu0 %v1887_v38  ;;  %1845 = vmatmul.mubr.bf16.gmra.mxu1 %v1903_v39 }
  0xe2   :  { %v2051_v40 = vpop.f32.mrf.mxu0  ;;  %v2053_v41 = vpop.f32.mrf.mxu1 }
  0xe3   :  { %v699_v51 = vmul.f32 %v2051_v40, %v2051_v40 }
  0xe4   :  { %v2055_v42 = vpop.f32.mrf.mxu0  ;;  %v2059_v44 = vpop.f32.mrf.mxu1 }
  0xe5   :  { %3111 = vst [vmem:[#allocation2_spill] sm:$0xff] %v2059_v44  ;;  %v697_v46 = vmul.f32 %v2055_v42, %v2055_v42 }
  0xe6   :  { %v2057_v43 = vpop.f32.mrf.mxu0  ;;  %v2071_v50 = vpop.f32.mrf.mxu1 }
  0xe7   :  { %v700_v55 = vmul.f32 %v2057_v43, %v2057_v43 }
  0xe8   :  { %v2061_v45 = vpop.f32.mrf.mxu0  ;;  %v2083_v59 = vpop.f32.mrf.mxu1 }
  0xe9   :  { %v627_v47 = vadd.f32 %v2061_v45, %v2055_v42  ;;  %v698_v48 = vmul.f32 %v2061_v45, %v2061_v45  ;;  %3112 = vst [vmem:[#allocation3_spill] sm:$0xff] %v2083_v59 }
  0xea   :  { %v2069_v49 = vpop.f32.mrf.mxu0  ;;  %v2095_v4 = vpop.f32.mrf.mxu1 }
  0xeb   :  { %v628_v52 = vadd.f32 %v2051_v40, %v627_v47  ;;  %v761_v53 = vadd.f32 %v698_v48, %v697_v46  ;;  %v703_v5 = vmul.f32 %v2069_v49, %v2069_v49 }
  0xec   :  { %v2076_v54 = vpop.f32.mrf.mxu0  ;;  %v2107_v13 = vpop.f32.mrf.mxu1 }
  0xed   :  { %v762_v56 = vadd.f32 %v761_v53, %v699_v51  ;;  %v629_v57 = vadd.f32 %v2057_v43, %v628_v52  ;;  %v701_v61 = vmul.f32 %v2076_v54, %v2076_v54  ;;  %3113 = vst [vmem:[#allocation4_spill] sm:$0xff] %v2107_v13 }
  0xee   :  { %v2081_v58 = vpop.f32.mrf.mxu0  ;;  %v2119_v22 = vpop.f32.mrf.mxu1 }
  0xef   :  { %v630_v60 = vadd.f32 %v629_v57, %v2076_v54  ;;  %v763_v62 = vadd.f32 %v762_v56, %v700_v55  ;;  %v704_v9 = vmul.f32 %v2081_v58, %v2081_v58 }
  0xf0   :  { %v2088_v63 = vpop.f32.mrf.mxu0  ;;  %v2131_v31 = vpop.f32.mrf.mxu1 }
  0xf1   :  { %v764_v0 = vadd.f32 %v763_v62, %v701_v61  ;;  %v631_v1 = vadd.f32 %v630_v60, %v2088_v63  ;;  %v702_v2 = vmul.f32 %v2088_v63, %v2088_v63  ;;  %3114 = vst [vmem:[#allocation5_spill] sm:$0xff] %v2131_v31 }
  0xf2   :  { %v2093_v3 = vpop.f32.mrf.mxu0  ;;  %v2143_v46 = vpop.f32.mrf.mxu1 }
  0xf3   :  { %v632_v6 = vadd.f32 %v2069_v49, %v631_v1  ;;  %v765_v7 = vadd.f32 %v764_v0, %v702_v2  ;;  %v707_v23 = vmul.f32 %v2093_v3, %v2093_v3 }
  0xf4   :  { %v2100_v8 = vpop.f32.mrf.mxu0  ;;  %v2155_v60 = vpop.f32.mrf.mxu1 }
  0xf5   :  { %v766_v10 = vadd.f32 %v765_v7, %v703_v5  ;;  %v633_v11 = vadd.f32 %v2081_v58, %v632_v6  ;;  %v705_v15 = vmul.f32 %v2100_v8, %v2100_v8  ;;  %3115 = vst [vmem:[#allocation6_spill] sm:$0xff] %v2155_v60 }
  0xf6   :  { %v2105_v12 = vpop.f32.mrf.mxu0 }
  0xf7   :  { %v634_v14 = vadd.f32 %v633_v11, %v2100_v8  ;;  %v767_v16 = vadd.f32 %v766_v10, %v704_v9  ;;  %v708_v27 = vmul.f32 %v2105_v12, %v2105_v12  ;;  %v2167_v9 = vpop.f32.mrf.mxu1 }
  0xf8   :  { %v2112_v17 = vpop.f32.mrf.mxu0 }
  0xf9   :  { %v768_v18 = vadd.f32 %v767_v16, %v705_v15  ;;  %v635_v19 = vadd.f32 %v634_v14, %v2112_v17  ;;  %v706_v20 = vmul.f32 %v2112_v17, %v2112_v17 }
  0xfa   :  { %v2117_v21 = vpop.f32.mrf.mxu0 }
  0xfb   :  { %v636_v24 = vadd.f32 %v2093_v3, %v635_v19  ;;  %v769_v25 = vadd.f32 %v768_v18, %v706_v20  ;;  %v711_v47 = vmul.f32 %v2117_v21, %v2117_v21 }
  0xfc   :  { %v2124_v26 = vpop.f32.mrf.mxu0 }
  0xfd   :  { %v770_v28 = vadd.f32 %v769_v25, %v707_v23  ;;  %v637_v29 = vadd.f32 %v2105_v12, %v636_v24  ;;  %v709_v33 = vmul.f32 %v2124_v26, %v2124_v26  ;;  %v2179_v23 = vpop.f32.mrf.mxu1 }
  0xfe   :  { %v2129_v30 = vpop.f32.mrf.mxu0  ;;  %3116 = vst [vmem:[#allocation7_spill] sm:$0xff] %v2179_v23 }
  0xff   :  { %v638_v32 = vadd.f32 %v637_v29, %v2124_v26  ;;  %v771_v34 = vadd.f32 %v770_v28, %v708_v27  ;;  %v712_v53 = vmul.f32 %v2129_v30, %v2129_v30 }
 0x100   :  { %v2136_v35 = vpop.f32.mrf.mxu0 }
 0x101   :  { %v772_v36 = vadd.f32 %v771_v34, %v709_v33  ;;  %v639_v37 = vadd.f32 %v638_v32, %v2136_v35  ;;  %v710_v38 = vmul.f32 %v2136_v35, %v2136_v35 }
 0x102   :  { %v2141_v39 = vpop.f32.mrf.mxu0 }
 0x103   :  { %v640_v48 = vadd.f32 %v2117_v21, %v639_v37  ;;  %v773_v51 = vadd.f32 %v772_v36, %v710_v38  ;;  %v715_v10 = vmul.f32 %v2141_v39, %v2141_v39  ;;  %v2191_v36 = vpop.f32.mrf.mxu1 }
 0x104   :  { %v2148_v52 = vpop.f32.mrf.mxu0 }
 0x105   :  { %v774_v55 = vadd.f32 %v773_v51, %v711_v47  ;;  %v641_v56 = vadd.f32 %v2129_v30, %v640_v48  ;;  %v713_v62 = vmul.f32 %v2148_v52, %v2148_v52 }
 0x106   :  { %v2153_v57 = vpop.f32.mrf.mxu0 }
 0x107   :  { %v642_v61 = vadd.f32 %v641_v56, %v2148_v52  ;;  %v775_v0 = vadd.f32 %v774_v55, %v712_v53  ;;  %v716_v16 = vmul.f32 %v2153_v57, %v2153_v57 }
 0x108   :  { %v2160_v1 = vpop.f32.mrf.mxu0 }
 0x109   :  { %v776_v2 = vadd.f32 %v775_v0, %v713_v62  ;;  %v643_v5 = vadd.f32 %v642_v61, %v2160_v1  ;;  %v714_v6 = vmul.f32 %v2160_v1, %v2160_v1  ;;  %v2203_v61 = vpop.f32.mrf.mxu1 }
 0x10a   :  { %v2165_v7 = vpop.f32.mrf.mxu0  ;;  %3117 = vst [vmem:[#allocation8_spill] sm:$0xff] %v2203_v61 }
 0x10b   :  { %v644_v11 = vadd.f32 %v2141_v39, %v643_v5  ;;  %v777_v14 = vadd.f32 %v776_v2, %v714_v6  ;;  %v719_v37 = vmul.f32 %v2165_v7, %v2165_v7 }
 0x10c   :  { %v2172_v15 = vpop.f32.mrf.mxu0 }
 0x10d   :  { %v778_v18 = vadd.f32 %v777_v14, %v715_v10  ;;  %v645_v19 = vadd.f32 %v2153_v57, %v644_v11  ;;  %v717_v25 = vmul.f32 %v2172_v15, %v2172_v15 }
 0x10e   :  { %v2177_v20 = vpop.f32.mrf.mxu0 }
 0x10f   :  { %v646_v24 = vadd.f32 %v645_v19, %v2172_v15  ;;  %v779_v27 = vadd.f32 %v778_v18, %v716_v16  ;;  %v720_v51 = vmul.f32 %v2177_v20, %v2177_v20  ;;  %v2215_v16 = vpop.f32.mrf.mxu1 }
 0x110   :  { %v2184_v28 = vpop.f32.mrf.mxu0  ;;  %3118 = vst [vmem:[#allocation9_spill] sm:$0xff] %v2215_v16 }
 0x111   :  { %v780_v29 = vadd.f32 %v779_v27, %v717_v25  ;;  %v647_v32 = vadd.f32 %v646_v24, %v2184_v28  ;;  %v718_v33 = vmul.f32 %v2184_v28, %v2184_v28 }
 0x112   :  { %v2189_v34 = vpop.f32.mrf.mxu0 }
 0x113   :  { %v648_v38 = vadd.f32 %v2165_v7, %v647_v32  ;;  %v781_v47 = vadd.f32 %v780_v29, %v718_v33  ;;  %v723_v18 = vmul.f32 %v2189_v34, %v2189_v34 }
 0x114   :  { %v2196_v48 = vpop.f32.mrf.mxu0 }
 0x115   :  { %v782_v53 = vadd.f32 %v781_v47, %v719_v37  ;;  %v649_v55 = vadd.f32 %v2177_v20, %v648_v38  ;;  %v721_v0 = vmul.f32 %v2196_v48, %v2196_v48  ;;  %v2227_v37 = vpop.f32.mrf.mxu1 }
 0x116   :  { %v2201_v56 = vpop.f32.mrf.mxu0  ;;  %3119 = vst [vmem:[#allocation10_spill] sm:$0xff] %v2227_v37 }
 0x117   :  { %v650_v62 = vadd.f32 %v649_v55, %v2196_v48  ;;  %v783_v2 = vadd.f32 %v782_v53, %v720_v51  ;;  %v724_v27 = vmul.f32 %v2201_v56, %v2201_v56 }
 0x118   :  { %v2208_v5 = vpop.f32.mrf.mxu0 }
 0x119   :  { %v784_v6 = vadd.f32 %v783_v2, %v721_v0  ;;  %v651_v10 = vadd.f32 %v650_v62, %v2208_v5  ;;  %v722_v11 = vmul.f32 %v2208_v5, %v2208_v5  ;;  %v2237_v2 = vpop.f32.mrf.mxu1 }
 0x11a   :  { %v2213_v14 = vpop.f32.mrf.mxu0  ;;  %3120 = vst [vmem:[#allocation11_spill] sm:$0xff] %v2237_v2 }
 0x11b   :  { %v652_v19 = vadd.f32 %v2189_v34, %v651_v10  ;;  %v785_v24 = vadd.f32 %v784_v6, %v722_v11  ;;  %v727_v6 = vmul.f32 %v2213_v14, %v2213_v14 }
 0x11c   :  { %v2220_v25 = vpop.f32.mrf.mxu0 }
 0x11d   :  { %v786_v29 = vadd.f32 %v785_v24, %v723_v18  ;;  %v653_v32 = vadd.f32 %v2201_v56, %v652_v19  ;;  %v725_v47 = vmul.f32 %v2220_v25, %v2220_v25 }
 0x11e   :  { %v2225_v33 = vpop.f32.mrf.mxu0 }
 0x11f   :  { %v654_v38 = vadd.f32 %v653_v32, %v2220_v25  ;;  %v787_v51 = vadd.f32 %v786_v29, %v724_v27  ;;  %v728_v18 = vmul.f32 %v2225_v33, %v2225_v33  ;;  %v2245_v27 = vpop.f32.mrf.mxu1  ;;  %v729_v29 = vmul.f32 %v2059_v44, %v2059_v44 }
 0x120   :  { %v2232_v53 = vpop.f32.mrf.mxu0  ;;  %3121 = vst [vmem:[#allocation12_spill] sm:$0xff] %v2245_v27 }
 0x121   :  { %v788_v55 = vadd.f32 %v787_v51, %v725_v47  ;;  %v655_v62 = vadd.f32 %v654_v38, %v2232_v53  ;;  %v726_v0 = vmul.f32 %v2232_v53, %v2232_v53  ;;  %v730_v51 = vmul.f32 %v2083_v59, %v2083_v59 }
 0x123   :  { %v656_v10 = vadd.f32 %v2213_v14, %v655_v62  ;;  %v789_v11 = vadd.f32 %v788_v55, %v726_v0  ;;  %v2253_v62 = vpop.f32.mrf.mxu1  ;;  %v731_v0 = vmul.f32 %v2053_v41, %v2053_v41 }
 0x124   :  { %3122 = vst [vmem:[#allocation13_spill] sm:$0xff] %v2253_v62 }
 0x125   :  { %v657_v19 = vadd.f32 %v2225_v33, %v656_v10  ;;  %v790_v24 = vadd.f32 %v789_v11, %v727_v6  ;;  %v732_v11 = vmul.f32 %v2071_v50, %v2071_v50 }
 0x127   :  { %v791_v32 = vadd.f32 %v790_v24, %v728_v18  ;;  %v658_v38 = vadd.f32 %v657_v19, %v2059_v44  ;;  %v2261_v24 = vpop.f32.mrf.mxu1 }
 0x128   :  { %3123 = vst [vmem:[#allocation14_spill] sm:$0xff] %v2261_v24 }
 0x129   :  { %v659_v47 = vadd.f32 %v658_v38, %v2083_v59  ;;  %v792_v55 = vadd.f32 %v791_v32, %v729_v29  ;;  %v733_v29 = vmul.f32 %v2107_v13, %v2107_v13 }
 0x12b   :  { %v660_v6 = vadd.f32 %v2053_v41, %v659_v47  ;;  %v793_v10 = vadd.f32 %v792_v55, %v730_v51  ;;  %v734_v47 = vmul.f32 %v2131_v31, %v2131_v31  ;;  %v2269_v51 = vpop.f32.mrf.mxu1  ;;  %v735_v55 = vmul.f32 %v2095_v4, %v2095_v4 }
 0x12c   :  { %3124 = vst [vmem:[#allocation15_spill] sm:$0xff] %v2269_v51 }
 0x12d   :  { %v794_v18 = vadd.f32 %v793_v10, %v731_v0  ;;  %v661_v19 = vadd.f32 %v2071_v50, %v660_v6  ;;  %v736_v10 = vmul.f32 %v2119_v22, %v2119_v22 }
 0x12f   :  { %v662_v38 = vadd.f32 %v661_v19, %v2107_v13  ;;  %v795_v32 = vadd.f32 %v794_v18, %v732_v11  ;;  %v2277_v18 = vpop.f32.mrf.mxu1 }
 0x130   :  { %3125 = vst [vmem:[#allocation16_spill] sm:$0xff] %v2277_v18 }
 0x131   :  { %v796_v59 = vadd.f32 %v795_v32, %v733_v29  ;;  %v663_v44 = vadd.f32 %v662_v38, %v2131_v31  ;;  %v737_v29 = vmul.f32 %v2155_v60, %v2155_v60 }
 0x133   :  { %v664_v0 = vadd.f32 %v2095_v4, %v663_v44  ;;  %v797_v6 = vadd.f32 %v796_v59, %v734_v47  ;;  %v738_v44 = vmul.f32 %v2179_v23, %v2179_v23  ;;  %v2285_v59 = vpop.f32.mrf.mxu1  ;;  %v739_v47 = vmul.f32 %v2143_v46, %v2143_v46 }
 0x134   :  { %3126 = vst [vmem:[#allocation17_spill] sm:$0xff] %v2285_v59 }
 0x135   :  { %v798_v19 = vadd.f32 %v797_v6, %v735_v55  ;;  %v665_v11 = vadd.f32 %v2119_v22, %v664_v0  ;;  %v740_v6 = vmul.f32 %v2167_v9, %v2167_v9 }
 0x137   :  { %v666_v38 = vadd.f32 %v665_v11, %v2155_v60  ;;  %v799_v32 = vadd.f32 %v798_v19, %v736_v10  ;;  %v2293_v19 = vpop.f32.mrf.mxu1 }
 0x138   :  { %3127 = vst [vmem:[#allocation18_spill] sm:$0xff] %v2293_v19 }
 0x139   :  { %v800_v31 = vadd.f32 %v799_v32, %v737_v29  ;;  %v667_v13 = vadd.f32 %v666_v38, %v2179_v23  ;;  %v741_v29 = vmul.f32 %v2203_v61, %v2203_v61 }
 0x13b   :  { %v668_v55 = vadd.f32 %v2143_v46, %v667_v13  ;;  %v801_v0 = vadd.f32 %v800_v31, %v738_v44  ;;  %v742_v13 = vmul.f32 %v2227_v37, %v2227_v37  ;;  %v2301_v31 = vpop.f32.mrf.mxu1  ;;  %v743_v44 = vmul.f32 %v2191_v36, %v2191_v36 }
 0x13c   :  { %3128 = vst [vmem:[#allocation19_spill] sm:$0xff] %v2301_v31 }
 0x13d   :  { %v802_v11 = vadd.f32 %v801_v0, %v739_v47  ;;  %v669_v10 = vadd.f32 %v2167_v9, %v668_v55  ;;  %v744_v0 = vmul.f32 %v2215_v16, %v2215_v16 }
 0x13f   :  { %v670_v38 = vadd.f32 %v669_v10, %v2203_v61  ;;  %v803_v32 = vadd.f32 %v802_v11, %v740_v6  ;;  %v2309_v11 = vpop.f32.mrf.mxu1 }
 0x140   :  { %3129 = vst [vmem:[#allocation20_spill] sm:$0xff] %v2309_v11 }
 0x141   :  { %v804_v23 = vadd.f32 %v803_v32, %v741_v29  ;;  %v671_v60 = vadd.f32 %v670_v38, %v2227_v37  ;;  %v745_v29 = vmul.f32 %v2245_v27, %v2245_v27 }
 0x143   :  { %v672_v47 = vadd.f32 %v2191_v36, %v671_v60  ;;  %v805_v55 = vadd.f32 %v804_v23, %v742_v13  ;;  %v746_v60 = vmul.f32 %v2261_v24, %v2261_v24  ;;  %v2317_v23 = vpop.f32.mrf.mxu1  ;;  %v747_v13 = vmul.f32 %v2237_v2, %v2237_v2 }
 0x144   :  { %3130 = vst [vmem:[#allocation21_spill] sm:$0xff] %v2317_v23 }
 0x145   :  { %v806_v10 = vadd.f32 %v805_v55, %v743_v44  ;;  %v673_v6 = vadd.f32 %v2215_v16, %v672_v47  ;;  %v748_v55 = vmul.f32 %v2253_v62, %v2253_v62 }
 0x147   :  { %v674_v38 = vadd.f32 %v673_v6, %v2245_v27  ;;  %v807_v32 = vadd.f32 %v806_v10, %v744_v0  ;;  %v2325_v10 = vpop.f32.mrf.mxu1 }
 0x148   :  { %3131 = vst [vmem:[#allocation22_spill] sm:$0xff] %v2325_v10 }
 0x149   :  { %v808_v37 = vadd.f32 %v807_v32, %v745_v29  ;;  %v675_v61 = vadd.f32 %v674_v38, %v2261_v24  ;;  %v749_v29 = vmul.f32 %v2277_v18, %v2277_v18 }
 0x14b   :  { %v676_v44 = vadd.f32 %v2237_v2, %v675_v61  ;;  %v809_v47 = vadd.f32 %v808_v37, %v746_v60  ;;  %v750_v61 = vmul.f32 %v2293_v19, %v2293_v19  ;;  %v2333_v37 = vpop.f32.mrf.mxu1  ;;  %v751_v60 = vmul.f32 %v2269_v51, %v2269_v51 }
 0x14c   :  { %3132 = vst [vmem:[#allocation23_spill] sm:$0xff] %v2333_v37 }
 0x14d   :  { %v810_v6 = vadd.f32 %v809_v47, %v747_v13  ;;  %v677_v0 = vadd.f32 %v2253_v62, %v676_v44  ;;  %v752_v47 = vmul.f32 %v2285_v59, %v2285_v59 }
 0x14f   :  { %v678_v38 = vadd.f32 %v677_v0, %v2277_v18  ;;  %v811_v32 = vadd.f32 %v810_v6, %v748_v55  ;;  %v2341_v6 = vpop.f32.mrf.mxu1 }
 0x150   :  { %3133 = vst [vmem:[#allocation24_spill] sm:$0xff] %v2341_v6 }
 0x151   :  { %v812_v24 = vadd.f32 %v811_v32, %v749_v29  ;;  %v679_v27 = vadd.f32 %v678_v38, %v2293_v19  ;;  %v753_v29 = vmul.f32 %v2309_v11, %v2309_v11 }
 0x153   :  { %v680_v13 = vadd.f32 %v2269_v51, %v679_v27  ;;  %v813_v44 = vadd.f32 %v812_v24, %v750_v61  ;;  %v754_v27 = vmul.f32 %v2325_v10, %v2325_v10  ;;  %v2349_v24 = vpop.f32.mrf.mxu1  ;;  %v755_v61 = vmul.f32 %v2301_v31, %v2301_v31 }
 0x155   :  { %v814_v0 = vadd.f32 %v813_v44, %v751_v60  ;;  %v681_v55 = vadd.f32 %v2285_v59, %v680_v13  ;;  %v756_v44 = vmul.f32 %v2317_v23, %v2317_v23 }
 0x157   :  { %v682_v38 = vadd.f32 %v681_v55, %v2309_v11  ;;  %v815_v32 = vadd.f32 %v814_v0, %v752_v47  ;;  %v2357_v0 = vpop.f32.mrf.mxu1 }
 0x158   :  { %3134 = vst [vmem:[#allocation25_spill] sm:$0xff] %v2357_v0 }
 0x159   :  { %v816_v19 = vadd.f32 %v815_v32, %v753_v29  ;;  %v683_v18 = vadd.f32 %v682_v38, %v2325_v10  ;;  %v757_v29 = vmul.f32 %v2341_v6, %v2341_v6 }
 0x15b   :  { %v684_v60 = vadd.f32 %v2301_v31, %v683_v18  ;;  %v817_v13 = vadd.f32 %v816_v19, %v754_v27  ;;  %v758_v18 = vmul.f32 %v2357_v0, %v2357_v0  ;;  %v759_v19 = vmul.f32 %v2333_v37, %v2333_v37 }
 0x15d   :  { %v818_v55 = vadd.f32 %v817_v13, %v755_v61  ;;  %v685_v47 = vadd.f32 %v2317_v23, %v684_v60  ;;  %v760_v60 = vmul.f32 %v2349_v24, %v2349_v24 }
 0x15f   :  { %v686_v38 = vadd.f32 %v685_v47, %v2341_v6  ;;  %v819_v32 = vadd.f32 %v818_v55, %v756_v44 }
 0x161   :  { %v820_v10 = vadd.f32 %v819_v32, %v757_v29  ;;  %v687_v11 = vadd.f32 %v686_v38, %v2357_v0 }
 0x163   :  { %v688_v27 = vadd.f32 %v2333_v37, %v687_v11  ;;  %v821_v61 = vadd.f32 %v820_v10, %v758_v18 }
 0x165   :  { %v689_v13 = vadd.f32 %v2349_v24, %v688_v27  ;;  %v822_v47 = vadd.f32 %v821_v61, %v759_v19  ;;  %v842_v19 = vlaneseq }
 0x167   :  { %v690_v6 = vrot.slane %v689_v13, 4  ;;  %v823_v44 = vadd.f32 %v822_v47, %v760_v60  ;;  %v2371_v61 = vshrl.u32 %v842_v19, 7 }
 0x169   :  { %v691_v55 = vadd.f32 %v690_v6, %v689_v13  ;;  %v824_v29 = vrot.slane %v823_v44, 4  ;;  %v834_v6 = vld [vmem:[%s3078_s2] sm:$0x1]  ;;  %v3105_v60 = vsub.s32 0, %v2371_v61 }
 0x16b   :  { %v692_v38 = vrot.slane %v691_v55, 2  ;;  %v825_v32 = vadd.f32 %v824_v29, %v823_v44  ;;  %v3135_v44 = vld [vmem:[#allocation2_spill] sm:$0xff]  ;;  %v3137_v29 = vld [vmem:[#allocation4_spill] sm:$0xff] }
 0x16d   :  { %v693_v23 = vadd.f32 %v692_v38, %v691_v55  ;;  %v826_v0 = vrot.slane %v825_v32, 2  ;;  %v3136_v55 = vld [vmem:[#allocation3_spill] sm:$0xff]  ;;  %v3138_v38 = vld [vmem:[#allocation5_spill] sm:$0xff] }
 0x16f   :  { %v694_v31 = vrot.slane %v693_v23, 1  ;;  %v827_v59 = vadd.f32 %v826_v0, %v825_v32 }
 0x171   :  { %v695_v51 = vadd.f32 %v694_v31, %v693_v23  ;;  %v828_v62 = vrot.slane %v827_v59, 1 }
 0x173   :  { %v696_v11 = vmul.f32 0.001953125, %v695_v51  ;;  %v829_v10 = vadd.f32 %v828_v62, %v827_v59  ;;  %v2380_v62 = vld [vmem:[%s3079_s3] sm:$0x1] }
 0x175   :  { %v830_v18 = vmul.f32 0.001953125, %v829_v10  ;;  %v831_v37 = vmul.f32 %v696_v11, %v696_v11  ;;  %v3139_v10 = vld [vmem:[#allocation6_spill] sm:$0xff] }
 0x177   :  { %v832_v2 = vsub.f32 %v830_v18, %v831_v37  ;;  %v3140_v18 = vld [vmem:[#allocation7_spill] sm:$0xff] }
 0x179   :  { %v833_v16 = vmax.f32 %v832_v2, 0.0 }
 0x17b   :  { %v835_v27 = vadd.f32 1e-05, %v833_v16 }
 0x17d   :  { %1904 = vrsqrt.f32 %v835_v27 }
 0x18a   :  { %v1905_v0 = vpop.eup %1904 }
 0x18b   :  { %v837_v31 = vmul.f32 %v1905_v0, %v834_v6  ;;  %v3141_v6 = vld [vmem:[#allocation8_spill] sm:$0xff]  ;;  %v3142_v0 = vld [vmem:[#allocation10_spill] sm:$0xff] }
 0x18d   :  { %v2382_v51 = vmul.f32 %v837_v31, %v696_v11  ;;  %v2386_v16 = vrot.slane %v837_v31, %v3105_v60  ;;  %v3155_v60 = vld [vmem:[#allocation15_spill] sm:$0xff] }
 0x18f   :  { %v840_v2 = vsub.f32 %v2380_v62, %v2382_v51  ;;  %v2392_v59 = vmul.f32 %v2386_v16, %v2055_v42  ;;  %v2396_v23 = vmul.f32 %v2386_v16, %v2061_v45  ;;  %v2400_v37 = vmul.f32 %v2051_v40, %v2386_v16  ;;  %v3143_v51 = vld [vmem:[#allocation9_spill] sm:$0xff] }
 0x190   :  { %v2404_v13 = vmul.f32 %v2057_v43, %v2386_v16  ;;  %v2408_v47 = vmul.f32 %v2386_v16, %v2076_v54  ;;  %v2412_v42 = vmul.f32 %v2386_v16, %v2088_v63  ;;  %v2416_v45 = vmul.f32 %v2069_v49, %v2386_v16 }
 0x191   :  { %v2420_v40 = vmul.f32 %v2081_v58, %v2386_v16  ;;  %v2424_v43 = vmul.f32 %v2386_v16, %v2100_v8  ;;  %v2428_v54 = vmul.f32 %v2386_v16, %v2112_v17  ;;  %v2432_v63 = vmul.f32 %v2093_v3, %v2386_v16 }
 0x192   :  { %v2436_v49 = vmul.f32 %v2105_v12, %v2386_v16  ;;  %v2440_v58 = vmul.f32 %v2386_v16, %v2124_v26  ;;  %v2444_v8 = vmul.f32 %v2386_v16, %v2136_v35  ;;  %v2448_v17 = vmul.f32 %v2117_v21, %v2386_v16 }
 0x193   :  { %v2452_v3 = vmul.f32 %v2129_v30, %v2386_v16  ;;  %v2456_v12 = vmul.f32 %v2386_v16, %v2148_v52  ;;  %v2460_v26 = vmul.f32 %v2386_v16, %v2160_v1  ;;  %v2464_v35 = vmul.f32 %v2141_v39, %v2386_v16 }
 0x194   :  { %v2468_v21 = vmul.f32 %v2153_v57, %v2386_v16  ;;  %v2472_v30 = vmul.f32 %v2386_v16, %v2172_v15  ;;  %v2476_v52 = vmul.f32 %v2386_v16, %v2184_v28  ;;  %v2480_v1 = vmul.f32 %v2165_v7, %v2386_v16 }
 0x195   :  { %v2484_v39 = vmul.f32 %v2177_v20, %v2386_v16  ;;  %v2488_v57 = vmul.f32 %v2386_v16, %v2196_v48  ;;  %v2492_v15 = vmul.f32 %v2386_v16, %v2208_v5  ;;  %v2496_v28 = vmul.f32 %v2189_v34, %v2386_v16 }
 0x196   :  { %v2500_v7 = vmul.f32 %v2201_v56, %v2386_v16  ;;  %v2504_v20 = vmul.f32 %v2386_v16, %v2220_v25  ;;  %v2508_v48 = vmul.f32 %v2386_v16, %v2232_v53  ;;  %v2512_v5 = vmul.f32 %v2213_v14, %v2386_v16 }
 0x197   :  { %v2516_v34 = vmul.f32 %v2225_v33, %v2386_v16  ;;  %v2520_v56 = vmul.f32 %v2386_v16, %v3135_v44  ;;  %v2524_v25 = vmul.f32 %v2386_v16, %v3136_v55  ;;  %v2528_v53 = vmul.f32 %v2053_v41, %v2386_v16  ;;  %v3144_v44 = vld [vmem:[#allocation12_spill] sm:$0xff]  ;;  %v3145_v55 = vld [vmem:[#allocation14_spill] sm:$0xff] }
 0x198   :  { %v2532_v14 = vmul.f32 %v2071_v50, %v2386_v16  ;;  %v2536_v33 = vmul.f32 %v2386_v16, %v3137_v29  ;;  %v2540_v32 = vmul.f32 %v2386_v16, %v3138_v38  ;;  %v2544_v11 = vmul.f32 %v2095_v4, %v2386_v16  ;;  %v3147_v38 = vld [vmem:[#allocation11_spill] sm:$0xff] }
 0x199   :  { %v2548_v41 = vmul.f32 %v2119_v22, %v2386_v16  ;;  %v2552_v50 = vmul.f32 %v2386_v16, %v3139_v10  ;;  %v2556_v27 = vmul.f32 %v2386_v16, %v3140_v18  ;;  %v2560_v19 = vmul.f32 %v2143_v46, %v2386_v16  ;;  %v3149_v18 = vld [vmem:[#allocation13_spill] sm:$0xff] }
 0x19a   :  { %v2564_v4 = vmul.f32 %v2167_v9, %v2386_v16  ;;  %v2568_v22 = vmul.f32 %v2386_v16, %v3141_v6  ;;  %v2572_v31 = vmul.f32 %v2386_v16, %v3142_v0  ;;  %v2576_v62 = vmul.f32 %v2191_v36, %v2386_v16  ;;  %v3151_v6 = vld [vmem:[#allocation16_spill] sm:$0xff] }
 0x19b   :  { %v2580_v46 = vmul.f32 %v3143_v51, %v2386_v16  ;;  %v2584_v9 = vmul.f32 %v2386_v16, %v3144_v44  ;;  %v2588_v29 = vmul.f32 %v2386_v16, %v3145_v55  ;;  %v2592_v10 = vmul.f32 %v3147_v38, %v2386_v16  ;;  %v3153_v51 = vld [vmem:[#allocation18_spill] sm:$0xff] }
 0x19c   :  { %v2596_v36 = vmul.f32 %v3149_v18, %v2386_v16  ;;  %v2600_v0 = vmul.f32 %v2386_v16, %v3151_v6  ;;  %v2604_v44 = vmul.f32 %v2386_v16, %v3153_v51  ;;  %v2608_v55 = vmul.f32 %v3155_v60, %v2386_v16 }
 0x19d   :  { %3146 = vst [vmem:[#allocation2_spill] sm:$0xff] %v2588_v29  ;;  %3148 = vst [vmem:[#allocation3_spill] sm:$0xff] %v2592_v10  ;;  %v3157_v29 = vld [vmem:[#allocation17_spill] sm:$0xff]  ;;  %v3159_v10 = vld [vmem:[#allocation20_spill] sm:$0xff] }
 0x19e   :  { %3150 = vst [vmem:[#allocation4_spill] sm:$0xff] %v2596_v36  ;;  %3152 = vst [vmem:[#allocation5_spill] sm:$0xff] %v2600_v0  ;;  %v2612_v38 = vmul.f32 %v3157_v29, %v2386_v16  ;;  %v2616_v18 = vmul.f32 %v2386_v16, %v3159_v10  ;;  %v3161_v36 = vld [vmem:[#allocation22_spill] sm:$0xff]  ;;  %v3163_v0 = vld [vmem:[#allocation19_spill] sm:$0xff] }
 0x19f   :  { %3154 = vst [vmem:[#allocation6_spill] sm:$0xff] %v2604_v44  ;;  %3156 = vst [vmem:[#allocation7_spill] sm:$0xff] %v2608_v55  ;;  %v2620_v6 = vmul.f32 %v2386_v16, %v3161_v36  ;;  %v2624_v51 = vmul.f32 %v3163_v0, %v2386_v16  ;;  %v3164_v44 = vld [vmem:[#allocation21_spill] sm:$0xff]  ;;  %v3165_v55 = vsub.s32 0, %v2371_v61 }
 0x1a0   :  { %3158 = vst [vmem:[#allocation8_spill] sm:$0xff] %v2612_v38  ;;  %3160 = vst [vmem:[#allocation10_spill] sm:$0xff] %v2616_v18  ;;  %v2628_v60 = vmul.f32 %v3164_v44, %v2386_v16  ;;  %v3166_v38 = vld [vmem:[#allocation24_spill] sm:$0xff]  ;;  %v3167_v18 = vld [vmem:[#allocation25_spill] sm:$0xff]  ;;  %v2648_v44 = vmul.f32 %v2349_v24, %v2386_v16 }
 0x1a1   :  { %3162 = vst [vmem:[#allocation9_spill] sm:$0xff] %v2620_v6  ;;  %v2632_v29 = vrot.slane %v840_v2, %v3165_v55  ;;  %v2636_v10 = vmul.f32 %v2386_v16, %v3166_v38  ;;  %v2640_v36 = vmul.f32 %v2386_v16, %v3167_v18  ;;  %v3168_v6 = vld [vmem:[#allocation23_spill] sm:$0xff] }
 0x1a2   :  { %v2644_v0 = vmul.f32 %v3168_v6, %v2386_v16 }
 0x1a3   :  { %v2652_v61 = vadd.f32 %v2632_v29, %v2392_v59  ;;  %v2656_v2 = vadd.f32 %v2632_v29, %v2396_v23  ;;  %v2660_v55 = vadd.f32 %v2632_v29, %v2400_v37  ;;  %v2664_v38 = vadd.f32 %v2632_v29, %v2404_v13 }
 0x1a4   :  { %v2668_v24 = vadd.f32 %v2632_v29, %v2408_v47  ;;  %v2672_v16 = vadd.f32 %v2632_v29, %v2412_v42  ;;  %v2676_v59 = vadd.f32 %v2632_v29, %v2416_v45  ;;  %v2680_v23 = vadd.f32 %v2632_v29, %v2420_v40  ;;  %v3179_v18 = vld [vmem:[#allocation3_spill] sm:$0xff] }
 0x1a5   :  { %3169 = vst [vmem:[#allocation12_spill] sm:$0xff] %v2652_v61  ;;  %3170 = vst [vmem:[#allocation14_spill] sm:$0xff] %v2656_v2  ;;  %v2684_v37 = vadd.f32 %v2632_v29, %v2424_v43  ;;  %v2688_v13 = vadd.f32 %v2632_v29, %v2428_v54  ;;  %v2692_v47 = vadd.f32 %v2632_v29, %v2432_v63  ;;  %v3181_v6 = vld [vmem:[#allocation4_spill] sm:$0xff] }
 0x1a6   :  { %3171 = vst [vmem:[#allocation11_spill] sm:$0xff] %v2660_v55  ;;  %3172 = vst [vmem:[#allocation13_spill] sm:$0xff] %v2664_v38  ;;  %v2696_v42 = vadd.f32 %v2632_v29, %v2436_v49  ;;  %v2700_v45 = vadd.f32 %v2632_v29, %v2440_v58  ;;  %v2704_v40 = vadd.f32 %v2632_v29, %v2444_v8 }
 0x1a7   :  { %3173 = vst [vmem:[#allocation16_spill] sm:$0xff] %v2668_v24  ;;  %v2708_v43 = vadd.f32 %v2632_v29, %v2448_v17  ;;  %v2712_v54 = vadd.f32 %v2632_v29, %v2452_v3  ;;  %v2716_v63 = vadd.f32 %v2632_v29, %v2456_v12  ;;  %v2720_v49 = vadd.f32 %v2632_v29, %v2460_v26 }
 0x1a8   :  { %v2724_v58 = vadd.f32 %v2632_v29, %v2464_v35  ;;  %v2728_v8 = vadd.f32 %v2632_v29, %v2468_v21  ;;  %v2732_v17 = vadd.f32 %v2632_v29, %v2472_v30  ;;  %v2736_v3 = vadd.f32 %v2632_v29, %v2476_v52 }
 0x1a9   :  { %v2740_v12 = vadd.f32 %v2632_v29, %v2480_v1  ;;  %v2744_v26 = vadd.f32 %v2632_v29, %v2484_v39  ;;  %v2748_v35 = vadd.f32 %v2632_v29, %v2488_v57  ;;  %v2752_v21 = vadd.f32 %v2632_v29, %v2492_v15 }
 0x1aa   :  { %v2756_v30 = vadd.f32 %v2632_v29, %v2496_v28  ;;  %v2760_v52 = vadd.f32 %v2632_v29, %v2500_v7  ;;  %v2764_v1 = vadd.f32 %v2632_v29, %v2504_v20  ;;  %v2768_v39 = vadd.f32 %v2632_v29, %v2508_v48 }
 0x1ab   :  { %v2772_v57 = vadd.f32 %v2632_v29, %v2512_v5  ;;  %v2776_v15 = vadd.f32 %v2632_v29, %v2516_v34  ;;  %v2780_v28 = vadd.f32 %v2632_v29, %v2520_v56  ;;  %v2784_v7 = vadd.f32 %v2632_v29, %v2524_v25 }
 0x1ac   :  { %v2788_v20 = vadd.f32 %v2632_v29, %v2528_v53  ;;  %v2792_v48 = vadd.f32 %v2632_v29, %v2532_v14  ;;  %v2796_v5 = vadd.f32 %v2632_v29, %v2536_v33  ;;  %v2800_v34 = vadd.f32 %v2632_v29, %v2540_v32 }
 0x1ad   :  { %v2804_v56 = vadd.f32 %v2632_v29, %v2544_v11  ;;  %v2808_v25 = vadd.f32 %v2632_v29, %v2548_v41  ;;  %v2812_v53 = vadd.f32 %v2632_v29, %v2552_v50  ;;  %v2816_v14 = vadd.f32 %v2632_v29, %v2556_v27 }
 0x1ae   :  { %v2820_v33 = vadd.f32 %v2632_v29, %v2560_v19  ;;  %v2824_v32 = vadd.f32 %v2632_v29, %v2564_v4  ;;  %v2828_v11 = vadd.f32 %v2632_v29, %v2568_v22  ;;  %v2832_v41 = vadd.f32 %v2632_v29, %v2572_v31  ;;  %v3177_v4 = vld [vmem:[#allocation2_spill] sm:$0xff] }
 0x1af   :  { %v2836_v50 = vadd.f32 %v2632_v29, %v2576_v62  ;;  %v2840_v27 = vadd.f32 %v2632_v29, %v2580_v46  ;;  %v2844_v19 = vadd.f32 %v2632_v29, %v2584_v9  ;;  %v2848_v22 = vadd.f32 %v2632_v29, %v3177_v4 }
 0x1b0   :  { %v2852_v31 = vadd.f32 %v2632_v29, %v3179_v18  ;;  %v2856_v62 = vadd.f32 %v2632_v29, %v3181_v6 }
 0x1b1   :  { %3174 = vst [vmem:[#allocation18_spill] sm:$0xff] %v2836_v50  ;;  %3175 = vst [vmem:[#allocation15_spill] sm:$0xff] %v2840_v27  ;;  %v3183_v50 = vld [vmem:[#allocation5_spill] sm:$0xff]  ;;  %v3184_v27 = vld [vmem:[#allocation6_spill] sm:$0xff] }
 0x1b2   :  { %3176 = vst [vmem:[#allocation17_spill] sm:$0xff] %v2844_v19  ;;  %3178 = vst [vmem:[#allocation20_spill] sm:$0xff] %v2848_v22  ;;  %v2860_v46 = vadd.f32 %v2632_v29, %v3183_v50  ;;  %v2864_v9 = vadd.f32 %v2632_v29, %v3184_v27  ;;  %v3185_v19 = vld [vmem:[#allocation7_spill] sm:$0xff]  ;;  %v3186_v22 = vld [vmem:[#allocation8_spill] sm:$0xff]  ;;  %v2884_v27 = vadd.f32 %v2632_v29, %v2624_v51 }
 0x1b3   :  { %3180 = vst [vmem:[#allocation22_spill] sm:$0xff] %v2852_v31  ;;  %3182 = vst [vmem:[#allocation19_spill] sm:$0xff] %v2856_v62  ;;  %v2868_v4 = vadd.f32 %v2632_v29, %v3185_v19  ;;  %v2872_v18 = vadd.f32 %v2632_v29, %v3186_v22  ;;  %v3187_v31 = vld [vmem:[#allocation10_spill] sm:$0xff]  ;;  %v3188_v62 = vld [vmem:[#allocation9_spill] sm:$0xff]  ;;  %v2888_v19 = vadd.f32 %v2632_v29, %v2628_v60  ;;  %v992_v60 = vmax.f32 %v2696_v42, 0.0 }
 0x1b4   :  { %v2876_v6 = vadd.f32 %v2632_v29, %v3187_v31  ;;  %v2880_v50 = vadd.f32 %v2632_v29, %v3188_v62  ;;  %3189 = vst [vmem:[#allocation21_spill] sm:$0xff] %v2884_v27  ;;  %v2892_v22 = vadd.f32 %v2632_v29, %v2636_v10  ;;  %v2896_v31 = vadd.f32 %v2632_v29, %v2640_v36 }
 0x1b5   :  { %3190 = vst [vmem:[#allocation24_spill] sm:$0xff] %v2888_v19  ;;  %v2900_v62 = vadd.f32 %v2632_v29, %v2644_v0  ;;  %v2904_v51 = vadd.f32 %v2632_v29, %v2648_v44  ;;  %v986_v36 = vmax.f32 %v2672_v16, 0.0  ;;  %v988_v0 = vmax.f32 %v2680_v23, 0.0 }
 0x1b6   :  { %3191 = vst [vmem:[#allocation25_spill] sm:$0xff] %v2892_v22  ;;  %3192 = vst [vmem:[#allocation23_spill] sm:$0xff] %v2896_v31  ;;  %v987_v31 = vmax.f32 %v2676_v59, 0.0  ;;  %v990_v29 = vmax.f32 %v2688_v13, 0.0  ;;  %v991_v44 = vmax.f32 %v2692_v47, 0.0  ;;  %v993_v19 = vmax.f32 %v2700_v45, 0.0 }
 0x1b7   :  { %3193 = vst [vmem:[#allocation2_spill] sm:$0xff] %v2900_v62  ;;  %3194 = vst [vmem:[#allocation3_spill] sm:$0xff] %v2904_v51  ;;  %v989_v62 = vmax.f32 %v2684_v37, 0.0  ;;  %v994_v10 = vmax.f32 %v2704_v40, 0.0  ;;  %v995_v22 = vmax.f32 %v2708_v43, 0.0  ;;  %v996_v16 = vmax.f32 %v2712_v54, 0.0 }
 0x1b8   :  { %v997_v59 = vmax.f32 %v2716_v63, 0.0  ;;  %v998_v23 = vmax.f32 %v2720_v49, 0.0  ;;  %v999_v37 = vmax.f32 %v2724_v58, 0.0  ;;  %v1000_v13 = vmax.f32 %v2728_v8, 0.0  ;;  %v3195_v27 = vld [vmem:[#allocation18_spill] sm:$0xff]  ;;  %v3196_v24 = vld [vmem:[#allocation15_spill] sm:$0xff] }
 0x1b9   :  { %v1001_v47 = vmax.f32 %v2732_v17, 0.0  ;;  %v1002_v42 = vmax.f32 %v2736_v3, 0.0  ;;  %v1003_v45 = vmax.f32 %v2740_v12, 0.0  ;;  %v1004_v40 = vmax.f32 %v2744_v26, 0.0  ;;  %v3197_v38 = vld [vmem:[#allocation17_spill] sm:$0xff]  ;;  %v3198_v55 = vld [vmem:[#allocation20_spill] sm:$0xff] }
 0x1ba   :  { %v1005_v43 = vmax.f32 %v2748_v35, 0.0  ;;  %v1006_v54 = vmax.f32 %v2752_v21, 0.0  ;;  %v1007_v63 = vmax.f32 %v2756_v30, 0.0  ;;  %v1008_v49 = vmax.f32 %v2760_v52, 0.0  ;;  %v3199_v2 = vld [vmem:[#allocation22_spill] sm:$0xff]  ;;  %v3200_v61 = vld [vmem:[#allocation19_spill] sm:$0xff] }
 0x1bb   :  { %v1009_v58 = vmax.f32 %v2764_v1, 0.0  ;;  %v1010_v8 = vmax.f32 %v2768_v39, 0.0  ;;  %v1011_v17 = vmax.f32 %v2772_v57, 0.0  ;;  %v1012_v3 = vmax.f32 %v2776_v15, 0.0  ;;  %v3201_v51 = vld [vmem:[#allocation21_spill] sm:$0xff] }
 0x1bc   :  { %v1013_v12 = vmax.f32 %v2780_v28, 0.0  ;;  %v1014_v26 = vmax.f32 %v2784_v7, 0.0  ;;  %v1015_v35 = vmax.f32 %v2788_v20, 0.0  ;;  %v1016_v21 = vmax.f32 %v2792_v48, 0.0 }
 0x1bd   :  { %v1017_v30 = vmax.f32 %v2796_v5, 0.0  ;;  %v1018_v52 = vmax.f32 %v2800_v34, 0.0  ;;  %v1019_v1 = vmax.f32 %v2804_v56, 0.0  ;;  %v1020_v39 = vmax.f32 %v2808_v25, 0.0 }
 0x1be   :  { %v1021_v57 = vmax.f32 %v2812_v53, 0.0  ;;  %v1022_v15 = vmax.f32 %v2816_v14, 0.0  ;;  %v1023_v28 = vmax.f32 %v2820_v33, 0.0  ;;  %v1024_v7 = vmax.f32 %v2824_v32, 0.0 }
 0x1bf   :  { %v1025_v20 = vmax.f32 %v2828_v11, 0.0  ;;  %v1026_v48 = vmax.f32 %v2832_v41, 0.0  ;;  %v1027_v5 = vmax.f32 %v3195_v27, 0.0  ;;  %v1028_v34 = vmax.f32 %v3196_v24, 0.0 }
 0x1c0   :  { %v1029_v56 = vmax.f32 %v3197_v38, 0.0  ;;  %v1030_v25 = vmax.f32 %v3198_v55, 0.0  ;;  %v1031_v53 = vmax.f32 %v3199_v2, 0.0  ;;  %v1032_v14 = vmax.f32 %v3200_v61, 0.0  ;;  %v3202_v55 = vld [vmem:[#allocation24_spill] sm:$0xff]  ;;  %v3203_v61 = vld [vmem:[#allocation25_spill] sm:$0xff] }
 0x1c1   :  { %v1033_v33 = vmax.f32 %v2860_v46, 0.0  ;;  %v1034_v32 = vmax.f32 %v2864_v9, 0.0  ;;  %v1035_v11 = vmax.f32 %v2868_v4, 0.0  ;;  %v1036_v41 = vmax.f32 %v2872_v18, 0.0  ;;  %v3204_v9 = vld [vmem:[#allocation23_spill] sm:$0xff]  ;;  %v3205_v18 = vld [vmem:[#allocation2_spill] sm:$0xff] }
 0x1c2   :  { %v1037_v27 = vmax.f32 %v2876_v6, 0.0  ;;  %v1038_v24 = vmax.f32 %v2880_v50, 0.0  ;;  %v1039_v38 = vmax.f32 %v3201_v51, 0.0  ;;  %v1040_v2 = vmax.f32 %v3202_v55, 0.0  ;;  %v3206_v50 = vld [vmem:[#allocation3_spill] sm:$0xff]  ;;  %v3207_v55 = vld [vmem:[#allocation12_spill] sm:$0xff] }
 0x1c3   :  { %v1041_v46 = vmax.f32 %v3203_v61, 0.0  ;;  %v1042_v4 = vmax.f32 %v3204_v9, 0.0  ;;  %v1043_v6 = vmax.f32 %v3205_v18, 0.0  ;;  %v1044_v51 = vmax.f32 %v3206_v50, 0.0  ;;  %v3209_v9 = vld [vmem:[#allocation14_spill] sm:$0xff] }
 0x1c4   :  { %v3208_v61 = vmax.f32 %v3207_v55, 0.0  ;;  %v3210_v18 = vmax.f32 %v3209_v9, 0.0  ;;  %v3211_v55 = vld [vmem:[#allocation11_spill] sm:$0xff] }
 0x1c5   :  { %v3212_v9 = vmax.f32 %v3211_v55, 0.0 }
 0x1c6   :  { %v1540_v50 = vpack.c.bf16 %v3210_v18, %v3208_v61  ;;  %v3213_v18 = vld [vmem:[#allocation13_spill] sm:$0xff] }
 0x1c7   :  { %v3214_v61 = vmax.f32 %v3213_v18, 0.0  ;;  %v3215_v18 = vld [vmem:[#allocation16_spill] sm:$0xff] }
 0x1c8   :  { %1541 = vst [vmem:[%s3080_s4] sm:$0xff] %v1540_v50  }
 0x1c9   :  { %v1545_v55 = vpack.c.bf16 %v3214_v61, %v3212_v9  ;;  %v3216_v9 = vmax.f32 %v3215_v18, 0.0  ;;  %v1555_v18 = vpack.c.bf16 %v988_v0, %v987_v31  ;;  %v1570_v0 = vpack.c.bf16 %v994_v10, %v993_v19 }
 0x1ca   :  { %v1575_v31 = vpack.c.bf16 %v996_v16, %v995_v22  ;;  %v1590_v19 = vpack.c.bf16 %v1002_v42, %v1001_v47  ;;  %v1595_v22 = vpack.c.bf16 %v1004_v40, %v1003_v45  ;;  %v1600_v10 = vpack.c.bf16 %v1006_v54, %v1005_v43 }
 0x1cb   :  { %v1550_v61 = vpack.c.bf16 %v986_v36, %v3216_v9  ;;  %v1560_v9 = vpack.c.bf16 %v990_v29, %v989_v62  ;;  %v1565_v36 = vpack.c.bf16 %v992_v60, %v991_v44  ;;  %1697 = vst [vmem:[%s3080_s4 + $0x8] sm:$0xff] %v1545_v55   ;;  %1699 = vst [vmem:[%s3080_s4 + $0x18] sm:$0xff] %v1555_v18  }
 0x1cc   :  { %v1580_v62 = vpack.c.bf16 %v998_v23, %v997_v59  ;;  %v1585_v60 = vpack.c.bf16 %v1000_v13, %v999_v37  ;;  %1702 = vst [vmem:[%s3080_s4 + $0x30] sm:$0xff] %v1570_v0   ;;  %1703 = vst [vmem:[%s3080_s4 + $0x38] sm:$0xff] %v1575_v31   ;;  %v1605_v29 = vpack.c.bf16 %v1008_v49, %v1007_v63 }
 0x1cd   :  { %1698 = vst [vmem:[%s3080_s4 + $0x10] sm:$0xff] %v1550_v61   ;;  %1700 = vst [vmem:[%s3080_s4 + $0x20] sm:$0xff] %v1560_v9   ;;  %v1610_v44 = vpack.c.bf16 %v1010_v8, %v1009_v58  ;;  %v1615_v16 = vpack.c.bf16 %v1012_v3, %v1011_v17  ;;  %v1620_v59 = vpack.c.bf16 %v1014_v26, %v1013_v12 }
 0x1ce   :  { %1701 = vst [vmem:[%s3080_s4 + $0x28] sm:$0xff] %v1565_v36   ;;  %1704 = vst [vmem:[%s3080_s4 + $0x40] sm:$0xff] %v1580_v62   ;;  %v1625_v23 = vpack.c.bf16 %v1016_v21, %v1015_v35  ;;  %v1630_v37 = vpack.c.bf16 %v1018_v52, %v1017_v30  ;;  %v1635_v13 = vpack.c.bf16 %v1020_v39, %v1019_v1 }
 0x1cf   :  { %1705 = vst [vmem:[%s3080_s4 + $0x48] sm:$0xff] %v1585_v60   ;;  %1706 = vst [vmem:[%s3080_s4 + $0x50] sm:$0xff] %v1590_v19   ;;  %v1640_v47 = vpack.c.bf16 %v1022_v15, %v1021_v57  ;;  %v1645_v42 = vpack.c.bf16 %v1024_v7, %v1023_v28  ;;  %v1650_v45 = vpack.c.bf16 %v1026_v48, %v1025_v20 }
 0x1d0   :  { %1707 = vst [vmem:[%s3080_s4 + $0x58] sm:$0xff] %v1595_v22   ;;  %1708 = vst [vmem:[%s3080_s4 + $0x60] sm:$0xff] %v1600_v10   ;;  %v1655_v40 = vpack.c.bf16 %v1028_v34, %v1027_v5  ;;  %v1660_v43 = vpack.c.bf16 %v1030_v25, %v1029_v56  ;;  %v1665_v54 = vpack.c.bf16 %v1032_v14, %v1031_v53 }
 0x1d1   :  { %1709 = vst [vmem:[%s3080_s4 + $0x68] sm:$0xff] %v1605_v29   ;;  %1710 = vst [vmem:[%s3080_s4 + $0x70] sm:$0xff] %v1610_v44   ;;  %v1670_v63 = vpack.c.bf16 %v1034_v32, %v1033_v33  ;;  %v1675_v49 = vpack.c.bf16 %v1036_v41, %v1035_v11  ;;  %v1680_v58 = vpack.c.bf16 %v1038_v24, %v1037_v27 }
 0x1d2   :  { %1711 = vst [vmem:[%s3080_s4 + $0x78] sm:$0xff] %v1615_v16   ;;  %1712 = vst [vmem:[%s3080_s4 + $0x80] sm:$0xff] %v1620_v59   ;;  %v1685_v8 = vpack.c.bf16 %v1040_v2, %v1039_v38  ;;  %v1690_v17 = vpack.c.bf16 %v1042_v4, %v1041_v46  ;;  %v1695_v3 = vpack.c.bf16 %v1044_v51, %v1043_v6 }
 0x1d3   :  { %1713 = vst [vmem:[%s3080_s4 + $0x88] sm:$0xff] %v1625_v23   ;;  %1714 = vst [vmem:[%s3080_s4 + $0x90] sm:$0xff] %v1630_v37  }
 0x1d4   :  { %1715 = vst [vmem:[%s3080_s4 + $0x98] sm:$0xff] %v1635_v13   ;;  %1716 = vst [vmem:[%s3080_s4 + $0xa0] sm:$0xff] %v1640_v47  }
 0x1d5   :  { %1717 = vst [vmem:[%s3080_s4 + $0xa8] sm:$0xff] %v1645_v42   ;;  %1718 = vst [vmem:[%s3080_s4 + $0xb0] sm:$0xff] %v1650_v45  }
 0x1d6   :  { %1719 = vst [vmem:[%s3080_s4 + $0xb8] sm:$0xff] %v1655_v40   ;;  %1720 = vst [vmem:[%s3080_s4 + $0xc0] sm:$0xff] %v1660_v43  }
 0x1d7   :  { %1721 = vst [vmem:[%s3080_s4 + $0xc8] sm:$0xff] %v1665_v54   ;;  %1722 = vst [vmem:[%s3080_s4 + $0xd0] sm:$0xff] %v1670_v63  }
 0x1d8   :  { %1723 = vst [vmem:[%s3080_s4 + $0xd8] sm:$0xff] %v1675_v49   ;;  %1724 = vst [vmem:[%s3080_s4 + $0xe0] sm:$0xff] %v1680_v58  }
 0x1d9   :  { %1725 = vst [vmem:[%s3080_s4 + $0xe8] sm:$0xff] %v1685_v8   ;;  %1726 = vst [vmem:[%s3080_s4 + $0xf0] sm:$0xff] %v1690_v17  }
 0x1da   :  { %1727 = vst [vmem:[%s3080_s4 + $0xf8] sm:$0xff] %v1695_v3  }

// kernel: resnet_forward.11
= control target key start
LH: loop header
LB: loop body
LE: loop exit
PB: predicated region body
PF: predicated region fallthrough
CT: control target
= control target key end

     0   :  { %v2107_v0 = vmov 0   ;;  %s3430_s1 = inlined_call_operand.vmem [shape: bf16[256,128], index: 1, kind: input, shape index: {}]   ;;  %s3431_s0 = inlined_call_operand.vmem [shape: bf16[512,256], index: 0, kind: input, shape index: {}]   ;;  %s3432_s2 = inlined_call_operand.vmem [shape: f32[1,128], index: 2, kind: input, shape index: {}]   ;;  %s3433_s3 = inlined_call_operand.vmem [shape: f32[1,128], index: 3, kind: input, shape index: {}]   ;;  %s3434_s4 = inlined_call_operand.vmem [shape: bf16[512,128], index: 4, kind: output, shape index: {}]  }
   0x1   :  { %530 = vmatprep.subr.bf16.mxu0 %v2107_v0  ;;  %v1993_v1 = vld [vmem:[%s3430_s1 + $0x38] sm:$0xff]   ;;  %1960 = vmatprep.subr.bf16.mxu1 %v2107_v0  ;;  %v1994_v2 = vld [vmem:[%s3430_s1 + $0x30] sm:$0xff]   ;;  %v1995_v3 = vld [vmem:[%s3430_s1 + $0x28] sm:$0xff]  }
   0x2   :  { %531 = vmatpush1.bf16.msra.mxu0 %v1993_v1  ;;  %1976 = vmatpush1.bf16.msra.mxu1 %v1993_v1  ;;  %v1996_v4 = vld [vmem:[%s3430_s1 + $0x20] sm:$0xff]   ;;  %v1997_v5 = vld [vmem:[%s3430_s1 + $0x18] sm:$0xff]   ;;  %v1998_v7 = vld [vmem:[%s3430_s1 + $0x10] sm:$0xff]  }
   0x3   :  { %532 = vmatprep.subr.bf16.mxu0 %v2107_v0  ;;  %1961 = vmatprep.subr.bf16.mxu1 %v2107_v0  ;;  %v2011_v6 = vld [vmem:[%s3431_s0 + $0x4] ss:$8 sps:$4 sm:$0xff]   ;;  %v2001_v11 = vld [vmem:[%s3430_s1 + $0x78] sm:$0xff]   ;;  %v2002_v12 = vld [vmem:[%s3430_s1 + $0x70] sm:$0xff]  }
   0x4   :  { %562 = vmatprep.mubr.bf16.mxu0 %v2011_v6  ;;  %v1999_v8 = vld [vmem:[%s3430_s1 + $0x8] sm:$0xff]   ;;  %v2000_v9 = vld [vmem:[%s3430_s1] sm:$0xff]   ;;  %v2005_v15 = vld [vmem:[%s3430_s1 + $0x58] sm:$0xff]  }
   0x5   :  { %v2035_v10 = vld [vmem:[%s3431_s0 + $0x104] ss:$8 sps:$4 sm:$0xff]   ;;  %v2006_v16 = vld [vmem:[%s3430_s1 + $0x50] sm:$0xff]   ;;  %v2009_v19 = vld [vmem:[%s3431_s0] ss:$8 sps:$4 sm:$0xff]  }
   0x6   :  { %533 = vmatpush1.bf16.msra.mxu0 %v1994_v2  ;;  %1977 = vmatpush1.bf16.msra.mxu1 %v1994_v2  ;;  %v2003_v13 = vld [vmem:[%s3430_s1 + $0x68] sm:$0xff]   ;;  %v2004_v14 = vld [vmem:[%s3430_s1 + $0x60] sm:$0xff]   ;;  %v2012_v21 = vld [vmem:[%s3431_s0 + $0x14] ss:$8 sps:$4 sm:$0xff]  }
   0x7   :  { %534 = vmatprep.subr.bf16.mxu0 %v2107_v0  ;;  %1962 = vmatprep.subr.bf16.mxu1 %v2107_v0  ;;  %v2007_v17 = vld [vmem:[%s3430_s1 + $0x48] sm:$0xff]   ;;  %v2008_v18 = vld [vmem:[%s3430_s1 + $0x40] sm:$0xff]   ;;  %v2039_v22 = vld [vmem:[%s3431_s0 + $0x114] ss:$8 sps:$4 sm:$0xff]  }
   0x8   :  { %690 = vmatprep.mubr.bf16.mxu1 %v2035_v10  ;;  %v2033_v20 = vld [vmem:[%s3431_s0 + $0x100] ss:$8 sps:$4 sm:$0xff]   ;;  %v2014_v23 = vld [vmem:[%s3431_s0 + $0x10] ss:$8 sps:$4 sm:$0xff]   ;;  %v2015_v25 = vld [vmem:[%s3431_s0 + $0x24] ss:$8 sps:$4 sm:$0xff]  }
   0x9   :  { %v2041_v24 = vld [vmem:[%s3431_s0 + $0x110] ss:$8 sps:$4 sm:$0xff]   ;;  %v2045_v26 = vld [vmem:[%s3431_s0 + $0x124] ss:$8 sps:$4 sm:$0xff]   ;;  %v2017_v27 = vld [vmem:[%s3431_s0 + $0x20] ss:$8 sps:$4 sm:$0xff]  }
   0xa   :  { %535 = vmatpush1.bf16.msra.mxu0 %v1995_v3  ;;  %1978 = vmatpush1.bf16.msra.mxu1 %v1995_v3  ;;  %v2047_v28 = vld [vmem:[%s3431_s0 + $0x120] ss:$8 sps:$4 sm:$0xff]   ;;  %v2018_v29 = vld [vmem:[%s3431_s0 + $0x34] ss:$8 sps:$4 sm:$0xff]   ;;  %v2020_v31 = vld [vmem:[%s3431_s0 + $0x30] ss:$8 sps:$4 sm:$0xff]  }
   0xb   :  { %536 = vmatprep.subr.bf16.mxu0 %v2107_v0  ;;  %1963 = vmatprep.subr.bf16.mxu1 %v2107_v0  ;;  %v2051_v30 = vld [vmem:[%s3431_s0 + $0x134] ss:$8 sps:$4 sm:$0xff]   ;;  %v2053_v32 = vld [vmem:[%s3431_s0 + $0x130] ss:$8 sps:$4 sm:$0xff]   ;;  %v2021_v33 = vld [vmem:[%s3431_s0 + $0x44] ss:$8 sps:$4 sm:$0xff]  }
   0xc   :  { %v2057_v34 = vld [vmem:[%s3431_s0 + $0x144] ss:$8 sps:$4 sm:$0xff]   ;;  %v2023_v35 = vld [vmem:[%s3431_s0 + $0x40] ss:$8 sps:$4 sm:$0xff]   ;;  %v2024_v37 = vld [vmem:[%s3431_s0 + $0x54] ss:$8 sps:$4 sm:$0xff]  }
   0xd   :  { %v2059_v36 = vld [vmem:[%s3431_s0 + $0x140] ss:$8 sps:$4 sm:$0xff]   ;;  %v2063_v38 = vld [vmem:[%s3431_s0 + $0x154] ss:$8 sps:$4 sm:$0xff]   ;;  %v2026_v39 = vld [vmem:[%s3431_s0 + $0x50] ss:$8 sps:$4 sm:$0xff]  }
   0xe   :  { %537 = vmatpush1.bf16.msra.mxu0 %v1996_v4  ;;  %1979 = vmatpush1.bf16.msra.mxu1 %v1996_v4  ;;  %v2065_v40 = vld [vmem:[%s3431_s0 + $0x150] ss:$8 sps:$4 sm:$0xff]   ;;  %v2027_v41 = vld [vmem:[%s3431_s0 + $0x64] ss:$8 sps:$4 sm:$0xff]   ;;  %v2029_v43 = vld [vmem:[%s3431_s0 + $0x60] ss:$8 sps:$4 sm:$0xff]  }
   0xf   :  { %538 = vmatprep.subr.bf16.mxu0 %v2107_v0  ;;  %1964 = vmatprep.subr.bf16.mxu1 %v2107_v0  ;;  %v2069_v42 = vld [vmem:[%s3431_s0 + $0x164] ss:$8 sps:$4 sm:$0xff]   ;;  %v2071_v44 = vld [vmem:[%s3431_s0 + $0x160] ss:$8 sps:$4 sm:$0xff]   ;;  %v2030_v45 = vld [vmem:[%s3431_s0 + $0x74] ss:$8 sps:$4 sm:$0xff]  }
  0x10   :  { %v2075_v46 = vld [vmem:[%s3431_s0 + $0x174] ss:$8 sps:$4 sm:$0xff]   ;;  %v2032_v47 = vld [vmem:[%s3431_s0 + $0x70] ss:$8 sps:$4 sm:$0xff]   ;;  %v2036_v49 = vld [vmem:[%s3431_s0 + $0x84] ss:$8 sps:$4 sm:$0xff]  }
  0x11   :  { %v2077_v48 = vld [vmem:[%s3431_s0 + $0x170] ss:$8 sps:$4 sm:$0xff]   ;;  %v2081_v50 = vld [vmem:[%s3431_s0 + $0x184] ss:$8 sps:$4 sm:$0xff]   ;;  %v2038_v51 = vld [vmem:[%s3431_s0 + $0x80] ss:$8 sps:$4 sm:$0xff]  }
  0x12   :  { %539 = vmatpush1.bf16.msra.mxu0 %v1997_v5  ;;  %1980 = vmatpush1.bf16.msra.mxu1 %v1997_v5  ;;  %v2083_v52 = vld [vmem:[%s3431_s0 + $0x180] ss:$8 sps:$4 sm:$0xff]   ;;  %v2042_v53 = vld [vmem:[%s3431_s0 + $0x94] ss:$8 sps:$4 sm:$0xff]   ;;  %v2044_v55 = vld [vmem:[%s3431_s0 + $0x90] ss:$8 sps:$4 sm:$0xff]  }
  0x13   :  { %540 = vmatprep.subr.bf16.mxu0 %v2107_v0  ;;  %1965 = vmatprep.subr.bf16.mxu1 %v2107_v0  ;;  %v2084_v54 = vld [vmem:[%s3431_s0 + $0x194] ss:$8 sps:$4 sm:$0xff]   ;;  %v2086_v56 = vld [vmem:[%s3431_s0 + $0x190] ss:$8 sps:$4 sm:$0xff]   ;;  %v2048_v57 = vld [vmem:[%s3431_s0 + $0xa4] ss:$8 sps:$4 sm:$0xff]  }
  0x14   :  { %v2087_v58 = vld [vmem:[%s3431_s0 + $0x1a4] ss:$8 sps:$4 sm:$0xff]   ;;  %v2050_v59 = vld [vmem:[%s3431_s0 + $0xa0] ss:$8 sps:$4 sm:$0xff]   ;;  %v2054_v61 = vld [vmem:[%s3431_s0 + $0xb4] ss:$8 sps:$4 sm:$0xff]  }
  0x15   :  { %v2089_v60 = vld [vmem:[%s3431_s0 + $0x1a0] ss:$8 sps:$4 sm:$0xff]   ;;  %v2090_v62 = vld [vmem:[%s3431_s0 + $0x1b4] ss:$8 sps:$4 sm:$0xff]   ;;  %v2056_v63 = vld [vmem:[%s3431_s0 + $0xb0] ss:$8 sps:$4 sm:$0xff]  }
  0x16   :  { %541 = vmatpush1.bf16.msra.mxu0 %v1998_v7  ;;  %1981 = vmatpush1.bf16.msra.mxu1 %v1998_v7  ;;  %v2060_v1 = vld [vmem:[%s3431_s0 + $0xc4] ss:$8 sps:$4 sm:$0xff]   ;;  %v2062_v3 = vld [vmem:[%s3431_s0 + $0xc0] ss:$8 sps:$4 sm:$0xff]   ;;  %v2066_v5 = vld [vmem:[%s3431_s0 + $0xd4] ss:$8 sps:$4 sm:$0xff]  }
  0x17   :  { %542 = vmatprep.subr.bf16.mxu0 %v2107_v0  ;;  %1966 = vmatprep.subr.bf16.mxu1 %v2107_v0  ;;  %v2093_v2 = vld [vmem:[%s3431_s0 + $0x1c4] ss:$8 sps:$4 sm:$0xff]   ;;  %v2095_v4 = vld [vmem:[%s3431_s0 + $0x1c0] ss:$8 sps:$4 sm:$0xff]   ;;  %v2096_v6 = vld [vmem:[%s3431_s0 + $0x1d4] ss:$8 sps:$4 sm:$0xff]  }
  0x18   :  { %v2068_v7 = vld [vmem:[%s3431_s0 + $0xd0] ss:$8 sps:$4 sm:$0xff]   ;;  %v2099_v10 = vld [vmem:[%s3431_s0 + $0x1e4] ss:$8 sps:$4 sm:$0xff]  }
  0x1a   :  { %543 = vmatpush1.bf16.msra.mxu0 %v1999_v8  ;;  %1982 = vmatpush1.bf16.msra.mxu1 %v1999_v8  ;;  %v2098_v8 = vld [vmem:[%s3431_s0 + $0x1d0] ss:$8 sps:$4 sm:$0xff]  }
  0x1b   :  { %544 = vmatprep.subr.bf16.mxu0 %v2107_v0  ;;  %1967 = vmatprep.subr.bf16.mxu1 %v2107_v0 }
  0x1e   :  { %545 = vmatpush1.bf16.msra.mxu0 %v2000_v9  ;;  %1983 = vmatpush1.bf16.msra.mxu1 %v2000_v9  ;;  %v2072_v9 = vld [vmem:[%s3431_s0 + $0xe4] ss:$8 sps:$4 sm:$0xff]  }
  0x1f   :  { %546 = vmatprep.subr.bf16.mxu0 %v2107_v0  ;;  %1968 = vmatprep.subr.bf16.mxu1 %v2107_v0 }
  0x22   :  { %547 = vmatpush2.bf16.msra.mxu0 %v2001_v11  ;;  %1984 = vmatpush2.bf16.msra.mxu1 %v2001_v11  ;;  %v2074_v11 = vld [vmem:[%s3431_s0 + $0xe0] ss:$8 sps:$4 sm:$0xff]  }
  0x23   :  { %548 = vmatprep.subr.bf16.mxu0 %v2107_v0  ;;  %1969 = vmatprep.subr.bf16.mxu1 %v2107_v0 }
  0x26   :  { %549 = vmatpush2.bf16.msra.mxu0 %v2002_v12  ;;  %1985 = vmatpush2.bf16.msra.mxu1 %v2002_v12  ;;  %v2101_v12 = vld [vmem:[%s3431_s0 + $0x1e0] ss:$8 sps:$4 sm:$0xff]  }
  0x27   :  { %550 = vmatprep.subr.bf16.mxu0 %v2107_v0  ;;  %1970 = vmatprep.subr.bf16.mxu1 %v2107_v0 }
  0x2a   :  { %551 = vmatpush2.bf16.msra.mxu0 %v2003_v13  ;;  %1986 = vmatpush2.bf16.msra.mxu1 %v2003_v13  ;;  %v2078_v13 = vld [vmem:[%s3431_s0 + $0xf4] ss:$8 sps:$4 sm:$0xff]  }
  0x2b   :  { %552 = vmatprep.subr.bf16.mxu0 %v2107_v0  ;;  %1971 = vmatprep.subr.bf16.mxu1 %v2107_v0 }
  0x2e   :  { %553 = vmatpush2.bf16.msra.mxu0 %v2004_v14  ;;  %1987 = vmatpush2.bf16.msra.mxu1 %v2004_v14  ;;  %v2102_v14 = vld [vmem:[%s3431_s0 + $0x1f4] ss:$8 sps:$4 sm:$0xff]  }
  0x2f   :  { %554 = vmatprep.subr.bf16.mxu0 %v2107_v0  ;;  %1972 = vmatprep.subr.bf16.mxu1 %v2107_v0 }
  0x32   :  { %555 = vmatpush2.bf16.msra.mxu0 %v2005_v15  ;;  %1988 = vmatpush2.bf16.msra.mxu1 %v2005_v15  ;;  %v2080_v15 = vld [vmem:[%s3431_s0 + $0xf0] ss:$8 sps:$4 sm:$0xff]  }
  0x33   :  { %556 = vmatprep.subr.bf16.mxu0 %v2107_v0  ;;  %1973 = vmatprep.subr.bf16.mxu1 %v2107_v0 }
  0x36   :  { %557 = vmatpush2.bf16.msra.mxu0 %v2006_v16  ;;  %1989 = vmatpush2.bf16.msra.mxu1 %v2006_v16  ;;  %v2104_v16 = vld [vmem:[%s3431_s0 + $0x1f0] ss:$8 sps:$4 sm:$0xff]  }
  0x37   :  { %558 = vmatprep.subr.bf16.mxu0 %v2107_v0  ;;  %1974 = vmatprep.subr.bf16.mxu1 %v2107_v0 }
  0x3a   :  { %559 = vmatpush2.bf16.msra.mxu0 %v2007_v17  ;;  %1990 = vmatpush2.bf16.msra.mxu1 %v2007_v17 }
  0x3b   :  { %560 = vmatprep.subr.bf16.mxu0 %v2107_v0  ;;  %1975 = vmatprep.subr.bf16.mxu1 %v2107_v0  ;;  %v2092_v0 = vld [vmem:[%s3431_s0 + $0x1b0] ss:$8 sps:$4 sm:$0xff]  }
  0x3e   :  { %561 = vmatpush2.bf16.msra.mxu0 %v2008_v18  ;;  %1991 = vmatpush2.bf16.msra.mxu1 %v2008_v18 }
  0x41   :  { %563 = vmatmul.mubr.bf16.vlgmr.msra.gmra.mxu0 %v2009_v19  ;;  %691 = vmatmul.mubr.bf16.vlgmr.msra.gmra.mxu1 %v2033_v20 }
  0x42   :  { %570 = vmatprep.mubr.bf16.mxu0 %v2012_v21  ;;  %698 = vmatprep.mubr.bf16.mxu1 %v2039_v22 }
  0x49   :  { %571 = vmatmul.mubr.bf16.gmra.mxu0 %v2014_v23  ;;  %699 = vmatmul.mubr.bf16.gmra.mxu1 %v2041_v24 }
  0x4a   :  { %578 = vmatprep.mubr.bf16.mxu0 %v2015_v25  ;;  %706 = vmatprep.mubr.bf16.mxu1 %v2045_v26 }
  0x51   :  { %579 = vmatmul.mubr.bf16.gmra.mxu0 %v2017_v27  ;;  %707 = vmatmul.mubr.bf16.gmra.mxu1 %v2047_v28 }
  0x52   :  { %586 = vmatprep.mubr.bf16.mxu0 %v2018_v29  ;;  %714 = vmatprep.mubr.bf16.mxu1 %v2051_v30 }
  0x59   :  { %587 = vmatmul.mubr.bf16.gmra.mxu0 %v2020_v31  ;;  %715 = vmatmul.mubr.bf16.gmra.mxu1 %v2053_v32 }
  0x5a   :  { %594 = vmatprep.mubr.bf16.mxu0 %v2021_v33  ;;  %722 = vmatprep.mubr.bf16.mxu1 %v2057_v34 }
  0x61   :  { %595 = vmatmul.mubr.bf16.gmra.mxu0 %v2023_v35  ;;  %723 = vmatmul.mubr.bf16.gmra.mxu1 %v2059_v36 }
  0x62   :  { %602 = vmatprep.mubr.bf16.mxu0 %v2024_v37  ;;  %730 = vmatprep.mubr.bf16.mxu1 %v2063_v38 }
  0x69   :  { %603 = vmatmul.mubr.bf16.gmra.mxu0 %v2026_v39  ;;  %731 = vmatmul.mubr.bf16.gmra.mxu1 %v2065_v40 }
  0x6a   :  { %610 = vmatprep.mubr.bf16.mxu0 %v2027_v41  ;;  %738 = vmatprep.mubr.bf16.mxu1 %v2069_v42 }
  0x71   :  { %611 = vmatmul.mubr.bf16.gmra.mxu0 %v2029_v43  ;;  %739 = vmatmul.mubr.bf16.gmra.mxu1 %v2071_v44 }
  0x72   :  { %618 = vmatprep.mubr.bf16.mxu0 %v2030_v45  ;;  %746 = vmatprep.mubr.bf16.mxu1 %v2075_v46 }
  0x79   :  { %619 = vmatmul.mubr.bf16.gmra.mxu0 %v2032_v47  ;;  %747 = vmatmul.mubr.bf16.gmra.mxu1 %v2077_v48 }
  0x7a   :  { %626 = vmatprep.mubr.bf16.mxu0 %v2036_v49  ;;  %754 = vmatprep.mubr.bf16.mxu1 %v2081_v50 }
  0x81   :  { %627 = vmatmul.mubr.bf16.gmra.mxu0 %v2038_v51  ;;  %755 = vmatmul.mubr.bf16.gmra.mxu1 %v2083_v52 }
  0x82   :  { %634 = vmatprep.mubr.bf16.mxu0 %v2042_v53  ;;  %762 = vmatprep.mubr.bf16.mxu1 %v2084_v54 }
  0x89   :  { %635 = vmatmul.mubr.bf16.gmra.mxu0 %v2044_v55  ;;  %763 = vmatmul.mubr.bf16.gmra.mxu1 %v2086_v56 }
  0x8a   :  { %642 = vmatprep.mubr.bf16.mxu0 %v2048_v57  ;;  %770 = vmatprep.mubr.bf16.mxu1 %v2087_v58 }
  0x91   :  { %643 = vmatmul.mubr.bf16.gmra.mxu0 %v2050_v59  ;;  %771 = vmatmul.mubr.bf16.gmra.mxu1 %v2089_v60 }
  0x92   :  { %650 = vmatprep.mubr.bf16.mxu0 %v2054_v61  ;;  %778 = vmatprep.mubr.bf16.mxu1 %v2090_v62 }
  0x99   :  { %651 = vmatmul.mubr.bf16.gmra.mxu0 %v2056_v63  ;;  %779 = vmatmul.mubr.bf16.gmra.mxu1 %v2092_v0 }
  0x9a   :  { %658 = vmatprep.mubr.bf16.mxu0 %v2060_v1  ;;  %786 = vmatprep.mubr.bf16.mxu1 %v2093_v2 }
  0xa1   :  { %659 = vmatmul.mubr.bf16.gmra.mxu0 %v2062_v3  ;;  %787 = vmatmul.mubr.bf16.gmra.mxu1 %v2095_v4 }
  0xa2   :  { %666 = vmatprep.mubr.bf16.mxu0 %v2066_v5  ;;  %794 = vmatprep.mubr.bf16.mxu1 %v2096_v6 }
  0xa9   :  { %667 = vmatmul.mubr.bf16.gmra.mxu0 %v2068_v7  ;;  %795 = vmatmul.mubr.bf16.gmra.mxu1 %v2098_v8 }
  0xaa   :  { %674 = vmatprep.mubr.bf16.mxu0 %v2072_v9  ;;  %802 = vmatprep.mubr.bf16.mxu1 %v2099_v10 }
  0xb1   :  { %675 = vmatmul.mubr.bf16.gmra.mxu0 %v2074_v11  ;;  %803 = vmatmul.mubr.bf16.gmra.mxu1 %v2101_v12 }
  0xb2   :  { %682 = vmatprep.mubr.bf16.mxu0 %v2078_v13  ;;  %810 = vmatprep.mubr.bf16.mxu1 %v2102_v14 }
  0xb9   :  { %683 = vmatmul.mubr.bf16.gmra.mxu0 %v2080_v15  ;;  %811 = vmatmul.mubr.bf16.gmra.mxu1 %v2104_v16 }
 0x101   :  { %v2405_v17 = vpop.f32.mrf.mxu0  ;;  %v2407_v18 = vpop.f32.mrf.mxu1 }
 0x103   :  { %v566_v19 = vpop.f32.mrf.mxu0  ;;  %v694_v20 = vpop.f32.mrf.mxu1 }
 0x105   :  { %v2409_v21 = vpop.f32.mrf.mxu0  ;;  %v2411_v22 = vpop.f32.mrf.mxu1 }
 0x106   :  { %v890_v19 = vmul.f32 %v2409_v21, %v2409_v21 }
 0x107   :  { %v569_v23 = vpop.f32.mrf.mxu0  ;;  %v697_v24 = vpop.f32.mrf.mxu1 }
 0x108   :  { %v889_v24 = vmul.f32 %v2405_v17, %v2405_v17 }
 0x109   :  { %v2413_v25 = vpop.f32.mrf.mxu0  ;;  %v2415_v26 = vpop.f32.mrf.mxu1 }
 0x10b   :  { %v574_v27 = vpop.f32.mrf.mxu0  ;;  %v702_v28 = vpop.f32.mrf.mxu1 }
 0x10c   :  { %v819_v27 = vadd.f32 %v2409_v21, %v2405_v17  ;;  %v891_v28 = vmul.f32 %v2413_v25, %v2413_v25 }
 0x10d   :  { %v2417_v29 = vpop.f32.mrf.mxu0  ;;  %v2419_v30 = vpop.f32.mrf.mxu1 }
 0x10f   :  { %v577_v31 = vpop.f32.mrf.mxu0  ;;  %v705_v32 = vpop.f32.mrf.mxu1 }
 0x111   :  { %v2421_v33 = vpop.f32.mrf.mxu0  ;;  %v2423_v34 = vpop.f32.mrf.mxu1 }
 0x113   :  { %v582_v35 = vpop.f32.mrf.mxu0  ;;  %v710_v36 = vpop.f32.mrf.mxu1 }
 0x114   :  { %v953_v35 = vadd.f32 %v890_v19, %v889_v24  ;;  %v820_v36 = vadd.f32 %v819_v27, %v2413_v25 }
 0x115   :  { %v2425_v37 = vpop.f32.mrf.mxu0  ;;  %v2427_v38 = vpop.f32.mrf.mxu1 }
 0x117   :  { %v585_v39 = vpop.f32.mrf.mxu0  ;;  %v713_v40 = vpop.f32.mrf.mxu1 }
 0x118   :  { %v892_v39 = vmul.f32 %v2417_v29, %v2417_v29 }
 0x119   :  { %v2429_v41 = vpop.f32.mrf.mxu0  ;;  %v2431_v42 = vpop.f32.mrf.mxu1 }
 0x11b   :  { %v590_v43 = vpop.f32.mrf.mxu0  ;;  %v718_v44 = vpop.f32.mrf.mxu1 }
 0x11c   :  { %v954_v44 = vadd.f32 %v953_v35, %v891_v28 }
 0x11d   :  { %v2433_v45 = vpop.f32.mrf.mxu0  ;;  %v2435_v46 = vpop.f32.mrf.mxu1 }
 0x11f   :  { %v593_v47 = vpop.f32.mrf.mxu0  ;;  %v721_v48 = vpop.f32.mrf.mxu1 }
 0x120   :  { %v821_v47 = vadd.f32 %v820_v36, %v2417_v29  ;;  %v893_v48 = vmul.f32 %v2421_v33, %v2421_v33 }
 0x121   :  { %v2437_v49 = vpop.f32.mrf.mxu0  ;;  %v2439_v50 = vpop.f32.mrf.mxu1 }
 0x122   :  { %v897_v28 = vmul.f32 %v2437_v49, %v2437_v49 }
 0x123   :  { %v598_v51 = vpop.f32.mrf.mxu0  ;;  %v726_v52 = vpop.f32.mrf.mxu1 }
 0x125   :  { %v2441_v53 = vpop.f32.mrf.mxu0  ;;  %v2443_v54 = vpop.f32.mrf.mxu1 }
 0x127   :  { %v601_v55 = vpop.f32.mrf.mxu0  ;;  %v729_v56 = vpop.f32.mrf.mxu1 }
 0x128   :  { %v955_v55 = vadd.f32 %v954_v44, %v892_v39  ;;  %v822_v56 = vadd.f32 %v821_v47, %v2421_v33  ;;  %v898_v39 = vmul.f32 %v2441_v53, %v2441_v53 }
 0x129   :  { %v2445_v57 = vpop.f32.mrf.mxu0  ;;  %v2447_v58 = vpop.f32.mrf.mxu1 }
 0x12b   :  { %v606_v59 = vpop.f32.mrf.mxu0  ;;  %v734_v60 = vpop.f32.mrf.mxu1 }
 0x12c   :  { %v894_v59 = vmul.f32 %v2425_v37, %v2425_v37 }
 0x12d   :  { %v2449_v61 = vpop.f32.mrf.mxu0  ;;  %v2451_v62 = vpop.f32.mrf.mxu1 }
 0x12f   :  { %v609_v63 = vpop.f32.mrf.mxu0  ;;  %v737_v0 = vpop.f32.mrf.mxu1 }
 0x130   :  { %v956_v0 = vadd.f32 %v955_v55, %v893_v48 }
 0x131   :  { %v2453_v1 = vpop.f32.mrf.mxu0  ;;  %v2455_v2 = vpop.f32.mrf.mxu1 }
 0x133   :  { %v614_v3 = vpop.f32.mrf.mxu0  ;;  %v742_v4 = vpop.f32.mrf.mxu1 }
 0x134   :  { %v823_v3 = vadd.f32 %v822_v56, %v2425_v37  ;;  %v895_v4 = vmul.f32 %v2429_v41, %v2429_v41 }
 0x135   :  { %v2457_v5 = vpop.f32.mrf.mxu0  ;;  %v2459_v6 = vpop.f32.mrf.mxu1 }
 0x137   :  { %v617_v7 = vpop.f32.mrf.mxu0  ;;  %v745_v8 = vpop.f32.mrf.mxu1 }
 0x139   :  { %v2461_v9 = vpop.f32.mrf.mxu0  ;;  %v2463_v10 = vpop.f32.mrf.mxu1 }
 0x13b   :  { %v622_v11 = vpop.f32.mrf.mxu0  ;;  %v750_v12 = vpop.f32.mrf.mxu1 }
 0x13c   :  { %v957_v11 = vadd.f32 %v956_v0, %v894_v59  ;;  %v824_v12 = vadd.f32 %v823_v3, %v2429_v41  ;;  %v900_v3 = vmul.f32 %v2449_v61, %v2449_v61 }
 0x13d   :  { %v2465_v13 = vpop.f32.mrf.mxu0  ;;  %v2467_v14 = vpop.f32.mrf.mxu1 }
 0x13e   :  { %v958_v24 = vadd.f32 %v957_v11, %v895_v4  ;;  %v825_v27 = vadd.f32 %v824_v12, %v2433_v45  ;;  %v901_v12 = vmul.f32 %v2453_v1, %v2453_v1 }
 0x13f   :  { %v625_v15 = vpop.f32.mrf.mxu0  ;;  %v753_v16 = vpop.f32.mrf.mxu1 }
 0x140   :  { %v896_v15 = vmul.f32 %v2433_v45, %v2433_v45  ;;  %v826_v36 = vadd.f32 %v825_v27, %v2437_v49 }
 0x141   :  { %v2471_v20 = vpop.f32.mrf.mxu0  ;;  %v2473_v23 = vpop.f32.mrf.mxu1 }
 0x142   :  { %3464 = vst [vmem:[#allocation2_spill] sm:$0xff] %v2471_v20  ;;  %v959_v35 = vadd.f32 %v958_v24, %v896_v15 }
 0x143   :  { %v630_v31 = vpop.f32.mrf.mxu0  ;;  %v758_v32 = vpop.f32.mrf.mxu1 }
 0x144   :  { %v960_v48 = vadd.f32 %v959_v35, %v897_v28 }
 0x145   :  { %v2484_v40 = vpop.f32.mrf.mxu0  ;;  %v2486_v43 = vpop.f32.mrf.mxu1 }
 0x146   :  { %3465 = vst [vmem:[#allocation3_spill] sm:$0xff] %v2484_v40  ;;  %v961_v59 = vadd.f32 %v960_v48, %v898_v39  ;;  %v903_v48 = vmul.f32 %v2461_v9, %v2461_v9 }
 0x147   :  { %v633_v51 = vpop.f32.mrf.mxu0  ;;  %v761_v52 = vpop.f32.mrf.mxu1 }
 0x148   :  { %v827_v51 = vadd.f32 %v826_v36, %v2441_v53  ;;  %v899_v52 = vmul.f32 %v2445_v57, %v2445_v57 }
 0x149   :  { %v2494_v60 = vpop.f32.mrf.mxu0  ;;  %v2496_v63 = vpop.f32.mrf.mxu1 }
 0x14a   :  { %3466 = vst [vmem:[#allocation4_spill] sm:$0xff] %v2494_v60  ;;  %v828_v0 = vadd.f32 %v827_v51, %v2445_v57 }
 0x14b   :  { %v638_v7 = vpop.f32.mrf.mxu0  ;;  %v766_v8 = vpop.f32.mrf.mxu1 }
 0x14c   :  { %v962_v8 = vadd.f32 %v961_v59, %v899_v52  ;;  %v829_v11 = vadd.f32 %v828_v0, %v2449_v61  ;;  %v904_v59 = vmul.f32 %v2465_v13, %v2465_v13 }
 0x14d   :  { %v2504_v16 = vpop.f32.mrf.mxu0  ;;  %v2506_v19 = vpop.f32.mrf.mxu1 }
 0x14e   :  { %3467 = vst [vmem:[#allocation5_spill] sm:$0xff] %v2504_v16  ;;  %v963_v27 = vadd.f32 %v962_v8, %v900_v3  ;;  %v830_v28 = vadd.f32 %v829_v11, %v2453_v1 }
 0x14f   :  { %v641_v31 = vpop.f32.mrf.mxu0  ;;  %v769_v32 = vpop.f32.mrf.mxu1 }
 0x150   :  { %v902_v31 = vmul.f32 %v2457_v5, %v2457_v5  ;;  %v964_v36 = vadd.f32 %v963_v27, %v901_v12  ;;  %v831_v39 = vadd.f32 %v830_v28, %v2457_v5  ;;  %v905_v12 = vmul.f32 %v2471_v20, %v2471_v20 }
 0x151   :  { %v2514_v44 = vpop.f32.mrf.mxu0  ;;  %v2516_v47 = vpop.f32.mrf.mxu1 }
 0x152   :  { %3468 = vst [vmem:[#allocation6_spill] sm:$0xff] %v2514_v44 }
 0x153   :  { %v646_v55 = vpop.f32.mrf.mxu0  ;;  %v774_v56 = vpop.f32.mrf.mxu1 }
 0x154   :  { %v965_v55 = vadd.f32 %v964_v36, %v902_v31  ;;  %v832_v56 = vadd.f32 %v831_v39, %v2461_v9  ;;  %v906_v31 = vmul.f32 %v2484_v40, %v2484_v40 }
 0x155   :  { %v2524_v4 = vpop.f32.mrf.mxu0  ;;  %v2526_v7 = vpop.f32.mrf.mxu1 }
 0x156   :  { %3469 = vst [vmem:[#allocation7_spill] sm:$0xff] %v2524_v4  ;;  %v966_v8 = vadd.f32 %v965_v55, %v903_v48  ;;  %v833_v11 = vadd.f32 %v832_v56, %v2465_v13 }
 0x157   :  { %v649_v15 = vpop.f32.mrf.mxu0  ;;  %v777_v24 = vpop.f32.mrf.mxu1 }
 0x158   :  { %v967_v27 = vadd.f32 %v966_v8, %v904_v59  ;;  %v834_v28 = vadd.f32 %v833_v11, %v2471_v20  ;;  %v908_v8 = vmul.f32 %v2504_v16, %v2504_v16 }
 0x159   :  { %v2534_v32 = vpop.f32.mrf.mxu0  ;;  %v2536_v35 = vpop.f32.mrf.mxu1 }
 0x15a   :  { %3470 = vst [vmem:[#allocation8_spill] sm:$0xff] %v2534_v32  ;;  %v835_v48 = vadd.f32 %v834_v28, %v2484_v40 }
 0x15b   :  { %v654_v51 = vpop.f32.mrf.mxu0  ;;  %v782_v52 = vpop.f32.mrf.mxu1 }
 0x15c   :  { %v968_v51 = vadd.f32 %v967_v27, %v905_v12  ;;  %v907_v52 = vmul.f32 %v2494_v60, %v2494_v60  ;;  %v836_v59 = vadd.f32 %v835_v48, %v2494_v60  ;;  %v909_v27 = vmul.f32 %v2514_v44, %v2514_v44 }
 0x15d   :  { %v2544_v0 = vpop.f32.mrf.mxu0  ;;  %v2546_v3 = vpop.f32.mrf.mxu1 }
 0x15e   :  { %3471 = vst [vmem:[#allocation9_spill] sm:$0xff] %v2544_v0  ;;  %v837_v12 = vadd.f32 %v836_v59, %v2504_v16 }
 0x15f   :  { %v657_v15 = vpop.f32.mrf.mxu0  ;;  %v785_v24 = vpop.f32.mrf.mxu1 }
 0x160   :  { %v969_v15 = vadd.f32 %v968_v51, %v906_v31  ;;  %v838_v31 = vadd.f32 %v837_v12, %v2514_v44  ;;  %v910_v51 = vmul.f32 %v2524_v4, %v2524_v4 }
 0x161   :  { %v2554_v36 = vpop.f32.mrf.mxu0  ;;  %v2556_v39 = vpop.f32.mrf.mxu1 }
 0x162   :  { %3472 = vst [vmem:[#allocation10_spill] sm:$0xff] %v2554_v36  ;;  %3473 = vst [vmem:[#allocation11_spill] sm:$0xff] %v2556_v39  ;;  %v970_v20 = vadd.f32 %v969_v15, %v907_v52  ;;  %v839_v52 = vadd.f32 %v838_v31, %v2524_v4  ;;  %v911_v15 = vmul.f32 %v2534_v32, %v2534_v32 }
 0x163   :  { %v662_v55 = vpop.f32.mrf.mxu0  ;;  %v790_v56 = vpop.f32.mrf.mxu1 }
 0x164   :  { %v971_v55 = vadd.f32 %v970_v20, %v908_v8  ;;  %v840_v20 = vadd.f32 %v839_v52, %v2534_v32 }
 0x165   :  { %v2564_v11 = vpop.f32.mrf.mxu0  ;;  %v2566_v24 = vpop.f32.mrf.mxu1 }
 0x166   :  { %3474 = vst [vmem:[#allocation12_spill] sm:$0xff] %v2564_v11  ;;  %3475 = vst [vmem:[#allocation13_spill] sm:$0xff] %v2566_v24  ;;  %v972_v60 = vadd.f32 %v971_v55, %v909_v27  ;;  %v841_v27 = vadd.f32 %v840_v20, %v2544_v0  ;;  %v913_v55 = vmul.f32 %v2554_v36, %v2554_v36 }
 0x167   :  { %v665_v28 = vpop.f32.mrf.mxu0  ;;  %v793_v40 = vpop.f32.mrf.mxu1 }
 0x168   :  { %v973_v28 = vadd.f32 %v972_v60, %v910_v51  ;;  %v912_v40 = vmul.f32 %v2544_v0, %v2544_v0  ;;  %v842_v60 = vadd.f32 %v841_v27, %v2554_v36 }
 0x169   :  { %v2574_v48 = vpop.f32.mrf.mxu0  ;;  %v2576_v56 = vpop.f32.mrf.mxu1 }
 0x16a   :  { %3476 = vst [vmem:[#allocation14_spill] sm:$0xff] %v2574_v48  ;;  %3477 = vst [vmem:[#allocation15_spill] sm:$0xff] %v2576_v56  ;;  %v974_v44 = vadd.f32 %v973_v28, %v911_v15  ;;  %v843_v15 = vadd.f32 %v842_v60, %v2564_v11  ;;  %v915_v28 = vmul.f32 %v2574_v48, %v2574_v48 }
 0x16b   :  { %v670_v59 = vpop.f32.mrf.mxu0  ;;  %v798_v16 = vpop.f32.mrf.mxu1 }
 0x16c   :  { %v975_v59 = vadd.f32 %v974_v44, %v912_v40  ;;  %v914_v16 = vmul.f32 %v2564_v11, %v2564_v11  ;;  %v844_v44 = vadd.f32 %v843_v15, %v2574_v48 }
 0x16d   :  { %v2584_v8 = vpop.f32.mrf.mxu0  ;;  %v2586_v12 = vpop.f32.mrf.mxu1 }
 0x16e   :  { %3478 = vst [vmem:[#allocation16_spill] sm:$0xff] %v2584_v8  ;;  %3479 = vst [vmem:[#allocation17_spill] sm:$0xff] %v2586_v12  ;;  %v976_v32 = vadd.f32 %v975_v59, %v913_v55  ;;  %v845_v55 = vadd.f32 %v844_v44, %v2584_v8 }
 0x16f   :  { %v673_v31 = vpop.f32.mrf.mxu0  ;;  %v801_v4 = vpop.f32.mrf.mxu1 }
 0x170   :  { %v977_v31 = vadd.f32 %v976_v32, %v914_v16  ;;  %v916_v4 = vmul.f32 %v2584_v8, %v2584_v8 }
 0x171   :  { %v2594_v51 = vpop.f32.mrf.mxu0  ;;  %v2596_v52 = vpop.f32.mrf.mxu1 }
 0x172   :  { %3480 = vst [vmem:[#allocation18_spill] sm:$0xff] %v2594_v51  ;;  %3481 = vst [vmem:[#allocation19_spill] sm:$0xff] %v2596_v52  ;;  %v978_v36 = vadd.f32 %v977_v31, %v915_v28  ;;  %v917_v59 = vmul.f32 %v2594_v51, %v2594_v51  ;;  %v846_v32 = vadd.f32 %v845_v55, %v2594_v51 }
 0x173   :  { %v678_v20 = vpop.f32.mrf.mxu0  ;;  %v806_v0 = vpop.f32.mrf.mxu1 }
 0x174   :  { %v979_v20 = vadd.f32 %v978_v36, %v916_v4 }
 0x175   :  { %v2604_v40 = vpop.f32.mrf.mxu0  ;;  %v2606_v27 = vpop.f32.mrf.mxu1 }
 0x176   :  { %3482 = vst [vmem:[#allocation20_spill] sm:$0xff] %v2604_v40  ;;  %3483 = vst [vmem:[#allocation21_spill] sm:$0xff] %v2606_v27  ;;  %v918_v0 = vmul.f32 %v2604_v40, %v2604_v40  ;;  %v980_v48 = vadd.f32 %v979_v20, %v917_v59  ;;  %v847_v28 = vadd.f32 %v846_v32, %v2604_v40 }
 0x177   :  { %v681_v60 = vpop.f32.mrf.mxu0  ;;  %v809_v11 = vpop.f32.mrf.mxu1  ;;  %v921_v40 = vmul.f32 %v2407_v18, %v2407_v18 }
 0x178   :  { %v981_v60 = vadd.f32 %v980_v48, %v918_v0  ;;  %v922_v0 = vmul.f32 %v2411_v22, %v2411_v22 }
 0x179   :  { %v2614_v16 = vpop.f32.mrf.mxu0  ;;  %v2616_v15 = vpop.f32.mrf.mxu1 }
 0x17a   :  { %3484 = vst [vmem:[#allocation22_spill] sm:$0xff] %v2616_v15  ;;  %v919_v31 = vmul.f32 %v2614_v16, %v2614_v16  ;;  %v848_v36 = vadd.f32 %v847_v28, %v2614_v16 }
 0x17b   :  { %v686_v44 = vpop.f32.mrf.mxu0  ;;  %v814_v8 = vpop.f32.mrf.mxu1 }
 0x17c   :  { %v982_v55 = vadd.f32 %v981_v60, %v919_v31  ;;  %v923_v31 = vmul.f32 %v2415_v26, %v2415_v26 }
 0x17d   :  { %v2622_v11 = vpop.f32.mrf.mxu0  ;;  %v2624_v4 = vpop.f32.mrf.mxu1 }
 0x17e   :  { %3485 = vst [vmem:[#allocation23_spill] sm:$0xff] %v2622_v11  ;;  %3486 = vst [vmem:[#allocation24_spill] sm:$0xff] %v2624_v4  ;;  %v849_v51 = vadd.f32 %v848_v36, %v2622_v11  ;;  %v920_v59 = vmul.f32 %v2622_v11, %v2622_v11 }
 0x17f   :  { %v689_v20 = vpop.f32.mrf.mxu0  ;;  %v817_v32 = vpop.f32.mrf.mxu1 }
 0x180   :  { %v850_v8 = vadd.f32 %v849_v51, %v2407_v18  ;;  %v983_v48 = vadd.f32 %v982_v55, %v920_v59  ;;  %v924_v20 = vmul.f32 %v2419_v30, %v2419_v30  ;;  %v925_v51 = vmul.f32 %v2423_v34, %v2423_v34 }
 0x182   :  { %v851_v28 = vadd.f32 %v850_v8, %v2411_v22  ;;  %v984_v44 = vadd.f32 %v983_v48, %v921_v40  ;;  %v926_v40 = vmul.f32 %v2427_v38, %v2427_v38 }
 0x184   :  { %v852_v60 = vadd.f32 %v851_v28, %v2415_v26  ;;  %v985_v36 = vadd.f32 %v984_v44, %v922_v0  ;;  %v927_v0 = vmul.f32 %v2431_v42, %v2431_v42 }
 0x186   :  { %v853_v32 = vadd.f32 %v852_v60, %v2419_v30  ;;  %v986_v11 = vadd.f32 %v985_v36, %v923_v31  ;;  %v928_v31 = vmul.f32 %v2435_v46, %v2435_v46 }
 0x188   :  { %v854_v55 = vadd.f32 %v853_v32, %v2423_v34  ;;  %v987_v59 = vadd.f32 %v986_v11, %v924_v20  ;;  %v929_v11 = vmul.f32 %v2439_v50, %v2439_v50 }
 0x18a   :  { %v855_v8 = vadd.f32 %v854_v55, %v2427_v38  ;;  %v988_v48 = vadd.f32 %v987_v59, %v925_v51  ;;  %v930_v51 = vmul.f32 %v2443_v54, %v2443_v54 }
 0x18c   :  { %v856_v28 = vadd.f32 %v855_v8, %v2431_v42  ;;  %v989_v44 = vadd.f32 %v988_v48, %v926_v40  ;;  %v931_v40 = vmul.f32 %v2447_v58, %v2447_v58 }
 0x18e   :  { %v857_v60 = vadd.f32 %v856_v28, %v2435_v46  ;;  %v990_v36 = vadd.f32 %v989_v44, %v927_v0  ;;  %v932_v0 = vmul.f32 %v2451_v62, %v2451_v62 }
 0x190   :  { %v991_v20 = vadd.f32 %v990_v36, %v928_v31  ;;  %v858_v32 = vadd.f32 %v857_v60, %v2439_v50  ;;  %v933_v31 = vmul.f32 %v2455_v2, %v2455_v2 }
 0x192   :  { %v859_v55 = vadd.f32 %v858_v32, %v2443_v54  ;;  %v992_v59 = vadd.f32 %v991_v20, %v929_v11  ;;  %v934_v11 = vmul.f32 %v2459_v6, %v2459_v6 }
 0x194   :  { %v860_v8 = vadd.f32 %v859_v55, %v2447_v58  ;;  %v993_v48 = vadd.f32 %v992_v59, %v930_v51  ;;  %v935_v51 = vmul.f32 %v2463_v10, %v2463_v10 }
 0x196   :  { %v861_v28 = vadd.f32 %v860_v8, %v2451_v62  ;;  %v994_v44 = vadd.f32 %v993_v48, %v931_v40  ;;  %v936_v40 = vmul.f32 %v2467_v14, %v2467_v14 }
 0x198   :  { %v862_v60 = vadd.f32 %v861_v28, %v2455_v2  ;;  %v995_v36 = vadd.f32 %v994_v44, %v932_v0  ;;  %v937_v0 = vmul.f32 %v2473_v23, %v2473_v23 }
 0x19a   :  { %v863_v20 = vadd.f32 %v862_v60, %v2459_v6  ;;  %v996_v32 = vadd.f32 %v995_v36, %v933_v31  ;;  %v938_v60 = vmul.f32 %v2486_v43, %v2486_v43 }
 0x19c   :  { %v864_v55 = vadd.f32 %v863_v20, %v2463_v10  ;;  %v997_v59 = vadd.f32 %v996_v32, %v934_v11  ;;  %v939_v32 = vmul.f32 %v2496_v63, %v2496_v63 }
 0x19e   :  { %v865_v8 = vadd.f32 %v864_v55, %v2467_v14  ;;  %v998_v48 = vadd.f32 %v997_v59, %v935_v51  ;;  %v940_v59 = vmul.f32 %v2506_v19, %v2506_v19 }
 0x1a0   :  { %v866_v28 = vadd.f32 %v865_v8, %v2473_v23  ;;  %v999_v44 = vadd.f32 %v998_v48, %v936_v40  ;;  %v941_v48 = vmul.f32 %v2516_v47, %v2516_v47 }
 0x1a2   :  { %v867_v31 = vadd.f32 %v866_v28, %v2486_v43  ;;  %v1000_v36 = vadd.f32 %v999_v44, %v937_v0  ;;  %v942_v44 = vmul.f32 %v2526_v7, %v2526_v7 }
 0x1a4   :  { %v1001_v20 = vadd.f32 %v1000_v36, %v938_v60  ;;  %v868_v11 = vadd.f32 %v867_v31, %v2496_v63  ;;  %v943_v36 = vmul.f32 %v2536_v35, %v2536_v35 }
 0x1a6   :  { %v1002_v55 = vadd.f32 %v1001_v20, %v939_v32  ;;  %v869_v51 = vadd.f32 %v868_v11, %v2506_v19  ;;  %v944_v32 = vmul.f32 %v2546_v3, %v2546_v3 }
 0x1a8   :  { %v1003_v8 = vadd.f32 %v1002_v55, %v940_v59  ;;  %v870_v40 = vadd.f32 %v869_v51, %v2516_v47  ;;  %v945_v59 = vmul.f32 %v2556_v39, %v2556_v39 }
 0x1aa   :  { %v1004_v28 = vadd.f32 %v1003_v8, %v941_v48  ;;  %v871_v0 = vadd.f32 %v870_v40, %v2526_v7  ;;  %v946_v48 = vmul.f32 %v2566_v24, %v2566_v24 }
 0x1ac   :  { %v1005_v31 = vadd.f32 %v1004_v28, %v942_v44  ;;  %v872_v60 = vadd.f32 %v871_v0, %v2536_v35  ;;  %v947_v44 = vmul.f32 %v2576_v56, %v2576_v56 }
 0x1ae   :  { %v1006_v20 = vadd.f32 %v1005_v31, %v943_v36  ;;  %v873_v11 = vadd.f32 %v872_v60, %v2546_v3  ;;  %v948_v36 = vmul.f32 %v2586_v12, %v2586_v12 }
 0x1b0   :  { %v1007_v55 = vadd.f32 %v1006_v20, %v944_v32  ;;  %v874_v51 = vadd.f32 %v873_v11, %v2556_v39  ;;  %v949_v32 = vmul.f32 %v2596_v52, %v2596_v52 }
 0x1b2   :  { %v1008_v8 = vadd.f32 %v1007_v55, %v945_v59  ;;  %v875_v40 = vadd.f32 %v874_v51, %v2566_v24  ;;  %v950_v59 = vmul.f32 %v2606_v27, %v2606_v27 }
 0x1b4   :  { %v1009_v28 = vadd.f32 %v1008_v8, %v946_v48  ;;  %v876_v0 = vadd.f32 %v875_v40, %v2576_v56  ;;  %v951_v48 = vmul.f32 %v2616_v15, %v2616_v15 }
 0x1b6   :  { %v1010_v31 = vadd.f32 %v1009_v28, %v947_v44  ;;  %v877_v60 = vadd.f32 %v876_v0, %v2586_v12  ;;  %v952_v44 = vmul.f32 %v2624_v4, %v2624_v4 }
 0x1b8   :  { %v1011_v20 = vadd.f32 %v1010_v31, %v948_v36  ;;  %v878_v11 = vadd.f32 %v877_v60, %v2596_v52 }
 0x1ba   :  { %v1012_v55 = vadd.f32 %v1011_v20, %v949_v32  ;;  %v879_v51 = vadd.f32 %v878_v11, %v2606_v27 }
 0x1bc   :  { %v1013_v8 = vadd.f32 %v1012_v55, %v950_v59  ;;  %v880_v40 = vadd.f32 %v879_v51, %v2616_v15 }
 0x1be   :  { %v1014_v28 = vadd.f32 %v1013_v8, %v951_v48  ;;  %v881_v0 = vadd.f32 %v880_v40, %v2624_v4  ;;  %v1034_v4 = vlaneseq }
 0x1c0   :  { %v882_v31 = vrot.slane %v881_v0, 4  ;;  %v1015_v60 = vadd.f32 %v1014_v28, %v952_v44  ;;  %v2725_v28 = vshrl.u32 %v1034_v4, 7 }
 0x1c2   :  { %v883_v36 = vadd.f32 %v882_v31, %v881_v0  ;;  %v1016_v20 = vrot.slane %v1015_v60, 4  ;;  %v1026_v0 = vld [vmem:[%s3432_s2] sm:$0x1]  ;;  %v3458_v44 = vsub.s32 0, %v2725_v28 }
 0x1c4   :  { %v884_v11 = vrot.slane %v883_v36, 2  ;;  %v1017_v32 = vadd.f32 %v1016_v20, %v1015_v60  ;;  %v3487_v20 = vld [vmem:[#allocation2_spill] sm:$0xff] }
 0x1c6   :  { %v885_v52 = vadd.f32 %v884_v11, %v883_v36  ;;  %v1018_v27 = vrot.slane %v1017_v32, 2  ;;  %v3488_v11 = vld [vmem:[#allocation3_spill] sm:$0xff] }
 0x1c8   :  { %v886_v55 = vrot.slane %v885_v52, 1  ;;  %v1019_v59 = vadd.f32 %v1018_v27, %v1017_v32  ;;  %v3489_v32 = vld [vmem:[#allocation4_spill] sm:$0xff] }
 0x1ca   :  { %v887_v51 = vadd.f32 %v886_v55, %v885_v52  ;;  %v1020_v12 = vrot.slane %v1019_v59, 1  ;;  %v3490_v55 = vld [vmem:[#allocation5_spill] sm:$0xff] }
 0x1cc   :  { %v888_v56 = vmul.f32 0.001953125, %v887_v51  ;;  %v1021_v15 = vadd.f32 %v1020_v12, %v1019_v59  ;;  %v2734_v12 = vld [vmem:[%s3433_s3] sm:$0x1]  ;;  %v3492_v51 = vld [vmem:[#allocation7_spill] sm:$0xff] }
 0x1cd   :  { %v3491_v59 = vld [vmem:[#allocation6_spill] sm:$0xff] }
 0x1ce   :  { %v1022_v8 = vmul.f32 0.001953125, %v1021_v15  ;;  %v1023_v48 = vmul.f32 %v888_v56, %v888_v56 }
 0x1d0   :  { %v1024_v40 = vsub.f32 %v1022_v8, %v1023_v48  ;;  %v3493_v48 = vld [vmem:[#allocation8_spill] sm:$0xff] }
 0x1d2   :  { %v1025_v24 = vmax.f32 %v1024_v40, 0.0 }
 0x1d4   :  { %v1027_v39 = vadd.f32 1e-05, %v1025_v24 }
 0x1d6   :  { %2105 = vrsqrt.f32 %v1027_v39 }
 0x1e3   :  { %v2106_v27 = vpop.eup %2105 }
 0x1e4   :  { %v1029_v52 = vmul.f32 %v2106_v27, %v1026_v0  ;;  %v3494_v0 = vld [vmem:[#allocation9_spill] sm:$0xff] }
 0x1e6   :  { %v2736_v15 = vmul.f32 %v1029_v52, %v888_v56  ;;  %v2740_v39 = vrot.slane %v1029_v52, %v3458_v44  ;;  %v3495_v52 = vld [vmem:[#allocation10_spill] sm:$0xff]  ;;  %v3501_v44 = vld [vmem:[#allocation23_spill] sm:$0xff] }
 0x1e8   :  { %v1032_v24 = vsub.f32 %v2734_v12, %v2736_v15  ;;  %v2746_v4 = vmul.f32 %v2740_v39, %v2405_v17  ;;  %v2750_v31 = vmul.f32 %v2740_v39, %v2409_v21  ;;  %v2754_v60 = vmul.f32 %v2740_v39, %v2413_v25  ;;  %v3496_v15 = vld [vmem:[#allocation12_spill] sm:$0xff] }
 0x1e9   :  { %v2758_v56 = vmul.f32 %v2740_v39, %v2417_v29  ;;  %v2762_v36 = vmul.f32 %v2740_v39, %v2421_v33  ;;  %v2766_v17 = vmul.f32 %v2740_v39, %v2425_v37  ;;  %v2770_v21 = vmul.f32 %v2740_v39, %v2429_v41 }
 0x1ea   :  { %v2774_v25 = vmul.f32 %v2740_v39, %v2433_v45  ;;  %v2778_v29 = vmul.f32 %v2740_v39, %v2437_v49  ;;  %v2782_v33 = vmul.f32 %v2740_v39, %v2441_v53  ;;  %v2786_v37 = vmul.f32 %v2740_v39, %v2445_v57 }
 0x1eb   :  { %v2790_v41 = vmul.f32 %v2740_v39, %v2449_v61  ;;  %v2794_v45 = vmul.f32 %v2740_v39, %v2453_v1  ;;  %v2798_v49 = vmul.f32 %v2740_v39, %v2457_v5  ;;  %v2802_v53 = vmul.f32 %v2740_v39, %v2461_v9 }
 0x1ec   :  { %v2806_v57 = vmul.f32 %v2740_v39, %v2465_v13  ;;  %v2810_v61 = vmul.f32 %v2740_v39, %v3487_v20  ;;  %v2814_v1 = vmul.f32 %v2740_v39, %v3488_v11  ;;  %v2818_v5 = vmul.f32 %v2740_v39, %v3489_v32  ;;  %v3497_v11 = vld [vmem:[#allocation14_spill] sm:$0xff] }
 0x1ed   :  { %v2822_v9 = vmul.f32 %v2740_v39, %v3490_v55  ;;  %v2826_v13 = vmul.f32 %v2740_v39, %v3491_v59  ;;  %v2830_v8 = vmul.f32 %v2740_v39, %v3492_v51  ;;  %v2834_v40 = vmul.f32 %v2740_v39, %v3493_v48  ;;  %v3498_v55 = vld [vmem:[#allocation16_spill] sm:$0xff]  ;;  %v3499_v51 = vld [vmem:[#allocation18_spill] sm:$0xff] }
 0x1ee   :  { %v2838_v27 = vmul.f32 %v2740_v39, %v3494_v0  ;;  %v2842_v12 = vmul.f32 %v2740_v39, %v3495_v52  ;;  %v2846_v20 = vmul.f32 %v2740_v39, %v3496_v15  ;;  %v2850_v32 = vmul.f32 %v2740_v39, %v3497_v11  ;;  %v3500_v0 = vld [vmem:[#allocation20_spill] sm:$0xff] }
 0x1ef   :  { %v2854_v59 = vmul.f32 %v2740_v39, %v3498_v55  ;;  %v2858_v48 = vmul.f32 %v2740_v39, %v3499_v51  ;;  %v2862_v52 = vmul.f32 %v2740_v39, %v3500_v0  ;;  %v2866_v15 = vmul.f32 %v2740_v39, %v2614_v16 }
 0x1f0   :  { %v2870_v11 = vmul.f32 %v2740_v39, %v3501_v44  ;;  %v2874_v55 = vmul.f32 %v2740_v39, %v2407_v18  ;;  %v2878_v51 = vmul.f32 %v2740_v39, %v2411_v22  ;;  %v2882_v0 = vmul.f32 %v2740_v39, %v2415_v26 }
 0x1f1   :  { %v2886_v16 = vmul.f32 %v2740_v39, %v2419_v30  ;;  %v2890_v44 = vmul.f32 %v2740_v39, %v2423_v34  ;;  %v2894_v18 = vmul.f32 %v2740_v39, %v2427_v38  ;;  %v2898_v22 = vmul.f32 %v2740_v39, %v2431_v42 }
 0x1f2   :  { %v2902_v26 = vmul.f32 %v2740_v39, %v2435_v46  ;;  %v2906_v30 = vmul.f32 %v2740_v39, %v2439_v50  ;;  %v2910_v34 = vmul.f32 %v2740_v39, %v2443_v54  ;;  %v2914_v38 = vmul.f32 %v2740_v39, %v2447_v58 }
 0x1f3   :  { %v2918_v42 = vmul.f32 %v2740_v39, %v2451_v62  ;;  %v2922_v46 = vmul.f32 %v2740_v39, %v2455_v2  ;;  %v2926_v50 = vmul.f32 %v2740_v39, %v2459_v6  ;;  %v2930_v54 = vmul.f32 %v2740_v39, %v2463_v10 }
 0x1f4   :  { %v2934_v58 = vmul.f32 %v2740_v39, %v2467_v14  ;;  %v2938_v62 = vmul.f32 %v2740_v39, %v2473_v23  ;;  %v2942_v2 = vmul.f32 %v2740_v39, %v2486_v43  ;;  %v2946_v6 = vmul.f32 %v2740_v39, %v2496_v63 }
 0x1f5   :  { %v2950_v10 = vmul.f32 %v2740_v39, %v2506_v19  ;;  %v2954_v14 = vmul.f32 %v2740_v39, %v2516_v47  ;;  %v2958_v23 = vmul.f32 %v2740_v39, %v2526_v7  ;;  %v2962_v43 = vmul.f32 %v2740_v39, %v2536_v35 }
 0x1f6   :  { %3502 = vst [vmem:[#allocation2_spill] sm:$0xff] %v2946_v6  ;;  %v2966_v63 = vmul.f32 %v2740_v39, %v2546_v3  ;;  %v3508_v6 = vld [vmem:[#allocation11_spill] sm:$0xff] }
 0x1f7   :  { %3503 = vst [vmem:[#allocation3_spill] sm:$0xff] %v2950_v10  ;;  %3504 = vst [vmem:[#allocation4_spill] sm:$0xff] %v2954_v14  ;;  %v2970_v19 = vmul.f32 %v2740_v39, %v3508_v6  ;;  %v3510_v10 = vld [vmem:[#allocation13_spill] sm:$0xff]  ;;  %v3512_v14 = vld [vmem:[#allocation15_spill] sm:$0xff] }
 0x1f8   :  { %3505 = vst [vmem:[#allocation5_spill] sm:$0xff] %v2958_v23  ;;  %3506 = vst [vmem:[#allocation6_spill] sm:$0xff] %v2962_v43  ;;  %v2974_v47 = vmul.f32 %v2740_v39, %v3510_v10  ;;  %v2978_v7 = vmul.f32 %v2740_v39, %v3512_v14  ;;  %v3514_v23 = vld [vmem:[#allocation17_spill] sm:$0xff]  ;;  %v3515_v43 = vsub.s32 0, %v2725_v28 }
 0x1f9   :  { %3507 = vst [vmem:[#allocation7_spill] sm:$0xff] %v2966_v63  ;;  %3509 = vst [vmem:[#allocation8_spill] sm:$0xff] %v2970_v19  ;;  %v2982_v35 = vmul.f32 %v2740_v39, %v3514_v23  ;;  %v3516_v63 = vld [vmem:[#allocation19_spill] sm:$0xff]  ;;  %v3517_v19 = vld [vmem:[#allocation21_spill] sm:$0xff] }
 0x1fa   :  { %3511 = vst [vmem:[#allocation9_spill] sm:$0xff] %v2974_v47  ;;  %3513 = vst [vmem:[#allocation10_spill] sm:$0xff] %v2978_v7  ;;  %v2986_v3 = vrot.slane %v1032_v24, %v3515_v43  ;;  %v2990_v6 = vmul.f32 %v2740_v39, %v3516_v63  ;;  %v2994_v10 = vmul.f32 %v2740_v39, %v3517_v19  ;;  %v3518_v47 = vld [vmem:[#allocation22_spill] sm:$0xff]  ;;  %v3519_v7 = vld [vmem:[#allocation24_spill] sm:$0xff] }
 0x1fb   :  { %v2998_v14 = vmul.f32 %v2740_v39, %v3518_v47  ;;  %v3002_v23 = vmul.f32 %v2740_v39, %v3519_v7 }
 0x1fc   :  { %v3006_v28 = vadd.f32 %v2986_v3, %v2746_v4  ;;  %v3010_v24 = vadd.f32 %v2986_v3, %v2750_v31  ;;  %v3014_v43 = vadd.f32 %v2986_v3, %v2754_v60  ;;  %v3018_v63 = vadd.f32 %v2986_v3, %v2758_v56 }
 0x1fd   :  { %v3022_v39 = vadd.f32 %v2986_v3, %v2762_v36  ;;  %v3026_v4 = vadd.f32 %v2986_v3, %v2766_v17  ;;  %v3030_v31 = vadd.f32 %v2986_v3, %v2770_v21  ;;  %v3034_v60 = vadd.f32 %v2986_v3, %v2774_v25  ;;  %v3528_v19 = vld [vmem:[#allocation2_spill] sm:$0xff] }
 0x1fe   :  { %3520 = vst [vmem:[#allocation12_spill] sm:$0xff] %v3006_v28  ;;  %3521 = vst [vmem:[#allocation14_spill] sm:$0xff] %v3010_v24  ;;  %v3038_v56 = vadd.f32 %v2986_v3, %v2778_v29  ;;  %v3042_v36 = vadd.f32 %v2986_v3, %v2782_v33  ;;  %v3046_v17 = vadd.f32 %v2986_v3, %v2786_v37  ;;  %v3530_v47 = vld [vmem:[#allocation3_spill] sm:$0xff]  ;;  %v3532_v7 = vld [vmem:[#allocation4_spill] sm:$0xff] }
 0x1ff   :  { %3522 = vst [vmem:[#allocation16_spill] sm:$0xff] %v3014_v43  ;;  %3523 = vst [vmem:[#allocation18_spill] sm:$0xff] %v3018_v63  ;;  %v3050_v21 = vadd.f32 %v2986_v3, %v2790_v41  ;;  %v3054_v25 = vadd.f32 %v2986_v3, %v2794_v45  ;;  %v3058_v29 = vadd.f32 %v2986_v3, %v2798_v49 }
 0x200   :  { %3524 = vst [vmem:[#allocation20_spill] sm:$0xff] %v3022_v39  ;;  %v3062_v33 = vadd.f32 %v2986_v3, %v2802_v53  ;;  %v3066_v37 = vadd.f32 %v2986_v3, %v2806_v57  ;;  %v3070_v41 = vadd.f32 %v2986_v3, %v2810_v61  ;;  %v3074_v45 = vadd.f32 %v2986_v3, %v2814_v1 }
 0x201   :  { %v3078_v49 = vadd.f32 %v2986_v3, %v2818_v5  ;;  %v3082_v53 = vadd.f32 %v2986_v3, %v2822_v9  ;;  %v3086_v57 = vadd.f32 %v2986_v3, %v2826_v13  ;;  %v3090_v61 = vadd.f32 %v2986_v3, %v2830_v8 }
 0x202   :  { %v3094_v1 = vadd.f32 %v2986_v3, %v2834_v40  ;;  %v3098_v5 = vadd.f32 %v2986_v3, %v2838_v27  ;;  %v3102_v9 = vadd.f32 %v2986_v3, %v2842_v12  ;;  %v3106_v13 = vadd.f32 %v2986_v3, %v2846_v20 }
 0x203   :  { %v3110_v8 = vadd.f32 %v2986_v3, %v2850_v32  ;;  %v3114_v40 = vadd.f32 %v2986_v3, %v2854_v59  ;;  %v3118_v27 = vadd.f32 %v2986_v3, %v2858_v48  ;;  %v3122_v12 = vadd.f32 %v2986_v3, %v2862_v52 }
 0x204   :  { %v3126_v20 = vadd.f32 %v2986_v3, %v2866_v15  ;;  %v3130_v32 = vadd.f32 %v2986_v3, %v2870_v11  ;;  %v3134_v59 = vadd.f32 %v2986_v3, %v2874_v55  ;;  %v3138_v48 = vadd.f32 %v2986_v3, %v2878_v51 }
 0x205   :  { %v3142_v52 = vadd.f32 %v2986_v3, %v2882_v0  ;;  %v3146_v15 = vadd.f32 %v2986_v3, %v2886_v16  ;;  %v3150_v11 = vadd.f32 %v2986_v3, %v2890_v44  ;;  %v3154_v55 = vadd.f32 %v2986_v3, %v2894_v18 }
 0x206   :  { %v3158_v51 = vadd.f32 %v2986_v3, %v2898_v22  ;;  %v3162_v0 = vadd.f32 %v2986_v3, %v2902_v26  ;;  %v3166_v16 = vadd.f32 %v2986_v3, %v2906_v30  ;;  %v3170_v44 = vadd.f32 %v2986_v3, %v2910_v34 }
 0x207   :  { %v3174_v18 = vadd.f32 %v2986_v3, %v2914_v38  ;;  %v3178_v22 = vadd.f32 %v2986_v3, %v2918_v42  ;;  %v3182_v26 = vadd.f32 %v2986_v3, %v2922_v46  ;;  %v3186_v30 = vadd.f32 %v2986_v3, %v2926_v50 }
 0x208   :  { %v3190_v34 = vadd.f32 %v2986_v3, %v2930_v54  ;;  %v3194_v38 = vadd.f32 %v2986_v3, %v2934_v58  ;;  %v3198_v42 = vadd.f32 %v2986_v3, %v2938_v62  ;;  %v3202_v46 = vadd.f32 %v2986_v3, %v2942_v2 }
 0x209   :  { %v3206_v50 = vadd.f32 %v2986_v3, %v3528_v19  ;;  %v3210_v54 = vadd.f32 %v2986_v3, %v3530_v47  ;;  %v3214_v58 = vadd.f32 %v2986_v3, %v3532_v7 }
 0x20a   :  { %3525 = vst [vmem:[#allocation23_spill] sm:$0xff] %v3194_v38  ;;  %3526 = vst [vmem:[#allocation11_spill] sm:$0xff] %v3198_v42  ;;  %v3534_v38 = vld [vmem:[#allocation5_spill] sm:$0xff]  ;;  %v3535_v42 = vld [vmem:[#allocation6_spill] sm:$0xff] }
 0x20b   :  { %3527 = vst [vmem:[#allocation13_spill] sm:$0xff] %v3202_v46  ;;  %3529 = vst [vmem:[#allocation15_spill] sm:$0xff] %v3206_v50  ;;  %v3218_v62 = vadd.f32 %v2986_v3, %v3534_v38  ;;  %v3222_v2 = vadd.f32 %v2986_v3, %v3535_v42  ;;  %v3536_v46 = vld [vmem:[#allocation7_spill] sm:$0xff]  ;;  %v3537_v50 = vld [vmem:[#allocation8_spill] sm:$0xff]  ;;  %v3242_v42 = vadd.f32 %v2986_v3, %v2982_v35  ;;  %v1184_v35 = vmax.f32 %v3050_v21, 0.0 }
 0x20c   :  { %3531 = vst [vmem:[#allocation17_spill] sm:$0xff] %v3210_v54  ;;  %3533 = vst [vmem:[#allocation19_spill] sm:$0xff] %v3214_v58  ;;  %v3226_v19 = vadd.f32 %v2986_v3, %v3536_v46  ;;  %v3230_v47 = vadd.f32 %v2986_v3, %v3537_v50  ;;  %v3538_v54 = vld [vmem:[#allocation9_spill] sm:$0xff]  ;;  %v3539_v58 = vld [vmem:[#allocation10_spill] sm:$0xff]  ;;  %v3246_v46 = vadd.f32 %v2986_v3, %v2990_v6  ;;  %v1186_v6 = vmax.f32 %v3058_v29, 0.0 }
 0x20d   :  { %v3234_v7 = vadd.f32 %v2986_v3, %v3538_v54  ;;  %v3238_v38 = vadd.f32 %v2986_v3, %v3539_v58  ;;  %3541 = vst [vmem:[#allocation22_spill] sm:$0xff] %v3242_v42  ;;  %v3250_v50 = vadd.f32 %v2986_v3, %v2994_v10  ;;  %v3254_v54 = vadd.f32 %v2986_v3, %v2998_v14 }
 0x20e   :  { %3542 = vst [vmem:[#allocation24_spill] sm:$0xff] %v3246_v46  ;;  %v3258_v58 = vadd.f32 %v2986_v3, %v3002_v23  ;;  %v1178_v10 = vmax.f32 %v3026_v4, 0.0  ;;  %v1180_v14 = vmax.f32 %v3034_v60, 0.0  ;;  %v1182_v3 = vmax.f32 %v3042_v36, 0.0 }
 0x20f   :  { %3540 = vst [vmem:[#allocation21_spill] sm:$0xff] %v3238_v38  ;;  %3543 = vst [vmem:[#allocation2_spill] sm:$0xff] %v3250_v50  ;;  %v1179_v50 = vmax.f32 %v3030_v31, 0.0  ;;  %v1183_v23 = vmax.f32 %v3046_v17, 0.0  ;;  %v1185_v42 = vmax.f32 %v3054_v25, 0.0  ;;  %v1187_v46 = vmax.f32 %v3062_v33, 0.0 }
 0x210   :  { %3544 = vst [vmem:[#allocation3_spill] sm:$0xff] %v3254_v54  ;;  %3545 = vst [vmem:[#allocation4_spill] sm:$0xff] %v3258_v58  ;;  %v1181_v54 = vmax.f32 %v3038_v56, 0.0  ;;  %v1188_v4 = vmax.f32 %v3066_v37, 0.0  ;;  %v1189_v31 = vmax.f32 %v3070_v41, 0.0  ;;  %v1190_v60 = vmax.f32 %v3074_v45, 0.0 }
 0x211   :  { %v1191_v56 = vmax.f32 %v3078_v49, 0.0  ;;  %v1192_v36 = vmax.f32 %v3082_v53, 0.0  ;;  %v1193_v17 = vmax.f32 %v3086_v57, 0.0  ;;  %v1194_v21 = vmax.f32 %v3090_v61, 0.0  ;;  %v3546_v38 = vld [vmem:[#allocation23_spill] sm:$0xff] }
 0x212   :  { %v1195_v25 = vmax.f32 %v3094_v1, 0.0  ;;  %v1196_v29 = vmax.f32 %v3098_v5, 0.0  ;;  %v1197_v33 = vmax.f32 %v3102_v9, 0.0  ;;  %v1198_v37 = vmax.f32 %v3106_v13, 0.0  ;;  %v3547_v39 = vld [vmem:[#allocation11_spill] sm:$0xff]  ;;  %v3548_v63 = vld [vmem:[#allocation13_spill] sm:$0xff] }
 0x213   :  { %v1199_v41 = vmax.f32 %v3110_v8, 0.0  ;;  %v1200_v45 = vmax.f32 %v3114_v40, 0.0  ;;  %v1201_v49 = vmax.f32 %v3118_v27, 0.0  ;;  %v1202_v53 = vmax.f32 %v3122_v12, 0.0  ;;  %v3549_v43 = vld [vmem:[#allocation15_spill] sm:$0xff]  ;;  %v3550_v24 = vld [vmem:[#allocation17_spill] sm:$0xff] }
 0x214   :  { %v1203_v57 = vmax.f32 %v3126_v20, 0.0  ;;  %v1204_v61 = vmax.f32 %v3130_v32, 0.0  ;;  %v1205_v1 = vmax.f32 %v3134_v59, 0.0  ;;  %v1206_v5 = vmax.f32 %v3138_v48, 0.0  ;;  %v3551_v28 = vld [vmem:[#allocation19_spill] sm:$0xff] }
 0x215   :  { %v1207_v9 = vmax.f32 %v3142_v52, 0.0  ;;  %v1208_v13 = vmax.f32 %v3146_v15, 0.0  ;;  %v1209_v8 = vmax.f32 %v3150_v11, 0.0  ;;  %v1210_v40 = vmax.f32 %v3154_v55, 0.0 }
 0x216   :  { %v1211_v27 = vmax.f32 %v3158_v51, 0.0  ;;  %v1212_v12 = vmax.f32 %v3162_v0, 0.0  ;;  %v1213_v20 = vmax.f32 %v3166_v16, 0.0  ;;  %v1214_v32 = vmax.f32 %v3170_v44, 0.0  ;;  %v3552_v58 = vld [vmem:[#allocation21_spill] sm:$0xff] }
 0x217   :  { %v1215_v59 = vmax.f32 %v3174_v18, 0.0  ;;  %v1216_v48 = vmax.f32 %v3178_v22, 0.0  ;;  %v1217_v52 = vmax.f32 %v3182_v26, 0.0  ;;  %v1218_v15 = vmax.f32 %v3186_v30, 0.0 }
 0x218   :  { %v1219_v11 = vmax.f32 %v3190_v34, 0.0  ;;  %v1220_v55 = vmax.f32 %v3546_v38, 0.0  ;;  %v1221_v51 = vmax.f32 %v3547_v39, 0.0  ;;  %v1222_v0 = vmax.f32 %v3548_v63, 0.0  ;;  %v3553_v63 = vld [vmem:[#allocation22_spill] sm:$0xff] }
 0x219   :  { %v1223_v16 = vmax.f32 %v3549_v43, 0.0  ;;  %v1224_v44 = vmax.f32 %v3550_v24, 0.0  ;;  %v1225_v18 = vmax.f32 %v3551_v28, 0.0  ;;  %v1226_v22 = vmax.f32 %v3218_v62, 0.0  ;;  %v3554_v24 = vld [vmem:[#allocation24_spill] sm:$0xff]  ;;  %v3555_v62 = vld [vmem:[#allocation2_spill] sm:$0xff] }
 0x21a   :  { %v1227_v26 = vmax.f32 %v3222_v2, 0.0  ;;  %v1228_v30 = vmax.f32 %v3226_v19, 0.0  ;;  %v1229_v34 = vmax.f32 %v3230_v47, 0.0  ;;  %v1230_v38 = vmax.f32 %v3234_v7, 0.0  ;;  %v3556_v19 = vld [vmem:[#allocation3_spill] sm:$0xff]  ;;  %v3557_v7 = vld [vmem:[#allocation4_spill] sm:$0xff] }
 0x21b   :  { %v1231_v39 = vmax.f32 %v3552_v58, 0.0  ;;  %v1232_v43 = vmax.f32 %v3553_v63, 0.0  ;;  %v1233_v28 = vmax.f32 %v3554_v24, 0.0  ;;  %v1234_v2 = vmax.f32 %v3555_v62, 0.0  ;;  %v3558_v63 = vld [vmem:[#allocation12_spill] sm:$0xff]  ;;  %v3560_v62 = vld [vmem:[#allocation14_spill] sm:$0xff] }
 0x21c   :  { %v1235_v47 = vmax.f32 %v3556_v19, 0.0  ;;  %v1236_v58 = vmax.f32 %v3557_v7, 0.0  ;;  %v3559_v24 = vmax.f32 %v3558_v63, 0.0  ;;  %v3561_v19 = vmax.f32 %v3560_v62, 0.0  ;;  %v3562_v63 = vld [vmem:[#allocation16_spill] sm:$0xff] }
 0x21d   :  { %v3563_v62 = vmax.f32 %v3562_v63, 0.0 }
 0x21e   :  { %v1772_v7 = vpack.c.bf16 %v3561_v19, %v3559_v24  ;;  %v3564_v19 = vld [vmem:[#allocation18_spill] sm:$0xff] }
 0x21f   :  { %v3565_v24 = vmax.f32 %v3564_v19, 0.0  ;;  %v3566_v19 = vld [vmem:[#allocation20_spill] sm:$0xff] }
 0x220   :  { %1773 = vst [vmem:[%s3434_s4] sm:$0xff] %v1772_v7  }
 0x221   :  { %v1777_v63 = vpack.c.bf16 %v3565_v24, %v3563_v62  ;;  %v3567_v24 = vmax.f32 %v3566_v19, 0.0  ;;  %v1787_v19 = vpack.c.bf16 %v1180_v14, %v1179_v50  ;;  %v1802_v14 = vpack.c.bf16 %v1186_v6, %v1185_v42 }
 0x222   :  { %v1807_v50 = vpack.c.bf16 %v1188_v4, %v1187_v46  ;;  %v1822_v42 = vpack.c.bf16 %v1194_v21, %v1193_v17  ;;  %v1827_v46 = vpack.c.bf16 %v1196_v29, %v1195_v25  ;;  %v1832_v6 = vpack.c.bf16 %v1198_v37, %v1197_v33 }
 0x223   :  { %v1782_v62 = vpack.c.bf16 %v1178_v10, %v3567_v24  ;;  %v1792_v10 = vpack.c.bf16 %v1182_v3, %v1181_v54  ;;  %v1797_v24 = vpack.c.bf16 %v1184_v35, %v1183_v23  ;;  %1929 = vst [vmem:[%s3434_s4 + $0x8] sm:$0xff] %v1777_v63   ;;  %1931 = vst [vmem:[%s3434_s4 + $0x18] sm:$0xff] %v1787_v19  }
 0x224   :  { %v1812_v54 = vpack.c.bf16 %v1190_v60, %v1189_v31  ;;  %v1817_v35 = vpack.c.bf16 %v1192_v36, %v1191_v56  ;;  %1934 = vst [vmem:[%s3434_s4 + $0x30] sm:$0xff] %v1802_v14   ;;  %1935 = vst [vmem:[%s3434_s4 + $0x38] sm:$0xff] %v1807_v50   ;;  %v1837_v3 = vpack.c.bf16 %v1200_v45, %v1199_v41 }
 0x225   :  { %1930 = vst [vmem:[%s3434_s4 + $0x10] sm:$0xff] %v1782_v62   ;;  %1932 = vst [vmem:[%s3434_s4 + $0x20] sm:$0xff] %v1792_v10   ;;  %v1842_v23 = vpack.c.bf16 %v1202_v53, %v1201_v49  ;;  %v1847_v4 = vpack.c.bf16 %v1204_v61, %v1203_v57  ;;  %v1852_v31 = vpack.c.bf16 %v1206_v5, %v1205_v1 }
 0x226   :  { %1933 = vst [vmem:[%s3434_s4 + $0x28] sm:$0xff] %v1797_v24   ;;  %1936 = vst [vmem:[%s3434_s4 + $0x40] sm:$0xff] %v1812_v54   ;;  %v1857_v60 = vpack.c.bf16 %v1208_v13, %v1207_v9  ;;  %v1862_v56 = vpack.c.bf16 %v1210_v40, %v1209_v8  ;;  %v1867_v36 = vpack.c.bf16 %v1212_v12, %v1211_v27 }
 0x227   :  { %1937 = vst [vmem:[%s3434_s4 + $0x48] sm:$0xff] %v1817_v35   ;;  %1938 = vst [vmem:[%s3434_s4 + $0x50] sm:$0xff] %v1822_v42   ;;  %v1872_v17 = vpack.c.bf16 %v1214_v32, %v1213_v20  ;;  %v1877_v21 = vpack.c.bf16 %v1216_v48, %v1215_v59  ;;  %v1882_v25 = vpack.c.bf16 %v1218_v15, %v1217_v52 }
 0x228   :  { %1939 = vst [vmem:[%s3434_s4 + $0x58] sm:$0xff] %v1827_v46   ;;  %1940 = vst [vmem:[%s3434_s4 + $0x60] sm:$0xff] %v1832_v6   ;;  %v1887_v29 = vpack.c.bf16 %v1220_v55, %v1219_v11  ;;  %v1892_v33 = vpack.c.bf16 %v1222_v0, %v1221_v51  ;;  %v1897_v37 = vpack.c.bf16 %v1224_v44, %v1223_v16 }
 0x229   :  { %1941 = vst [vmem:[%s3434_s4 + $0x68] sm:$0xff] %v1837_v3   ;;  %1942 = vst [vmem:[%s3434_s4 + $0x70] sm:$0xff] %v1842_v23   ;;  %v1902_v41 = vpack.c.bf16 %v1226_v22, %v1225_v18  ;;  %v1907_v45 = vpack.c.bf16 %v1228_v30, %v1227_v26  ;;  %v1912_v49 = vpack.c.bf16 %v1230_v38, %v1229_v34 }
 0x22a   :  { %1943 = vst [vmem:[%s3434_s4 + $0x78] sm:$0xff] %v1847_v4   ;;  %1944 = vst [vmem:[%s3434_s4 + $0x80] sm:$0xff] %v1852_v31   ;;  %v1917_v53 = vpack.c.bf16 %v1232_v43, %v1231_v39  ;;  %v1922_v57 = vpack.c.bf16 %v1234_v2, %v1233_v28  ;;  %v1927_v61 = vpack.c.bf16 %v1236_v58, %v1235_v47 }
 0x22b   :  { %1945 = vst [vmem:[%s3434_s4 + $0x88] sm:$0xff] %v1857_v60   ;;  %1946 = vst [vmem:[%s3434_s4 + $0x90] sm:$0xff] %v1862_v56  }
 0x22c   :  { %1947 = vst [vmem:[%s3434_s4 + $0x98] sm:$0xff] %v1867_v36   ;;  %1948 = vst [vmem:[%s3434_s4 + $0xa0] sm:$0xff] %v1872_v17  }
 0x22d   :  { %1949 = vst [vmem:[%s3434_s4 + $0xa8] sm:$0xff] %v1877_v21   ;;  %1950 = vst [vmem:[%s3434_s4 + $0xb0] sm:$0xff] %v1882_v25  }
 0x22e   :  { %1951 = vst [vmem:[%s3434_s4 + $0xb8] sm:$0xff] %v1887_v29   ;;  %1952 = vst [vmem:[%s3434_s4 + $0xc0] sm:$0xff] %v1892_v33  }
 0x22f   :  { %1953 = vst [vmem:[%s3434_s4 + $0xc8] sm:$0xff] %v1897_v37   ;;  %1954 = vst [vmem:[%s3434_s4 + $0xd0] sm:$0xff] %v1902_v41  }
 0x230   :  { %1955 = vst [vmem:[%s3434_s4 + $0xd8] sm:$0xff] %v1907_v45   ;;  %1956 = vst [vmem:[%s3434_s4 + $0xe0] sm:$0xff] %v1912_v49  }
 0x231   :  { %1957 = vst [vmem:[%s3434_s4 + $0xe8] sm:$0xff] %v1917_v53   ;;  %1958 = vst [vmem:[%s3434_s4 + $0xf0] sm:$0xff] %v1922_v57  }
 0x232   :  { %1959 = vst [vmem:[%s3434_s4 + $0xf8] sm:$0xff] %v1927_v61  }

// kernel: resnet_forward.12
= control target key start
LH: loop header
LB: loop body
LE: loop exit
PB: predicated region body
PF: predicated region fallthrough
CT: control target
= control target key end

     0   :  { %v2461_v0 = vmov 0   ;;  %s4341_s1 = inlined_call_operand.vmem [shape: bf16[256,128], index: 1, kind: input, shape index: {}]   ;;  %s4342_s0 = inlined_call_operand.vmem [shape: bf16[512,256], index: 0, kind: input, shape index: {}]   ;;  %s4343_s4 = inlined_call_operand.vmem [shape: bf16[512,128], index: 4, kind: input, shape index: {}]   ;;  %s4344_s2 = inlined_call_operand.vmem [shape: f32[1,128], index: 2, kind: input, shape index: {}]   ;;  %s4345_s3 = inlined_call_operand.vmem [shape: f32[1,128], index: 3, kind: input, shape index: {}]   ;;  %s4346_s5 = inlined_call_operand.vmem [shape: bf16[512,128], index: 5, kind: output, shape index: {}]  }
   0x1   :  { %533 = vmatprep.subr.bf16.mxu0 %v2461_v0  ;;  %v2347_v1 = vld [vmem:[%s4341_s1 + $0x38] sm:$0xff]   ;;  %2314 = vmatprep.subr.bf16.mxu1 %v2461_v0  ;;  %v2348_v2 = vld [vmem:[%s4341_s1 + $0x30] sm:$0xff]   ;;  %v2349_v3 = vld [vmem:[%s4341_s1 + $0x28] sm:$0xff]  }
   0x2   :  { %534 = vmatpush1.bf16.msra.mxu0 %v2347_v1  ;;  %2330 = vmatpush1.bf16.msra.mxu1 %v2347_v1  ;;  %v2350_v4 = vld [vmem:[%s4341_s1 + $0x20] sm:$0xff]   ;;  %v2351_v5 = vld [vmem:[%s4341_s1 + $0x18] sm:$0xff]   ;;  %v2352_v7 = vld [vmem:[%s4341_s1 + $0x10] sm:$0xff]  }
   0x3   :  { %535 = vmatprep.subr.bf16.mxu0 %v2461_v0  ;;  %2315 = vmatprep.subr.bf16.mxu1 %v2461_v0  ;;  %v2365_v6 = vld [vmem:[%s4342_s0 + $0x4] ss:$8 sps:$4 sm:$0xff]   ;;  %v2355_v11 = vld [vmem:[%s4341_s1 + $0x78] sm:$0xff]   ;;  %v2356_v12 = vld [vmem:[%s4341_s1 + $0x70] sm:$0xff]  }
   0x4   :  { %565 = vmatprep.mubr.bf16.mxu0 %v2365_v6  ;;  %v2353_v8 = vld [vmem:[%s4341_s1 + $0x8] sm:$0xff]   ;;  %v2354_v9 = vld [vmem:[%s4341_s1] sm:$0xff]   ;;  %v2359_v15 = vld [vmem:[%s4341_s1 + $0x58] sm:$0xff]  }
   0x5   :  { %v2389_v10 = vld [vmem:[%s4342_s0 + $0x104] ss:$8 sps:$4 sm:$0xff]   ;;  %v2360_v16 = vld [vmem:[%s4341_s1 + $0x50] sm:$0xff]   ;;  %v2363_v19 = vld [vmem:[%s4342_s0] ss:$8 sps:$4 sm:$0xff]  }
   0x6   :  { %536 = vmatpush1.bf16.msra.mxu0 %v2348_v2  ;;  %2331 = vmatpush1.bf16.msra.mxu1 %v2348_v2  ;;  %v2357_v13 = vld [vmem:[%s4341_s1 + $0x68] sm:$0xff]   ;;  %v2358_v14 = vld [vmem:[%s4341_s1 + $0x60] sm:$0xff]   ;;  %v2366_v21 = vld [vmem:[%s4342_s0 + $0x14] ss:$8 sps:$4 sm:$0xff]  }
   0x7   :  { %537 = vmatprep.subr.bf16.mxu0 %v2461_v0  ;;  %2316 = vmatprep.subr.bf16.mxu1 %v2461_v0  ;;  %v2361_v17 = vld [vmem:[%s4341_s1 + $0x48] sm:$0xff]   ;;  %v2362_v18 = vld [vmem:[%s4341_s1 + $0x40] sm:$0xff]   ;;  %v2393_v22 = vld [vmem:[%s4342_s0 + $0x114] ss:$8 sps:$4 sm:$0xff]  }
   0x8   :  { %693 = vmatprep.mubr.bf16.mxu1 %v2389_v10  ;;  %v2387_v20 = vld [vmem:[%s4342_s0 + $0x100] ss:$8 sps:$4 sm:$0xff]   ;;  %v2368_v23 = vld [vmem:[%s4342_s0 + $0x10] ss:$8 sps:$4 sm:$0xff]   ;;  %v2369_v25 = vld [vmem:[%s4342_s0 + $0x24] ss:$8 sps:$4 sm:$0xff]  }
   0x9   :  { %v2395_v24 = vld [vmem:[%s4342_s0 + $0x110] ss:$8 sps:$4 sm:$0xff]   ;;  %v2399_v26 = vld [vmem:[%s4342_s0 + $0x124] ss:$8 sps:$4 sm:$0xff]   ;;  %v2371_v27 = vld [vmem:[%s4342_s0 + $0x20] ss:$8 sps:$4 sm:$0xff]  }
   0xa   :  { %538 = vmatpush1.bf16.msra.mxu0 %v2349_v3  ;;  %2332 = vmatpush1.bf16.msra.mxu1 %v2349_v3  ;;  %v2401_v28 = vld [vmem:[%s4342_s0 + $0x120] ss:$8 sps:$4 sm:$0xff]   ;;  %v2372_v29 = vld [vmem:[%s4342_s0 + $0x34] ss:$8 sps:$4 sm:$0xff]   ;;  %v2374_v31 = vld [vmem:[%s4342_s0 + $0x30] ss:$8 sps:$4 sm:$0xff]  }
   0xb   :  { %539 = vmatprep.subr.bf16.mxu0 %v2461_v0  ;;  %2317 = vmatprep.subr.bf16.mxu1 %v2461_v0  ;;  %v2405_v30 = vld [vmem:[%s4342_s0 + $0x134] ss:$8 sps:$4 sm:$0xff]   ;;  %v2407_v32 = vld [vmem:[%s4342_s0 + $0x130] ss:$8 sps:$4 sm:$0xff]   ;;  %v2375_v33 = vld [vmem:[%s4342_s0 + $0x44] ss:$8 sps:$4 sm:$0xff]  }
   0xc   :  { %v2411_v34 = vld [vmem:[%s4342_s0 + $0x144] ss:$8 sps:$4 sm:$0xff]   ;;  %v2377_v35 = vld [vmem:[%s4342_s0 + $0x40] ss:$8 sps:$4 sm:$0xff]   ;;  %v2378_v37 = vld [vmem:[%s4342_s0 + $0x54] ss:$8 sps:$4 sm:$0xff]  }
   0xd   :  { %v2413_v36 = vld [vmem:[%s4342_s0 + $0x140] ss:$8 sps:$4 sm:$0xff]   ;;  %v2417_v38 = vld [vmem:[%s4342_s0 + $0x154] ss:$8 sps:$4 sm:$0xff]   ;;  %v2380_v39 = vld [vmem:[%s4342_s0 + $0x50] ss:$8 sps:$4 sm:$0xff]  }
   0xe   :  { %540 = vmatpush1.bf16.msra.mxu0 %v2350_v4  ;;  %2333 = vmatpush1.bf16.msra.mxu1 %v2350_v4  ;;  %v2419_v40 = vld [vmem:[%s4342_s0 + $0x150] ss:$8 sps:$4 sm:$0xff]   ;;  %v2381_v41 = vld [vmem:[%s4342_s0 + $0x64] ss:$8 sps:$4 sm:$0xff]   ;;  %v2383_v43 = vld [vmem:[%s4342_s0 + $0x60] ss:$8 sps:$4 sm:$0xff]  }
   0xf   :  { %541 = vmatprep.subr.bf16.mxu0 %v2461_v0  ;;  %2318 = vmatprep.subr.bf16.mxu1 %v2461_v0  ;;  %v2423_v42 = vld [vmem:[%s4342_s0 + $0x164] ss:$8 sps:$4 sm:$0xff]   ;;  %v2425_v44 = vld [vmem:[%s4342_s0 + $0x160] ss:$8 sps:$4 sm:$0xff]   ;;  %v2384_v45 = vld [vmem:[%s4342_s0 + $0x74] ss:$8 sps:$4 sm:$0xff]  }
  0x10   :  { %v2429_v46 = vld [vmem:[%s4342_s0 + $0x174] ss:$8 sps:$4 sm:$0xff]   ;;  %v2386_v47 = vld [vmem:[%s4342_s0 + $0x70] ss:$8 sps:$4 sm:$0xff]   ;;  %v2390_v49 = vld [vmem:[%s4342_s0 + $0x84] ss:$8 sps:$4 sm:$0xff]  }
  0x11   :  { %v2431_v48 = vld [vmem:[%s4342_s0 + $0x170] ss:$8 sps:$4 sm:$0xff]   ;;  %v2435_v50 = vld [vmem:[%s4342_s0 + $0x184] ss:$8 sps:$4 sm:$0xff]   ;;  %v2392_v51 = vld [vmem:[%s4342_s0 + $0x80] ss:$8 sps:$4 sm:$0xff]  }
  0x12   :  { %542 = vmatpush1.bf16.msra.mxu0 %v2351_v5  ;;  %2334 = vmatpush1.bf16.msra.mxu1 %v2351_v5  ;;  %v2437_v52 = vld [vmem:[%s4342_s0 + $0x180] ss:$8 sps:$4 sm:$0xff]   ;;  %v2396_v53 = vld [vmem:[%s4342_s0 + $0x94] ss:$8 sps:$4 sm:$0xff]   ;;  %v2398_v55 = vld [vmem:[%s4342_s0 + $0x90] ss:$8 sps:$4 sm:$0xff]  }
  0x13   :  { %543 = vmatprep.subr.bf16.mxu0 %v2461_v0  ;;  %2319 = vmatprep.subr.bf16.mxu1 %v2461_v0  ;;  %v2438_v54 = vld [vmem:[%s4342_s0 + $0x194] ss:$8 sps:$4 sm:$0xff]   ;;  %v2440_v56 = vld [vmem:[%s4342_s0 + $0x190] ss:$8 sps:$4 sm:$0xff]   ;;  %v2402_v57 = vld [vmem:[%s4342_s0 + $0xa4] ss:$8 sps:$4 sm:$0xff]  }
  0x14   :  { %v2441_v58 = vld [vmem:[%s4342_s0 + $0x1a4] ss:$8 sps:$4 sm:$0xff]   ;;  %v2404_v59 = vld [vmem:[%s4342_s0 + $0xa0] ss:$8 sps:$4 sm:$0xff]   ;;  %v2408_v61 = vld [vmem:[%s4342_s0 + $0xb4] ss:$8 sps:$4 sm:$0xff]  }
  0x15   :  { %v2443_v60 = vld [vmem:[%s4342_s0 + $0x1a0] ss:$8 sps:$4 sm:$0xff]   ;;  %v2444_v62 = vld [vmem:[%s4342_s0 + $0x1b4] ss:$8 sps:$4 sm:$0xff]   ;;  %v2410_v63 = vld [vmem:[%s4342_s0 + $0xb0] ss:$8 sps:$4 sm:$0xff]  }
  0x16   :  { %544 = vmatpush1.bf16.msra.mxu0 %v2352_v7  ;;  %2335 = vmatpush1.bf16.msra.mxu1 %v2352_v7  ;;  %v2414_v1 = vld [vmem:[%s4342_s0 + $0xc4] ss:$8 sps:$4 sm:$0xff]   ;;  %v2416_v3 = vld [vmem:[%s4342_s0 + $0xc0] ss:$8 sps:$4 sm:$0xff]   ;;  %v2420_v5 = vld [vmem:[%s4342_s0 + $0xd4] ss:$8 sps:$4 sm:$0xff]  }
  0x17   :  { %545 = vmatprep.subr.bf16.mxu0 %v2461_v0  ;;  %2320 = vmatprep.subr.bf16.mxu1 %v2461_v0  ;;  %v2447_v2 = vld [vmem:[%s4342_s0 + $0x1c4] ss:$8 sps:$4 sm:$0xff]   ;;  %v2449_v4 = vld [vmem:[%s4342_s0 + $0x1c0] ss:$8 sps:$4 sm:$0xff]   ;;  %v2450_v6 = vld [vmem:[%s4342_s0 + $0x1d4] ss:$8 sps:$4 sm:$0xff]  }
  0x18   :  { %v2422_v7 = vld [vmem:[%s4342_s0 + $0xd0] ss:$8 sps:$4 sm:$0xff]   ;;  %v2453_v10 = vld [vmem:[%s4342_s0 + $0x1e4] ss:$8 sps:$4 sm:$0xff]  }
  0x1a   :  { %546 = vmatpush1.bf16.msra.mxu0 %v2353_v8  ;;  %2336 = vmatpush1.bf16.msra.mxu1 %v2353_v8  ;;  %v2452_v8 = vld [vmem:[%s4342_s0 + $0x1d0] ss:$8 sps:$4 sm:$0xff]  }
  0x1b   :  { %547 = vmatprep.subr.bf16.mxu0 %v2461_v0  ;;  %2321 = vmatprep.subr.bf16.mxu1 %v2461_v0 }
  0x1e   :  { %548 = vmatpush1.bf16.msra.mxu0 %v2354_v9  ;;  %2337 = vmatpush1.bf16.msra.mxu1 %v2354_v9  ;;  %v2426_v9 = vld [vmem:[%s4342_s0 + $0xe4] ss:$8 sps:$4 sm:$0xff]  }
  0x1f   :  { %549 = vmatprep.subr.bf16.mxu0 %v2461_v0  ;;  %2322 = vmatprep.subr.bf16.mxu1 %v2461_v0 }
  0x22   :  { %550 = vmatpush2.bf16.msra.mxu0 %v2355_v11  ;;  %2338 = vmatpush2.bf16.msra.mxu1 %v2355_v11  ;;  %v2428_v11 = vld [vmem:[%s4342_s0 + $0xe0] ss:$8 sps:$4 sm:$0xff]  }
  0x23   :  { %551 = vmatprep.subr.bf16.mxu0 %v2461_v0  ;;  %2323 = vmatprep.subr.bf16.mxu1 %v2461_v0 }
  0x26   :  { %552 = vmatpush2.bf16.msra.mxu0 %v2356_v12  ;;  %2339 = vmatpush2.bf16.msra.mxu1 %v2356_v12  ;;  %v2455_v12 = vld [vmem:[%s4342_s0 + $0x1e0] ss:$8 sps:$4 sm:$0xff]  }
  0x27   :  { %553 = vmatprep.subr.bf16.mxu0 %v2461_v0  ;;  %2324 = vmatprep.subr.bf16.mxu1 %v2461_v0 }
  0x2a   :  { %554 = vmatpush2.bf16.msra.mxu0 %v2357_v13  ;;  %2340 = vmatpush2.bf16.msra.mxu1 %v2357_v13  ;;  %v2432_v13 = vld [vmem:[%s4342_s0 + $0xf4] ss:$8 sps:$4 sm:$0xff]  }
  0x2b   :  { %555 = vmatprep.subr.bf16.mxu0 %v2461_v0  ;;  %2325 = vmatprep.subr.bf16.mxu1 %v2461_v0 }
  0x2e   :  { %556 = vmatpush2.bf16.msra.mxu0 %v2358_v14  ;;  %2341 = vmatpush2.bf16.msra.mxu1 %v2358_v14  ;;  %v2456_v14 = vld [vmem:[%s4342_s0 + $0x1f4] ss:$8 sps:$4 sm:$0xff]  }
  0x2f   :  { %557 = vmatprep.subr.bf16.mxu0 %v2461_v0  ;;  %2326 = vmatprep.subr.bf16.mxu1 %v2461_v0 }
  0x32   :  { %558 = vmatpush2.bf16.msra.mxu0 %v2359_v15  ;;  %2342 = vmatpush2.bf16.msra.mxu1 %v2359_v15  ;;  %v2434_v15 = vld [vmem:[%s4342_s0 + $0xf0] ss:$8 sps:$4 sm:$0xff]  }
  0x33   :  { %559 = vmatprep.subr.bf16.mxu0 %v2461_v0  ;;  %2327 = vmatprep.subr.bf16.mxu1 %v2461_v0 }
  0x36   :  { %560 = vmatpush2.bf16.msra.mxu0 %v2360_v16  ;;  %2343 = vmatpush2.bf16.msra.mxu1 %v2360_v16  ;;  %v2458_v16 = vld [vmem:[%s4342_s0 + $0x1f0] ss:$8 sps:$4 sm:$0xff]  }
  0x37   :  { %561 = vmatprep.subr.bf16.mxu0 %v2461_v0  ;;  %2328 = vmatprep.subr.bf16.mxu1 %v2461_v0 }
  0x3a   :  { %562 = vmatpush2.bf16.msra.mxu0 %v2361_v17  ;;  %2344 = vmatpush2.bf16.msra.mxu1 %v2361_v17 }
  0x3b   :  { %563 = vmatprep.subr.bf16.mxu0 %v2461_v0  ;;  %2329 = vmatprep.subr.bf16.mxu1 %v2461_v0  ;;  %v2446_v0 = vld [vmem:[%s4342_s0 + $0x1b0] ss:$8 sps:$4 sm:$0xff]  }
  0x3e   :  { %564 = vmatpush2.bf16.msra.mxu0 %v2362_v18  ;;  %2345 = vmatpush2.bf16.msra.mxu1 %v2362_v18 }
  0x41   :  { %566 = vmatmul.mubr.bf16.vlgmr.msra.gmra.mxu0 %v2363_v19  ;;  %694 = vmatmul.mubr.bf16.vlgmr.msra.gmra.mxu1 %v2387_v20 }
  0x42   :  { %573 = vmatprep.mubr.bf16.mxu0 %v2366_v21  ;;  %701 = vmatprep.mubr.bf16.mxu1 %v2393_v22 }
  0x49   :  { %574 = vmatmul.mubr.bf16.gmra.mxu0 %v2368_v23  ;;  %702 = vmatmul.mubr.bf16.gmra.mxu1 %v2395_v24 }
  0x4a   :  { %581 = vmatprep.mubr.bf16.mxu0 %v2369_v25  ;;  %709 = vmatprep.mubr.bf16.mxu1 %v2399_v26 }
  0x51   :  { %582 = vmatmul.mubr.bf16.gmra.mxu0 %v2371_v27  ;;  %710 = vmatmul.mubr.bf16.gmra.mxu1 %v2401_v28 }
  0x52   :  { %589 = vmatprep.mubr.bf16.mxu0 %v2372_v29  ;;  %717 = vmatprep.mubr.bf16.mxu1 %v2405_v30 }
  0x59   :  { %590 = vmatmul.mubr.bf16.gmra.mxu0 %v2374_v31  ;;  %718 = vmatmul.mubr.bf16.gmra.mxu1 %v2407_v32 }
  0x5a   :  { %597 = vmatprep.mubr.bf16.mxu0 %v2375_v33  ;;  %725 = vmatprep.mubr.bf16.mxu1 %v2411_v34 }
  0x61   :  { %598 = vmatmul.mubr.bf16.gmra.mxu0 %v2377_v35  ;;  %726 = vmatmul.mubr.bf16.gmra.mxu1 %v2413_v36 }
  0x62   :  { %605 = vmatprep.mubr.bf16.mxu0 %v2378_v37  ;;  %733 = vmatprep.mubr.bf16.mxu1 %v2417_v38 }
  0x69   :  { %606 = vmatmul.mubr.bf16.gmra.mxu0 %v2380_v39  ;;  %734 = vmatmul.mubr.bf16.gmra.mxu1 %v2419_v40 }
  0x6a   :  { %613 = vmatprep.mubr.bf16.mxu0 %v2381_v41  ;;  %741 = vmatprep.mubr.bf16.mxu1 %v2423_v42 }
  0x71   :  { %614 = vmatmul.mubr.bf16.gmra.mxu0 %v2383_v43  ;;  %742 = vmatmul.mubr.bf16.gmra.mxu1 %v2425_v44 }
  0x72   :  { %621 = vmatprep.mubr.bf16.mxu0 %v2384_v45  ;;  %749 = vmatprep.mubr.bf16.mxu1 %v2429_v46 }
  0x79   :  { %622 = vmatmul.mubr.bf16.gmra.mxu0 %v2386_v47  ;;  %750 = vmatmul.mubr.bf16.gmra.mxu1 %v2431_v48 }
  0x7a   :  { %629 = vmatprep.mubr.bf16.mxu0 %v2390_v49  ;;  %757 = vmatprep.mubr.bf16.mxu1 %v2435_v50 }
  0x81   :  { %630 = vmatmul.mubr.bf16.gmra.mxu0 %v2392_v51  ;;  %758 = vmatmul.mubr.bf16.gmra.mxu1 %v2437_v52 }
  0x82   :  { %637 = vmatprep.mubr.bf16.mxu0 %v2396_v53  ;;  %765 = vmatprep.mubr.bf16.mxu1 %v2438_v54 }
  0x89   :  { %638 = vmatmul.mubr.bf16.gmra.mxu0 %v2398_v55  ;;  %766 = vmatmul.mubr.bf16.gmra.mxu1 %v2440_v56 }
  0x8a   :  { %645 = vmatprep.mubr.bf16.mxu0 %v2402_v57  ;;  %773 = vmatprep.mubr.bf16.mxu1 %v2441_v58 }
  0x91   :  { %646 = vmatmul.mubr.bf16.gmra.mxu0 %v2404_v59  ;;  %774 = vmatmul.mubr.bf16.gmra.mxu1 %v2443_v60 }
  0x92   :  { %653 = vmatprep.mubr.bf16.mxu0 %v2408_v61  ;;  %781 = vmatprep.mubr.bf16.mxu1 %v2444_v62 }
  0x99   :  { %654 = vmatmul.mubr.bf16.gmra.mxu0 %v2410_v63  ;;  %782 = vmatmul.mubr.bf16.gmra.mxu1 %v2446_v0 }
  0x9a   :  { %661 = vmatprep.mubr.bf16.mxu0 %v2414_v1  ;;  %789 = vmatprep.mubr.bf16.mxu1 %v2447_v2 }
  0xa1   :  { %662 = vmatmul.mubr.bf16.gmra.mxu0 %v2416_v3  ;;  %790 = vmatmul.mubr.bf16.gmra.mxu1 %v2449_v4 }
  0xa2   :  { %669 = vmatprep.mubr.bf16.mxu0 %v2420_v5  ;;  %797 = vmatprep.mubr.bf16.mxu1 %v2450_v6 }
  0xa9   :  { %670 = vmatmul.mubr.bf16.gmra.mxu0 %v2422_v7  ;;  %798 = vmatmul.mubr.bf16.gmra.mxu1 %v2452_v8 }
  0xaa   :  { %677 = vmatprep.mubr.bf16.mxu0 %v2426_v9  ;;  %805 = vmatprep.mubr.bf16.mxu1 %v2453_v10 }
  0xb1   :  { %678 = vmatmul.mubr.bf16.gmra.mxu0 %v2428_v11  ;;  %806 = vmatmul.mubr.bf16.gmra.mxu1 %v2455_v12 }
  0xb2   :  { %685 = vmatprep.mubr.bf16.mxu0 %v2432_v13  ;;  %813 = vmatprep.mubr.bf16.mxu1 %v2456_v14 }
  0xb9   :  { %686 = vmatmul.mubr.bf16.gmra.mxu0 %v2434_v15  ;;  %814 = vmatmul.mubr.bf16.gmra.mxu1 %v2458_v16 }
 0x101   :  { %v2764_v17 = vpop.f32.mrf.mxu0  ;;  %v2766_v18 = vpop.f32.mrf.mxu1 }
 0x103   :  { %v569_v19 = vpop.f32.mrf.mxu0  ;;  %v697_v20 = vpop.f32.mrf.mxu1 }
 0x105   :  { %v2768_v21 = vpop.f32.mrf.mxu0  ;;  %v2770_v22 = vpop.f32.mrf.mxu1 }
 0x106   :  { %v893_v19 = vmul.f32 %v2768_v21, %v2768_v21 }
 0x107   :  { %v572_v23 = vpop.f32.mrf.mxu0  ;;  %v700_v24 = vpop.f32.mrf.mxu1 }
 0x108   :  { %v892_v24 = vmul.f32 %v2764_v17, %v2764_v17 }
 0x109   :  { %v2772_v25 = vpop.f32.mrf.mxu0  ;;  %v2774_v26 = vpop.f32.mrf.mxu1 }
 0x10b   :  { %v577_v27 = vpop.f32.mrf.mxu0  ;;  %v705_v28 = vpop.f32.mrf.mxu1 }
 0x10c   :  { %v822_v27 = vadd.f32 %v2768_v21, %v2764_v17  ;;  %v894_v28 = vmul.f32 %v2772_v25, %v2772_v25 }
 0x10d   :  { %v2776_v29 = vpop.f32.mrf.mxu0  ;;  %v2778_v30 = vpop.f32.mrf.mxu1 }
 0x10f   :  { %v580_v31 = vpop.f32.mrf.mxu0  ;;  %v708_v32 = vpop.f32.mrf.mxu1 }
 0x111   :  { %v2780_v33 = vpop.f32.mrf.mxu0  ;;  %v2782_v34 = vpop.f32.mrf.mxu1 }
 0x113   :  { %v585_v35 = vpop.f32.mrf.mxu0  ;;  %v713_v36 = vpop.f32.mrf.mxu1 }
 0x114   :  { %v956_v35 = vadd.f32 %v893_v19, %v892_v24  ;;  %v823_v36 = vadd.f32 %v822_v27, %v2772_v25 }
 0x115   :  { %v2784_v37 = vpop.f32.mrf.mxu0  ;;  %v2786_v38 = vpop.f32.mrf.mxu1 }
 0x117   :  { %v588_v39 = vpop.f32.mrf.mxu0  ;;  %v716_v40 = vpop.f32.mrf.mxu1 }
 0x118   :  { %v895_v39 = vmul.f32 %v2776_v29, %v2776_v29 }
 0x119   :  { %v2788_v41 = vpop.f32.mrf.mxu0  ;;  %v2790_v42 = vpop.f32.mrf.mxu1 }
 0x11b   :  { %v593_v43 = vpop.f32.mrf.mxu0  ;;  %v721_v44 = vpop.f32.mrf.mxu1 }
 0x11c   :  { %v957_v44 = vadd.f32 %v956_v35, %v894_v28 }
 0x11d   :  { %v2792_v45 = vpop.f32.mrf.mxu0  ;;  %v2794_v46 = vpop.f32.mrf.mxu1 }
 0x11f   :  { %v596_v47 = vpop.f32.mrf.mxu0  ;;  %v724_v48 = vpop.f32.mrf.mxu1 }
 0x120   :  { %v824_v47 = vadd.f32 %v823_v36, %v2776_v29  ;;  %v896_v48 = vmul.f32 %v2780_v33, %v2780_v33 }
 0x121   :  { %v2796_v49 = vpop.f32.mrf.mxu0  ;;  %v2798_v50 = vpop.f32.mrf.mxu1 }
 0x122   :  { %v900_v28 = vmul.f32 %v2796_v49, %v2796_v49 }
 0x123   :  { %v601_v51 = vpop.f32.mrf.mxu0  ;;  %v729_v52 = vpop.f32.mrf.mxu1 }
 0x125   :  { %v2800_v53 = vpop.f32.mrf.mxu0  ;;  %v2802_v54 = vpop.f32.mrf.mxu1 }
 0x127   :  { %v604_v55 = vpop.f32.mrf.mxu0  ;;  %v732_v56 = vpop.f32.mrf.mxu1 }
 0x128   :  { %v958_v55 = vadd.f32 %v957_v44, %v895_v39  ;;  %v825_v56 = vadd.f32 %v824_v47, %v2780_v33  ;;  %v901_v39 = vmul.f32 %v2800_v53, %v2800_v53 }
 0x129   :  { %v2804_v57 = vpop.f32.mrf.mxu0  ;;  %v2806_v58 = vpop.f32.mrf.mxu1 }
 0x12b   :  { %v609_v59 = vpop.f32.mrf.mxu0  ;;  %v737_v60 = vpop.f32.mrf.mxu1 }
 0x12c   :  { %v897_v59 = vmul.f32 %v2784_v37, %v2784_v37 }
 0x12d   :  { %v2808_v61 = vpop.f32.mrf.mxu0  ;;  %v2810_v62 = vpop.f32.mrf.mxu1 }
 0x12f   :  { %v612_v63 = vpop.f32.mrf.mxu0  ;;  %v740_v0 = vpop.f32.mrf.mxu1 }
 0x130   :  { %v959_v0 = vadd.f32 %v958_v55, %v896_v48 }
 0x131   :  { %v2812_v1 = vpop.f32.mrf.mxu0  ;;  %v2814_v2 = vpop.f32.mrf.mxu1 }
 0x133   :  { %v617_v3 = vpop.f32.mrf.mxu0  ;;  %v745_v4 = vpop.f32.mrf.mxu1 }
 0x134   :  { %v826_v3 = vadd.f32 %v825_v56, %v2784_v37  ;;  %v898_v4 = vmul.f32 %v2788_v41, %v2788_v41 }
 0x135   :  { %v2816_v5 = vpop.f32.mrf.mxu0  ;;  %v2818_v6 = vpop.f32.mrf.mxu1 }
 0x137   :  { %v620_v7 = vpop.f32.mrf.mxu0  ;;  %v748_v8 = vpop.f32.mrf.mxu1 }
 0x139   :  { %v2820_v9 = vpop.f32.mrf.mxu0  ;;  %v2822_v10 = vpop.f32.mrf.mxu1 }
 0x13b   :  { %v625_v11 = vpop.f32.mrf.mxu0  ;;  %v753_v12 = vpop.f32.mrf.mxu1 }
 0x13c   :  { %v960_v11 = vadd.f32 %v959_v0, %v897_v59  ;;  %v827_v12 = vadd.f32 %v826_v3, %v2788_v41  ;;  %v903_v3 = vmul.f32 %v2808_v61, %v2808_v61 }
 0x13d   :  { %v2824_v13 = vpop.f32.mrf.mxu0  ;;  %v2826_v14 = vpop.f32.mrf.mxu1 }
 0x13e   :  { %v961_v24 = vadd.f32 %v960_v11, %v898_v4  ;;  %v828_v27 = vadd.f32 %v827_v12, %v2792_v45  ;;  %v904_v12 = vmul.f32 %v2812_v1, %v2812_v1 }
 0x13f   :  { %v628_v15 = vpop.f32.mrf.mxu0  ;;  %v756_v16 = vpop.f32.mrf.mxu1 }
 0x140   :  { %v899_v15 = vmul.f32 %v2792_v45, %v2792_v45  ;;  %v829_v36 = vadd.f32 %v828_v27, %v2796_v49 }
 0x141   :  { %v2830_v20 = vpop.f32.mrf.mxu0  ;;  %v2832_v23 = vpop.f32.mrf.mxu1 }
 0x142   :  { %4437 = vst [vmem:[#allocation2_spill] sm:$0xff] %v2830_v20  ;;  %v962_v35 = vadd.f32 %v961_v24, %v899_v15 }
 0x143   :  { %v633_v31 = vpop.f32.mrf.mxu0  ;;  %v761_v32 = vpop.f32.mrf.mxu1 }
 0x144   :  { %v963_v48 = vadd.f32 %v962_v35, %v900_v28 }
 0x145   :  { %v2843_v40 = vpop.f32.mrf.mxu0  ;;  %v2845_v43 = vpop.f32.mrf.mxu1 }
 0x146   :  { %4438 = vst [vmem:[#allocation3_spill] sm:$0xff] %v2843_v40  ;;  %v964_v59 = vadd.f32 %v963_v48, %v901_v39  ;;  %v906_v48 = vmul.f32 %v2820_v9, %v2820_v9 }
 0x147   :  { %v636_v51 = vpop.f32.mrf.mxu0  ;;  %v764_v52 = vpop.f32.mrf.mxu1 }
 0x148   :  { %v830_v51 = vadd.f32 %v829_v36, %v2800_v53  ;;  %v902_v52 = vmul.f32 %v2804_v57, %v2804_v57 }
 0x149   :  { %v2853_v60 = vpop.f32.mrf.mxu0  ;;  %v2855_v63 = vpop.f32.mrf.mxu1 }
 0x14a   :  { %4439 = vst [vmem:[#allocation4_spill] sm:$0xff] %v2853_v60  ;;  %v831_v0 = vadd.f32 %v830_v51, %v2804_v57 }
 0x14b   :  { %v641_v7 = vpop.f32.mrf.mxu0  ;;  %v769_v8 = vpop.f32.mrf.mxu1 }
 0x14c   :  { %v965_v8 = vadd.f32 %v964_v59, %v902_v52  ;;  %v832_v11 = vadd.f32 %v831_v0, %v2808_v61  ;;  %v907_v59 = vmul.f32 %v2824_v13, %v2824_v13 }
 0x14d   :  { %v2863_v16 = vpop.f32.mrf.mxu0  ;;  %v2865_v19 = vpop.f32.mrf.mxu1 }
 0x14e   :  { %4440 = vst [vmem:[#allocation5_spill] sm:$0xff] %v2863_v16  ;;  %v966_v27 = vadd.f32 %v965_v8, %v903_v3  ;;  %v833_v28 = vadd.f32 %v832_v11, %v2812_v1 }
 0x14f   :  { %v644_v31 = vpop.f32.mrf.mxu0  ;;  %v772_v32 = vpop.f32.mrf.mxu1 }
 0x150   :  { %v905_v31 = vmul.f32 %v2816_v5, %v2816_v5  ;;  %v967_v36 = vadd.f32 %v966_v27, %v904_v12  ;;  %v834_v39 = vadd.f32 %v833_v28, %v2816_v5  ;;  %v908_v12 = vmul.f32 %v2830_v20, %v2830_v20 }
 0x151   :  { %v2873_v44 = vpop.f32.mrf.mxu0  ;;  %v2875_v47 = vpop.f32.mrf.mxu1 }
 0x152   :  { %4441 = vst [vmem:[#allocation6_spill] sm:$0xff] %v2873_v44 }
 0x153   :  { %v649_v55 = vpop.f32.mrf.mxu0  ;;  %v777_v56 = vpop.f32.mrf.mxu1 }
 0x154   :  { %v968_v55 = vadd.f32 %v967_v36, %v905_v31  ;;  %v835_v56 = vadd.f32 %v834_v39, %v2820_v9  ;;  %v909_v31 = vmul.f32 %v2843_v40, %v2843_v40 }
 0x155   :  { %v2883_v4 = vpop.f32.mrf.mxu0  ;;  %v2885_v7 = vpop.f32.mrf.mxu1 }
 0x156   :  { %4442 = vst [vmem:[#allocation7_spill] sm:$0xff] %v2883_v4  ;;  %v969_v8 = vadd.f32 %v968_v55, %v906_v48  ;;  %v836_v11 = vadd.f32 %v835_v56, %v2824_v13 }
 0x157   :  { %v652_v15 = vpop.f32.mrf.mxu0  ;;  %v780_v24 = vpop.f32.mrf.mxu1 }
 0x158   :  { %v970_v27 = vadd.f32 %v969_v8, %v907_v59  ;;  %v837_v28 = vadd.f32 %v836_v11, %v2830_v20  ;;  %v911_v8 = vmul.f32 %v2863_v16, %v2863_v16 }
 0x159   :  { %v2893_v32 = vpop.f32.mrf.mxu0  ;;  %v2895_v35 = vpop.f32.mrf.mxu1 }
 0x15a   :  { %4443 = vst [vmem:[#allocation8_spill] sm:$0xff] %v2893_v32  ;;  %v838_v48 = vadd.f32 %v837_v28, %v2843_v40 }
 0x15b   :  { %v657_v51 = vpop.f32.mrf.mxu0  ;;  %v785_v52 = vpop.f32.mrf.mxu1 }
 0x15c   :  { %v971_v51 = vadd.f32 %v970_v27, %v908_v12  ;;  %v910_v52 = vmul.f32 %v2853_v60, %v2853_v60  ;;  %v839_v59 = vadd.f32 %v838_v48, %v2853_v60  ;;  %v912_v27 = vmul.f32 %v2873_v44, %v2873_v44 }
 0x15d   :  { %v2903_v0 = vpop.f32.mrf.mxu0  ;;  %v2905_v3 = vpop.f32.mrf.mxu1 }
 0x15e   :  { %4444 = vst [vmem:[#allocation9_spill] sm:$0xff] %v2903_v0  ;;  %v840_v12 = vadd.f32 %v839_v59, %v2863_v16 }
 0x15f   :  { %v660_v15 = vpop.f32.mrf.mxu0  ;;  %v788_v24 = vpop.f32.mrf.mxu1 }
 0x160   :  { %v972_v15 = vadd.f32 %v971_v51, %v909_v31  ;;  %v841_v31 = vadd.f32 %v840_v12, %v2873_v44  ;;  %v913_v51 = vmul.f32 %v2883_v4, %v2883_v4 }
 0x161   :  { %v2913_v36 = vpop.f32.mrf.mxu0  ;;  %v2915_v39 = vpop.f32.mrf.mxu1 }
 0x162   :  { %4445 = vst [vmem:[#allocation10_spill] sm:$0xff] %v2913_v36  ;;  %v973_v20 = vadd.f32 %v972_v15, %v910_v52  ;;  %v842_v52 = vadd.f32 %v841_v31, %v2883_v4  ;;  %v914_v15 = vmul.f32 %v2893_v32, %v2893_v32 }
 0x163   :  { %v665_v55 = vpop.f32.mrf.mxu0  ;;  %v793_v56 = vpop.f32.mrf.mxu1 }
 0x164   :  { %v974_v55 = vadd.f32 %v973_v20, %v911_v8  ;;  %v843_v20 = vadd.f32 %v842_v52, %v2893_v32 }
 0x165   :  { %v2923_v11 = vpop.f32.mrf.mxu0  ;;  %v2925_v24 = vpop.f32.mrf.mxu1 }
 0x166   :  { %4446 = vst [vmem:[#allocation11_spill] sm:$0xff] %v2923_v11  ;;  %v975_v60 = vadd.f32 %v974_v55, %v912_v27  ;;  %v844_v27 = vadd.f32 %v843_v20, %v2903_v0  ;;  %v916_v55 = vmul.f32 %v2913_v36, %v2913_v36 }
 0x167   :  { %v668_v28 = vpop.f32.mrf.mxu0  ;;  %v796_v40 = vpop.f32.mrf.mxu1 }
 0x168   :  { %v976_v28 = vadd.f32 %v975_v60, %v913_v51  ;;  %v915_v40 = vmul.f32 %v2903_v0, %v2903_v0  ;;  %v845_v60 = vadd.f32 %v844_v27, %v2913_v36 }
 0x169   :  { %v2933_v48 = vpop.f32.mrf.mxu0  ;;  %v2935_v56 = vpop.f32.mrf.mxu1 }
 0x16a   :  { %4447 = vst [vmem:[#allocation12_spill] sm:$0xff] %v2933_v48  ;;  %4448 = vst [vmem:[#allocation13_spill] sm:$0xff] %v2935_v56  ;;  %v977_v44 = vadd.f32 %v976_v28, %v914_v15  ;;  %v846_v15 = vadd.f32 %v845_v60, %v2923_v11  ;;  %v918_v28 = vmul.f32 %v2933_v48, %v2933_v48 }
 0x16b   :  { %v673_v59 = vpop.f32.mrf.mxu0  ;;  %v801_v16 = vpop.f32.mrf.mxu1 }
 0x16c   :  { %v978_v59 = vadd.f32 %v977_v44, %v915_v40  ;;  %v917_v16 = vmul.f32 %v2923_v11, %v2923_v11  ;;  %v847_v44 = vadd.f32 %v846_v15, %v2933_v48 }
 0x16d   :  { %v2943_v8 = vpop.f32.mrf.mxu0  ;;  %v2945_v12 = vpop.f32.mrf.mxu1 }
 0x16e   :  { %4449 = vst [vmem:[#allocation14_spill] sm:$0xff] %v2943_v8  ;;  %4450 = vst [vmem:[#allocation15_spill] sm:$0xff] %v2945_v12  ;;  %v979_v32 = vadd.f32 %v978_v59, %v916_v55  ;;  %v848_v55 = vadd.f32 %v847_v44, %v2943_v8 }
 0x16f   :  { %v676_v31 = vpop.f32.mrf.mxu0  ;;  %v804_v4 = vpop.f32.mrf.mxu1 }
 0x170   :  { %v980_v31 = vadd.f32 %v979_v32, %v917_v16  ;;  %v919_v4 = vmul.f32 %v2943_v8, %v2943_v8 }
 0x171   :  { %v2953_v51 = vpop.f32.mrf.mxu0  ;;  %v2955_v52 = vpop.f32.mrf.mxu1 }
 0x172   :  { %4451 = vst [vmem:[#allocation16_spill] sm:$0xff] %v2953_v51  ;;  %4452 = vst [vmem:[#allocation17_spill] sm:$0xff] %v2955_v52  ;;  %v981_v36 = vadd.f32 %v980_v31, %v918_v28  ;;  %v920_v59 = vmul.f32 %v2953_v51, %v2953_v51  ;;  %v849_v32 = vadd.f32 %v848_v55, %v2953_v51 }
 0x173   :  { %v681_v20 = vpop.f32.mrf.mxu0  ;;  %v809_v0 = vpop.f32.mrf.mxu1 }
 0x174   :  { %v982_v20 = vadd.f32 %v981_v36, %v919_v4 }
 0x175   :  { %v2963_v40 = vpop.f32.mrf.mxu0  ;;  %v2965_v27 = vpop.f32.mrf.mxu1 }
 0x176   :  { %4453 = vst [vmem:[#allocation18_spill] sm:$0xff] %v2963_v40  ;;  %4454 = vst [vmem:[#allocation19_spill] sm:$0xff] %v2965_v27  ;;  %v921_v0 = vmul.f32 %v2963_v40, %v2963_v40  ;;  %v983_v48 = vadd.f32 %v982_v20, %v920_v59  ;;  %v850_v28 = vadd.f32 %v849_v32, %v2963_v40 }
 0x177   :  { %v684_v60 = vpop.f32.mrf.mxu0  ;;  %v812_v11 = vpop.f32.mrf.mxu1  ;;  %v924_v40 = vmul.f32 %v2766_v18, %v2766_v18 }
 0x178   :  { %v984_v60 = vadd.f32 %v983_v48, %v921_v0  ;;  %v925_v0 = vmul.f32 %v2770_v22, %v2770_v22 }
 0x179   :  { %v2973_v16 = vpop.f32.mrf.mxu0  ;;  %v2975_v15 = vpop.f32.mrf.mxu1 }
 0x17a   :  { %4455 = vst [vmem:[#allocation20_spill] sm:$0xff] %v2975_v15  ;;  %v922_v31 = vmul.f32 %v2973_v16, %v2973_v16  ;;  %v851_v36 = vadd.f32 %v850_v28, %v2973_v16 }
 0x17b   :  { %v689_v44 = vpop.f32.mrf.mxu0  ;;  %v817_v8 = vpop.f32.mrf.mxu1 }
 0x17c   :  { %v985_v55 = vadd.f32 %v984_v60, %v922_v31  ;;  %v926_v31 = vmul.f32 %v2774_v26, %v2774_v26 }
 0x17d   :  { %v2981_v11 = vpop.f32.mrf.mxu0  ;;  %v2983_v4 = vpop.f32.mrf.mxu1 }
 0x17e   :  { %4456 = vst [vmem:[#allocation21_spill] sm:$0xff] %v2981_v11  ;;  %4457 = vst [vmem:[#allocation22_spill] sm:$0xff] %v2983_v4  ;;  %v852_v51 = vadd.f32 %v851_v36, %v2981_v11  ;;  %v923_v59 = vmul.f32 %v2981_v11, %v2981_v11 }
 0x17f   :  { %v692_v20 = vpop.f32.mrf.mxu0  ;;  %v820_v32 = vpop.f32.mrf.mxu1 }
 0x180   :  { %v853_v8 = vadd.f32 %v852_v51, %v2766_v18  ;;  %v986_v48 = vadd.f32 %v985_v55, %v923_v59  ;;  %v927_v20 = vmul.f32 %v2778_v30, %v2778_v30  ;;  %v928_v51 = vmul.f32 %v2782_v34, %v2782_v34 }
 0x182   :  { %v854_v28 = vadd.f32 %v853_v8, %v2770_v22  ;;  %v987_v44 = vadd.f32 %v986_v48, %v924_v40  ;;  %v929_v40 = vmul.f32 %v2786_v38, %v2786_v38 }
 0x184   :  { %v855_v60 = vadd.f32 %v854_v28, %v2774_v26  ;;  %v988_v36 = vadd.f32 %v987_v44, %v925_v0  ;;  %v930_v0 = vmul.f32 %v2790_v42, %v2790_v42 }
 0x186   :  { %v856_v32 = vadd.f32 %v855_v60, %v2778_v30  ;;  %v989_v11 = vadd.f32 %v988_v36, %v926_v31  ;;  %v931_v31 = vmul.f32 %v2794_v46, %v2794_v46 }
 0x188   :  { %v857_v55 = vadd.f32 %v856_v32, %v2782_v34  ;;  %v990_v59 = vadd.f32 %v989_v11, %v927_v20  ;;  %v932_v11 = vmul.f32 %v2798_v50, %v2798_v50 }
 0x18a   :  { %v858_v8 = vadd.f32 %v857_v55, %v2786_v38  ;;  %v991_v48 = vadd.f32 %v990_v59, %v928_v51  ;;  %v933_v51 = vmul.f32 %v2802_v54, %v2802_v54 }
 0x18c   :  { %v859_v28 = vadd.f32 %v858_v8, %v2790_v42  ;;  %v992_v44 = vadd.f32 %v991_v48, %v929_v40  ;;  %v934_v40 = vmul.f32 %v2806_v58, %v2806_v58 }
 0x18e   :  { %v860_v60 = vadd.f32 %v859_v28, %v2794_v46  ;;  %v993_v36 = vadd.f32 %v992_v44, %v930_v0  ;;  %v935_v0 = vmul.f32 %v2810_v62, %v2810_v62 }
 0x190   :  { %v994_v20 = vadd.f32 %v993_v36, %v931_v31  ;;  %v861_v32 = vadd.f32 %v860_v60, %v2798_v50  ;;  %v936_v31 = vmul.f32 %v2814_v2, %v2814_v2 }
 0x192   :  { %v862_v55 = vadd.f32 %v861_v32, %v2802_v54  ;;  %v995_v59 = vadd.f32 %v994_v20, %v932_v11  ;;  %v937_v11 = vmul.f32 %v2818_v6, %v2818_v6 }
 0x194   :  { %v863_v8 = vadd.f32 %v862_v55, %v2806_v58  ;;  %v996_v48 = vadd.f32 %v995_v59, %v933_v51  ;;  %v938_v51 = vmul.f32 %v2822_v10, %v2822_v10 }
 0x196   :  { %v864_v28 = vadd.f32 %v863_v8, %v2810_v62  ;;  %v997_v44 = vadd.f32 %v996_v48, %v934_v40  ;;  %v939_v40 = vmul.f32 %v2826_v14, %v2826_v14 }
 0x198   :  { %v865_v60 = vadd.f32 %v864_v28, %v2814_v2  ;;  %v998_v36 = vadd.f32 %v997_v44, %v935_v0  ;;  %v940_v0 = vmul.f32 %v2832_v23, %v2832_v23 }
 0x19a   :  { %v866_v20 = vadd.f32 %v865_v60, %v2818_v6  ;;  %v999_v32 = vadd.f32 %v998_v36, %v936_v31  ;;  %v941_v60 = vmul.f32 %v2845_v43, %v2845_v43 }
 0x19c   :  { %v867_v55 = vadd.f32 %v866_v20, %v2822_v10  ;;  %v1000_v59 = vadd.f32 %v999_v32, %v937_v11  ;;  %v942_v32 = vmul.f32 %v2855_v63, %v2855_v63 }
 0x19e   :  { %v868_v8 = vadd.f32 %v867_v55, %v2826_v14  ;;  %v1001_v48 = vadd.f32 %v1000_v59, %v938_v51  ;;  %v943_v59 = vmul.f32 %v2865_v19, %v2865_v19 }
 0x1a0   :  { %v869_v28 = vadd.f32 %v868_v8, %v2832_v23  ;;  %v1002_v44 = vadd.f32 %v1001_v48, %v939_v40  ;;  %v944_v48 = vmul.f32 %v2875_v47, %v2875_v47 }
 0x1a2   :  { %v870_v31 = vadd.f32 %v869_v28, %v2845_v43  ;;  %v1003_v36 = vadd.f32 %v1002_v44, %v940_v0  ;;  %v945_v44 = vmul.f32 %v2885_v7, %v2885_v7 }
 0x1a4   :  { %v1004_v20 = vadd.f32 %v1003_v36, %v941_v60  ;;  %v871_v11 = vadd.f32 %v870_v31, %v2855_v63  ;;  %v946_v36 = vmul.f32 %v2895_v35, %v2895_v35 }
 0x1a6   :  { %v1005_v55 = vadd.f32 %v1004_v20, %v942_v32  ;;  %v872_v51 = vadd.f32 %v871_v11, %v2865_v19  ;;  %v947_v32 = vmul.f32 %v2905_v3, %v2905_v3 }
 0x1a8   :  { %v1006_v8 = vadd.f32 %v1005_v55, %v943_v59  ;;  %v873_v40 = vadd.f32 %v872_v51, %v2875_v47  ;;  %v948_v59 = vmul.f32 %v2915_v39, %v2915_v39 }
 0x1aa   :  { %v1007_v28 = vadd.f32 %v1006_v8, %v944_v48  ;;  %v874_v0 = vadd.f32 %v873_v40, %v2885_v7  ;;  %v949_v48 = vmul.f32 %v2925_v24, %v2925_v24 }
 0x1ac   :  { %v1008_v31 = vadd.f32 %v1007_v28, %v945_v44  ;;  %v875_v60 = vadd.f32 %v874_v0, %v2895_v35  ;;  %v950_v44 = vmul.f32 %v2935_v56, %v2935_v56 }
 0x1ae   :  { %v1009_v20 = vadd.f32 %v1008_v31, %v946_v36  ;;  %v876_v11 = vadd.f32 %v875_v60, %v2905_v3  ;;  %v951_v36 = vmul.f32 %v2945_v12, %v2945_v12 }
 0x1b0   :  { %v1010_v55 = vadd.f32 %v1009_v20, %v947_v32  ;;  %v877_v51 = vadd.f32 %v876_v11, %v2915_v39  ;;  %v952_v32 = vmul.f32 %v2955_v52, %v2955_v52 }
 0x1b2   :  { %v1011_v8 = vadd.f32 %v1010_v55, %v948_v59  ;;  %v878_v40 = vadd.f32 %v877_v51, %v2925_v24  ;;  %v953_v59 = vmul.f32 %v2965_v27, %v2965_v27 }
 0x1b4   :  { %v1012_v28 = vadd.f32 %v1011_v8, %v949_v48  ;;  %v879_v0 = vadd.f32 %v878_v40, %v2935_v56  ;;  %v954_v48 = vmul.f32 %v2975_v15, %v2975_v15 }
 0x1b6   :  { %v1013_v31 = vadd.f32 %v1012_v28, %v950_v44  ;;  %v880_v60 = vadd.f32 %v879_v0, %v2945_v12  ;;  %v955_v44 = vmul.f32 %v2983_v4, %v2983_v4 }
 0x1b8   :  { %v1014_v20 = vadd.f32 %v1013_v31, %v951_v36  ;;  %v881_v11 = vadd.f32 %v880_v60, %v2955_v52 }
 0x1ba   :  { %v1015_v55 = vadd.f32 %v1014_v20, %v952_v32  ;;  %v882_v51 = vadd.f32 %v881_v11, %v2965_v27 }
 0x1bc   :  { %v1016_v8 = vadd.f32 %v1015_v55, %v953_v59  ;;  %v883_v40 = vadd.f32 %v882_v51, %v2975_v15  ;;  %v1037_v15 = vlaneseq }
 0x1be   :  { %v1017_v28 = vadd.f32 %v1016_v8, %v954_v48  ;;  %v884_v0 = vadd.f32 %v883_v40, %v2983_v4 }
 0x1c0   :  { %v885_v31 = vrot.slane %v884_v0, 4  ;;  %v1018_v60 = vadd.f32 %v1017_v28, %v955_v44  ;;  %v3088_v44 = vshrl.u32 %v1037_v15, 7  ;;  %v3113_v15 = vld [vmem:[%s4343_s4 + $0x20] sm:$0xff]  }
 0x1c1   :  { %4462 = vst [vmem:[#allocation27_spill] sm:$0xff] %v3113_v15  ;;  %v3304_v15 = vld [vmem:[%s4345_s3] sm:$0x1] }
 0x1c2   :  { %v886_v36 = vadd.f32 %v885_v31, %v884_v0  ;;  %v1019_v20 = vrot.slane %v1018_v60, 4  ;;  %v3093_v31 = vld [vmem:[%s4343_s4] sm:$0xff]  }
 0x1c3   :  { %4458 = vst [vmem:[#allocation23_spill] sm:$0xff] %v3093_v31  ;;  %v4505_v31 = vld [vmem:[#allocation14_spill] sm:$0xff] }
 0x1c4   :  { %v887_v11 = vrot.slane %v886_v36, 2  ;;  %v1020_v32 = vadd.f32 %v1019_v20, %v1018_v60  ;;  %v3125_v20 = vld [vmem:[%s4343_s4 + $0x30] sm:$0xff]   ;;  %v3232_v60 = vld [vmem:[%s4343_s4 + $0xa8] sm:$0xff]  }
 0x1c5   :  { %4464 = vst [vmem:[#allocation29_spill] sm:$0xff] %v3125_v20  ;;  %4479 = vst [vmem:[#allocation44_spill] sm:$0xff] %v3232_v60  ;;  %v3258_v20 = vld [vmem:[%s4343_s4 + $0xc0] sm:$0xff]   ;;  %v4493_v60 = vld [vmem:[#allocation4_spill] sm:$0xff] }
 0x1c6   :  { %v888_v52 = vadd.f32 %v887_v11, %v886_v36  ;;  %v1021_v27 = vrot.slane %v1020_v32, 2  ;;  %v3120_v36 = vld [vmem:[%s4343_s4 + $0x28] sm:$0xff]   ;;  %v3167_v11 = vld [vmem:[%s4343_s4 + $0x60] sm:$0xff]   ;;  %4482 = vst [vmem:[#allocation47_spill] sm:$0xff] %v3258_v20  ;;  %v3318_v20 = vld [vmem:[%s4343_s4 + $0xf8] sm:$0xff]  }
 0x1c7   :  { %4463 = vst [vmem:[#allocation28_spill] sm:$0xff] %v3120_v36  ;;  %4470 = vst [vmem:[#allocation35_spill] sm:$0xff] %v3167_v11  ;;  %v3280_v11 = vld [vmem:[%s4343_s4 + $0xd8] sm:$0xff]  }
 0x1c8   :  { %v889_v55 = vrot.slane %v888_v52, 1  ;;  %v1022_v59 = vadd.f32 %v1021_v27, %v1020_v32  ;;  %v3108_v27 = vld [vmem:[%s4343_s4 + $0x18] sm:$0xff]   ;;  %4485 = vst [vmem:[#allocation50_spill] sm:$0xff] %v3280_v11  ;;  %4490 = vst [vmem:[#allocation54_spill] sm:$0xff] %v3318_v20  ;;  %v4495_v20 = vld [vmem:[#allocation6_spill] sm:$0xff] }
 0x1c9   :  { %4461 = vst [vmem:[#allocation26_spill] sm:$0xff] %v3108_v27  ;;  %v3218_v32 = vld [vmem:[%s4343_s4 + $0x98] sm:$0xff]   ;;  %v3285_v27 = vld [vmem:[%s4343_s4 + $0xe0] sm:$0xff]  }
 0x1ca   :  { %v890_v51 = vadd.f32 %v889_v55, %v888_v52  ;;  %v1023_v12 = vrot.slane %v1022_v59, 1  ;;  %v3103_v52 = vld [vmem:[%s4343_s4 + $0x10] sm:$0xff]   ;;  %4477 = vst [vmem:[#allocation42_spill] sm:$0xff] %v3218_v32  ;;  %4486 = vst [vmem:[#allocation51_spill] sm:$0xff] %v3285_v27  ;;  %v4499_v27 = vld [vmem:[#allocation9_spill] sm:$0xff] }
 0x1cb   :  { %4460 = vst [vmem:[#allocation25_spill] sm:$0xff] %v3103_v52  ;;  %v3153_v55 = vld [vmem:[%s4343_s4 + $0x50] sm:$0xff]   ;;  %v4501_v11 = vld [vmem:[#allocation10_spill] sm:$0xff] }
 0x1cc   :  { %v3084_v56 = vmul.f32 0.001953125, %v890_v51  ;;  %v1024_v8 = vadd.f32 %v1023_v12, %v1022_v59  ;;  %v3098_v12 = vld [vmem:[%s4343_s4 + $0x8] sm:$0xff]   ;;  %v3134_v51 = vld [vmem:[%s4343_s4 + $0x38] sm:$0xff]   ;;  %4468 = vst [vmem:[#allocation33_spill] sm:$0xff] %v3153_v55  ;;  %v1029_v55 = vld [vmem:[%s4344_s2] sm:$0x1] }
 0x1cd   :  { %4459 = vst [vmem:[#allocation24_spill] sm:$0xff] %v3098_v12  ;;  %4465 = vst [vmem:[#allocation30_spill] sm:$0xff] %v3134_v51  ;;  %v3148_v59 = vld [vmem:[%s4343_s4 + $0x48] sm:$0xff]   ;;  %v3195_v51 = vld [vmem:[%s4343_s4 + $0x80] sm:$0xff]  }
 0x1ce   :  { %v1025_v48 = vmul.f32 0.001953125, %v1024_v8  ;;  %v1026_v40 = vmul.f32 %v3084_v56, %v3084_v56  ;;  %v3139_v8 = vld [vmem:[%s4343_s4 + $0x40] sm:$0xff]   ;;  %4467 = vst [vmem:[#allocation32_spill] sm:$0xff] %v3148_v59  ;;  %4474 = vst [vmem:[#allocation39_spill] sm:$0xff] %v3195_v51  ;;  %v3209_v59 = vld [vmem:[%s4343_s4 + $0x90] sm:$0xff]  }
 0x1cf   :  { %4466 = vst [vmem:[#allocation31_spill] sm:$0xff] %v3139_v8  ;;  %4476 = vst [vmem:[#allocation41_spill] sm:$0xff] %v3209_v59  ;;  %v3272_v52 = vld [vmem:[%s4343_s4 + $0xd0] sm:$0xff]   ;;  %v3294_v51 = vld [vmem:[%s4343_s4 + $0xe8] sm:$0xff]  }
 0x1d0   :  { %v1027_v4 = vsub.f32 %v1025_v48, %v1026_v40  ;;  %v3190_v40 = vld [vmem:[%s4343_s4 + $0x78] sm:$0xff]   ;;  %v3204_v48 = vld [vmem:[%s4343_s4 + $0x88] sm:$0xff]   ;;  %4484 = vst [vmem:[#allocation49_spill] sm:$0xff] %v3272_v52  ;;  %4487 = vst [vmem:[#allocation52_spill] sm:$0xff] %v3294_v51 }
 0x1d1   :  { %4473 = vst [vmem:[#allocation38_spill] sm:$0xff] %v3190_v40  ;;  %4475 = vst [vmem:[#allocation40_spill] sm:$0xff] %v3204_v48  ;;  %v3263_v40 = vld [vmem:[%s4343_s4 + $0xc8] sm:$0xff]   ;;  %v3299_v59 = vld [vmem:[%s4343_s4 + $0xf0] sm:$0xff]   ;;  %v4489_v48 = vsub.s32 0, %v3088_v44 }
 0x1d2   :  { %v1028_v28 = vmax.f32 %v1027_v4, 0.0  ;;  %v3181_v4 = vld [vmem:[%s4343_s4 + $0x70] sm:$0xff]   ;;  %4483 = vst [vmem:[#allocation48_spill] sm:$0xff] %v3263_v40  ;;  %4488 = vst [vmem:[#allocation53_spill] sm:$0xff] %v3299_v59  ;;  %v4494_v52 = vld [vmem:[#allocation5_spill] sm:$0xff] }
 0x1d3   :  { %4472 = vst [vmem:[#allocation37_spill] sm:$0xff] %v3181_v4  ;;  %v3249_v4 = vld [vmem:[%s4343_s4 + $0xb8] sm:$0xff]   ;;  %v4496_v59 = vld [vmem:[#allocation7_spill] sm:$0xff]  ;;  %v4497_v51 = vld [vmem:[#allocation8_spill] sm:$0xff] }
 0x1d4   :  { %v1030_v0 = vadd.f32 1e-05, %v1028_v28  ;;  %v3176_v28 = vld [vmem:[%s4343_s4 + $0x68] sm:$0xff]   ;;  %4481 = vst [vmem:[#allocation46_spill] sm:$0xff] %v3249_v4  ;;  %v4504_v12 = vld [vmem:[#allocation12_spill] sm:$0xff] }
 0x1d5   :  { %4471 = vst [vmem:[#allocation36_spill] sm:$0xff] %v3176_v28  ;;  %v3237_v28 = vld [vmem:[%s4343_s4 + $0xb0] sm:$0xff]  }
 0x1d6   :  { %2459 = vrsqrt.f32 %v1030_v0  ;;  %v3162_v0 = vld [vmem:[%s4343_s4 + $0x58] sm:$0xff]   ;;  %4480 = vst [vmem:[#allocation45_spill] sm:$0xff] %v3237_v28 }
 0x1d7   :  { %4469 = vst [vmem:[#allocation34_spill] sm:$0xff] %v3162_v0  ;;  %v3223_v0 = vld [vmem:[%s4343_s4 + $0xa0] sm:$0xff]  }
 0x1d8   :  { %4478 = vst [vmem:[#allocation43_spill] sm:$0xff] %v3223_v0  ;;  %v4502_v0 = vld [vmem:[#allocation11_spill] sm:$0xff] }
 0x1e3   :  { %v2460_v36 = vpop.eup %2459 }
 0x1e4   :  { %v1032_v32 = vmul.f32 %v2460_v36, %v1029_v55 }
 0x1e6   :  { %v3307_v36 = vmul.f32 %v1032_v32, %v3084_v56  ;;  %v3311_v55 = vrot.slane %v1032_v32, %v4489_v48  ;;  %v4491_v56 = vld [vmem:[#allocation2_spill] sm:$0xff]  ;;  %v4492_v48 = vld [vmem:[#allocation3_spill] sm:$0xff] }
 0x1e8   :  { %v3332_v4 = vmul.f32 %v3311_v55, %v2764_v17  ;;  %v3338_v32 = vmul.f32 %v3311_v55, %v2768_v21  ;;  %v3342_v8 = vmul.f32 %v3311_v55, %v2772_v25  ;;  %v3346_v40 = vmul.f32 %v3311_v55, %v2776_v29 }
 0x1e9   :  { %v3350_v17 = vmul.f32 %v3311_v55, %v2780_v33  ;;  %v3354_v28 = vmul.f32 %v3311_v55, %v2784_v37  ;;  %v3358_v21 = vmul.f32 %v3311_v55, %v2788_v41  ;;  %v3362_v25 = vmul.f32 %v3311_v55, %v2792_v45 }
 0x1ea   :  { %v3366_v29 = vmul.f32 %v3311_v55, %v2796_v49  ;;  %v3370_v33 = vmul.f32 %v3311_v55, %v2800_v53  ;;  %v3374_v37 = vmul.f32 %v3311_v55, %v2804_v57  ;;  %v3378_v41 = vmul.f32 %v3311_v55, %v2808_v61 }
 0x1eb   :  { %v3382_v45 = vmul.f32 %v3311_v55, %v2812_v1  ;;  %v3386_v49 = vmul.f32 %v3311_v55, %v2816_v5  ;;  %v3390_v53 = vmul.f32 %v3311_v55, %v2820_v9  ;;  %v3394_v57 = vmul.f32 %v3311_v55, %v2824_v13 }
 0x1ec   :  { %v3398_v61 = vmul.f32 %v3311_v55, %v4491_v56  ;;  %v3402_v1 = vmul.f32 %v3311_v55, %v4492_v48  ;;  %v3406_v5 = vmul.f32 %v3311_v55, %v4493_v60  ;;  %v3410_v9 = vmul.f32 %v3311_v55, %v4494_v52 }
 0x1ed   :  { %v3414_v13 = vmul.f32 %v3311_v55, %v4495_v20  ;;  %v3418_v56 = vmul.f32 %v3311_v55, %v4496_v59  ;;  %v3422_v48 = vmul.f32 %v3311_v55, %v4497_v51  ;;  %v3426_v60 = vmul.f32 %v3311_v55, %v4499_v27 }
 0x1ee   :  { %v3430_v52 = vmul.f32 %v3311_v55, %v4501_v11  ;;  %v3434_v20 = vmul.f32 %v3311_v55, %v4502_v0  ;;  %v3438_v59 = vmul.f32 %v3311_v55, %v4504_v12  ;;  %v3442_v51 = vmul.f32 %v3311_v55, %v4505_v31 }
 0x1ef   :  { %4498 = vst [vmem:[#allocation2_spill] sm:$0xff] %v3422_v48  ;;  %4500 = vst [vmem:[#allocation3_spill] sm:$0xff] %v3426_v60  ;;  %v4506_v48 = vld [vmem:[#allocation16_spill] sm:$0xff]  ;;  %v4507_v60 = vld [vmem:[#allocation18_spill] sm:$0xff]  ;;  %v3454_v0 = vmul.f32 %v3311_v55, %v2973_v16  ;;  %v3462_v31 = vmul.f32 %v3311_v55, %v2766_v18  ;;  %v3474_v16 = vmul.f32 %v3311_v55, %v2778_v30 }
 0x1f0   :  { %4503 = vst [vmem:[#allocation4_spill] sm:$0xff] %v3434_v20  ;;  %v3446_v27 = vmul.f32 %v3311_v55, %v4506_v48  ;;  %v3450_v11 = vmul.f32 %v3311_v55, %v4507_v60  ;;  %v4508_v20 = vld [vmem:[#allocation21_spill] sm:$0xff]  ;;  %v3466_v48 = vmul.f32 %v3311_v55, %v2770_v22  ;;  %v3470_v60 = vmul.f32 %v3311_v55, %v2774_v26 }
 0x1f1   :  { %v3458_v12 = vmul.f32 %v3311_v55, %v4508_v20  ;;  %v3478_v20 = vmul.f32 %v3311_v55, %v2782_v34  ;;  %v3482_v18 = vmul.f32 %v3311_v55, %v2786_v38  ;;  %v3486_v22 = vmul.f32 %v3311_v55, %v2790_v42 }
 0x1f2   :  { %v3490_v26 = vmul.f32 %v3311_v55, %v2794_v46  ;;  %v3494_v30 = vmul.f32 %v3311_v55, %v2798_v50  ;;  %v3498_v34 = vmul.f32 %v3311_v55, %v2802_v54  ;;  %v3502_v38 = vmul.f32 %v3311_v55, %v2806_v58 }
 0x1f3   :  { %v3506_v42 = vmul.f32 %v3311_v55, %v2810_v62  ;;  %v3510_v46 = vmul.f32 %v3311_v55, %v2814_v2  ;;  %v3514_v50 = vmul.f32 %v3311_v55, %v2818_v6  ;;  %v3518_v54 = vmul.f32 %v3311_v55, %v2822_v10 }
 0x1f4   :  { %v3522_v58 = vmul.f32 %v3311_v55, %v2826_v14  ;;  %v3526_v62 = vmul.f32 %v3311_v55, %v2832_v23  ;;  %v3530_v2 = vmul.f32 %v3311_v55, %v2845_v43  ;;  %v3534_v6 = vmul.f32 %v3311_v55, %v2855_v63 }
 0x1f5   :  { %v3538_v10 = vmul.f32 %v3311_v55, %v2865_v19  ;;  %v3542_v14 = vmul.f32 %v3311_v55, %v2875_v47  ;;  %v3546_v23 = vmul.f32 %v3311_v55, %v2885_v7  ;;  %v3550_v43 = vmul.f32 %v3311_v55, %v2895_v35 }
 0x1f6   :  { %v3554_v63 = vmul.f32 %v3311_v55, %v2905_v3  ;;  %v3558_v19 = vmul.f32 %v3311_v55, %v2915_v39  ;;  %v3562_v47 = vmul.f32 %v3311_v55, %v2925_v24  ;;  %v4519_v3 = vsub.f32 %v3304_v15, %v3307_v36  ;;  %v4520_v39 = vld [vmem:[#allocation17_spill] sm:$0xff]  ;;  %v4521_v24 = vld [vmem:[#allocation19_spill] sm:$0xff] }
 0x1f7   :  { %4509 = vst [vmem:[#allocation5_spill] sm:$0xff] %v3542_v14  ;;  %4510 = vst [vmem:[#allocation6_spill] sm:$0xff] %v3546_v23  ;;  %v4515_v14 = vld [vmem:[#allocation13_spill] sm:$0xff]  ;;  %v4517_v23 = vld [vmem:[#allocation15_spill] sm:$0xff] }
 0x1f8   :  { %4511 = vst [vmem:[#allocation7_spill] sm:$0xff] %v3550_v43  ;;  %4512 = vst [vmem:[#allocation8_spill] sm:$0xff] %v3554_v63  ;;  %v3566_v7 = vmul.f32 %v3311_v55, %v4515_v14  ;;  %v3570_v35 = vmul.f32 %v3311_v55, %v4517_v23  ;;  %v4518_v43 = vsub.s32 0, %v3088_v44  ;;  %v4522_v14 = vld [vmem:[#allocation20_spill] sm:$0xff]  ;;  %v4523_v23 = vld [vmem:[#allocation22_spill] sm:$0xff] }
 0x1f9   :  { %4513 = vst [vmem:[#allocation9_spill] sm:$0xff] %v3558_v19  ;;  %4514 = vst [vmem:[#allocation10_spill] sm:$0xff] %v3562_v47  ;;  %v3581_v19 = vmul.f32 %v3311_v55, %v4520_v39  ;;  %v3585_v47 = vmul.f32 %v3311_v55, %v4521_v24  ;;  %v3593_v44 = vmul.f32 %v3311_v55, %v4523_v23  ;;  %v4524_v39 = vld [vmem:[#allocation2_spill] sm:$0xff]  ;;  %v4525_v24 = vld [vmem:[#allocation3_spill] sm:$0xff] }
 0x1fa   :  { %4516 = vst [vmem:[#allocation11_spill] sm:$0xff] %v3566_v7  ;;  %v3577_v63 = vrot.slane %v4519_v3, %v4518_v43  ;;  %v3589_v7 = vmul.f32 %v3311_v55, %v4522_v14  ;;  %v4526_v14 = vld [vmem:[#allocation4_spill] sm:$0xff] }
 0x1fc   :  { %v3597_v15 = vadd.f32 %v3577_v63, %v3332_v4  ;;  %v3601_v36 = vadd.f32 %v3577_v63, %v3338_v32  ;;  %v3605_v43 = vadd.f32 %v3577_v63, %v3342_v8  ;;  %v3609_v3 = vadd.f32 %v3577_v63, %v3346_v40 }
 0x1fd   :  { %v3613_v55 = vadd.f32 %v3577_v63, %v3350_v17  ;;  %v3617_v4 = vadd.f32 %v3577_v63, %v3354_v28  ;;  %v3621_v32 = vadd.f32 %v3577_v63, %v3358_v21  ;;  %v3625_v8 = vadd.f32 %v3577_v63, %v3362_v25 }
 0x1fe   :  { %v3629_v40 = vadd.f32 %v3577_v63, %v3366_v29  ;;  %v3633_v17 = vadd.f32 %v3577_v63, %v3370_v33  ;;  %v3637_v28 = vadd.f32 %v3577_v63, %v3374_v37  ;;  %v3641_v21 = vadd.f32 %v3577_v63, %v3378_v41 }
 0x1ff   :  { %v3645_v25 = vadd.f32 %v3577_v63, %v3382_v45  ;;  %v3649_v29 = vadd.f32 %v3577_v63, %v3386_v49  ;;  %v3653_v33 = vadd.f32 %v3577_v63, %v3390_v53  ;;  %v3657_v37 = vadd.f32 %v3577_v63, %v3394_v57 }
 0x200   :  { %v3661_v41 = vadd.f32 %v3577_v63, %v3398_v61  ;;  %v3665_v45 = vadd.f32 %v3577_v63, %v3402_v1  ;;  %v3669_v49 = vadd.f32 %v3577_v63, %v3406_v5  ;;  %v3673_v53 = vadd.f32 %v3577_v63, %v3410_v9 }
 0x201   :  { %v3677_v57 = vadd.f32 %v3577_v63, %v3414_v13  ;;  %v3681_v61 = vadd.f32 %v3577_v63, %v3418_v56  ;;  %v3685_v1 = vadd.f32 %v3577_v63, %v4524_v39  ;;  %v3689_v5 = vadd.f32 %v3577_v63, %v4525_v24 }
 0x202   :  { %v3693_v9 = vadd.f32 %v3577_v63, %v3430_v52  ;;  %v3697_v13 = vadd.f32 %v3577_v63, %v4526_v14  ;;  %v3701_v56 = vadd.f32 %v3577_v63, %v3438_v59  ;;  %v3705_v23 = vadd.f32 %v3577_v63, %v3442_v51  ;;  %v4532_v14 = vld [vmem:[#allocation5_spill] sm:$0xff] }
 0x203   :  { %v3709_v39 = vadd.f32 %v3577_v63, %v3446_v27  ;;  %v3713_v52 = vadd.f32 %v3577_v63, %v3450_v11  ;;  %v3717_v24 = vadd.f32 %v3577_v63, %v3454_v0  ;;  %v3721_v59 = vadd.f32 %v3577_v63, %v3458_v12 }
 0x204   :  { %v3725_v51 = vadd.f32 %v3577_v63, %v3462_v31  ;;  %v3729_v27 = vadd.f32 %v3577_v63, %v3466_v48  ;;  %v3733_v11 = vadd.f32 %v3577_v63, %v3470_v60  ;;  %v3737_v0 = vadd.f32 %v3577_v63, %v3474_v16 }
 0x205   :  { %v3741_v12 = vadd.f32 %v3577_v63, %v3478_v20  ;;  %v3745_v31 = vadd.f32 %v3577_v63, %v3482_v18  ;;  %v3749_v48 = vadd.f32 %v3577_v63, %v3486_v22  ;;  %v3753_v60 = vadd.f32 %v3577_v63, %v3490_v26 }
 0x206   :  { %v3757_v16 = vadd.f32 %v3577_v63, %v3494_v30  ;;  %v3761_v20 = vadd.f32 %v3577_v63, %v3498_v34  ;;  %v3765_v18 = vadd.f32 %v3577_v63, %v3502_v38  ;;  %v3769_v22 = vadd.f32 %v3577_v63, %v3506_v42 }
 0x207   :  { %v3773_v26 = vadd.f32 %v3577_v63, %v3510_v46  ;;  %v3777_v30 = vadd.f32 %v3577_v63, %v3514_v50  ;;  %v3781_v34 = vadd.f32 %v3577_v63, %v3518_v54  ;;  %v3785_v38 = vadd.f32 %v3577_v63, %v3522_v58 }
 0x208   :  { %v3789_v42 = vadd.f32 %v3577_v63, %v3526_v62  ;;  %v3793_v46 = vadd.f32 %v3577_v63, %v3530_v2  ;;  %v3797_v50 = vadd.f32 %v3577_v63, %v3534_v6  ;;  %v3801_v54 = vadd.f32 %v3577_v63, %v3538_v10 }
 0x209   :  { %4527 = vst [vmem:[#allocation12_spill] sm:$0xff] %v3785_v38  ;;  %v3805_v58 = vadd.f32 %v3577_v63, %v4532_v14  ;;  %v4534_v38 = vld [vmem:[#allocation6_spill] sm:$0xff] }
 0x20a   :  { %4528 = vst [vmem:[#allocation14_spill] sm:$0xff] %v3789_v42  ;;  %4529 = vst [vmem:[#allocation16_spill] sm:$0xff] %v3793_v46  ;;  %v3809_v62 = vadd.f32 %v3577_v63, %v4534_v38  ;;  %v4535_v42 = vld [vmem:[#allocation7_spill] sm:$0xff]  ;;  %v4536_v46 = vld [vmem:[#allocation8_spill] sm:$0xff] }
 0x20b   :  { %4530 = vst [vmem:[#allocation18_spill] sm:$0xff] %v3797_v50  ;;  %4531 = vst [vmem:[#allocation21_spill] sm:$0xff] %v3801_v54  ;;  %v3813_v2 = vadd.f32 %v3577_v63, %v4535_v42  ;;  %v3817_v6 = vadd.f32 %v3577_v63, %v4536_v46  ;;  %v4537_v50 = vld [vmem:[#allocation9_spill] sm:$0xff]  ;;  %v4538_v54 = vld [vmem:[#allocation10_spill] sm:$0xff]  ;;  %v3833_v42 = vadd.f32 %v3577_v63, %v3570_v35 }
 0x20c   :  { %4533 = vst [vmem:[#allocation13_spill] sm:$0xff] %v3805_v58  ;;  %v3821_v10 = vadd.f32 %v3577_v63, %v4537_v50  ;;  %v3825_v14 = vadd.f32 %v3577_v63, %v4538_v54  ;;  %v4540_v58 = vld [vmem:[#allocation11_spill] sm:$0xff]  ;;  %v3837_v46 = vadd.f32 %v3577_v63, %v3581_v19  ;;  %v3841_v50 = vadd.f32 %v3577_v63, %v3585_v47  ;;  %v4551_v47 = vld [vmem:[#allocation24_spill] sm:$0xff] }
 0x20d   :  { %v3829_v38 = vadd.f32 %v3577_v63, %v4540_v58  ;;  %4542 = vst [vmem:[#allocation19_spill] sm:$0xff] %v3833_v42  ;;  %v3845_v54 = vadd.f32 %v3577_v63, %v3589_v7  ;;  %v3849_v58 = vadd.f32 %v3577_v63, %v3593_v44  ;;  %v4554_v7 = vunpack.c.h.bf16 %v4551_v47  ;;  %v4556_v44 = vld [vmem:[#allocation25_spill] sm:$0xff] }
 0x20e   :  { %4539 = vst [vmem:[#allocation15_spill] sm:$0xff] %v3825_v14  ;;  %4543 = vst [vmem:[#allocation20_spill] sm:$0xff] %v3837_v46 }
 0x20f   :  { %4541 = vst [vmem:[#allocation17_spill] sm:$0xff] %v3829_v38  ;;  %4544 = vst [vmem:[#allocation22_spill] sm:$0xff] %v3841_v50  ;;  %v4546_v38 = vld [vmem:[#allocation23_spill] sm:$0xff]  ;;  %v4552_v50 = vunpack.c.l.bf16 %v4551_v47  ;;  %v3869_v63 = vadd.f32 %v4554_v7, %v3609_v3 }
 0x210   :  { %4545 = vst [vmem:[#allocation2_spill] sm:$0xff] %v3849_v58  ;;  %v4547_v35 = vunpack.c.l.bf16 %v4546_v38  ;;  %v4549_v19 = vunpack.c.h.bf16 %v4546_v38  ;;  %v4557_v58 = vunpack.c.l.bf16 %v4556_v44  ;;  %v4559_v38 = vunpack.c.h.bf16 %v4556_v44  ;;  %v4563_v47 = vld [vmem:[#allocation27_spill] sm:$0xff]  ;;  %v4566_v44 = vld [vmem:[#allocation28_spill] sm:$0xff] }
 0x211   :  { %v3864_v14 = vadd.f32 %v4552_v50, %v3605_v43  ;;  %4555 = vst [vmem:[#allocation6_spill] sm:$0xff] %v3869_v63  ;;  %v4564_v7 = vunpack.c.l.bf16 %v4563_v47 }
 0x212   :  { %v3854_v42 = vadd.f32 %v4547_v35, %v3597_v15  ;;  %v3859_v46 = vadd.f32 %v4549_v19, %v3601_v36  ;;  %v3874_v15 = vadd.f32 %v4557_v58, %v3613_v55  ;;  %v3879_v36 = vadd.f32 %v4559_v38, %v3617_v4  ;;  %v4560_v35 = vld [vmem:[#allocation26_spill] sm:$0xff] }
 0x213   :  { %4553 = vst [vmem:[#allocation5_spill] sm:$0xff] %v3864_v14  ;;  %v4561_v19 = vunpack.c.l.bf16 %v4560_v35  ;;  %v4562_v50 = vunpack.c.h.bf16 %v4560_v35  ;;  %v3894_v55 = vadd.f32 %v4564_v7, %v3629_v40  ;;  %v4565_v58 = vunpack.c.h.bf16 %v4563_v47  ;;  %v4572_v7 = vld [vmem:[#allocation30_spill] sm:$0xff] }
 0x214   :  { %4548 = vst [vmem:[#allocation3_spill] sm:$0xff] %v3854_v42  ;;  %4550 = vst [vmem:[#allocation4_spill] sm:$0xff] %v3859_v46  ;;  %v4567_v38 = vunpack.c.l.bf16 %v4566_v44  ;;  %v4568_v35 = vunpack.c.h.bf16 %v4566_v44  ;;  %v4574_v44 = vunpack.c.h.bf16 %v4572_v7 }
 0x215   :  { %4558 = vst [vmem:[#allocation7_spill] sm:$0xff] %v3874_v15  ;;  %v3884_v43 = vadd.f32 %v4561_v19, %v3621_v32  ;;  %v3889_v3 = vadd.f32 %v4562_v50, %v3625_v8  ;;  %v3899_v4 = vadd.f32 %v4565_v58, %v3633_v17  ;;  %v4569_v19 = vld [vmem:[#allocation29_spill] sm:$0xff]  ;;  %v4573_v58 = vunpack.c.l.bf16 %v4572_v7 }
 0x216   :  { %v3904_v32 = vadd.f32 %v4567_v38, %v3637_v28  ;;  %v3909_v8 = vadd.f32 %v4568_v35, %v3641_v21  ;;  %v4570_v50 = vunpack.c.l.bf16 %v4569_v19  ;;  %v4571_v47 = vunpack.c.h.bf16 %v4569_v19  ;;  %v4575_v38 = vld [vmem:[#allocation31_spill] sm:$0xff] }
 0x217   :  { %v3924_v28 = vadd.f32 %v4573_v58, %v3653_v33  ;;  %v3929_v21 = vadd.f32 %v4574_v44, %v3657_v37  ;;  %v4576_v35 = vunpack.c.l.bf16 %v4575_v38  ;;  %v4577_v19 = vunpack.c.h.bf16 %v4575_v38  ;;  %v4581_v58 = vld [vmem:[#allocation33_spill] sm:$0xff] }
 0x218   :  { %v3914_v40 = vadd.f32 %v4570_v50, %v3645_v25  ;;  %v3919_v17 = vadd.f32 %v4571_v47, %v3649_v29  ;;  %v4578_v50 = vld [vmem:[#allocation32_spill] sm:$0xff]  ;;  %v4582_v44 = vunpack.c.l.bf16 %v4581_v58  ;;  %v4583_v38 = vunpack.c.h.bf16 %v4581_v58 }
 0x219   :  { %v3934_v25 = vadd.f32 %v4576_v35, %v3661_v41  ;;  %v3939_v29 = vadd.f32 %v4577_v19, %v3665_v45  ;;  %v4579_v47 = vunpack.c.l.bf16 %v4578_v50  ;;  %v4580_v7 = vunpack.c.h.bf16 %v4578_v50  ;;  %v4584_v35 = vld [vmem:[#allocation34_spill] sm:$0xff] }
 0x21a   :  { %v3954_v41 = vadd.f32 %v4582_v44, %v3677_v57  ;;  %v3959_v45 = vadd.f32 %v4583_v38, %v3681_v61  ;;  %v4585_v19 = vunpack.c.l.bf16 %v4584_v35  ;;  %v4586_v50 = vunpack.c.h.bf16 %v4584_v35  ;;  %v4590_v44 = vld [vmem:[#allocation36_spill] sm:$0xff] }
 0x21b   :  { %v3944_v33 = vadd.f32 %v4579_v47, %v3669_v49  ;;  %v3949_v37 = vadd.f32 %v4580_v7, %v3673_v53  ;;  %v4587_v47 = vld [vmem:[#allocation35_spill] sm:$0xff]  ;;  %v4591_v38 = vunpack.c.l.bf16 %v4590_v44  ;;  %v4592_v35 = vunpack.c.h.bf16 %v4590_v44 }
 0x21c   :  { %v3964_v49 = vadd.f32 %v4585_v19, %v3685_v1  ;;  %v3969_v53 = vadd.f32 %v4586_v50, %v3689_v5  ;;  %v4588_v7 = vunpack.c.l.bf16 %v4587_v47  ;;  %v4589_v58 = vunpack.c.h.bf16 %v4587_v47  ;;  %v4593_v19 = vld [vmem:[#allocation37_spill] sm:$0xff] }
 0x21d   :  { %v3984_v1 = vadd.f32 %v4591_v38, %v3701_v56  ;;  %v3989_v5 = vadd.f32 %v4592_v35, %v3705_v23  ;;  %v4594_v50 = vunpack.c.l.bf16 %v4593_v19  ;;  %v4595_v47 = vunpack.c.h.bf16 %v4593_v19  ;;  %v4599_v38 = vld [vmem:[#allocation39_spill] sm:$0xff] }
 0x21e   :  { %v3974_v57 = vadd.f32 %v4588_v7, %v3693_v9  ;;  %v3979_v61 = vadd.f32 %v4589_v58, %v3697_v13  ;;  %v4596_v7 = vld [vmem:[#allocation38_spill] sm:$0xff]  ;;  %v4600_v35 = vunpack.c.l.bf16 %v4599_v38  ;;  %v4601_v19 = vunpack.c.h.bf16 %v4599_v38 }
 0x21f   :  { %v3994_v9 = vadd.f32 %v4594_v50, %v3709_v39  ;;  %v3999_v13 = vadd.f32 %v4595_v47, %v3713_v52  ;;  %v4597_v58 = vunpack.c.l.bf16 %v4596_v7  ;;  %v4598_v44 = vunpack.c.h.bf16 %v4596_v7  ;;  %v4602_v50 = vld [vmem:[#allocation40_spill] sm:$0xff] }
 0x220   :  { %v4014_v39 = vadd.f32 %v4600_v35, %v3725_v51  ;;  %v4019_v52 = vadd.f32 %v4601_v19, %v3729_v27  ;;  %v4603_v47 = vunpack.c.l.bf16 %v4602_v50  ;;  %v4604_v7 = vunpack.c.h.bf16 %v4602_v50  ;;  %v4608_v35 = vld [vmem:[#allocation42_spill] sm:$0xff] }
 0x221   :  { %v4004_v56 = vadd.f32 %v4597_v58, %v3717_v24  ;;  %v4009_v23 = vadd.f32 %v4598_v44, %v3721_v59  ;;  %v4605_v58 = vld [vmem:[#allocation41_spill] sm:$0xff]  ;;  %v4609_v19 = vunpack.c.l.bf16 %v4608_v35  ;;  %v4610_v50 = vunpack.c.h.bf16 %v4608_v35 }
 0x222   :  { %v4024_v24 = vadd.f32 %v4603_v47, %v3733_v11  ;;  %v4029_v59 = vadd.f32 %v4604_v7, %v3737_v0  ;;  %v4606_v44 = vunpack.c.l.bf16 %v4605_v58  ;;  %v4607_v38 = vunpack.c.h.bf16 %v4605_v58  ;;  %v4611_v47 = vld [vmem:[#allocation43_spill] sm:$0xff] }
 0x223   :  { %v4044_v11 = vadd.f32 %v4609_v19, %v3749_v48  ;;  %v4049_v0 = vadd.f32 %v4610_v50, %v3753_v60  ;;  %v4612_v7 = vunpack.c.l.bf16 %v4611_v47  ;;  %v4613_v58 = vunpack.c.h.bf16 %v4611_v47  ;;  %v4619_v19 = vld [vmem:[#allocation45_spill] sm:$0xff] }
 0x224   :  { %v4034_v51 = vadd.f32 %v4606_v44, %v3741_v12  ;;  %v4039_v27 = vadd.f32 %v4607_v38, %v3745_v31  ;;  %v4614_v44 = vld [vmem:[#allocation44_spill] sm:$0xff]  ;;  %v4620_v50 = vunpack.c.l.bf16 %v4619_v19  ;;  %v4622_v47 = vunpack.c.h.bf16 %v4619_v19 }
 0x225   :  { %v4054_v12 = vadd.f32 %v4612_v7, %v3757_v16  ;;  %v4059_v31 = vadd.f32 %v4613_v58, %v3761_v20  ;;  %v4615_v38 = vunpack.c.l.bf16 %v4614_v44  ;;  %v4617_v35 = vunpack.c.h.bf16 %v4614_v44  ;;  %v4624_v7 = vld [vmem:[#allocation46_spill] sm:$0xff] }
 0x226   :  { %v4074_v16 = vadd.f32 %v4620_v50, %v3773_v26  ;;  %v4079_v20 = vadd.f32 %v4622_v47, %v3777_v30  ;;  %v4625_v58 = vunpack.c.l.bf16 %v4624_v7  ;;  %v4628_v44 = vunpack.c.h.bf16 %v4624_v7  ;;  %v4633_v50 = vld [vmem:[#allocation16_spill] sm:$0xff]  ;;  %v4635_v47 = vld [vmem:[#allocation18_spill] sm:$0xff] }
 0x227   :  { %v4064_v48 = vadd.f32 %v4615_v38, %v3765_v18  ;;  %v4069_v60 = vadd.f32 %v4617_v35, %v3769_v22  ;;  %v4627_v38 = vld [vmem:[#allocation12_spill] sm:$0xff]  ;;  %v4630_v35 = vld [vmem:[#allocation14_spill] sm:$0xff] }
 0x228   :  { %4621 = vst [vmem:[#allocation10_spill] sm:$0xff] %v4074_v16  ;;  %4623 = vst [vmem:[#allocation11_spill] sm:$0xff] %v4079_v20  ;;  %v4084_v18 = vadd.f32 %v4625_v58, %v3781_v34  ;;  %v4089_v22 = vadd.f32 %v4628_v44, %v4627_v38  ;;  %v4636_v20 = vld [vmem:[#allocation48_spill] sm:$0xff]  ;;  %v4638_v58 = vld [vmem:[#allocation21_spill] sm:$0xff] }
 0x229   :  { %4616 = vst [vmem:[#allocation8_spill] sm:$0xff] %v4064_v48  ;;  %4618 = vst [vmem:[#allocation9_spill] sm:$0xff] %v4069_v60  ;;  %v4631_v60 = vld [vmem:[#allocation47_spill] sm:$0xff]  ;;  %v4637_v16 = vunpack.c.l.bf16 %v4636_v20  ;;  %v4639_v7 = vunpack.c.h.bf16 %v4636_v20  ;;  %v4640_v44 = vld [vmem:[#allocation13_spill] sm:$0xff] }
 0x22a   :  { %4626 = vst [vmem:[#allocation23_spill] sm:$0xff] %v4084_v18  ;;  %4629 = vst [vmem:[#allocation24_spill] sm:$0xff] %v4089_v22  ;;  %v4632_v48 = vunpack.c.l.bf16 %v4631_v60  ;;  %v4634_v19 = vunpack.c.h.bf16 %v4631_v60  ;;  %v4641_v22 = vld [vmem:[#allocation49_spill] sm:$0xff] }
 0x22b   :  { %v4104_v34 = vadd.f32 %v4637_v16, %v4635_v47  ;;  %v4109_v38 = vadd.f32 %v4639_v7, %v4638_v58  ;;  %v4642_v18 = vunpack.c.l.bf16 %v4641_v22  ;;  %v4644_v60 = vunpack.c.h.bf16 %v4641_v22  ;;  %v4651_v58 = vld [vmem:[#allocation51_spill] sm:$0xff] }
 0x22c   :  { %v4094_v26 = vadd.f32 %v4632_v48, %v4630_v35  ;;  %v4099_v30 = vadd.f32 %v4634_v19, %v4633_v50  ;;  %v4646_v50 = vld [vmem:[#allocation50_spill] sm:$0xff]  ;;  %v4652_v7 = vunpack.c.l.bf16 %v4651_v58  ;;  %v4654_v22 = vunpack.c.h.bf16 %v4651_v58 }
 0x22d   :  { %v4114_v48 = vadd.f32 %v4642_v18, %v4640_v44  ;;  %v4119_v35 = vadd.f32 %v4644_v60, %v3809_v62  ;;  %v4647_v19 = vunpack.c.l.bf16 %v4646_v50  ;;  %v4649_v20 = vunpack.c.h.bf16 %v4646_v50  ;;  %v4653_v44 = vld [vmem:[#allocation15_spill] sm:$0xff]  ;;  %v4656_v60 = vld [vmem:[#allocation17_spill] sm:$0xff] }
 0x22e   :  { %v4134_v18 = vadd.f32 %v4652_v7, %v3821_v10  ;;  %v4139_v62 = vadd.f32 %v4654_v22, %v4653_v44  ;;  %v4666_v7 = vld [vmem:[#allocation22_spill] sm:$0xff] }
 0x22f   :  { %4643 = vst [vmem:[#allocation25_spill] sm:$0xff] %v4114_v48  ;;  %4645 = vst [vmem:[#allocation26_spill] sm:$0xff] %v4119_v35  ;;  %v4124_v16 = vadd.f32 %v4647_v19, %v3813_v2  ;;  %v4129_v47 = vadd.f32 %v4649_v20, %v3817_v6  ;;  %v4657_v35 = vld [vmem:[#allocation52_spill] sm:$0xff]  ;;  %v4659_v19 = vld [vmem:[#allocation19_spill] sm:$0xff] }
 0x230   :  { %4655 = vst [vmem:[#allocation29_spill] sm:$0xff] %v4139_v62  ;;  %v4658_v48 = vunpack.c.l.bf16 %v4657_v35  ;;  %v4660_v50 = vunpack.c.h.bf16 %v4657_v35  ;;  %v4662_v20 = vld [vmem:[#allocation20_spill] sm:$0xff]  ;;  %v4669_v22 = vld [vmem:[#allocation54_spill] sm:$0xff]  ;;  %v4676_v15 = vld [vmem:[#allocation9_spill] sm:$0xff] }
 0x231   :  { %4648 = vst [vmem:[#allocation27_spill] sm:$0xff] %v4124_v16  ;;  %4650 = vst [vmem:[#allocation28_spill] sm:$0xff] %v4129_v47  ;;  %v4663_v47 = vld [vmem:[#allocation53_spill] sm:$0xff]  ;;  %v4670_v62 = vunpack.c.l.bf16 %v4669_v22  ;;  %v4673_v35 = vunpack.c.h.bf16 %v4669_v22  ;;  %v1376_v22 = vmax.f32 %v3894_v55, 0.0  ;;  %v1386_v55 = vmax.f32 %v3944_v33, 0.0  ;;  %v4677_v63 = vld [vmem:[#allocation10_spill] sm:$0xff] }
 0x232   :  { %v4144_v2 = vadd.f32 %v4658_v48, %v4656_v60  ;;  %v4149_v6 = vadd.f32 %v4660_v50, %v4659_v19  ;;  %v4664_v16 = vunpack.c.l.bf16 %v4663_v47  ;;  %v4667_v58 = vunpack.c.h.bf16 %v4663_v47  ;;  %v4672_v60 = vld [vmem:[#allocation2_spill] sm:$0xff]  ;;  %v4675_v50 = vld [vmem:[#allocation8_spill] sm:$0xff]  ;;  %v4678_v14 = vld [vmem:[#allocation11_spill] sm:$0xff] }
 0x233   :  { %v4164_v48 = vadd.f32 %v4670_v62, %v3845_v54  ;;  %v4169_v19 = vadd.f32 %v4673_v35, %v4672_v60  ;;  %v1374_v54 = vmax.f32 %v3884_v43, 0.0  ;;  %v1375_v62 = vmax.f32 %v3889_v3, 0.0  ;;  %v4679_v46 = vld [vmem:[#allocation23_spill] sm:$0xff]  ;;  %v4680_v42 = vld [vmem:[#allocation24_spill] sm:$0xff] }
 0x234   :  { %4661 = vst [vmem:[#allocation30_spill] sm:$0xff] %v4149_v6  ;;  %v4154_v10 = vadd.f32 %v4664_v16, %v4662_v20  ;;  %v4159_v44 = vadd.f32 %v4667_v58, %v4666_v7  ;;  %v1373_v58 = vmax.f32 %v3879_v36, 0.0  ;;  %v1377_v60 = vmax.f32 %v3899_v4, 0.0 }
 0x235   :  { %4671 = vst [vmem:[#allocation33_spill] sm:$0xff] %v4164_v48  ;;  %4674 = vst [vmem:[#allocation34_spill] sm:$0xff] %v4169_v19  ;;  %v1378_v35 = vmax.f32 %v3904_v32, 0.0  ;;  %v1379_v16 = vmax.f32 %v3909_v8, 0.0  ;;  %v1380_v20 = vmax.f32 %v3914_v40, 0.0  ;;  %v1381_v47 = vmax.f32 %v3919_v17, 0.0 }
 0x236   :  { %4665 = vst [vmem:[#allocation31_spill] sm:$0xff] %v4154_v10  ;;  %4668 = vst [vmem:[#allocation32_spill] sm:$0xff] %v4159_v44  ;;  %v1382_v7 = vmax.f32 %v3924_v28, 0.0  ;;  %v1383_v36 = vmax.f32 %v3929_v21, 0.0  ;;  %v1384_v43 = vmax.f32 %v3934_v25, 0.0  ;;  %v1385_v3 = vmax.f32 %v3939_v29, 0.0 }
 0x237   :  { %v1387_v4 = vmax.f32 %v3949_v37, 0.0  ;;  %v1388_v32 = vmax.f32 %v3954_v41, 0.0  ;;  %v1389_v8 = vmax.f32 %v3959_v45, 0.0  ;;  %v1390_v40 = vmax.f32 %v3964_v49, 0.0  ;;  %v4681_v19 = vld [vmem:[#allocation25_spill] sm:$0xff]  ;;  %v4682_v48 = vld [vmem:[#allocation26_spill] sm:$0xff] }
 0x238   :  { %v1391_v17 = vmax.f32 %v3969_v53, 0.0  ;;  %v1392_v28 = vmax.f32 %v3974_v57, 0.0  ;;  %v1393_v21 = vmax.f32 %v3979_v61, 0.0  ;;  %v1394_v25 = vmax.f32 %v3984_v1, 0.0  ;;  %v4683_v44 = vld [vmem:[#allocation27_spill] sm:$0xff]  ;;  %v4684_v10 = vld [vmem:[#allocation28_spill] sm:$0xff] }
 0x239   :  { %v1395_v29 = vmax.f32 %v3989_v5, 0.0  ;;  %v1396_v33 = vmax.f32 %v3994_v9, 0.0  ;;  %v1397_v37 = vmax.f32 %v3999_v13, 0.0  ;;  %v1398_v41 = vmax.f32 %v4004_v56, 0.0  ;;  %v4685_v6 = vld [vmem:[#allocation29_spill] sm:$0xff] }
 0x23a   :  { %v1399_v45 = vmax.f32 %v4009_v23, 0.0  ;;  %v1400_v49 = vmax.f32 %v4014_v39, 0.0  ;;  %v1401_v53 = vmax.f32 %v4019_v52, 0.0  ;;  %v1402_v57 = vmax.f32 %v4024_v24, 0.0 }
 0x23b   :  { %v1403_v61 = vmax.f32 %v4029_v59, 0.0  ;;  %v1404_v1 = vmax.f32 %v4034_v51, 0.0  ;;  %v1405_v5 = vmax.f32 %v4039_v27, 0.0  ;;  %v1406_v9 = vmax.f32 %v4044_v11, 0.0 }
 0x23c   :  { %v1407_v13 = vmax.f32 %v4049_v0, 0.0  ;;  %v1408_v56 = vmax.f32 %v4054_v12, 0.0  ;;  %v1409_v23 = vmax.f32 %v4059_v31, 0.0  ;;  %v1410_v39 = vmax.f32 %v4675_v50, 0.0 }
 0x23d   :  { %v1411_v52 = vmax.f32 %v4676_v15, 0.0  ;;  %v1412_v24 = vmax.f32 %v4677_v63, 0.0  ;;  %v1413_v59 = vmax.f32 %v4678_v14, 0.0  ;;  %v1414_v51 = vmax.f32 %v4679_v46, 0.0 }
 0x23e   :  { %v1415_v27 = vmax.f32 %v4680_v42, 0.0  ;;  %v1416_v11 = vmax.f32 %v4094_v26, 0.0  ;;  %v1417_v0 = vmax.f32 %v4099_v30, 0.0  ;;  %v1418_v12 = vmax.f32 %v4104_v34, 0.0  ;;  %v4686_v30 = vld [vmem:[#allocation30_spill] sm:$0xff] }
 0x23f   :  { %v1419_v31 = vmax.f32 %v4109_v38, 0.0  ;;  %v1420_v50 = vmax.f32 %v4681_v19, 0.0  ;;  %v1421_v15 = vmax.f32 %v4682_v48, 0.0  ;;  %v1422_v63 = vmax.f32 %v4683_v44, 0.0  ;;  %v4687_v38 = vld [vmem:[#allocation31_spill] sm:$0xff]  ;;  %v4688_v48 = vld [vmem:[#allocation32_spill] sm:$0xff] }
 0x240   :  { %v1423_v14 = vmax.f32 %v4684_v10, 0.0  ;;  %v1424_v46 = vmax.f32 %v4134_v18, 0.0  ;;  %v1425_v42 = vmax.f32 %v4685_v6, 0.0  ;;  %v1426_v26 = vmax.f32 %v4144_v2, 0.0  ;;  %v4689_v10 = vld [vmem:[#allocation33_spill] sm:$0xff]  ;;  %v4690_v6 = vld [vmem:[#allocation34_spill] sm:$0xff] }
 0x241   :  { %v1427_v34 = vmax.f32 %v4686_v30, 0.0  ;;  %v1428_v19 = vmax.f32 %v4687_v38, 0.0  ;;  %v1429_v44 = vmax.f32 %v4688_v48, 0.0  ;;  %v1430_v18 = vmax.f32 %v4689_v10, 0.0  ;;  %v4691_v30 = vld [vmem:[#allocation3_spill] sm:$0xff]  ;;  %v4693_v48 = vld [vmem:[#allocation4_spill] sm:$0xff] }
 0x242   :  { %v1431_v2 = vmax.f32 %v4690_v6, 0.0  ;;  %v4692_v38 = vmax.f32 %v4691_v30, 0.0  ;;  %v4694_v10 = vmax.f32 %v4693_v48, 0.0  ;;  %v4695_v30 = vld [vmem:[#allocation5_spill] sm:$0xff] }
 0x243   :  { %v4696_v48 = vmax.f32 %v4695_v30, 0.0 }
 0x244   :  { %v2095_v6 = vpack.c.bf16 %v4694_v10, %v4692_v38  ;;  %v4697_v10 = vld [vmem:[#allocation6_spill] sm:$0xff] }
 0x245   :  { %v4698_v38 = vmax.f32 %v4697_v10, 0.0  ;;  %v4699_v10 = vld [vmem:[#allocation7_spill] sm:$0xff] }
 0x246   :  { %2096 = vst [vmem:[%s4346_s5] sm:$0xff] %v2095_v6  }
 0x247   :  { %v2100_v30 = vpack.c.bf16 %v4698_v38, %v4696_v48  ;;  %v4700_v38 = vmax.f32 %v4699_v10, 0.0  ;;  %v2110_v10 = vpack.c.bf16 %v1375_v62, %v1374_v54  ;;  %v2125_v54 = vpack.c.bf16 %v1381_v47, %v1380_v20 }
 0x248   :  { %v2130_v62 = vpack.c.bf16 %v1383_v36, %v1382_v7  ;;  %v2145_v20 = vpack.c.bf16 %v1389_v8, %v1388_v32  ;;  %v2150_v47 = vpack.c.bf16 %v1391_v17, %v1390_v40  ;;  %v2155_v7 = vpack.c.bf16 %v1393_v21, %v1392_v28 }
 0x249   :  { %v2105_v48 = vpack.c.bf16 %v1373_v58, %v4700_v38  ;;  %v2115_v38 = vpack.c.bf16 %v1377_v60, %v1376_v22  ;;  %v2120_v58 = vpack.c.bf16 %v1379_v16, %v1378_v35  ;;  %2283 = vst [vmem:[%s4346_s5 + $0x8] sm:$0xff] %v2100_v30   ;;  %2285 = vst [vmem:[%s4346_s5 + $0x18] sm:$0xff] %v2110_v10  }
 0x24a   :  { %v2135_v22 = vpack.c.bf16 %v1385_v3, %v1384_v43  ;;  %v2140_v16 = vpack.c.bf16 %v1387_v4, %v1386_v55  ;;  %2288 = vst [vmem:[%s4346_s5 + $0x30] sm:$0xff] %v2125_v54   ;;  %2289 = vst [vmem:[%s4346_s5 + $0x38] sm:$0xff] %v2130_v62   ;;  %v2160_v60 = vpack.c.bf16 %v1395_v29, %v1394_v25 }
 0x24b   :  { %2284 = vst [vmem:[%s4346_s5 + $0x10] sm:$0xff] %v2105_v48   ;;  %2286 = vst [vmem:[%s4346_s5 + $0x20] sm:$0xff] %v2115_v38   ;;  %v2165_v35 = vpack.c.bf16 %v1397_v37, %v1396_v33  ;;  %v2170_v36 = vpack.c.bf16 %v1399_v45, %v1398_v41  ;;  %v2175_v43 = vpack.c.bf16 %v1401_v53, %v1400_v49 }
 0x24c   :  { %2287 = vst [vmem:[%s4346_s5 + $0x28] sm:$0xff] %v2120_v58   ;;  %2290 = vst [vmem:[%s4346_s5 + $0x40] sm:$0xff] %v2135_v22   ;;  %v2180_v3 = vpack.c.bf16 %v1403_v61, %v1402_v57  ;;  %v2185_v55 = vpack.c.bf16 %v1405_v5, %v1404_v1  ;;  %v2190_v4 = vpack.c.bf16 %v1407_v13, %v1406_v9 }
 0x24d   :  { %2291 = vst [vmem:[%s4346_s5 + $0x48] sm:$0xff] %v2140_v16   ;;  %2292 = vst [vmem:[%s4346_s5 + $0x50] sm:$0xff] %v2145_v20   ;;  %v2195_v32 = vpack.c.bf16 %v1409_v23, %v1408_v56  ;;  %v2200_v8 = vpack.c.bf16 %v1411_v52, %v1410_v39  ;;  %v2205_v40 = vpack.c.bf16 %v1413_v59, %v1412_v24 }
 0x24e   :  { %2293 = vst [vmem:[%s4346_s5 + $0x58] sm:$0xff] %v2150_v47   ;;  %2294 = vst [vmem:[%s4346_s5 + $0x60] sm:$0xff] %v2155_v7   ;;  %v2210_v17 = vpack.c.bf16 %v1415_v27, %v1414_v51  ;;  %v2215_v28 = vpack.c.bf16 %v1417_v0, %v1416_v11  ;;  %v2220_v21 = vpack.c.bf16 %v1419_v31, %v1418_v12 }
 0x24f   :  { %2295 = vst [vmem:[%s4346_s5 + $0x68] sm:$0xff] %v2160_v60   ;;  %2296 = vst [vmem:[%s4346_s5 + $0x70] sm:$0xff] %v2165_v35   ;;  %v2225_v25 = vpack.c.bf16 %v1421_v15, %v1420_v50  ;;  %v2230_v29 = vpack.c.bf16 %v1423_v14, %v1422_v63  ;;  %v2235_v33 = vpack.c.bf16 %v1425_v42, %v1424_v46 }
 0x250   :  { %2297 = vst [vmem:[%s4346_s5 + $0x78] sm:$0xff] %v2170_v36   ;;  %2298 = vst [vmem:[%s4346_s5 + $0x80] sm:$0xff] %v2175_v43   ;;  %v2240_v37 = vpack.c.bf16 %v1427_v34, %v1426_v26  ;;  %v2245_v41 = vpack.c.bf16 %v1429_v44, %v1428_v19  ;;  %v2250_v45 = vpack.c.bf16 %v1431_v2, %v1430_v18 }
 0x251   :  { %2299 = vst [vmem:[%s4346_s5 + $0x88] sm:$0xff] %v2180_v3   ;;  %2300 = vst [vmem:[%s4346_s5 + $0x90] sm:$0xff] %v2185_v55  }
 0x252   :  { %2301 = vst [vmem:[%s4346_s5 + $0x98] sm:$0xff] %v2190_v4   ;;  %2302 = vst [vmem:[%s4346_s5 + $0xa0] sm:$0xff] %v2195_v32  }
 0x253   :  { %2303 = vst [vmem:[%s4346_s5 + $0xa8] sm:$0xff] %v2200_v8   ;;  %2304 = vst [vmem:[%s4346_s5 + $0xb0] sm:$0xff] %v2205_v40  }
 0x254   :  { %2305 = vst [vmem:[%s4346_s5 + $0xb8] sm:$0xff] %v2210_v17   ;;  %2306 = vst [vmem:[%s4346_s5 + $0xc0] sm:$0xff] %v2215_v28  }
 0x255   :  { %2307 = vst [vmem:[%s4346_s5 + $0xc8] sm:$0xff] %v2220_v21   ;;  %2308 = vst [vmem:[%s4346_s5 + $0xd0] sm:$0xff] %v2225_v25  }
 0x256   :  { %2309 = vst [vmem:[%s4346_s5 + $0xd8] sm:$0xff] %v2230_v29   ;;  %2310 = vst [vmem:[%s4346_s5 + $0xe0] sm:$0xff] %v2235_v33  }
 0x257   :  { %2311 = vst [vmem:[%s4346_s5 + $0xe8] sm:$0xff] %v2240_v37   ;;  %2312 = vst [vmem:[%s4346_s5 + $0xf0] sm:$0xff] %v2245_v41  }
 0x258   :  { %2313 = vst [vmem:[%s4346_s5 + $0xf8] sm:$0xff] %v2250_v45  }

// kernel: resnet_forward.14
= control target key start
LH: loop header
LB: loop body
LE: loop exit
PB: predicated region body
PF: predicated region fallthrough
CT: control target
= control target key end

     0   :  { %s811_s1 = inlined_call_operand.vmem [shape: bf16[128,128], index: 1, kind: input, shape index: {}]   ;;  %s812_s0 = inlined_call_operand.vmem [shape: bf16[128,128], index: 0, kind: input, shape index: {}]   ;;  %s813_s2 = inlined_call_operand.vmem [shape: f32[1,128], index: 2, kind: input, shape index: {}]   ;;  %s814_s3 = inlined_call_operand.vmem [shape: f32[1,128], index: 3, kind: input, shape index: {}]   ;;  %s815_s4 = inlined_call_operand.vmem [shape: bf16[128,128], index: 4, kind: output, shape index: {}]  }
   0x1   :  { %v600_v0 = vld [vmem:[%s811_s1 + $0x38] sm:$0xff]   ;;  %v601_v1 = vld [vmem:[%s811_s1 + $0x30] sm:$0xff]   ;;  %v602_v2 = vld [vmem:[%s811_s1 + $0x28] sm:$0xff]  }
   0x2   :  { %552 = vmatprep.subr.bf16.mxu0 %v600_v0  ;;  %584 = vmatprep.subr.bf16.mxu1 %v600_v0  ;;  %v603_v3 = vld [vmem:[%s811_s1 + $0x20] sm:$0xff]   ;;  %v604_v5 = vld [vmem:[%s811_s1 + $0x18] sm:$0xff]   ;;  %v605_v7 = vld [vmem:[%s811_s1 + $0x10] sm:$0xff]  }
   0x3   :  { %553 = vmatpush3.bf16.msra.mxu0 %v600_v0  ;;  %592 = vmatpush3.bf16.msra.mxu1 %v600_v0  ;;  %v608_v4 = vld [vmem:[%s812_s0] sm:$0xff]   ;;  %v606_v8 = vld [vmem:[%s811_s1 + $0x8] sm:$0xff]   ;;  %v610_v12 = vld [vmem:[%s812_s0 + $0x10] sm:$0xff]  }
   0x4   :  { %554 = vmatprep.subr.bf16.mxu0 %v601_v1  ;;  %585 = vmatprep.subr.bf16.mxu1 %v601_v1  ;;  %v612_v6 = vld [vmem:[%s812_s0 + $0x20] sm:$0xff]   ;;  %v609_v10 = vld [vmem:[%s812_s0 + $0x8] sm:$0xff]   ;;  %v614_v13 = vld [vmem:[%s812_s0 + $0x30] sm:$0xff]  }
   0x5   :  { %568 = vmatprep.mubr.bf16.mxu0 %v608_v4  ;;  %576 = vmatprep.mubr.bf16.mxu1 %v612_v6  ;;  %v607_v9 = vld [vmem:[%s811_s1] sm:$0xff]   ;;  %v613_v11 = vld [vmem:[%s812_s0 + $0x28] sm:$0xff]   ;;  %v611_v14 = vld [vmem:[%s812_s0 + $0x18] sm:$0xff]  }
   0x6   :  { %v615_v15 = vld [vmem:[%s812_s0 + $0x38] sm:$0xff]  }
   0x7   :  { %555 = vmatpush3.bf16.msra.mxu0 %v601_v1  ;;  %593 = vmatpush3.bf16.msra.mxu1 %v601_v1 }
   0x8   :  { %556 = vmatprep.subr.bf16.mxu0 %v602_v2  ;;  %586 = vmatprep.subr.bf16.mxu1 %v602_v2 }
   0xb   :  { %557 = vmatpush3.bf16.msra.mxu0 %v602_v2  ;;  %594 = vmatpush3.bf16.msra.mxu1 %v602_v2 }
   0xc   :  { %558 = vmatprep.subr.bf16.mxu0 %v603_v3  ;;  %587 = vmatprep.subr.bf16.mxu1 %v603_v3 }
   0xf   :  { %559 = vmatpush3.bf16.msra.mxu0 %v603_v3  ;;  %595 = vmatpush3.bf16.msra.mxu1 %v603_v3 }
  0x10   :  { %560 = vmatprep.subr.bf16.mxu0 %v604_v5  ;;  %588 = vmatprep.subr.bf16.mxu1 %v604_v5 }
  0x13   :  { %561 = vmatpush3.bf16.msra.mxu0 %v604_v5  ;;  %596 = vmatpush3.bf16.msra.mxu1 %v604_v5 }
  0x14   :  { %562 = vmatprep.subr.bf16.mxu0 %v605_v7  ;;  %589 = vmatprep.subr.bf16.mxu1 %v605_v7 }
  0x17   :  { %563 = vmatpush3.bf16.msra.mxu0 %v605_v7  ;;  %597 = vmatpush3.bf16.msra.mxu1 %v605_v7 }
  0x18   :  { %564 = vmatprep.subr.bf16.mxu0 %v606_v8  ;;  %590 = vmatprep.subr.bf16.mxu1 %v606_v8 }
  0x1b   :  { %565 = vmatpush3.bf16.msra.mxu0 %v606_v8  ;;  %598 = vmatpush3.bf16.msra.mxu1 %v606_v8 }
  0x1c   :  { %566 = vmatprep.subr.bf16.mxu0 %v607_v9  ;;  %591 = vmatprep.subr.bf16.mxu1 %v607_v9 }
  0x1f   :  { %567 = vmatpush3.bf16.msra.mxu0 %v607_v9  ;;  %599 = vmatpush3.bf16.msra.mxu1 %v607_v9 }
  0x22   :  { %569 = vmatmul.mubr.bf16.vlgmr.msra.gmra.mxu0 %v609_v10  ;;  %577 = vmatmul.mubr.bf16.vlgmr.msra.gmra.mxu1 %v613_v11 }
  0x23   :  { %572 = vmatprep.mubr.bf16.mxu0 %v610_v12  ;;  %580 = vmatprep.mubr.bf16.mxu1 %v614_v13 }
  0x2a   :  { %573 = vmatmul.mubr.bf16.gmra.mxu0 %v611_v14  ;;  %581 = vmatmul.mubr.bf16.gmra.mxu1 %v615_v15 }
  0xe2   :  { %v691_v16 = vpop.f32.mrf.mxu0  ;;  %v693_v17 = vpop.f32.mrf.mxu1 }
  0xe3   :  { %v267_v27 = vmul.f32 %v691_v16, %v691_v16  ;;  %v275_v58 = vmul.f32 %v693_v17, %v693_v17 }
  0xe4   :  { %v695_v18 = vpop.f32.mrf.mxu0  ;;  %v699_v20 = vpop.f32.mrf.mxu1 }
  0xe5   :  { %v265_v22 = vmul.f32 %v695_v18, %v695_v18  ;;  %v273_v51 = vmul.f32 %v699_v20, %v699_v20 }
  0xe6   :  { %v697_v19 = vpop.f32.mrf.mxu0  ;;  %v711_v26 = vpop.f32.mrf.mxu1 }
  0xe7   :  { %v268_v31 = vmul.f32 %v697_v19, %v697_v19  ;;  %v276_v61 = vmul.f32 %v711_v26, %v711_v26 }
  0xe8   :  { %v701_v21 = vpop.f32.mrf.mxu0  ;;  %v723_v35 = vpop.f32.mrf.mxu1 }
  0xe9   :  { %v243_v23 = vadd.f32 %v701_v21, %v695_v18  ;;  %v266_v24 = vmul.f32 %v701_v21, %v701_v21  ;;  %v274_v55 = vmul.f32 %v723_v35, %v723_v35 }
  0xea   :  { %v709_v25 = vpop.f32.mrf.mxu0  ;;  %v733_v43 = vpop.f32.mrf.mxu1 }
  0xeb   :  { %v244_v28 = vadd.f32 %v691_v16, %v243_v23  ;;  %v281_v29 = vadd.f32 %v266_v24, %v265_v22  ;;  %v271_v44 = vmul.f32 %v709_v25, %v709_v25  ;;  %v279_v7 = vmul.f32 %v733_v43, %v733_v43 }
  0xec   :  { %v716_v30 = vpop.f32.mrf.mxu0  ;;  %v741_v50 = vpop.f32.mrf.mxu1 }
  0xed   :  { %v282_v32 = vadd.f32 %v281_v29, %v267_v27  ;;  %v245_v33 = vadd.f32 %v697_v19, %v244_v28  ;;  %v269_v37 = vmul.f32 %v716_v30, %v716_v30  ;;  %v277_v2 = vmul.f32 %v741_v50, %v741_v50 }
  0xee   :  { %v721_v34 = vpop.f32.mrf.mxu0  ;;  %v749_v57 = vpop.f32.mrf.mxu1 }
  0xef   :  { %v246_v36 = vadd.f32 %v245_v33, %v716_v30  ;;  %v283_v38 = vadd.f32 %v282_v32, %v268_v31  ;;  %v272_v47 = vmul.f32 %v721_v34, %v721_v34  ;;  %v280_v10 = vmul.f32 %v749_v57, %v749_v57 }
  0xf0   :  { %v728_v39 = vpop.f32.mrf.mxu0  ;;  %v231_v0 = vpop.f32.mrf.mxu1 }
  0xf1   :  { %v284_v40 = vadd.f32 %v283_v38, %v269_v37  ;;  %v247_v41 = vadd.f32 %v246_v36, %v728_v39  ;;  %v270_v42 = vmul.f32 %v728_v39, %v728_v39  ;;  %v278_v6 = vmul.f32 %v231_v0, %v231_v0 }
  0xf3   :  { %v248_v45 = vadd.f32 %v709_v25, %v247_v41  ;;  %v285_v46 = vadd.f32 %v284_v40, %v270_v42 }
  0xf5   :  { %v249_v48 = vadd.f32 %v721_v34, %v248_v45  ;;  %v286_v49 = vadd.f32 %v285_v46, %v271_v44  ;;  %v314_v45 = vlaneseq }
  0xf7   :  { %v287_v52 = vadd.f32 %v286_v49, %v272_v47  ;;  %v250_v53 = vadd.f32 %v249_v48, %v699_v20  ;;  %v315_v46 = vshrl.u32 %v314_v45, 7  ;;  %v306_v47 = vld [vmem:[%s813_s2] sm:$0x1] }
  0xf9   :  { %v251_v54 = vadd.f32 %v250_v53, %v723_v35  ;;  %v288_v56 = vadd.f32 %v287_v52, %v273_v51  ;;  %v316_v48 = vsub.s32 0, %v315_v46  ;;  %v310_v52 = vld [vmem:[%s814_s3] sm:$0x1] }
  0xfb   :  { %v252_v59 = vadd.f32 %v693_v17, %v251_v54  ;;  %v289_v60 = vadd.f32 %v288_v56, %v274_v55 }
  0xfd   :  { %v290_v62 = vadd.f32 %v289_v60, %v275_v58  ;;  %v253_v63 = vadd.f32 %v711_v26, %v252_v59 }
  0xff   :  { %v254_v1 = vadd.f32 %v253_v63, %v741_v50  ;;  %v291_v3 = vadd.f32 %v290_v62, %v276_v61 }
 0x101   :  { %v292_v4 = vadd.f32 %v291_v3, %v277_v2  ;;  %v255_v5 = vadd.f32 %v254_v1, %v231_v0 }
 0x103   :  { %v256_v8 = vadd.f32 %v733_v43, %v255_v5  ;;  %v293_v9 = vadd.f32 %v292_v4, %v278_v6 }
 0x105   :  { %v257_v11 = vadd.f32 %v749_v57, %v256_v8  ;;  %v294_v12 = vadd.f32 %v293_v9, %v279_v7 }
 0x107   :  { %v258_v13 = vrot.slane %v257_v11, 4  ;;  %v295_v14 = vadd.f32 %v294_v12, %v280_v10 }
 0x109   :  { %v259_v15 = vadd.f32 %v258_v13, %v257_v11  ;;  %v296_v22 = vrot.slane %v295_v14, 4 }
 0x10b   :  { %v260_v23 = vrot.slane %v259_v15, 2  ;;  %v297_v24 = vadd.f32 %v296_v22, %v295_v14 }
 0x10d   :  { %v261_v27 = vadd.f32 %v260_v23, %v259_v15  ;;  %v298_v28 = vrot.slane %v297_v24, 2 }
 0x10f   :  { %v262_v29 = vrot.slane %v261_v27, 1  ;;  %v299_v31 = vadd.f32 %v298_v28, %v297_v24 }
 0x111   :  { %v263_v32 = vadd.f32 %v262_v29, %v261_v27  ;;  %v300_v33 = vrot.slane %v299_v31, 1 }
 0x113   :  { %v264_v36 = vmul.f32 0.0078125, %v263_v32  ;;  %v301_v37 = vadd.f32 %v300_v33, %v299_v31 }
 0x115   :  { %v302_v38 = vmul.f32 0.0078125, %v301_v37  ;;  %v303_v40 = vmul.f32 %v264_v36, %v264_v36 }
 0x117   :  { %v304_v41 = vsub.f32 %v302_v38, %v303_v40 }
 0x119   :  { %v305_v42 = vmax.f32 %v304_v41, 0.0 }
 0x11b   :  { %v307_v44 = vadd.f32 1e-05, %v305_v42 }
 0x11d   :  { %616 = vrsqrt.f32 %v307_v44 }
 0x12a   :  { %v617_v49 = vpop.eup %616 }
 0x12b   :  { %v309_v51 = vmul.f32 %v617_v49, %v306_v47 }
 0x12d   :  { %v311_v53 = vmul.f32 %v309_v51, %v264_v36  ;;  %v317_v54 = vrot.slane %v309_v51, %v316_v48 }
 0x12f   :  { %v312_v55 = vsub.f32 %v310_v52, %v311_v53  ;;  %v319_v56 = vmul.f32 %v317_v54, %v695_v18  ;;  %v320_v58 = vmul.f32 %v317_v54, %v701_v21  ;;  %v321_v59 = vmul.f32 %v691_v16, %v317_v54 }
 0x130   :  { %v322_v60 = vmul.f32 %v697_v19, %v317_v54  ;;  %v323_v61 = vmul.f32 %v317_v54, %v716_v30  ;;  %v324_v62 = vmul.f32 %v317_v54, %v728_v39  ;;  %v325_v63 = vmul.f32 %v709_v25, %v317_v54 }
 0x131   :  { %v326_v1 = vmul.f32 %v721_v34, %v317_v54  ;;  %v327_v2 = vmul.f32 %v317_v54, %v699_v20  ;;  %v328_v3 = vmul.f32 %v317_v54, %v723_v35  ;;  %v329_v18 = vmul.f32 %v693_v17, %v317_v54 }
 0x132   :  { %v330_v21 = vmul.f32 %v711_v26, %v317_v54  ;;  %v339_v4 = vrot.slane %v312_v55, %v316_v48  ;;  %v331_v16 = vmul.f32 %v317_v54, %v741_v50  ;;  %v332_v19 = vmul.f32 %v317_v54, %v231_v0 }
 0x133   :  { %v333_v30 = vmul.f32 %v733_v43, %v317_v54  ;;  %v334_v39 = vmul.f32 %v749_v57, %v317_v54 }
 0x134   :  { %v341_v5 = vadd.f32 %v339_v4, %v319_v56  ;;  %v342_v25 = vadd.f32 %v339_v4, %v320_v58  ;;  %v343_v6 = vadd.f32 %v339_v4, %v321_v59  ;;  %v344_v34 = vadd.f32 %v339_v4, %v322_v60 }
 0x135   :  { %v345_v7 = vadd.f32 %v339_v4, %v323_v61  ;;  %v346_v20 = vadd.f32 %v339_v4, %v324_v62  ;;  %v347_v8 = vadd.f32 %v339_v4, %v325_v63  ;;  %v348_v35 = vadd.f32 %v339_v4, %v326_v1 }
 0x136   :  { %v349_v9 = vadd.f32 %v339_v4, %v327_v2  ;;  %v350_v17 = vadd.f32 %v339_v4, %v328_v3  ;;  %v351_v10 = vadd.f32 %v339_v4, %v329_v18  ;;  %v352_v26 = vadd.f32 %v339_v4, %v330_v21 }
 0x137   :  { %v353_v11 = vadd.f32 %v339_v4, %v331_v16  ;;  %v354_v12 = vadd.f32 %v339_v4, %v332_v19  ;;  %v355_v50 = vadd.f32 %v339_v4, %v333_v30  ;;  %v356_v0 = vadd.f32 %v339_v4, %v334_v39 }
 0x138   :  { %v492_v13 = vpack.c.bf16 %v342_v25, %v341_v5  ;;  %v497_v43 = vpack.c.bf16 %v344_v34, %v343_v6  ;;  %v502_v14 = vpack.c.bf16 %v346_v20, %v345_v7  ;;  %v507_v57 = vpack.c.bf16 %v348_v35, %v347_v8 }
 0x139   :  { %v512_v15 = vpack.c.bf16 %v350_v17, %v349_v9  ;;  %v517_v22 = vpack.c.bf16 %v352_v26, %v351_v10  ;;  %v522_v23 = vpack.c.bf16 %v354_v12, %v353_v11  ;;  %v527_v24 = vpack.c.bf16 %v356_v0, %v355_v50 }
 0x13a   :  { %493 = vst [vmem:[%s815_s4] sm:$0xff] %v492_v13   ;;  %529 = vst [vmem:[%s815_s4 + $0x8] sm:$0xff] %v497_v43  }
 0x13b   :  { %530 = vst [vmem:[%s815_s4 + $0x10] sm:$0xff] %v502_v14   ;;  %531 = vst [vmem:[%s815_s4 + $0x18] sm:$0xff] %v507_v57  }
 0x13c   :  { %532 = vst [vmem:[%s815_s4 + $0x20] sm:$0xff] %v512_v15   ;;  %533 = vst [vmem:[%s815_s4 + $0x28] sm:$0xff] %v517_v22  }
 0x13d   :  { %534 = vst [vmem:[%s815_s4 + $0x30] sm:$0xff] %v522_v23   ;;  %535 = vst [vmem:[%s815_s4 + $0x38] sm:$0xff] %v527_v24  }

// kernel: resnet_forward.13
= control target key start
LH: loop header
LB: loop body
LE: loop exit
PB: predicated region body
PF: predicated region fallthrough
CT: control target
= control target key end

     0   :  { %s1021_s1 = inlined_call_operand.vmem [shape: bf16[256,128], index: 1, kind: input, shape index: {}]   ;;  %s1022_s0 = inlined_call_operand.vmem [shape: bf16[128,256], index: 0, kind: input, shape index: {}]   ;;  %s1023_s2 = inlined_call_operand.vmem [shape: f32[1,128], index: 2, kind: input, shape index: {}]   ;;  %s1024_s3 = inlined_call_operand.vmem [shape: f32[1,128], index: 3, kind: input, shape index: {}]   ;;  %s1025_s4 = inlined_call_operand.vmem [shape: bf16[128,128], index: 4, kind: output, shape index: {}]  }
   0x1   :  { %v744_v0 = vld [vmem:[%s1021_s1 + $0x78] sm:$0xff]   ;;  %v746_v2 = vld [vmem:[%s1021_s1 + $0x70] sm:$0xff]   ;;  %v748_v4 = vld [vmem:[%s1021_s1 + $0x68] sm:$0xff]  }
   0x2   :  { %v745_v1 = vld [vmem:[%s1021_s1 + $0x38] sm:$0xff]   ;;  %664 = vmatprep.subr.bf16.mxu0 %v744_v0  ;;  %728 = vmatprep.subr.bf16.mxu1 %v744_v0  ;;  %v747_v3 = vld [vmem:[%s1021_s1 + $0x30] sm:$0xff]   ;;  %v749_v5 = vld [vmem:[%s1021_s1 + $0x28] sm:$0xff]  }
   0x3   :  { %665 = vmatpush3.bf16.msra.mxu0 %v745_v1  ;;  %736 = vmatpush3.bf16.msra.mxu1 %v745_v1  ;;  %v750_v6 = vld [vmem:[%s1021_s1 + $0x60] sm:$0xff]   ;;  %v752_v8 = vld [vmem:[%s1021_s1 + $0x58] sm:$0xff]   ;;  %v754_v10 = vld [vmem:[%s1021_s1 + $0x50] sm:$0xff]  }
   0x4   :  { %666 = vmatprep.subr.bf16.mxu0 %v746_v2  ;;  %729 = vmatprep.subr.bf16.mxu1 %v746_v2  ;;  %v751_v7 = vld [vmem:[%s1021_s1 + $0x20] sm:$0xff]   ;;  %v753_v9 = vld [vmem:[%s1021_s1 + $0x18] sm:$0xff]   ;;  %v755_v12 = vld [vmem:[%s1021_s1 + $0x10] sm:$0xff]  }
   0x5   :  { %v762_v11 = vld [vmem:[%s1022_s0 + $0x4] ss:$8 sps:$4 sm:$0xff]   ;;  %v760_v18 = vld [vmem:[%s1022_s0] ss:$8 sps:$4 sm:$0xff]   ;;  %v763_v20 = vld [vmem:[%s1022_s0 + $0x14] ss:$8 sps:$4 sm:$0xff]  }
   0x6   :  { %v768_v13 = vld [vmem:[%s1022_s0 + $0x44] ss:$8 sps:$4 sm:$0xff]   ;;  %274 = vmatprep.mubr.bf16.mxu0 %v762_v11  ;;  %v766_v19 = vld [vmem:[%s1022_s0 + $0x40] ss:$8 sps:$4 sm:$0xff]   ;;  %v772_v21 = vld [vmem:[%s1022_s0 + $0x54] ss:$8 sps:$4 sm:$0xff]  }
   0x7   :  { %667 = vmatpush3.bf16.msra.mxu0 %v747_v3  ;;  %737 = vmatpush3.bf16.msra.mxu1 %v747_v3  ;;  %v756_v14 = vld [vmem:[%s1021_s1 + $0x48] sm:$0xff]   ;;  %v758_v16 = vld [vmem:[%s1021_s1 + $0x40] sm:$0xff]   ;;  %v765_v22 = vld [vmem:[%s1022_s0 + $0x10] ss:$8 sps:$4 sm:$0xff]  }
   0x8   :  { %668 = vmatprep.subr.bf16.mxu0 %v748_v4  ;;  %730 = vmatprep.subr.bf16.mxu1 %v748_v4  ;;  %v757_v15 = vld [vmem:[%s1021_s1 + $0x8] sm:$0xff]   ;;  %v759_v17 = vld [vmem:[%s1021_s1] sm:$0xff]   ;;  %v774_v23 = vld [vmem:[%s1022_s0 + $0x50] ss:$8 sps:$4 sm:$0xff]  }
   0x9   :  { %306 = vmatprep.mubr.bf16.mxu1 %v768_v13  ;;  %v769_v24 = vld [vmem:[%s1022_s0 + $0x24] ss:$8 sps:$4 sm:$0xff]   ;;  %v771_v26 = vld [vmem:[%s1022_s0 + $0x20] ss:$8 sps:$4 sm:$0xff]   ;;  %v775_v28 = vld [vmem:[%s1022_s0 + $0x34] ss:$8 sps:$4 sm:$0xff]  }
   0xa   :  { %v778_v25 = vld [vmem:[%s1022_s0 + $0x64] ss:$8 sps:$4 sm:$0xff]   ;;  %v780_v27 = vld [vmem:[%s1022_s0 + $0x60] ss:$8 sps:$4 sm:$0xff]   ;;  %v781_v29 = vld [vmem:[%s1022_s0 + $0x74] ss:$8 sps:$4 sm:$0xff]  }
   0xb   :  { %669 = vmatpush3.bf16.msra.mxu0 %v749_v5  ;;  %738 = vmatpush3.bf16.msra.mxu1 %v749_v5  ;;  %v777_v30 = vld [vmem:[%s1022_s0 + $0x30] ss:$8 sps:$4 sm:$0xff]  }
   0xc   :  { %670 = vmatprep.subr.bf16.mxu0 %v750_v6  ;;  %731 = vmatprep.subr.bf16.mxu1 %v750_v6  ;;  %v783_v31 = vld [vmem:[%s1022_s0 + $0x70] ss:$8 sps:$4 sm:$0xff]  }
   0xf   :  { %671 = vmatpush3.bf16.msra.mxu0 %v751_v7  ;;  %739 = vmatpush3.bf16.msra.mxu1 %v751_v7 }
  0x10   :  { %672 = vmatprep.subr.bf16.mxu0 %v752_v8  ;;  %732 = vmatprep.subr.bf16.mxu1 %v752_v8 }
  0x13   :  { %673 = vmatpush3.bf16.msra.mxu0 %v753_v9  ;;  %740 = vmatpush3.bf16.msra.mxu1 %v753_v9 }
  0x14   :  { %674 = vmatprep.subr.bf16.mxu0 %v754_v10  ;;  %733 = vmatprep.subr.bf16.mxu1 %v754_v10 }
  0x17   :  { %675 = vmatpush3.bf16.msra.mxu0 %v755_v12  ;;  %741 = vmatpush3.bf16.msra.mxu1 %v755_v12 }
  0x18   :  { %676 = vmatprep.subr.bf16.mxu0 %v756_v14  ;;  %734 = vmatprep.subr.bf16.mxu1 %v756_v14 }
  0x1b   :  { %677 = vmatpush3.bf16.msra.mxu0 %v757_v15  ;;  %742 = vmatpush3.bf16.msra.mxu1 %v757_v15 }
  0x1c   :  { %678 = vmatprep.subr.bf16.mxu0 %v758_v16  ;;  %735 = vmatprep.subr.bf16.mxu1 %v758_v16 }
  0x1f   :  { %679 = vmatpush3.bf16.msra.mxu0 %v759_v17  ;;  %743 = vmatpush3.bf16.msra.mxu1 %v759_v17 }
  0x22   :  { %275 = vmatmul.mubr.bf16.vlgmr.msra.gmra.mxu0 %v760_v18  ;;  %307 = vmatmul.mubr.bf16.vlgmr.msra.gmra.mxu1 %v766_v19 }
  0x23   :  { %282 = vmatprep.mubr.bf16.mxu0 %v763_v20  ;;  %314 = vmatprep.mubr.bf16.mxu1 %v772_v21 }
  0x2a   :  { %283 = vmatmul.mubr.bf16.gmra.mxu0 %v765_v22  ;;  %315 = vmatmul.mubr.bf16.gmra.mxu1 %v774_v23 }
  0x2b   :  { %290 = vmatprep.mubr.bf16.mxu0 %v769_v24  ;;  %322 = vmatprep.mubr.bf16.mxu1 %v778_v25 }
  0x32   :  { %291 = vmatmul.mubr.bf16.gmra.mxu0 %v771_v26  ;;  %323 = vmatmul.mubr.bf16.gmra.mxu1 %v780_v27 }
  0x33   :  { %298 = vmatprep.mubr.bf16.mxu0 %v775_v28  ;;  %330 = vmatprep.mubr.bf16.mxu1 %v781_v29 }
  0x3a   :  { %299 = vmatmul.mubr.bf16.gmra.mxu0 %v777_v30  ;;  %331 = vmatmul.mubr.bf16.gmra.mxu1 %v783_v31 }
  0xe2   :  { %v680_v32 = vpop.f32.mrf.mxu0  ;;  %v704_v33 = vpop.f32.mrf.mxu1 }
  0xe4   :  { %v681_v34 = vpop.f32.mrf.mxu0  ;;  %v705_v35 = vpop.f32.mrf.mxu1 }
  0xe5   :  { %v909_v51 = vadd.f32 %v681_v34, %v680_v32  ;;  %v941_v20 = vadd.f32 %v705_v35, %v704_v33 }
  0xe6   :  { %v683_v36 = vpop.f32.mrf.mxu0  ;;  %v707_v37 = vpop.f32.mrf.mxu1 }
  0xe7   :  { %v361_v58 = vmul.f32 %v909_v51, %v909_v51  ;;  %v369_v29 = vmul.f32 %v941_v20, %v941_v20 }
  0xe8   :  { %v684_v38 = vpop.f32.mrf.mxu0  ;;  %v708_v39 = vpop.f32.mrf.mxu1 }
  0xe9   :  { %v907_v48 = vadd.f32 %v684_v38, %v683_v36  ;;  %v946_v24 = vadd.f32 %v708_v39, %v707_v37 }
  0xea   :  { %v686_v40 = vpop.f32.mrf.mxu0  ;;  %v710_v41 = vpop.f32.mrf.mxu1 }
  0xeb   :  { %v362_v55 = vmul.f32 %v907_v48, %v907_v48  ;;  %v339_v59 = vadd.f32 %v907_v48, %v909_v51  ;;  %v370_v33 = vmul.f32 %v946_v24, %v946_v24 }
  0xec   :  { %v687_v42 = vpop.f32.mrf.mxu0  ;;  %v711_v43 = vpop.f32.mrf.mxu1 }
  0xed   :  { %v911_v52 = vadd.f32 %v687_v42, %v686_v40  ;;  %v377_v0 = vadd.f32 %v362_v55, %v361_v58  ;;  %v953_v30 = vadd.f32 %v711_v43, %v710_v41 }
  0xee   :  { %v689_v44 = vpop.f32.mrf.mxu0  ;;  %v713_v45 = vpop.f32.mrf.mxu1 }
  0xef   :  { %v363_v60 = vmul.f32 %v911_v52, %v911_v52  ;;  %v340_v1 = vadd.f32 %v911_v52, %v339_v59  ;;  %v371_v38 = vmul.f32 %v953_v30, %v953_v30 }
  0xf0   :  { %v690_v46 = vpop.f32.mrf.mxu0  ;;  %v714_v47 = vpop.f32.mrf.mxu1 }
  0xf1   :  { %v915_v56 = vadd.f32 %v690_v46, %v689_v44  ;;  %v378_v5 = vadd.f32 %v377_v0, %v363_v60  ;;  %v958_v34 = vadd.f32 %v714_v47, %v713_v45 }
  0xf2   :  { %v692_v49 = vpop.f32.mrf.mxu0  ;;  %v716_v50 = vpop.f32.mrf.mxu1 }
  0xf3   :  { %v364_v2 = vmul.f32 %v915_v56, %v915_v56  ;;  %v341_v6 = vadd.f32 %v915_v56, %v340_v1  ;;  %v372_v42 = vmul.f32 %v958_v34, %v958_v34 }
  0xf4   :  { %v693_v53 = vpop.f32.mrf.mxu0  ;;  %v717_v54 = vpop.f32.mrf.mxu1 }
  0xf5   :  { %v923_v61 = vadd.f32 %v693_v53, %v692_v49  ;;  %v379_v10 = vadd.f32 %v378_v5, %v364_v2  ;;  %v963_v39 = vadd.f32 %v717_v54, %v716_v50 }
  0xf6   :  { %v695_v57 = vpop.f32.mrf.mxu0  ;;  %v719_v63 = vpop.f32.mrf.mxu1 }
  0xf7   :  { %v365_v7 = vmul.f32 %v923_v61, %v923_v61  ;;  %v342_v11 = vadd.f32 %v923_v61, %v341_v6  ;;  %v373_v47 = vmul.f32 %v963_v39, %v963_v39 }
  0xf8   :  { %v696_v62 = vpop.f32.mrf.mxu0  ;;  %v720_v9 = vpop.f32.mrf.mxu1 }
  0xf9   :  { %v928_v3 = vadd.f32 %v696_v62, %v695_v57  ;;  %v380_v15 = vadd.f32 %v379_v10, %v365_v7  ;;  %v968_v43 = vadd.f32 %v720_v9, %v719_v63 }
  0xfa   :  { %v698_v4 = vpop.f32.mrf.mxu0  ;;  %v722_v19 = vpop.f32.mrf.mxu1 }
  0xfb   :  { %v366_v12 = vmul.f32 %v928_v3, %v928_v3  ;;  %v343_v16 = vadd.f32 %v928_v3, %v342_v11  ;;  %v374_v55 = vmul.f32 %v968_v43, %v968_v43 }
  0xfc   :  { %v699_v8 = vpop.f32.mrf.mxu0  ;;  %v723_v28 = vpop.f32.mrf.mxu1 }
  0xfd   :  { %v936_v13 = vadd.f32 %v699_v8, %v698_v4  ;;  %v381_v21 = vadd.f32 %v380_v15, %v366_v12  ;;  %v724_v50 = vadd.f32 %v723_v28, %v722_v19  ;;  %v402_v28 = vld [vmem:[%s1023_s2] sm:$0x1] }
  0xfe   :  { %v701_v14 = vpop.f32.mrf.mxu0  ;;  %v725_v37 = vpop.f32.mrf.mxu1 }
  0xff   :  { %v367_v17 = vmul.f32 %v936_v13, %v936_v13  ;;  %v344_v22 = vadd.f32 %v936_v13, %v343_v16  ;;  %v375_v62 = vmul.f32 %v724_v50, %v724_v50 }
 0x100   :  { %v702_v18 = vpop.f32.mrf.mxu0  ;;  %v726_v46 = vpop.f32.mrf.mxu1 }
 0x101   :  { %v944_v23 = vadd.f32 %v702_v18, %v701_v14  ;;  %v382_v25 = vadd.f32 %v381_v21, %v367_v17  ;;  %v727_v58 = vadd.f32 %v726_v46, %v725_v37 }
 0x103   :  { %v345_v26 = vadd.f32 %v944_v23, %v344_v22  ;;  %v368_v27 = vmul.f32 %v944_v23, %v944_v23  ;;  %v376_v1 = vmul.f32 %v727_v58, %v727_v58 }
 0x105   :  { %v346_v31 = vadd.f32 %v941_v20, %v345_v26  ;;  %v383_v32 = vadd.f32 %v382_v25, %v368_v27  ;;  %v410_v26 = vlaneseq }
 0x107   :  { %v347_v35 = vadd.f32 %v946_v24, %v346_v31  ;;  %v384_v36 = vadd.f32 %v383_v32, %v369_v29  ;;  %v411_v27 = vshrl.u32 %v410_v26, 7 }
 0x109   :  { %v385_v40 = vadd.f32 %v384_v36, %v370_v33  ;;  %v348_v41 = vadd.f32 %v953_v30, %v347_v35  ;;  %v412_v29 = vsub.s32 0, %v411_v27  ;;  %v406_v33 = vld [vmem:[%s1024_s3] sm:$0x1] }
 0x10b   :  { %v349_v44 = vadd.f32 %v958_v34, %v348_v41  ;;  %v386_v45 = vadd.f32 %v385_v40, %v371_v38 }
 0x10d   :  { %v350_v49 = vadd.f32 %v963_v39, %v349_v44  ;;  %v387_v53 = vadd.f32 %v386_v45, %v372_v42 }
 0x10f   :  { %v351_v54 = vadd.f32 %v968_v43, %v350_v49  ;;  %v388_v57 = vadd.f32 %v387_v53, %v373_v47 }
 0x111   :  { %v389_v59 = vadd.f32 %v388_v57, %v374_v55  ;;  %v352_v60 = vadd.f32 %v724_v50, %v351_v54 }
 0x113   :  { %v390_v63 = vadd.f32 %v389_v59, %v375_v62  ;;  %v353_v0 = vadd.f32 %v727_v58, %v352_v60 }
 0x115   :  { %v354_v2 = vrot.slane %v353_v0, 4  ;;  %v391_v4 = vadd.f32 %v390_v63, %v376_v1 }
 0x117   :  { %v355_v5 = vadd.f32 %v354_v2, %v353_v0  ;;  %v392_v6 = vrot.slane %v391_v4, 4 }
 0x119   :  { %v356_v7 = vrot.slane %v355_v5, 2  ;;  %v393_v8 = vadd.f32 %v392_v6, %v391_v4 }
 0x11b   :  { %v357_v9 = vadd.f32 %v356_v7, %v355_v5  ;;  %v394_v10 = vrot.slane %v393_v8, 2 }
 0x11d   :  { %v358_v11 = vrot.slane %v357_v9, 1  ;;  %v395_v12 = vadd.f32 %v394_v10, %v393_v8 }
 0x11f   :  { %v359_v14 = vadd.f32 %v358_v11, %v357_v9  ;;  %v396_v15 = vrot.slane %v395_v12, 1 }
 0x121   :  { %v360_v16 = vmul.f32 0.0078125, %v359_v14  ;;  %v397_v17 = vadd.f32 %v396_v15, %v395_v12 }
 0x123   :  { %v398_v18 = vmul.f32 0.0078125, %v397_v17  ;;  %v399_v19 = vmul.f32 %v360_v16, %v360_v16 }
 0x125   :  { %v400_v21 = vsub.f32 %v398_v18, %v399_v19 }
 0x127   :  { %v401_v22 = vmax.f32 %v400_v21, 0.0 }
 0x129   :  { %v403_v25 = vadd.f32 1e-05, %v401_v22 }
 0x12b   :  { %784 = vrsqrt.f32 %v403_v25 }
 0x138   :  { %v785_v31 = vpop.eup %784 }
 0x139   :  { %v405_v32 = vmul.f32 %v785_v31, %v402_v28 }
 0x13b   :  { %v407_v35 = vmul.f32 %v405_v32, %v360_v16  ;;  %v413_v36 = vrot.slane %v405_v32, %v412_v29 }
 0x13d   :  { %v408_v37 = vsub.f32 %v406_v33, %v407_v35  ;;  %v415_v38 = vmul.f32 %v909_v51, %v413_v36  ;;  %v416_v40 = vmul.f32 %v907_v48, %v413_v36  ;;  %v417_v41 = vmul.f32 %v911_v52, %v413_v36 }
 0x13e   :  { %v418_v42 = vmul.f32 %v915_v56, %v413_v36  ;;  %v419_v44 = vmul.f32 %v923_v61, %v413_v36  ;;  %v420_v45 = vmul.f32 %v928_v3, %v413_v36  ;;  %v421_v46 = vmul.f32 %v936_v13, %v413_v36 }
 0x13f   :  { %v422_v47 = vmul.f32 %v944_v23, %v413_v36  ;;  %v423_v49 = vmul.f32 %v941_v20, %v413_v36  ;;  %v424_v53 = vmul.f32 %v946_v24, %v413_v36  ;;  %v425_v51 = vmul.f32 %v953_v30, %v413_v36 }
 0x140   :  { %v426_v48 = vmul.f32 %v958_v34, %v413_v36  ;;  %v435_v54 = vrot.slane %v408_v37, %v412_v29  ;;  %v427_v52 = vmul.f32 %v963_v39, %v413_v36  ;;  %v428_v56 = vmul.f32 %v968_v43, %v413_v36 }
 0x141   :  { %v429_v61 = vmul.f32 %v724_v50, %v413_v36  ;;  %v430_v55 = vmul.f32 %v727_v58, %v413_v36 }
 0x142   :  { %v437_v3 = vadd.f32 %v435_v54, %v415_v38  ;;  %v438_v57 = vadd.f32 %v435_v54, %v416_v40  ;;  %v439_v13 = vadd.f32 %v435_v54, %v417_v41  ;;  %v440_v59 = vadd.f32 %v435_v54, %v418_v42 }
 0x143   :  { %v441_v23 = vadd.f32 %v435_v54, %v419_v44  ;;  %v442_v60 = vadd.f32 %v435_v54, %v420_v45  ;;  %v443_v20 = vadd.f32 %v435_v54, %v421_v46  ;;  %v444_v62 = vadd.f32 %v435_v54, %v422_v47 }
 0x144   :  { %v445_v24 = vadd.f32 %v435_v54, %v423_v49  ;;  %v446_v63 = vadd.f32 %v435_v54, %v424_v53  ;;  %v447_v30 = vadd.f32 %v435_v54, %v425_v51  ;;  %v448_v0 = vadd.f32 %v435_v54, %v426_v48 }
 0x145   :  { %v449_v34 = vadd.f32 %v435_v54, %v427_v52  ;;  %v450_v1 = vadd.f32 %v435_v54, %v428_v56  ;;  %v451_v2 = vadd.f32 %v435_v54, %v429_v61  ;;  %v452_v39 = vadd.f32 %v435_v54, %v430_v55 }
 0x146   :  { %v453_v4 = vmax.f32 %v437_v3, 0.0  ;;  %v454_v43 = vmax.f32 %v438_v57, 0.0  ;;  %v455_v50 = vmax.f32 %v439_v13, 0.0  ;;  %v456_v58 = vmax.f32 %v440_v59, 0.0 }
 0x147   :  { %v457_v5 = vmax.f32 %v441_v23, 0.0  ;;  %v458_v6 = vmax.f32 %v442_v60, 0.0  ;;  %v459_v7 = vmax.f32 %v443_v20, 0.0  ;;  %v460_v8 = vmax.f32 %v444_v62, 0.0 }
 0x148   :  { %v461_v9 = vmax.f32 %v445_v24, 0.0  ;;  %v462_v10 = vmax.f32 %v446_v63, 0.0  ;;  %v463_v11 = vmax.f32 %v447_v30, 0.0  ;;  %v464_v12 = vmax.f32 %v448_v0, 0.0 }
 0x149   :  { %v465_v14 = vmax.f32 %v449_v34, 0.0  ;;  %v466_v15 = vmax.f32 %v450_v1, 0.0  ;;  %v467_v16 = vmax.f32 %v451_v2, 0.0  ;;  %v468_v17 = vmax.f32 %v452_v39, 0.0 }
 0x14a   :  { %v620_v18 = vpack.c.bf16 %v454_v43, %v453_v4  ;;  %v625_v19 = vpack.c.bf16 %v456_v58, %v455_v50  ;;  %v630_v21 = vpack.c.bf16 %v458_v6, %v457_v5  ;;  %v635_v22 = vpack.c.bf16 %v460_v8, %v459_v7 }
 0x14b   :  { %v640_v25 = vpack.c.bf16 %v462_v10, %v461_v9  ;;  %v645_v26 = vpack.c.bf16 %v464_v12, %v463_v11  ;;  %v650_v27 = vpack.c.bf16 %v466_v15, %v465_v14  ;;  %v655_v28 = vpack.c.bf16 %v468_v17, %v467_v16 }
 0x14c   :  { %621 = vst [vmem:[%s1025_s4] sm:$0xff] %v620_v18   ;;  %657 = vst [vmem:[%s1025_s4 + $0x8] sm:$0xff] %v625_v19  }
 0x14d   :  { %658 = vst [vmem:[%s1025_s4 + $0x10] sm:$0xff] %v630_v21   ;;  %659 = vst [vmem:[%s1025_s4 + $0x18] sm:$0xff] %v635_v22  }
 0x14e   :  { %660 = vst [vmem:[%s1025_s4 + $0x20] sm:$0xff] %v640_v25   ;;  %661 = vst [vmem:[%s1025_s4 + $0x28] sm:$0xff] %v645_v26  }
 0x14f   :  { %662 = vst [vmem:[%s1025_s4 + $0x30] sm:$0xff] %v650_v27   ;;  %663 = vst [vmem:[%s1025_s4 + $0x38] sm:$0xff] %v655_v28  }

// kernel: resnet_forward.17
= control target key start
LH: loop header
LB: loop body
LE: loop exit
PB: predicated region body
PF: predicated region fallthrough
CT: control target
= control target key end

     0   :  { %v182_v42 = vlaneseq  ;;  %s363_s1 = inlined_call_operand.vmem [shape: bf16[128,128], index: 1, kind: input, shape index: {}]   ;;  %s364_s0 = inlined_call_operand.vmem [shape: bf16[32,128], index: 0, kind: input, shape index: {}]   ;;  %s365_s2 = inlined_call_operand.vmem [shape: f32[1,128], index: 2, kind: input, shape index: {}]   ;;  %s366_s3 = inlined_call_operand.vmem [shape: f32[1,128], index: 3, kind: input, shape index: {}]   ;;  %s367_s4 = inlined_call_operand.vmem [shape: bf16[32,128], index: 4, kind: output, shape index: {}]  }
   0x1   :  { %v284_v0 = vld [vmem:[%s363_s1 + $0x38] sm:$0xff]   ;;  %v285_v1 = vld [vmem:[%s363_s1 + $0x30] sm:$0xff]   ;;  %v286_v2 = vld [vmem:[%s363_s1 + $0x28] sm:$0xff]  }
   0x2   :  { %264 = vmatprep.subr.bf16.mxu0 %v284_v0  ;;  %v287_v3 = vld [vmem:[%s363_s1 + $0x20] sm:$0xff]   ;;  %v288_v5 = vld [vmem:[%s363_s1 + $0x18] sm:$0xff]   ;;  %v289_v6 = vld [vmem:[%s363_s1 + $0x10] sm:$0xff]   ;;  %v183_v43 = vshrl.u32 %v182_v42, 7 }
   0x3   :  { %265 = vmatpush3.bf16.msra.mxu0 %v284_v0  ;;  %v292_v4 = vld [vmem:[%s364_s0] sm:$0xff]   ;;  %v290_v7 = vld [vmem:[%s363_s1 + $0x8] sm:$0xff]  }
   0x4   :  { %266 = vmatprep.subr.bf16.mxu0 %v285_v1  ;;  %280 = vmatprep.mubr.bf16.mxu0 %v292_v4  ;;  %v291_v8 = vld [vmem:[%s363_s1] sm:$0xff]   ;;  %v293_v9 = vld [vmem:[%s364_s0 + $0x8] sm:$0xff]   ;;  %v184_v45 = vsub.s32 0, %v183_v43 }
   0x5   :  { %v174_v44 = vld [vmem:[%s365_s2] sm:$0x1] }
   0x6   :  { %v178_v48 = vld [vmem:[%s366_s3] sm:$0x1] }
   0x7   :  { %267 = vmatpush3.bf16.msra.mxu0 %v285_v1 }
   0x8   :  { %268 = vmatprep.subr.bf16.mxu0 %v286_v2 }
   0xb   :  { %269 = vmatpush3.bf16.msra.mxu0 %v286_v2 }
   0xc   :  { %270 = vmatprep.subr.bf16.mxu0 %v287_v3 }
   0xf   :  { %271 = vmatpush3.bf16.msra.mxu0 %v287_v3 }
  0x10   :  { %272 = vmatprep.subr.bf16.mxu0 %v288_v5 }
  0x13   :  { %273 = vmatpush3.bf16.msra.mxu0 %v288_v5 }
  0x14   :  { %274 = vmatprep.subr.bf16.mxu0 %v289_v6 }
  0x17   :  { %275 = vmatpush3.bf16.msra.mxu0 %v289_v6 }
  0x18   :  { %276 = vmatprep.subr.bf16.mxu0 %v290_v7 }
  0x1b   :  { %277 = vmatpush3.bf16.msra.mxu0 %v290_v7 }
  0x1c   :  { %278 = vmatprep.subr.bf16.mxu0 %v291_v8 }
  0x1f   :  { %279 = vmatpush3.bf16.msra.mxu0 %v291_v8 }
  0x22   :  { %281 = vmatmul.mubr.bf16.vlgmr.msra.gmra.mxu0 %v293_v9 }
  0xe2   :  { %v282_v10 = vpop.f32.mrf.mxu0 }
  0xe3   :  { %v159_v17 = vmul.f32 %v282_v10, %v282_v10 }
  0xe4   :  { %v132_v11 = vpop.f32.mrf.mxu0 }
  0xe5   :  { %v157_v14 = vmul.f32 %v132_v11, %v132_v11 }
  0xe6   :  { %v283_v12 = vpop.f32.mrf.mxu0 }
  0xe7   :  { %v160_v20 = vmul.f32 %v283_v12, %v283_v12 }
  0xe8   :  { %v135_v13 = vpop.f32.mrf.mxu0 }
  0xe9   :  { %v147_v15 = vadd.f32 %v135_v13, %v132_v11  ;;  %v158_v16 = vmul.f32 %v135_v13, %v135_v13 }
  0xeb   :  { %v148_v18 = vadd.f32 %v282_v10, %v147_v15  ;;  %v161_v19 = vadd.f32 %v158_v16, %v157_v14 }
  0xed   :  { %v149_v21 = vadd.f32 %v283_v12, %v148_v18  ;;  %v162_v22 = vadd.f32 %v161_v19, %v159_v17 }
  0xef   :  { %v150_v23 = vrot.slane %v149_v21, 4  ;;  %v163_v24 = vadd.f32 %v162_v22, %v160_v20 }
  0xf1   :  { %v151_v25 = vadd.f32 %v150_v23, %v149_v21  ;;  %v164_v26 = vrot.slane %v163_v24, 4 }
  0xf3   :  { %v152_v27 = vrot.slane %v151_v25, 2  ;;  %v165_v28 = vadd.f32 %v164_v26, %v163_v24 }
  0xf5   :  { %v153_v29 = vadd.f32 %v152_v27, %v151_v25  ;;  %v166_v30 = vrot.slane %v165_v28, 2 }
  0xf7   :  { %v154_v31 = vrot.slane %v153_v29, 1  ;;  %v167_v32 = vadd.f32 %v166_v30, %v165_v28 }
  0xf9   :  { %v155_v33 = vadd.f32 %v154_v31, %v153_v29  ;;  %v168_v34 = vrot.slane %v167_v32, 1 }
  0xfb   :  { %v156_v35 = vmul.f32 0.03125, %v155_v33  ;;  %v169_v36 = vadd.f32 %v168_v34, %v167_v32 }
  0xfd   :  { %v170_v37 = vmul.f32 0.03125, %v169_v36  ;;  %v171_v38 = vmul.f32 %v156_v35, %v156_v35 }
  0xff   :  { %v172_v39 = vsub.f32 %v170_v37, %v171_v38 }
 0x101   :  { %v173_v40 = vmax.f32 %v172_v39, 0.0 }
 0x103   :  { %v175_v41 = vadd.f32 1e-05, %v173_v40 }
 0x105   :  { %294 = vrsqrt.f32 %v175_v41 }
 0x112   :  { %v295_v46 = vpop.eup %294 }
 0x113   :  { %v177_v47 = vmul.f32 %v295_v46, %v174_v44 }
 0x115   :  { %v179_v49 = vmul.f32 %v177_v47, %v156_v35  ;;  %v185_v50 = vrot.slane %v177_v47, %v184_v45 }
 0x117   :  { %v180_v51 = vsub.f32 %v178_v48, %v179_v49  ;;  %v187_v52 = vmul.f32 %v185_v50, %v132_v11  ;;  %v188_v53 = vmul.f32 %v185_v50, %v135_v13  ;;  %v189_v54 = vmul.f32 %v282_v10, %v185_v50 }
 0x118   :  { %v190_v55 = vmul.f32 %v283_v12, %v185_v50 }
 0x119   :  { %v195_v56 = vrot.slane %v180_v51, %v184_v45 }
 0x11b   :  { %v197_v57 = vadd.f32 %v195_v56, %v187_v52  ;;  %v198_v58 = vadd.f32 %v195_v56, %v188_v53  ;;  %v199_v59 = vadd.f32 %v195_v56, %v189_v54  ;;  %v200_v60 = vadd.f32 %v195_v56, %v190_v55 }
 0x11d   :  { %v246_v61 = vpack.c.bf16 %v198_v58, %v197_v57  ;;  %v251_v62 = vpack.c.bf16 %v200_v60, %v199_v59 }
 0x11f   :  { %247 = vst [vmem:[%s367_s4] sm:$0xff] %v246_v61   ;;  %253 = vst [vmem:[%s367_s4 + $0x8] sm:$0xff] %v251_v62  }

// kernel: resnet_forward.15
= control target key start
LH: loop header
LB: loop body
LE: loop exit
PB: predicated region body
PF: predicated region fallthrough
CT: control target
= control target key end

     0   :  { %s1517_s1 = inlined_call_operand.vmem [shape: bf16[384,128], index: 1, kind: input, shape index: {}]   ;;  %s1518_s0 = inlined_call_operand.vmem [shape: bf16[128,384], index: 0, kind: input, shape index: {}]   ;;  %s1519_s2 = inlined_call_operand.vmem [shape: f32[1,128], index: 2, kind: input, shape index: {}]   ;;  %s1520_s4 = inlined_call_operand.vmem [shape: bf16[128,128], index: 4, kind: input, shape index: {}]   ;;  %s1521_s3 = inlined_call_operand.vmem [shape: f32[1,128], index: 3, kind: input, shape index: {}]   ;;  %s1522_s5 = inlined_call_operand.vmem [shape: bf16[128,128], index: 5, kind: output, shape index: {}]  }
   0x1   :  { %v1107_v0 = vld [vmem:[%s1517_s1 + $0x78] sm:$0xff]   ;;  %v1110_v3 = vld [vmem:[%s1517_s1 + $0x70] sm:$0xff]   ;;  %v1113_v6 = vld [vmem:[%s1517_s1 + $0x68] sm:$0xff]  }
   0x2   :  { %v1108_v1 = vld [vmem:[%s1517_s1 + $0x38] sm:$0xff]   ;;  %995 = vmatprep.subr.bf16.mxu0 %v1107_v0  ;;  %v1111_v4 = vld [vmem:[%s1517_s1 + $0x30] sm:$0xff]   ;;  %v1114_v7 = vld [vmem:[%s1517_s1 + $0x28] sm:$0xff]  }
   0x3   :  { %v1109_v2 = vld [vmem:[%s1517_s1 + $0xb8] sm:$0xff]   ;;  %996 = vmatpush3.bf16.msra.mxu0 %v1108_v1  ;;  %v1112_v5 = vld [vmem:[%s1517_s1 + $0xb0] sm:$0xff]   ;;  %v1115_v8 = vld [vmem:[%s1517_s1 + $0xa8] sm:$0xff]  }
   0x4   :  { %1075 = vmatprep.subr.bf16.mxu1 %v1109_v2  ;;  %997 = vmatprep.subr.bf16.mxu0 %v1110_v3  ;;  %v1116_v9 = vld [vmem:[%s1517_s1 + $0x60] sm:$0xff]   ;;  %v1119_v12 = vld [vmem:[%s1517_s1 + $0x58] sm:$0xff]   ;;  %v1122_v15 = vld [vmem:[%s1517_s1 + $0x50] sm:$0xff]  }
   0x5   :  { %1076 = vmatpush3.bf16.msra.mxu1 %v1109_v2  ;;  %v1117_v10 = vld [vmem:[%s1517_s1 + $0x20] sm:$0xff]   ;;  %v1121_v13 = vld [vmem:[%s1517_s1 + $0x98] sm:$0xff]   ;;  %v1124_v16 = vld [vmem:[%s1517_s1 + $0x90] sm:$0xff]  }
   0x6   :  { %1077 = vmatprep.subr.bf16.mxu1 %v1112_v5  ;;  %v1118_v11 = vld [vmem:[%s1517_s1 + $0xa0] sm:$0xff]   ;;  %v1120_v14 = vld [vmem:[%s1517_s1 + $0x18] sm:$0xff]   ;;  %v1123_v17 = vld [vmem:[%s1517_s1 + $0x10] sm:$0xff]  }
   0x7   :  { %998 = vmatpush3.bf16.msra.mxu0 %v1111_v4  ;;  %v1125_v18 = vld [vmem:[%s1517_s1 + $0x48] sm:$0xff]   ;;  %v1128_v21 = vld [vmem:[%s1517_s1 + $0x40] sm:$0xff]   ;;  %v1143_v32 = vld [vmem:[%s1518_s0 + $0x50] ss:$12 sps:$4 sm:$0xff]  }
   0x8   :  { %999 = vmatprep.subr.bf16.mxu0 %v1113_v6  ;;  %v1126_v19 = vld [vmem:[%s1517_s1 + $0x8] sm:$0xff]   ;;  %v1130_v22 = vld [vmem:[%s1517_s1 + $0x80] sm:$0xff]   ;;  %v1141_v34 = vld [vmem:[%s1518_s0 + $0x30] ss:$12 sps:$4 sm:$0xff]  }
   0x9   :  { %1078 = vmatpush3.bf16.msra.mxu1 %v1112_v5  ;;  %v1127_v20 = vld [vmem:[%s1517_s1 + $0x88] sm:$0xff]   ;;  %v1133_v23 = vld [vmem:[%s1518_s0 + $0x4] ss:$12 sps:$4 sm:$0xff]   ;;  %v1139_v31 = vld [vmem:[%s1518_s0 + $0x34] ss:$12 sps:$4 sm:$0xff]  }
   0xa   :  { %1079 = vmatprep.subr.bf16.mxu1 %v1115_v8  ;;  %v1134_v24 = vld [vmem:[%s1518_s0 + $0x8] ss:$12 sps:$4 sm:$0xff]   ;;  %v1129_v25 = vld [vmem:[%s1517_s1] sm:$0xff]   ;;  %405 = vmatprep.mubr.bf16.mxu0 %v1133_v23  ;;  %v1144_v35 = vld [vmem:[%s1518_s0 + $0x4c] ss:$12 sps:$4 sm:$0xff]  }
   0xb   :  { %1000 = vmatpush3.bf16.msra.mxu0 %v1114_v7  ;;  %1091 = vmatprep.mubr.bf16.mxu1 %v1134_v24  ;;  %v1131_v26 = vld [vmem:[%s1518_s0] ss:$12 sps:$4 sm:$0xff]   ;;  %v1136_v27 = vld [vmem:[%s1518_s0 + $0x1c] ss:$12 sps:$4 sm:$0xff]   ;;  %v1142_v29 = vld [vmem:[%s1518_s0 + $0x38] ss:$12 sps:$4 sm:$0xff]  }
   0xc   :  { %1001 = vmatprep.subr.bf16.mxu0 %v1116_v9  ;;  %v1135_v28 = vld [vmem:[%s1518_s0 + $0x20] ss:$12 sps:$4 sm:$0xff]   ;;  %v1138_v30 = vld [vmem:[%s1518_s0 + $0x18] ss:$12 sps:$4 sm:$0xff]   ;;  %v1150_v33 = vld [vmem:[%s1518_s0 + $0x68] ss:$12 sps:$4 sm:$0xff]  }
   0xd   :  { %1080 = vmatpush3.bf16.msra.mxu1 %v1115_v8  ;;  %v1151_v36 = vld [vmem:[%s1518_s0 + $0x80] ss:$12 sps:$4 sm:$0xff]   ;;  %v1157_v37 = vld [vmem:[%s1518_s0 + $0x98] ss:$12 sps:$4 sm:$0xff]   ;;  %v1146_v38 = vld [vmem:[%s1518_s0 + $0x48] ss:$12 sps:$4 sm:$0xff]  }
   0xe   :  { %1081 = vmatprep.subr.bf16.mxu1 %v1118_v11  ;;  %v1147_v39 = vld [vmem:[%s1518_s0 + $0x64] ss:$12 sps:$4 sm:$0xff]   ;;  %v1149_v41 = vld [vmem:[%s1518_s0 + $0x60] ss:$12 sps:$4 sm:$0xff]   ;;  %v1152_v42 = vld [vmem:[%s1518_s0 + $0x7c] ss:$12 sps:$4 sm:$0xff]  }
   0xf   :  { %1002 = vmatpush3.bf16.msra.mxu0 %v1117_v10  ;;  %v1159_v40 = vld [vmem:[%s1518_s0 + $0xb0] ss:$12 sps:$4 sm:$0xff]   ;;  %v1154_v43 = vld [vmem:[%s1518_s0 + $0x78] ss:$12 sps:$4 sm:$0xff]   ;;  %v1155_v44 = vld [vmem:[%s1518_s0 + $0x94] ss:$12 sps:$4 sm:$0xff]  }
  0x10   :  { %1003 = vmatprep.subr.bf16.mxu0 %v1119_v12  ;;  %v1158_v45 = vld [vmem:[%s1518_s0 + $0x90] ss:$12 sps:$4 sm:$0xff]   ;;  %v1160_v46 = vld [vmem:[%s1518_s0 + $0xac] ss:$12 sps:$4 sm:$0xff]   ;;  %v1162_v47 = vld [vmem:[%s1518_s0 + $0xa8] ss:$12 sps:$4 sm:$0xff]  }
  0x11   :  { %1082 = vmatpush3.bf16.msra.mxu1 %v1118_v11 }
  0x12   :  { %1083 = vmatprep.subr.bf16.mxu1 %v1121_v13 }
  0x13   :  { %1004 = vmatpush3.bf16.msra.mxu0 %v1120_v14 }
  0x14   :  { %1005 = vmatprep.subr.bf16.mxu0 %v1122_v15 }
  0x15   :  { %1084 = vmatpush3.bf16.msra.mxu1 %v1121_v13 }
  0x16   :  { %1085 = vmatprep.subr.bf16.mxu1 %v1124_v16 }
  0x17   :  { %1006 = vmatpush3.bf16.msra.mxu0 %v1123_v17 }
  0x18   :  { %1007 = vmatprep.subr.bf16.mxu0 %v1125_v18 }
  0x19   :  { %1086 = vmatpush3.bf16.msra.mxu1 %v1124_v16 }
  0x1a   :  { %1087 = vmatprep.subr.bf16.mxu1 %v1127_v20 }
  0x1b   :  { %1008 = vmatpush3.bf16.msra.mxu0 %v1126_v19 }
  0x1c   :  { %1009 = vmatprep.subr.bf16.mxu0 %v1128_v21 }
  0x1d   :  { %1088 = vmatpush3.bf16.msra.mxu1 %v1127_v20 }
  0x1e   :  { %1089 = vmatprep.subr.bf16.mxu1 %v1130_v22 }
  0x1f   :  { %1010 = vmatpush3.bf16.msra.mxu0 %v1129_v25 }
  0x21   :  { %1090 = vmatpush3.bf16.msra.mxu1 %v1130_v22 }
  0x22   :  { %406 = vmatmul.mubr.bf16.vlgmr.msra.gmra.mxu0 %v1131_v26 }
  0x23   :  { %413 = vmatprep.mubr.bf16.mxu0 %v1136_v27 }
  0x24   :  { %1092 = vmatmul.mubr.bf16.vlgmr.msra.gmra.mxu1 %v1135_v28 }
  0x25   :  { %1095 = vmatprep.mubr.bf16.mxu1 %v1142_v29 }
  0x2a   :  { %414 = vmatmul.mubr.bf16.gmra.mxu0 %v1138_v30 }
  0x2b   :  { %421 = vmatprep.mubr.bf16.mxu0 %v1139_v31 }
  0x2c   :  { %1096 = vmatmul.mubr.bf16.gmra.mxu1 %v1143_v32 }
  0x2d   :  { %1099 = vmatprep.mubr.bf16.mxu1 %v1150_v33 }
  0x32   :  { %422 = vmatmul.mubr.bf16.gmra.mxu0 %v1141_v34 }
  0x33   :  { %429 = vmatprep.mubr.bf16.mxu0 %v1144_v35 }
  0x34   :  { %1100 = vmatmul.mubr.bf16.gmra.mxu1 %v1151_v36 }
  0x35   :  { %1103 = vmatprep.mubr.bf16.mxu1 %v1157_v37 }
  0x3a   :  { %430 = vmatmul.mubr.bf16.gmra.mxu0 %v1146_v38 }
  0x3b   :  { %437 = vmatprep.mubr.bf16.mxu0 %v1147_v39 }
  0x3c   :  { %1104 = vmatmul.mubr.bf16.gmra.mxu1 %v1159_v40 }
  0x42   :  { %438 = vmatmul.mubr.bf16.gmra.mxu0 %v1149_v41 }
  0x43   :  { %445 = vmatprep.mubr.bf16.mxu0 %v1152_v42 }
  0x4a   :  { %446 = vmatmul.mubr.bf16.gmra.mxu0 %v1154_v43 }
  0x4b   :  { %453 = vmatprep.mubr.bf16.mxu0 %v1155_v44 }
  0x52   :  { %454 = vmatmul.mubr.bf16.gmra.mxu0 %v1158_v45 }
  0x53   :  { %461 = vmatprep.mubr.bf16.mxu0 %v1160_v46 }
  0x5a   :  { %462 = vmatmul.mubr.bf16.gmra.mxu0 %v1162_v47 }
  0xe2   :  { %v1011_v48 = vpop.f32.mrf.mxu0 }
  0xe4   :  { %v1012_v49 = vpop.f32.mrf.mxu0  ;;  %v1093_v50 = vpop.f32.mrf.mxu1 }
  0xe5   :  { %v1013_v8 = vadd.f32 %v1012_v49, %v1011_v48 }
  0xe6   :  { %v1014_v51 = vpop.f32.mrf.mxu0  ;;  %v504_v52 = vpop.f32.mrf.mxu1 }
  0xe7   :  { %v1341_v15 = vadd.f32 %v1013_v8, %v504_v52 }
  0xe8   :  { %v1015_v53 = vpop.f32.mrf.mxu0  ;;  %v1094_v55 = vpop.f32.mrf.mxu1 }
  0xe9   :  { %v1016_v5 = vadd.f32 %v1015_v53, %v1014_v51  ;;  %v589_v24 = vmul.f32 %v1341_v15, %v1341_v15 }
  0xea   :  { %v1017_v54 = vpop.f32.mrf.mxu0  ;;  %v507_v58 = vpop.f32.mrf.mxu1 }
  0xeb   :  { %v1339_v12 = vadd.f32 %v1016_v5, %v507_v58 }
  0xec   :  { %v1018_v56 = vpop.f32.mrf.mxu0  ;;  %v1097_v61 = vpop.f32.mrf.mxu1 }
  0xed   :  { %v1019_v9 = vadd.f32 %v1018_v56, %v1017_v54  ;;  %v590_v20 = vmul.f32 %v1339_v12, %v1339_v12  ;;  %v567_v30 = vadd.f32 %v1339_v12, %v1341_v15 }
  0xee   :  { %v1020_v57 = vpop.f32.mrf.mxu0  ;;  %v520_v0 = vpop.f32.mrf.mxu1 }
  0xef   :  { %v1343_v16 = vadd.f32 %v1093_v50, %v1019_v9  ;;  %v605_v31 = vadd.f32 %v590_v20, %v589_v24 }
  0xf0   :  { %v1021_v59 = vpop.f32.mrf.mxu0  ;;  %v1098_v2 = vpop.f32.mrf.mxu1 }
  0xf1   :  { %v1022_v13 = vadd.f32 %v1021_v59, %v1020_v57  ;;  %v591_v25 = vmul.f32 %v1343_v16, %v1343_v16  ;;  %v568_v36 = vadd.f32 %v567_v30, %v1343_v16 }
  0xf2   :  { %v1023_v60 = vpop.f32.mrf.mxu0  ;;  %v523_v6 = vpop.f32.mrf.mxu1 }
  0xf3   :  { %v1347_v21 = vadd.f32 %v1094_v55, %v1022_v13  ;;  %v606_v37 = vadd.f32 %v605_v31, %v591_v25 }
  0xf4   :  { %v1024_v62 = vpop.f32.mrf.mxu0  ;;  %v1101_v11 = vpop.f32.mrf.mxu1 }
  0xf5   :  { %v1025_v17 = vadd.f32 %v1024_v62, %v1023_v60  ;;  %v592_v32 = vmul.f32 %v1347_v21, %v1347_v21  ;;  %v569_v43 = vadd.f32 %v568_v36, %v1347_v21 }
  0xf6   :  { %v1026_v63 = vpop.f32.mrf.mxu0  ;;  %v536_v19 = vpop.f32.mrf.mxu1 }
  0xf7   :  { %v1353_v26 = vadd.f32 %v1025_v17, %v520_v0  ;;  %v607_v44 = vadd.f32 %v606_v37, %v592_v32 }
  0xf8   :  { %v1027_v1 = vpop.f32.mrf.mxu0  ;;  %v1102_v29 = vpop.f32.mrf.mxu1 }
  0xf9   :  { %v1028_v22 = vadd.f32 %v1027_v1, %v1026_v63  ;;  %v593_v38 = vmul.f32 %v1353_v26, %v1353_v26  ;;  %v570_v49 = vadd.f32 %v569_v43, %v1353_v26 }
  0xfa   :  { %v1029_v3 = vpop.f32.mrf.mxu0  ;;  %v539_v41 = vpop.f32.mrf.mxu1 }
  0xfb   :  { %v1359_v33 = vadd.f32 %v1028_v22, %v523_v6  ;;  %v608_v51 = vadd.f32 %v607_v44, %v593_v38 }
  0xfc   :  { %v1030_v4 = vpop.f32.mrf.mxu0  ;;  %v1105_v48 = vpop.f32.mrf.mxu1 }
  0xfd   :  { %v1031_v27 = vadd.f32 %v1030_v4, %v1029_v3  ;;  %v594_v45 = vmul.f32 %v1359_v33, %v1359_v33  ;;  %v571_v55 = vadd.f32 %v570_v49, %v1359_v33 }
  0xfe   :  { %v1032_v7 = vpop.f32.mrf.mxu0  ;;  %v552_v60 = vpop.f32.mrf.mxu1 }
  0xff   :  { %v1364_v39 = vadd.f32 %v1097_v61, %v1031_v27  ;;  %v609_v57 = vadd.f32 %v608_v51, %v594_v45 }
 0x100   :  { %v1033_v10 = vpop.f32.mrf.mxu0  ;;  %v1106_v8 = vpop.f32.mrf.mxu1 }
 0x101   :  { %v1034_v34 = vadd.f32 %v1033_v10, %v1032_v7  ;;  %v595_v52 = vmul.f32 %v1364_v39, %v1364_v39  ;;  %v572_v61 = vadd.f32 %v571_v55, %v1364_v39 }
 0x102   :  { %v1035_v14 = vpop.f32.mrf.mxu0  ;;  %v555_v22 = vpop.f32.mrf.mxu1 }
 0x103   :  { %v1369_v46 = vadd.f32 %v1098_v2, %v1034_v34  ;;  %v610_v0 = vadd.f32 %v609_v57, %v595_v52 }
 0x104   :  { %v1036_v18 = vpop.f32.mrf.mxu0 }
 0x105   :  { %v1037_v40 = vadd.f32 %v1036_v18, %v1035_v14  ;;  %v596_v58 = vmul.f32 %v1369_v46, %v1369_v46  ;;  %v573_v3 = vadd.f32 %v572_v61, %v1369_v46 }
 0x106   :  { %v1038_v23 = vpop.f32.mrf.mxu0 }
 0x107   :  { %v1374_v53 = vadd.f32 %v1037_v40, %v536_v19  ;;  %v611_v6 = vadd.f32 %v610_v0, %v596_v58 }
 0x108   :  { %v1039_v28 = vpop.f32.mrf.mxu0 }
 0x109   :  { %v1040_v50 = vadd.f32 %v1039_v28, %v1038_v23  ;;  %v597_v1 = vmul.f32 %v1374_v53, %v1374_v53  ;;  %v574_v9 = vadd.f32 %v573_v3, %v1374_v53 }
 0x10a   :  { %v1041_v35 = vpop.f32.mrf.mxu0 }
 0x10b   :  { %v1380_v62 = vadd.f32 %v1040_v50, %v539_v41  ;;  %v612_v14 = vadd.f32 %v611_v6, %v597_v1 }
 0x10c   :  { %v1042_v42 = vpop.f32.mrf.mxu0 }
 0x10d   :  { %v1043_v56 = vadd.f32 %v1042_v42, %v1041_v35  ;;  %v598_v10 = vmul.f32 %v1380_v62, %v1380_v62  ;;  %v575_v18 = vadd.f32 %v574_v9, %v1380_v62 }
 0x10e   :  { %v1044_v47 = vpop.f32.mrf.mxu0 }
 0x10f   :  { %v1385_v4 = vadd.f32 %v1101_v11, %v1043_v56  ;;  %v613_v24 = vadd.f32 %v612_v14, %v598_v10  ;;  %v638_v14 = vlaneseq }
 0x110   :  { %v1045_v54 = vpop.f32.mrf.mxu0 }
 0x111   :  { %v1046_v63 = vadd.f32 %v1045_v54, %v1044_v47  ;;  %v599_v19 = vmul.f32 %v1385_v4, %v1385_v4  ;;  %v576_v25 = vadd.f32 %v575_v18, %v1385_v4  ;;  %v630_v18 = vld [vmem:[%s1519_s2] sm:$0x1] }
 0x112   :  { %v1047_v59 = vpop.f32.mrf.mxu0 }
 0x113   :  { %v1390_v13 = vadd.f32 %v1102_v29, %v1046_v63  ;;  %v614_v30 = vadd.f32 %v613_v24, %v599_v19  ;;  %v1435_v24 = vld [vmem:[%s1520_s4 + $0x10] sm:$0xff]  }
 0x114   :  { %v1048_v2 = vpop.f32.mrf.mxu0 }
 0x115   :  { %v1049_v5 = vadd.f32 %v1048_v2, %v1047_v59  ;;  %v600_v27 = vmul.f32 %v1390_v13, %v1390_v13  ;;  %v577_v31 = vadd.f32 %v576_v25, %v1390_v13 }
 0x116   :  { %v1050_v7 = vpop.f32.mrf.mxu0 }
 0x117   :  { %v1395_v11 = vadd.f32 %v1049_v5, %v552_v60  ;;  %v615_v37 = vadd.f32 %v614_v30, %v600_v27  ;;  %v1440_v27 = vld [vmem:[%s1520_s4 + $0x18] sm:$0xff]   ;;  %v634_v30 = vld [vmem:[%s1521_s3] sm:$0x1] }
 0x118   :  { %v1051_v17 = vpop.f32.mrf.mxu0 }
 0x119   :  { %v1052_v20 = vadd.f32 %v1051_v17, %v1050_v7  ;;  %v601_v32 = vmul.f32 %v1395_v11, %v1395_v11  ;;  %v578_v36 = vadd.f32 %v577_v31, %v1395_v11  ;;  %v639_v17 = vshrl.u32 %v638_v14, 7 }
 0x11a   :  { %v1053_v23 = vpop.f32.mrf.mxu0 }
 0x11b   :  { %v1400_v28 = vadd.f32 %v1052_v20, %v555_v22  ;;  %v616_v42 = vadd.f32 %v615_v37, %v601_v32  ;;  %v640_v19 = vsub.s32 0, %v639_v17  ;;  %v1425_v20 = vld [vmem:[%s1520_s4] sm:$0xff]   ;;  %v1430_v22 = vld [vmem:[%s1520_s4 + $0x8] sm:$0xff]   ;;  %v1462_v37 = vld [vmem:[%s1520_s4 + $0x30] sm:$0xff]  }
 0x11c   :  { %v1054_v29 = vpop.f32.mrf.mxu0  ;;  %v911_v31 = vunpack.c.l.bf16 %v1425_v20  ;;  %v912_v32 = vunpack.c.h.bf16 %v1425_v20 }
 0x11d   :  { %v1055_v34 = vadd.f32 %v1054_v29, %v1053_v23  ;;  %v602_v38 = vmul.f32 %v1400_v28, %v1400_v28  ;;  %v579_v43 = vadd.f32 %v578_v36, %v1400_v28  ;;  %v1445_v29 = vld [vmem:[%s1520_s4 + $0x20] sm:$0xff]   ;;  %v1457_v36 = vld [vmem:[%s1520_s4 + $0x28] sm:$0xff]  }
 0x11e   :  { %v1056_v35 = vpop.f32.mrf.mxu0 }
 0x11f   :  { %v1408_v40 = vadd.f32 %v1105_v48, %v1055_v34  ;;  %v617_v47 = vadd.f32 %v616_v42, %v602_v38  ;;  %v915_v34 = vunpack.c.l.bf16 %v1430_v22  ;;  %v919_v42 = vunpack.c.l.bf16 %v1435_v24 }
 0x120   :  { %v1057_v41 = vpop.f32.mrf.mxu0 }
 0x121   :  { %v603_v44 = vmul.f32 %v1408_v40, %v1408_v40  ;;  %v1058_v45 = vadd.f32 %v1057_v41, %v1056_v35  ;;  %v580_v49 = vadd.f32 %v579_v43, %v1408_v40  ;;  %v916_v35 = vunpack.c.h.bf16 %v1430_v22 }
 0x122   :  { %v920_v43 = vunpack.c.h.bf16 %v1435_v24 }
 0x123   :  { %v1414_v50 = vadd.f32 %v1106_v8, %v1058_v45  ;;  %v618_v51 = vadd.f32 %v617_v47, %v603_v44  ;;  %v987_v44 = vld [vmem:[%s1520_s4 + $0x38] sm:$0xff]   ;;  %v923_v45 = vunpack.c.l.bf16 %v1440_v27  ;;  %v924_v47 = vunpack.c.h.bf16 %v1440_v27 }
 0x125   :  { %v581_v52 = vadd.f32 %v580_v49, %v1414_v50  ;;  %v604_v48 = vmul.f32 %v1414_v50, %v1414_v50  ;;  %v927_v49 = vunpack.c.l.bf16 %v1445_v29 }
 0x127   :  { %v582_v54 = vrot.slane %v581_v52, 4  ;;  %v619_v55 = vadd.f32 %v618_v51, %v604_v48  ;;  %v928_v51 = vunpack.c.h.bf16 %v1445_v29  ;;  %v931_v48 = vunpack.c.l.bf16 %v1457_v36 }
 0x129   :  { %v583_v56 = vadd.f32 %v582_v54, %v581_v52  ;;  %v620_v57 = vrot.slane %v619_v55, 4  ;;  %v932_v54 = vunpack.c.h.bf16 %v1457_v36 }
 0x12b   :  { %v584_v58 = vrot.slane %v583_v56, 2  ;;  %v621_v59 = vadd.f32 %v620_v57, %v619_v55  ;;  %v935_v55 = vunpack.c.l.bf16 %v1462_v37  ;;  %v936_v57 = vunpack.c.h.bf16 %v1462_v37 }
 0x12d   :  { %v585_v60 = vadd.f32 %v584_v58, %v583_v56  ;;  %v622_v61 = vrot.slane %v621_v59, 2  ;;  %v939_v58 = vunpack.c.l.bf16 %v987_v44 }
 0x12f   :  { %v586_v63 = vrot.slane %v585_v60, 1  ;;  %v623_v0 = vadd.f32 %v622_v61, %v621_v59  ;;  %v940_v59 = vunpack.c.h.bf16 %v987_v44 }
 0x131   :  { %v587_v1 = vadd.f32 %v586_v63, %v585_v60  ;;  %v624_v2 = vrot.slane %v623_v0, 1 }
 0x133   :  { %v588_v3 = vmul.f32 0.0078125, %v587_v1  ;;  %v625_v5 = vadd.f32 %v624_v2, %v623_v0 }
 0x135   :  { %v626_v6 = vmul.f32 0.0078125, %v625_v5  ;;  %v627_v7 = vmul.f32 %v588_v3, %v588_v3 }
 0x137   :  { %v628_v8 = vsub.f32 %v626_v6, %v627_v7 }
 0x139   :  { %v629_v9 = vmax.f32 %v628_v8, 0.0 }
 0x13b   :  { %v631_v10 = vadd.f32 1e-05, %v629_v9 }
 0x13d   :  { %1163 = vrsqrt.f32 %v631_v10 }
 0x14a   :  { %v1164_v23 = vpop.eup %1163 }
 0x14b   :  { %v633_v25 = vmul.f32 %v1164_v23, %v630_v18 }
 0x14d   :  { %v635_v38 = vmul.f32 %v633_v25, %v588_v3  ;;  %v641_v41 = vrot.slane %v633_v25, %v640_v19 }
 0x14f   :  { %v636_v52 = vsub.f32 %v634_v30, %v635_v38  ;;  %v643_v56 = vmul.f32 %v641_v41, %v1341_v15  ;;  %v644_v60 = vmul.f32 %v641_v41, %v1339_v12  ;;  %v645_v61 = vmul.f32 %v641_v41, %v1343_v16 }
 0x150   :  { %v646_v63 = vmul.f32 %v641_v41, %v1347_v21  ;;  %v647_v0 = vmul.f32 %v641_v41, %v1353_v26  ;;  %v648_v1 = vmul.f32 %v641_v41, %v1359_v33  ;;  %v649_v2 = vmul.f32 %v641_v41, %v1364_v39 }
 0x151   :  { %v650_v3 = vmul.f32 %v641_v41, %v1369_v46  ;;  %v651_v15 = vmul.f32 %v641_v41, %v1374_v53  ;;  %v652_v5 = vmul.f32 %v641_v41, %v1380_v62  ;;  %v653_v6 = vmul.f32 %v641_v41, %v1385_v4 }
 0x152   :  { %v654_v12 = vmul.f32 %v641_v41, %v1390_v13  ;;  %v663_v7 = vrot.slane %v636_v52, %v640_v19  ;;  %v655_v16 = vmul.f32 %v641_v41, %v1395_v11  ;;  %v656_v21 = vmul.f32 %v641_v41, %v1400_v28 }
 0x153   :  { %v657_v26 = vmul.f32 %v641_v41, %v1408_v40  ;;  %v658_v33 = vmul.f32 %v641_v41, %v1414_v50 }
 0x154   :  { %v665_v39 = vadd.f32 %v663_v7, %v643_v56  ;;  %v666_v8 = vadd.f32 %v663_v7, %v644_v60  ;;  %v667_v46 = vadd.f32 %v663_v7, %v645_v61  ;;  %v668_v9 = vadd.f32 %v663_v7, %v646_v63 }
 0x155   :  { %v669_v53 = vadd.f32 %v663_v7, %v647_v0  ;;  %v670_v10 = vadd.f32 %v663_v7, %v648_v1  ;;  %v671_v62 = vadd.f32 %v663_v7, %v649_v2  ;;  %v672_v14 = vadd.f32 %v663_v7, %v650_v3 }
 0x156   :  { %v673_v4 = vadd.f32 %v663_v7, %v651_v15  ;;  %v674_v17 = vadd.f32 %v663_v7, %v652_v5  ;;  %v675_v13 = vadd.f32 %v663_v7, %v653_v6  ;;  %v676_v18 = vadd.f32 %v663_v7, %v654_v12 }
 0x157   :  { %v677_v19 = vadd.f32 %v663_v7, %v655_v16  ;;  %v678_v11 = vadd.f32 %v663_v7, %v656_v21  ;;  %v679_v20 = vadd.f32 %v663_v7, %v657_v26  ;;  %v680_v28 = vadd.f32 %v663_v7, %v658_v33 }
 0x158   :  { %v713_v22 = vadd.f32 %v911_v31, %v665_v39  ;;  %v714_v40 = vadd.f32 %v912_v32, %v666_v8  ;;  %v715_v23 = vadd.f32 %v915_v34, %v667_v46  ;;  %v716_v50 = vadd.f32 %v916_v35, %v668_v9 }
 0x159   :  { %v717_v24 = vadd.f32 %v919_v42, %v669_v53  ;;  %v718_v25 = vadd.f32 %v920_v43, %v670_v10  ;;  %v719_v27 = vadd.f32 %v923_v45, %v671_v62  ;;  %v720_v29 = vadd.f32 %v924_v47, %v672_v14 }
 0x15a   :  { %v721_v30 = vadd.f32 %v927_v49, %v673_v4  ;;  %v722_v36 = vadd.f32 %v928_v51, %v674_v17  ;;  %v723_v37 = vadd.f32 %v931_v48, %v675_v13  ;;  %v724_v38 = vadd.f32 %v932_v54, %v676_v18 }
 0x15b   :  { %v725_v41 = vadd.f32 %v935_v55, %v677_v19  ;;  %v726_v44 = vadd.f32 %v936_v57, %v678_v11  ;;  %v727_v52 = vadd.f32 %v939_v58, %v679_v20  ;;  %v728_v56 = vadd.f32 %v940_v59, %v680_v28 }
 0x15c   :  { %v729_v60 = vmax.f32 %v713_v22, 0.0  ;;  %v730_v61 = vmax.f32 %v714_v40, 0.0  ;;  %v731_v63 = vmax.f32 %v715_v23, 0.0  ;;  %v732_v0 = vmax.f32 %v716_v50, 0.0 }
 0x15d   :  { %v733_v31 = vmax.f32 %v717_v24, 0.0  ;;  %v734_v32 = vmax.f32 %v718_v25, 0.0  ;;  %v735_v34 = vmax.f32 %v719_v27, 0.0  ;;  %v736_v35 = vmax.f32 %v720_v29, 0.0 }
 0x15e   :  { %v737_v42 = vmax.f32 %v721_v30, 0.0  ;;  %v738_v43 = vmax.f32 %v722_v36, 0.0  ;;  %v739_v45 = vmax.f32 %v723_v37, 0.0  ;;  %v740_v47 = vmax.f32 %v724_v38, 0.0 }
 0x15f   :  { %v741_v49 = vmax.f32 %v725_v41, 0.0  ;;  %v742_v51 = vmax.f32 %v726_v44, 0.0  ;;  %v743_v48 = vmax.f32 %v727_v52, 0.0  ;;  %v744_v54 = vmax.f32 %v728_v56, 0.0 }
 0x160   :  { %v944_v55 = vpack.c.bf16 %v730_v61, %v729_v60  ;;  %v949_v57 = vpack.c.bf16 %v732_v0, %v731_v63  ;;  %v954_v58 = vpack.c.bf16 %v734_v32, %v733_v31  ;;  %v959_v59 = vpack.c.bf16 %v736_v35, %v735_v34 }
 0x161   :  { %v964_v1 = vpack.c.bf16 %v738_v43, %v737_v42  ;;  %v969_v2 = vpack.c.bf16 %v740_v47, %v739_v45  ;;  %v974_v3 = vpack.c.bf16 %v742_v51, %v741_v49  ;;  %v979_v15 = vpack.c.bf16 %v744_v54, %v743_v48 }
 0x162   :  { %945 = vst [vmem:[%s1522_s5] sm:$0xff] %v944_v55   ;;  %988 = vst [vmem:[%s1522_s5 + $0x8] sm:$0xff] %v949_v57  }
 0x163   :  { %989 = vst [vmem:[%s1522_s5 + $0x10] sm:$0xff] %v954_v58   ;;  %990 = vst [vmem:[%s1522_s5 + $0x18] sm:$0xff] %v959_v59  }
 0x164   :  { %991 = vst [vmem:[%s1522_s5 + $0x20] sm:$0xff] %v964_v1   ;;  %992 = vst [vmem:[%s1522_s5 + $0x28] sm:$0xff] %v969_v2  }
 0x165   :  { %993 = vst [vmem:[%s1522_s5 + $0x30] sm:$0xff] %v974_v3   ;;  %994 = vst [vmem:[%s1522_s5 + $0x38] sm:$0xff] %v979_v15  }

// kernel: resnet_forward.16
= control target key start
LH: loop header
LB: loop body
LE: loop exit
PB: predicated region body
PF: predicated region fallthrough
CT: control target
= control target key end

     0   :  { %s698_s1 = inlined_call_operand.vmem [shape: bf16[384,128], index: 1, kind: input, shape index: {}]   ;;  %s699_s0 = inlined_call_operand.vmem [shape: bf16[32,384], index: 0, kind: input, shape index: {}]   ;;  %s700_s2 = inlined_call_operand.vmem [shape: f32[1,128], index: 2, kind: input, shape index: {}]   ;;  %s701_s3 = inlined_call_operand.vmem [shape: f32[1,128], index: 3, kind: input, shape index: {}]   ;;  %s702_s4 = inlined_call_operand.vmem [shape: bf16[32,128], index: 4, kind: output, shape index: {}]  }
   0x1   :  { %v537_v0 = vld [vmem:[%s698_s1 + $0x78] sm:$0xff]   ;;  %v540_v3 = vld [vmem:[%s698_s1 + $0x70] sm:$0xff]   ;;  %v543_v6 = vld [vmem:[%s698_s1 + $0x68] sm:$0xff]  }
   0x2   :  { %v538_v1 = vld [vmem:[%s698_s1 + $0xb8] sm:$0xff]   ;;  %479 = vmatprep.subr.bf16.mxu0 %v537_v0  ;;  %v541_v4 = vld [vmem:[%s698_s1 + $0xb0] sm:$0xff]   ;;  %v544_v7 = vld [vmem:[%s698_s1 + $0xa8] sm:$0xff]  }
   0x3   :  { %v539_v2 = vld [vmem:[%s698_s1 + $0x38] sm:$0xff]   ;;  %517 = vmatprep.subr.bf16.mxu1 %v538_v1  ;;  %v542_v5 = vld [vmem:[%s698_s1 + $0x30] sm:$0xff]   ;;  %v545_v8 = vld [vmem:[%s698_s1 + $0x28] sm:$0xff]  }
   0x4   :  { %480 = vmatpush3.bf16.msra.mxu0 %v539_v2  ;;  %518 = vmatpush3.bf16.msra.mxu1 %v538_v1  ;;  %v546_v9 = vld [vmem:[%s698_s1 + $0x60] sm:$0xff]   ;;  %v549_v12 = vld [vmem:[%s698_s1 + $0x58] sm:$0xff]   ;;  %v552_v15 = vld [vmem:[%s698_s1 + $0x50] sm:$0xff]  }
   0x5   :  { %481 = vmatprep.subr.bf16.mxu0 %v540_v3  ;;  %519 = vmatprep.subr.bf16.mxu1 %v541_v4  ;;  %v547_v10 = vld [vmem:[%s698_s1 + $0xa0] sm:$0xff]   ;;  %v550_v13 = vld [vmem:[%s698_s1 + $0x98] sm:$0xff]   ;;  %v553_v16 = vld [vmem:[%s698_s1 + $0x90] sm:$0xff]  }
   0x6   :  { %v548_v11 = vld [vmem:[%s698_s1 + $0x20] sm:$0xff]   ;;  %v551_v14 = vld [vmem:[%s698_s1 + $0x18] sm:$0xff]   ;;  %v554_v17 = vld [vmem:[%s698_s1 + $0x10] sm:$0xff]  }
   0x7   :  { %v555_v18 = vld [vmem:[%s698_s1 + $0x48] sm:$0xff]   ;;  %v558_v21 = vld [vmem:[%s698_s1 + $0x40] sm:$0xff]  }
   0x8   :  { %482 = vmatpush3.bf16.msra.mxu0 %v542_v5  ;;  %520 = vmatpush3.bf16.msra.mxu1 %v541_v4  ;;  %v556_v19 = vld [vmem:[%s698_s1 + $0x88] sm:$0xff]   ;;  %v559_v22 = vld [vmem:[%s698_s1 + $0x80] sm:$0xff]  }
   0x9   :  { %483 = vmatprep.subr.bf16.mxu0 %v543_v6  ;;  %521 = vmatprep.subr.bf16.mxu1 %v544_v7  ;;  %v557_v20 = vld [vmem:[%s698_s1 + $0x8] sm:$0xff]   ;;  %v563_v23 = vld [vmem:[%s699_s0 + $0x4] ss:$12 sps:$4 sm:$0xff]  }
   0xa   :  { %v564_v24 = vld [vmem:[%s699_s0 + $0x8] ss:$12 sps:$4 sm:$0xff]   ;;  %282 = vmatprep.mubr.bf16.mxu0 %v563_v23  ;;  %v560_v25 = vld [vmem:[%s698_s1] sm:$0xff]  }
   0xb   :  { %533 = vmatprep.mubr.bf16.mxu1 %v564_v24  ;;  %v561_v26 = vld [vmem:[%s699_s0] ss:$12 sps:$4 sm:$0xff]   ;;  %v566_v28 = vld [vmem:[%s699_s0 + $0x1c] ss:$12 sps:$4 sm:$0xff]   ;;  %v568_v29 = vld [vmem:[%s699_s0 + $0x18] ss:$12 sps:$4 sm:$0xff]  }
   0xc   :  { %484 = vmatpush3.bf16.msra.mxu0 %v545_v8  ;;  %522 = vmatpush3.bf16.msra.mxu1 %v544_v7  ;;  %v565_v27 = vld [vmem:[%s699_s0 + $0x20] ss:$12 sps:$4 sm:$0xff]  }
   0xd   :  { %485 = vmatprep.subr.bf16.mxu0 %v546_v9  ;;  %523 = vmatprep.subr.bf16.mxu1 %v547_v10 }
  0x10   :  { %486 = vmatpush3.bf16.msra.mxu0 %v548_v11  ;;  %524 = vmatpush3.bf16.msra.mxu1 %v547_v10 }
  0x11   :  { %487 = vmatprep.subr.bf16.mxu0 %v549_v12  ;;  %525 = vmatprep.subr.bf16.mxu1 %v550_v13 }
  0x14   :  { %488 = vmatpush3.bf16.msra.mxu0 %v551_v14  ;;  %526 = vmatpush3.bf16.msra.mxu1 %v550_v13  ;;  %v383_v14 = vlaneseq }
  0x15   :  { %489 = vmatprep.subr.bf16.mxu0 %v552_v15  ;;  %527 = vmatprep.subr.bf16.mxu1 %v553_v16 }
  0x16   :  { %v384_v15 = vshrl.u32 %v383_v14, 7 }
  0x18   :  { %490 = vmatpush3.bf16.msra.mxu0 %v554_v17  ;;  %528 = vmatpush3.bf16.msra.mxu1 %v553_v16  ;;  %v375_v16 = vld [vmem:[%s700_s2] sm:$0x1]  ;;  %v385_v17 = vsub.s32 0, %v384_v15 }
  0x19   :  { %491 = vmatprep.subr.bf16.mxu0 %v555_v18  ;;  %529 = vmatprep.subr.bf16.mxu1 %v556_v19 }
  0x1c   :  { %492 = vmatpush3.bf16.msra.mxu0 %v557_v20  ;;  %530 = vmatpush3.bf16.msra.mxu1 %v556_v19  ;;  %v379_v20 = vld [vmem:[%s701_s3] sm:$0x1] }
  0x1d   :  { %493 = vmatprep.subr.bf16.mxu0 %v558_v21  ;;  %531 = vmatprep.subr.bf16.mxu1 %v559_v22 }
  0x20   :  { %494 = vmatpush3.bf16.msra.mxu0 %v560_v25  ;;  %532 = vmatpush3.bf16.msra.mxu1 %v559_v22 }
  0x23   :  { %283 = vmatmul.mubr.bf16.vlgmr.msra.gmra.mxu0 %v561_v26  ;;  %534 = vmatmul.mubr.bf16.vlgmr.msra.gmra.mxu1 %v565_v27 }
  0x24   :  { %290 = vmatprep.mubr.bf16.mxu0 %v566_v28 }
  0x2b   :  { %291 = vmatmul.mubr.bf16.gmra.mxu0 %v568_v29 }
  0xe3   :  { %v495_v30 = vpop.f32.mrf.mxu0  ;;  %v535_v31 = vpop.f32.mrf.mxu1 }
  0xe5   :  { %v496_v32 = vpop.f32.mrf.mxu0  ;;  %v333_v33 = vpop.f32.mrf.mxu1 }
  0xe6   :  { %v497_v37 = vadd.f32 %v496_v32, %v495_v30 }
  0xe7   :  { %v498_v34 = vpop.f32.mrf.mxu0  ;;  %v536_v35 = vpop.f32.mrf.mxu1 }
  0xe8   :  { %v334_v43 = vadd.f32 %v497_v37, %v333_v33 }
  0xe9   :  { %v499_v36 = vpop.f32.mrf.mxu0  ;;  %v336_v39 = vpop.f32.mrf.mxu1 }
  0xea   :  { %v500_v38 = vadd.f32 %v499_v36, %v498_v34  ;;  %v358_v49 = vmul.f32 %v334_v43, %v334_v43 }
  0xeb   :  { %v501_v40 = vpop.f32.mrf.mxu0 }
  0xec   :  { %v337_v41 = vadd.f32 %v500_v38, %v336_v39 }
  0xed   :  { %v502_v42 = vpop.f32.mrf.mxu0 }
  0xee   :  { %v503_v44 = vadd.f32 %v502_v42, %v501_v40  ;;  %v359_v46 = vmul.f32 %v337_v41, %v337_v41  ;;  %v348_v50 = vadd.f32 %v337_v41, %v334_v43 }
  0xef   :  { %v504_v45 = vpop.f32.mrf.mxu0 }
  0xf0   :  { %v342_v47 = vadd.f32 %v535_v31, %v503_v44  ;;  %v362_v53 = vadd.f32 %v359_v46, %v358_v49 }
  0xf1   :  { %v505_v48 = vpop.f32.mrf.mxu0 }
  0xf2   :  { %v360_v51 = vmul.f32 %v342_v47, %v342_v47  ;;  %v506_v52 = vadd.f32 %v505_v48, %v504_v45  ;;  %v349_v54 = vadd.f32 %v348_v50, %v342_v47 }
  0xf4   :  { %v345_v55 = vadd.f32 %v536_v35, %v506_v52  ;;  %v363_v56 = vadd.f32 %v362_v53, %v360_v51 }
  0xf6   :  { %v350_v57 = vadd.f32 %v349_v54, %v345_v55  ;;  %v361_v58 = vmul.f32 %v345_v55, %v345_v55 }
  0xf8   :  { %v351_v59 = vrot.slane %v350_v57, 4  ;;  %v364_v60 = vadd.f32 %v363_v56, %v361_v58 }
  0xfa   :  { %v352_v61 = vadd.f32 %v351_v59, %v350_v57  ;;  %v365_v62 = vrot.slane %v364_v60, 4 }
  0xfc   :  { %v353_v63 = vrot.slane %v352_v61, 2  ;;  %v366_v0 = vadd.f32 %v365_v62, %v364_v60 }
  0xfe   :  { %v354_v1 = vadd.f32 %v353_v63, %v352_v61  ;;  %v367_v2 = vrot.slane %v366_v0, 2 }
 0x100   :  { %v355_v3 = vrot.slane %v354_v1, 1  ;;  %v368_v4 = vadd.f32 %v367_v2, %v366_v0 }
 0x102   :  { %v356_v5 = vadd.f32 %v355_v3, %v354_v1  ;;  %v369_v6 = vrot.slane %v368_v4, 1 }
 0x104   :  { %v357_v7 = vmul.f32 0.03125, %v356_v5  ;;  %v370_v8 = vadd.f32 %v369_v6, %v368_v4 }
 0x106   :  { %v371_v9 = vmul.f32 0.03125, %v370_v8  ;;  %v372_v10 = vmul.f32 %v357_v7, %v357_v7 }
 0x108   :  { %v373_v11 = vsub.f32 %v371_v9, %v372_v10 }
 0x10a   :  { %v374_v12 = vmax.f32 %v373_v11, 0.0 }
 0x10c   :  { %v376_v13 = vadd.f32 1e-05, %v374_v12 }
 0x10e   :  { %569 = vrsqrt.f32 %v376_v13 }
 0x11b   :  { %v570_v18 = vpop.eup %569 }
 0x11c   :  { %v378_v19 = vmul.f32 %v570_v18, %v375_v16 }
 0x11e   :  { %v380_v21 = vmul.f32 %v378_v19, %v357_v7  ;;  %v386_v22 = vrot.slane %v378_v19, %v385_v17 }
 0x120   :  { %v381_v23 = vsub.f32 %v379_v20, %v380_v21  ;;  %v388_v24 = vmul.f32 %v386_v22, %v334_v43  ;;  %v389_v25 = vmul.f32 %v386_v22, %v337_v41  ;;  %v390_v26 = vmul.f32 %v386_v22, %v342_v47 }
 0x121   :  { %v391_v27 = vmul.f32 %v386_v22, %v345_v55 }
 0x122   :  { %v396_v28 = vrot.slane %v381_v23, %v385_v17 }
 0x124   :  { %v398_v29 = vadd.f32 %v396_v28, %v388_v24  ;;  %v399_v30 = vadd.f32 %v396_v28, %v389_v25  ;;  %v400_v31 = vadd.f32 %v396_v28, %v390_v26  ;;  %v401_v32 = vadd.f32 %v396_v28, %v391_v27 }
 0x126   :  { %v402_v33 = vmax.f32 %v398_v29, 0.0  ;;  %v403_v34 = vmax.f32 %v399_v30, 0.0  ;;  %v404_v35 = vmax.f32 %v400_v31, 0.0  ;;  %v405_v36 = vmax.f32 %v401_v32, 0.0 }
 0x128   :  { %v471_v37 = vpack.c.bf16 %v403_v34, %v402_v33  ;;  %v476_v38 = vpack.c.bf16 %v405_v36, %v404_v35 }
 0x12a   :  { %472 = vst [vmem:[%s702_s4] sm:$0xff] %v471_v37   ;;  %478 = vst [vmem:[%s702_s4 + $0x8] sm:$0xff] %v476_v38  }

// kernel: resnet_forward.19
= control target key start
LH: loop header
LB: loop body
LE: loop exit
PB: predicated region body
PF: predicated region fallthrough
CT: control target
= control target key end

     0   :  { %v239_v1 = vmov 0.0   ;;  %vm240_vm0 = vmmov 0   ;;  %s339_s0 = inlined_call_operand.vmem [shape: bf16[2,16,128], index: 0, kind: input, shape index: {}]   ;;  %s340_s1 = inlined_call_operand.vmem [shape: f32[128,128], index: 1, kind: input, shape index: {}]   ;;  %s341_s2 = inlined_call_operand.vmem [shape: f32[1,128], index: 2, kind: input, shape index: {}]   ;;  %s342_s3 = inlined_call_operand.hbm [shape: f32[2,128], index: 3, kind: output, shape index: {}]  }
   0x1   :  { %v54_v0 = vld [vmem:[%s340_s1 + $0x78] sm:$0xff]  ;;  %179 = vmatprep.subr.mxu0 %v239_v1  ;;  %v53_v2 = vld [vmem:[%s340_s1 + $0x70] sm:$0xff]  ;;  %211 = vmatprep.mubr.msk.f32.mxu0 %vm240_vm0, %v239_v1  ;;  %v52_v3 = vld [vmem:[%s340_s1 + $0x68] sm:$0xff] }
   0x2   :  { %180 = vmatpush3.msra.mxu0 %v54_v0  ;;  %v51_v4 = vld [vmem:[%s340_s1 + $0x60] sm:$0xff]  ;;  %v161_v6 = vld [vmem:[%s339_s0 + $0x8] sm:$0xff]  }
   0x3   :  { %181 = vmatprep.subr.mxu0 %v239_v1  ;;  %v154_v5 = vld [vmem:[%s339_s0] sm:$0xff]   ;;  %v159_v9 = vunpack.c.l.bf16 %v161_v6  ;;  %v160_v10 = vunpack.c.h.bf16 %v161_v6 }
   0x4   :  { %182 = vmatpush3.msra.mxu0 %v53_v2  ;;  %v155_v7 = vunpack.c.l.bf16 %v154_v5  ;;  %v156_v8 = vunpack.c.h.bf16 %v154_v5 }
   0x5   :  { %183 = vmatprep.subr.mxu0 %v239_v1 }
   0x6   :  { %184 = vmatpush3.msra.mxu0 %v52_v3 }
   0x7   :  { %8 = vsyncpa [#allocation3], 0  ;;  %185 = vmatprep.subr.mxu0 %v239_v1  ;;  %v50_v11 = vld [vmem:[%s340_s1 + $0x58] sm:$0xff]  ;;  %v23_v12 = vadd.f32 %v156_v8, %v155_v7  ;;  %v30_v13 = vadd.f32 %v160_v10, %v159_v9  ;;  %v49_v14 = vld [vmem:[%s340_s1 + $0x50] sm:$0xff]  ;;  %vm64_vm1 = vcmask 1041409   ;;  %s241_s22 = smov [#allocation2]  }
   0x8   :  { %186 = vmatpush3.msra.mxu0 %v51_v4  ;;  %v48_v17 = vld [vmem:[%s340_s1 + $0x48] sm:$0xff]  ;;  %v47_v20 = vld [vmem:[%s340_s1 + $0x40] sm:$0xff]  ;;  %v46_v23 = vld [vmem:[%s340_s1 + $0x38] sm:$0xff]  ;;  %s144_s23 = sshll.u32 %s241_s22, 4  ;;  %s145_s23 = int_to_ptr.vmem [resolvable:$true] %s144_s23 }
   0x9   :  { %187 = vmatprep.subr.mxu0 %v239_v1  ;;  %v24_v15 = vrot.slane %v23_v12, 4  ;;  %v31_v16 = vrot.slane %v30_v13, 4  ;;  %v45_v26 = vld [vmem:[%s340_s1 + $0x30] sm:$0xff]  ;;  %v44_v29 = vld [vmem:[%s340_s1 + $0x28] sm:$0xff]  ;;  %v43_v30 = vld [vmem:[%s340_s1 + $0x20] sm:$0xff]  ;;  %s217_s24 = scalar_lea.vmem %s145_s23, 32  ;;  %p222_p1 = scmp.lt.s32.totalorder %s145_s23, %s145_s23 }
   0xa   :  { %188 = vmatpush3.msra.mxu0 %v50_v11  ;;  %v42_v33 = vld [vmem:[%s340_s1 + $0x18] sm:$0xff]  ;;  %v41_v34 = vld [vmem:[%s340_s1 + $0x10] sm:$0xff]  ;;  %v40_v37 = vld [vmem:[%s340_s1 + $0x8] sm:$0xff]  ;;  %p218_p0 = scmp.ne.s32.totalorder %s145_s23, %s217_s24  ;;  %p223_p2 = scmp.lt.s32.totalorder %s217_s24, %s217_s24 }
   0xb   :  { %189 = vmatprep.subr.mxu0 %v239_v1  ;;  %v25_v18 = vadd.f32 %v24_v15, %v23_v12  ;;  %v32_v19 = vadd.f32 %v31_v16, %v30_v13  ;;  %v39_v38 = vld [vmem:[%s340_s1] sm:$0xff] }
   0xc   :  { %190 = vmatpush3.msra.mxu0 %v49_v14  ;;  %v152_v40 = vld [vmem:[%s341_s2] ss:$0 sm:$0xff]  ;;  %p224_p3 = por %p223_p2, %p222_p1 }
   0xd   :  { %191 = vmatprep.subr.mxu0 %v239_v1  ;;  %v26_v21 = vrot.slane %v25_v18, 2  ;;  %v33_v22 = vrot.slane %v32_v19, 2 }
   0xe   :  { %192 = vmatpush3.msra.mxu0 %v48_v17  ;;  %p225_p4 = pnand %p224_p3, %p218_p0 }
   0xf   :  { %193 = vmatprep.subr.mxu0 %v239_v1  ;;  %v27_v24 = vadd.f32 %v26_v21, %v25_v18  ;;  %v34_v25 = vadd.f32 %v33_v22, %v32_v19 }
  0x10   :  { %194 = vmatpush3.msra.mxu0 %v47_v20 }
  0x11   :  { %195 = vmatprep.subr.mxu0 %v239_v1  ;;  %v28_v27 = vrot.slane %v27_v24, 1  ;;  %v35_v28 = vrot.slane %v34_v25, 1 }
  0x12   :  { %196 = vmatpush3.msra.mxu0 %v46_v23 }
  0x13   :  { %197 = vmatprep.subr.mxu0 %v239_v1  ;;  %v29_v31 = vadd.f32 %v28_v27, %v27_v24  ;;  %v36_v32 = vadd.f32 %v35_v28, %v34_v25 }
  0x14   :  { %198 = vmatpush3.msra.mxu0 %v45_v26 }
  0x15   :  { %199 = vmatprep.subr.mxu0 %v239_v1  ;;  %v37_v35 = vmul.f32 0.0625, %v29_v31  ;;  %v38_v36 = vmul.f32 0.0625, %v36_v32 }
  0x16   :  { %200 = vmatpush3.msra.mxu0 %v44_v29 }
  0x17   :  { %201 = vmatprep.subr.mxu0 %v239_v1  ;;  %v65_v39 = vsel %vm64_vm1, %v38_v36, %v37_v35 }
  0x18   :  { %202 = vmatpush3.msra.mxu0 %v43_v30 }
  0x19   :  { %203 = vmatprep.subr.mxu0 %v239_v1 }
  0x1a   :  { %204 = vmatpush3.msra.mxu0 %v42_v33 }
  0x1b   :  { %205 = vmatprep.subr.mxu0 %v239_v1 }
  0x1c   :  { %206 = vmatpush3.msra.mxu0 %v41_v34 }
  0x1d   :  { %207 = vmatprep.subr.mxu0 %v239_v1 }
  0x1e   :  { %208 = vmatpush3.msra.mxu0 %v40_v37 }
  0x1f   :  { %209 = vmatprep.subr.mxu0 %v239_v1 }
  0x20   :  { %210 = vmatpush3.msra.mxu0 %v39_v38 }
  0x21   :  { %212 = vmatmul.mubr.f32.vlgmr.msra.gmra.mxu0 %v65_v39 }
  0xe1   :  { %v133_v41 = vpop.f32.mrf.mxu0 }
  0xe2   :  { %v134_v42 = vadd.f32 %v152_v40, %v133_v41 }
  0xe3   :  { %v213_v43 = vpop.f32.mrf.mxu0 }
  0xe4   :  { %137 = vst [vmem:[#allocation2] sm:$0x3] %v134_v42 }
  0xe5   :  { %228 = shalt.err (!%p225_p4)
}
  0xe6   :  { %147 = dma.vmem_to_hbm [thread:$0]  %s145_s23, 32, %s342_s3, [#allocation3]  }
  0xe7   :  { %237 = dma.done.wait [#allocation3], 32  }
  0xe8   :  { %238 = vsyncadd [#allocation3], 4294967264 }
  0xe9   :  { %151 = vsyncpa [#allocation3], 1 }

// kernel: resnet_forward.18
= control target key start
LH: loop header
LB: loop body
LE: loop exit
PB: predicated region body
PF: predicated region fallthrough
CT: control target
= control target key end

     0   :  { %s1064_s1 = inlined_call_operand.vmem [shape: bf16[640,128], index: 1, kind: input, shape index: {}]   ;;  %s1065_s0 = inlined_call_operand.vmem [shape: bf16[32,640], index: 0, kind: input, shape index: {}]   ;;  %s1066_s2 = inlined_call_operand.vmem [shape: f32[1,128], index: 2, kind: input, shape index: {}]   ;;  %s1067_s3 = inlined_call_operand.vmem [shape: f32[1,128], index: 3, kind: input, shape index: {}]   ;;  %s1068_s4 = inlined_call_operand.vmem [shape: bf16[32,128], index: 4, kind: input, shape index: {}]   ;;  %s1069_s5 = inlined_call_operand.vmem [shape: bf16[32,128], index: 5, kind: output, shape index: {}]  }
   0x1   :  { %v810_v0 = vld [vmem:[%s1064_s1 + $0x78] sm:$0xff]   ;;  %v814_v4 = vld [vmem:[%s1064_s1 + $0x70] sm:$0xff]   ;;  %v818_v8 = vld [vmem:[%s1064_s1 + $0x68] sm:$0xff]  }
   0x2   :  { %v811_v1 = vld [vmem:[%s1064_s1 + $0xf8] sm:$0xff]   ;;  %724 = vmatprep.subr.bf16.mxu0 %v810_v0  ;;  %v815_v5 = vld [vmem:[%s1064_s1 + $0xf0] sm:$0xff]   ;;  %v819_v9 = vld [vmem:[%s1064_s1 + $0xe8] sm:$0xff]  }
   0x3   :  { %v812_v2 = vld [vmem:[%s1064_s1 + $0x38] sm:$0xff]   ;;  %752 = vmatprep.subr.bf16.mxu1 %v811_v1  ;;  %v816_v6 = vld [vmem:[%s1064_s1 + $0x30] sm:$0xff]   ;;  %v820_v10 = vld [vmem:[%s1064_s1 + $0x28] sm:$0xff]  }
   0x4   :  { %v813_v3 = vld [vmem:[%s1064_s1 + $0xb8] sm:$0xff]   ;;  %725 = vmatpush3.bf16.msra.mxu0 %v812_v2  ;;  %v817_v7 = vld [vmem:[%s1064_s1 + $0xb0] sm:$0xff]   ;;  %v821_v11 = vld [vmem:[%s1064_s1 + $0xa8] sm:$0xff]  }
   0x5   :  { %753 = vmatpush3.bf16.msra.mxu1 %v813_v3  ;;  %726 = vmatprep.subr.bf16.mxu0 %v814_v4  ;;  %v822_v12 = vld [vmem:[%s1064_s1 + $0x60] sm:$0xff]   ;;  %v826_v16 = vld [vmem:[%s1064_s1 + $0x58] sm:$0xff]   ;;  %v830_v20 = vld [vmem:[%s1064_s1 + $0x50] sm:$0xff]  }
   0x6   :  { %754 = vmatprep.subr.bf16.mxu1 %v815_v5  ;;  %v823_v13 = vld [vmem:[%s1064_s1 + $0xe0] sm:$0xff]   ;;  %v827_v17 = vld [vmem:[%s1064_s1 + $0xd8] sm:$0xff]   ;;  %v831_v21 = vld [vmem:[%s1064_s1 + $0xd0] sm:$0xff]  }
   0x7   :  { %v824_v14 = vld [vmem:[%s1064_s1 + $0x20] sm:$0xff]   ;;  %v828_v18 = vld [vmem:[%s1064_s1 + $0x18] sm:$0xff]   ;;  %v832_v22 = vld [vmem:[%s1064_s1 + $0x10] sm:$0xff]  }
   0x8   :  { %727 = vmatpush3.bf16.msra.mxu0 %v816_v6  ;;  %v825_v15 = vld [vmem:[%s1064_s1 + $0xa0] sm:$0xff]   ;;  %v829_v19 = vld [vmem:[%s1064_s1 + $0x98] sm:$0xff]   ;;  %v833_v23 = vld [vmem:[%s1064_s1 + $0x90] sm:$0xff]  }
   0x9   :  { %755 = vmatpush3.bf16.msra.mxu1 %v817_v7  ;;  %728 = vmatprep.subr.bf16.mxu0 %v818_v8  ;;  %v834_v24 = vld [vmem:[%s1064_s1 + $0x48] sm:$0xff]   ;;  %v838_v28 = vld [vmem:[%s1064_s1 + $0x40] sm:$0xff]   ;;  %v848_v36 = vld [vmem:[%s1064_s1 + $0x138] sm:$0xff]  }
   0xa   :  { %756 = vmatprep.subr.bf16.mxu1 %v819_v9  ;;  %v835_v25 = vld [vmem:[%s1064_s1 + $0xc8] sm:$0xff]   ;;  %v839_v29 = vld [vmem:[%s1064_s1 + $0xc0] sm:$0xff]   ;;  %v849_v37 = vld [vmem:[%s1064_s1 + $0x130] sm:$0xff]  }
   0xb   :  { %v836_v26 = vld [vmem:[%s1064_s1 + $0x8] sm:$0xff]   ;;  %v840_v30 = vld [vmem:[%s1064_s1] sm:$0xff]   ;;  %v852_v45 = vld [vmem:[%s1064_s1 + $0x118] sm:$0xff]  }
   0xc   :  { %729 = vmatpush3.bf16.msra.mxu0 %v820_v10  ;;  %v837_v27 = vld [vmem:[%s1064_s1 + $0x88] sm:$0xff]   ;;  %v841_v31 = vld [vmem:[%s1064_s1 + $0x80] sm:$0xff]   ;;  %v859_v46 = vld [vmem:[%s1064_s1 + $0x110] sm:$0xff]  }
   0xd   :  { %757 = vmatpush3.bf16.msra.mxu1 %v821_v11  ;;  %730 = vmatprep.subr.bf16.mxu0 %v822_v12  ;;  %v842_v32 = vld [vmem:[%s1065_s0] ss:$20 sps:$4 sm:$0xff]   ;;  %v844_v33 = vld [vmem:[%s1065_s0 + $0x4] ss:$20 sps:$4 sm:$0xff]   ;;  %v845_v34 = vld [vmem:[%s1065_s0 + $0x8] ss:$20 sps:$4 sm:$0xff]  }
   0xe   :  { %758 = vmatprep.subr.bf16.mxu1 %v823_v13  ;;  %v847_v35 = vld [vmem:[%s1065_s0 + $0xc] ss:$20 sps:$4 sm:$0xff]   ;;  %437 = vmatprep.mubr.bf16.mxu0 %v844_v33  ;;  %v855_v40 = vld [vmem:[%s1065_s0 + $0x34] ss:$20 sps:$4 sm:$0xff]   ;;  %v858_v42 = vld [vmem:[%s1065_s0 + $0x30] ss:$20 sps:$4 sm:$0xff]  }
   0xf   :  { %486 = vmatprep.mubr.bf16.mxu1 %v847_v35  ;;  %v850_v38 = vld [vmem:[%s1064_s1 + $0x128] sm:$0xff]   ;;  %v851_v43 = vld [vmem:[%s1064_s1 + $0x120] sm:$0xff]  }
  0x10   :  { %731 = vmatpush3.bf16.msra.mxu0 %v824_v14  ;;  %v853_v39 = vld [vmem:[%s1065_s0 + $0x2c] ss:$20 sps:$4 sm:$0xff]   ;;  %v857_v41 = vld [vmem:[%s1065_s0 + $0x28] ss:$20 sps:$4 sm:$0xff]   ;;  %v862_v44 = vld [vmem:[%s1065_s0 + $0x10] ss:$20 sps:$4 sm:$0xff]  }
  0x11   :  { %759 = vmatpush3.bf16.msra.mxu1 %v825_v15  ;;  %732 = vmatprep.subr.bf16.mxu0 %v826_v16  ;;  %v860_v47 = vld [vmem:[%s1064_s1 + $0x108] sm:$0xff]   ;;  %v861_v48 = vld [vmem:[%s1064_s1 + $0x100] sm:$0xff]  }
  0x12   :  { %760 = vmatprep.subr.bf16.mxu1 %v827_v17  ;;  %v863_v49 = vld [vmem:[%s1065_s0 + $0x38] ss:$20 sps:$4 sm:$0xff]  }
  0x14   :  { %733 = vmatpush3.bf16.msra.mxu0 %v828_v18 }
  0x15   :  { %761 = vmatpush3.bf16.msra.mxu1 %v829_v19  ;;  %734 = vmatprep.subr.bf16.mxu0 %v830_v20 }
  0x16   :  { %762 = vmatprep.subr.bf16.mxu1 %v831_v21 }
  0x18   :  { %735 = vmatpush3.bf16.msra.mxu0 %v832_v22 }
  0x19   :  { %763 = vmatpush3.bf16.msra.mxu1 %v833_v23  ;;  %736 = vmatprep.subr.bf16.mxu0 %v834_v24 }
  0x1a   :  { %764 = vmatprep.subr.bf16.mxu1 %v835_v25 }
  0x1c   :  { %737 = vmatpush3.bf16.msra.mxu0 %v836_v26 }
  0x1d   :  { %765 = vmatpush3.bf16.msra.mxu1 %v837_v27  ;;  %738 = vmatprep.subr.bf16.mxu0 %v838_v28 }
  0x1e   :  { %766 = vmatprep.subr.bf16.mxu1 %v839_v29 }
  0x20   :  { %739 = vmatpush3.bf16.msra.mxu0 %v840_v30 }
  0x21   :  { %767 = vmatpush3.bf16.msra.mxu1 %v841_v31  ;;  %790 = vmatprep.subr.bf16.mxu0 %v848_v36 }
  0x23   :  { %438 = vmatmul.mubr.bf16.vlgmr.msra.gmra.mxu0 %v842_v32 }
  0x24   :  { %487 = vmatmul.mubr.bf16.vlgmr.msra.gmra.mxu1 %v845_v34  ;;  %791 = vmatpush3.bf16.msra.mxu0 %v848_v36 }
  0x25   :  { %792 = vmatprep.subr.bf16.mxu0 %v849_v37  ;;  %445 = vmatprep.mubr.bf16.mxu0 %v853_v39 }
  0x26   :  { %494 = vmatprep.mubr.bf16.mxu1 %v855_v40 }
  0x28   :  { %793 = vmatpush3.bf16.msra.mxu0 %v849_v37 }
  0x29   :  { %794 = vmatprep.subr.bf16.mxu0 %v850_v38 }
  0x2b   :  { %446 = vmatmul.mubr.bf16.gmra.mxu0 %v857_v41 }
  0x2c   :  { %495 = vmatmul.mubr.bf16.gmra.mxu1 %v858_v42  ;;  %795 = vmatpush3.bf16.msra.mxu0 %v850_v38 }
  0x2d   :  { %796 = vmatprep.subr.bf16.mxu0 %v851_v43  ;;  %806 = vmatprep.mubr.bf16.mxu0 %v862_v44 }
  0x30   :  { %797 = vmatpush3.bf16.msra.mxu0 %v851_v43 }
  0x31   :  { %798 = vmatprep.subr.bf16.mxu0 %v852_v45 }
  0x34   :  { %799 = vmatpush3.bf16.msra.mxu0 %v852_v45 }
  0x35   :  { %800 = vmatprep.subr.bf16.mxu0 %v859_v46 }
  0x38   :  { %801 = vmatpush3.bf16.msra.mxu0 %v859_v46 }
  0x39   :  { %802 = vmatprep.subr.bf16.mxu0 %v860_v47 }
  0x3c   :  { %803 = vmatpush3.bf16.msra.mxu0 %v860_v47 }
  0x3d   :  { %804 = vmatprep.subr.bf16.mxu0 %v861_v48 }
  0x40   :  { %805 = vmatpush3.bf16.msra.mxu0 %v861_v48 }
  0x43   :  { %807 = vmatmul.mubr.bf16.vlgmr.msra.gmra.mxu0 %v863_v49 }
  0xe3   :  { %v740_v50 = vpop.f32.mrf.mxu0 }
  0xe4   :  { %v768_v51 = vpop.f32.mrf.mxu1 }
  0xe5   :  { %v741_v52 = vpop.f32.mrf.mxu0 }
  0xe6   :  { %v769_v53 = vpop.f32.mrf.mxu1  ;;  %v742_v1 = vadd.f32 %v741_v52, %v740_v50  ;;  %v587_v50 = vlaneseq  ;;  %v579_v52 = vld [vmem:[%s1066_s2] sm:$0x1] }
  0xe7   :  { %v743_v54 = vpop.f32.mrf.mxu0  ;;  %v770_v2 = vadd.f32 %v769_v53, %v768_v51 }
  0xe8   :  { %v771_v55 = vpop.f32.mrf.mxu1  ;;  %v588_v51 = vshrl.u32 %v587_v50, 7 }
  0xe9   :  { %v744_v56 = vpop.f32.mrf.mxu0  ;;  %v489_v12 = vadd.f32 %v770_v2, %v742_v1 }
  0xea   :  { %v772_v57 = vpop.f32.mrf.mxu1  ;;  %v745_v5 = vadd.f32 %v744_v56, %v743_v54  ;;  %v589_v53 = vsub.s32 0, %v588_v51  ;;  %v583_v56 = vld [vmem:[%s1067_s3] sm:$0x1] }
  0xeb   :  { %v746_v58 = vpop.f32.mrf.mxu0  ;;  %v773_v6 = vadd.f32 %v772_v57, %v771_v55  ;;  %v705_v57 = vld [vmem:[%s1068_s4] sm:$0xff]  }
  0xec   :  { %v774_v59 = vpop.f32.mrf.mxu1 }
  0xed   :  { %v747_v60 = vpop.f32.mrf.mxu0  ;;  %v492_v16 = vadd.f32 %v773_v6, %v745_v5 }
  0xee   :  { %v775_v61 = vpop.f32.mrf.mxu1  ;;  %v748_v7 = vadd.f32 %v747_v60, %v746_v58  ;;  %v722_v60 = vld [vmem:[%s1068_s4 + $0x8] sm:$0xff]  }
  0xef   :  { %v749_v62 = vpop.f32.mrf.mxu0  ;;  %v776_v8 = vadd.f32 %v775_v61, %v774_v59  ;;  %v710_v1 = vunpack.c.l.bf16 %v722_v60  ;;  %v711_v2 = vunpack.c.h.bf16 %v722_v60 }
  0xf0   :  { %v777_v63 = vpop.f32.mrf.mxu1 }
  0xf1   :  { %v750_v0 = vpop.f32.mrf.mxu0  ;;  %v497_v14 = vadd.f32 %v776_v8, %v748_v7 }
  0xf2   :  { %v778_v3 = vpop.f32.mrf.mxu1  ;;  %v751_v10 = vadd.f32 %v750_v0, %v749_v62  ;;  %v706_v62 = vunpack.c.l.bf16 %v705_v57  ;;  %v707_v0 = vunpack.c.h.bf16 %v705_v57 }
  0xf3   :  { %v779_v11 = vadd.f32 %v778_v3, %v777_v63 }
  0xf5   :  { %v500_v19 = vadd.f32 %v779_v11, %v751_v10 }
 0x103   :  { %v808_v4 = vpop.f32.mrf.mxu0 }
 0x104   :  { %v546_v18 = vadd.f32 %v808_v4, %v497_v14 }
 0x105   :  { %v537_v9 = vpop.f32.mrf.mxu0 }
 0x106   :  { %v538_v15 = vadd.f32 %v537_v9, %v489_v12  ;;  %v564_v25 = vmul.f32 %v546_v18, %v546_v18 }
 0x107   :  { %v809_v13 = vpop.f32.mrf.mxu0 }
 0x108   :  { %v562_v21 = vmul.f32 %v538_v15, %v538_v15  ;;  %v549_v22 = vadd.f32 %v809_v13, %v500_v19 }
 0x109   :  { %v540_v17 = vpop.f32.mrf.mxu0 }
 0x10a   :  { %v541_v20 = vadd.f32 %v540_v17, %v492_v16  ;;  %v565_v28 = vmul.f32 %v549_v22, %v549_v22 }
 0x10c   :  { %v552_v23 = vadd.f32 %v541_v20, %v538_v15  ;;  %v563_v24 = vmul.f32 %v541_v20, %v541_v20 }
 0x10e   :  { %v553_v26 = vadd.f32 %v552_v23, %v546_v18  ;;  %v566_v27 = vadd.f32 %v563_v24, %v562_v21 }
 0x110   :  { %v554_v29 = vadd.f32 %v553_v26, %v549_v22  ;;  %v567_v30 = vadd.f32 %v566_v27, %v564_v25 }
 0x112   :  { %v555_v31 = vrot.slane %v554_v29, 4  ;;  %v568_v32 = vadd.f32 %v567_v30, %v565_v28 }
 0x114   :  { %v556_v33 = vadd.f32 %v555_v31, %v554_v29  ;;  %v569_v34 = vrot.slane %v568_v32, 4 }
 0x116   :  { %v557_v35 = vrot.slane %v556_v33, 2  ;;  %v570_v36 = vadd.f32 %v569_v34, %v568_v32 }
 0x118   :  { %v558_v37 = vadd.f32 %v557_v35, %v556_v33  ;;  %v571_v38 = vrot.slane %v570_v36, 2 }
 0x11a   :  { %v559_v39 = vrot.slane %v558_v37, 1  ;;  %v572_v40 = vadd.f32 %v571_v38, %v570_v36 }
 0x11c   :  { %v560_v41 = vadd.f32 %v559_v39, %v558_v37  ;;  %v573_v42 = vrot.slane %v572_v40, 1 }
 0x11e   :  { %v561_v43 = vmul.f32 0.03125, %v560_v41  ;;  %v574_v44 = vadd.f32 %v573_v42, %v572_v40 }
 0x120   :  { %v575_v45 = vmul.f32 0.03125, %v574_v44  ;;  %v576_v46 = vmul.f32 %v561_v43, %v561_v43 }
 0x122   :  { %v577_v47 = vsub.f32 %v575_v45, %v576_v46 }
 0x124   :  { %v578_v48 = vmax.f32 %v577_v47, 0.0 }
 0x126   :  { %v580_v49 = vadd.f32 1e-05, %v578_v48 }
 0x128   :  { %864 = vrsqrt.f32 %v580_v49 }
 0x135   :  { %v865_v54 = vpop.eup %864 }
 0x136   :  { %v582_v55 = vmul.f32 %v865_v54, %v579_v52 }
 0x138   :  { %v584_v58 = vmul.f32 %v582_v55, %v561_v43  ;;  %v590_v59 = vrot.slane %v582_v55, %v589_v53 }
 0x13a   :  { %v585_v61 = vsub.f32 %v583_v56, %v584_v58  ;;  %v592_v63 = vmul.f32 %v590_v59, %v538_v15  ;;  %v593_v3 = vmul.f32 %v590_v59, %v541_v20  ;;  %v594_v4 = vmul.f32 %v590_v59, %v546_v18 }
 0x13b   :  { %v595_v5 = vmul.f32 %v590_v59, %v549_v22 }
 0x13c   :  { %v600_v6 = vrot.slane %v585_v61, %v589_v53 }
 0x13e   :  { %v602_v7 = vadd.f32 %v600_v6, %v592_v63  ;;  %v603_v8 = vadd.f32 %v600_v6, %v593_v3  ;;  %v604_v9 = vadd.f32 %v600_v6, %v594_v4  ;;  %v605_v10 = vadd.f32 %v600_v6, %v595_v5 }
 0x140   :  { %v614_v11 = vadd.f32 %v706_v62, %v602_v7  ;;  %v615_v12 = vadd.f32 %v707_v0, %v603_v8  ;;  %v616_v13 = vadd.f32 %v710_v1, %v604_v9  ;;  %v617_v14 = vadd.f32 %v711_v2, %v605_v10 }
 0x142   :  { %v618_v16 = vmax.f32 %v614_v11, 0.0  ;;  %v619_v17 = vmax.f32 %v615_v12, 0.0  ;;  %v620_v19 = vmax.f32 %v616_v13, 0.0  ;;  %v621_v21 = vmax.f32 %v617_v14, 0.0 }
 0x144   :  { %v715_v15 = vpack.c.bf16 %v619_v17, %v618_v16  ;;  %v720_v23 = vpack.c.bf16 %v621_v21, %v620_v19 }
 0x146   :  { %716 = vst [vmem:[%s1069_s5] sm:$0xff] %v715_v15   ;;  %723 = vst [vmem:[%s1069_s5 + $0x8] sm:$0xff] %v720_v23  }

</bundles_post_ra>
